<compile_context>
chip_gen: v6e
topology: v6e:2x2x1
jax: 0.10.0
libtpu: 0.0.40
codegen_flags: <defaults>
</compile_context>

<pallas_src>
from math import sqrt

import numpy as np
import jax
import jax.numpy as jnp
from jax.experimental import pallas as pl
from jax.experimental.pallas import tpu as pltpu


# ---------------------------------------------------------------------------
# Fused forward kernel (one grid step == one batch sample)
# ---------------------------------------------------------------------------
def _fused_kernel(x_ref,
                  w1e_ref, w1o_ref, b1_ref, s1e_ref, s1o_ref,
                  w2e_ref, w2o_ref, b2_ref, s2e_ref, s2o_ref,
                  w3e_ref, w3o_ref, b3_ref, s3e_ref, s3o_ref,
                  w4_ref, b4_ref, fw1_ref, fb1_ref, fw2_ref, fb2_ref,
                  out_ref,
                  ze_ref, zo_ref, a1_ref, a2_ref, a3_ref):
    f32 = jnp.float32

    def mm(a, b):
        return jnp.dot(a, b, preferred_element_type=f32)

    # ---- conv1: 5x5 stride 2, 3->32, then ReLU + 2x2 maxpool --------------
    # x_ref: (1, 2, 32, 192); phase p holds image rows h = 2*i + p, flattened
    # per row as (w, c) -> 192 lanes.  For kernel row kh the needed rows
    # h = 2*ho + kh are the contiguous slice [kh//2 : kh//2+30] of phase kh%2.
    for kh in range(5):
        slab = x_ref[0, kh % 2, kh // 2:kh // 2 + 30, :]          # (30, 192)
        pe = mm(slab, w1e_ref[kh])                                # (30, 480) even wo
        po = mm(slab, w1o_ref[kh])                                # (30, 480) odd  wo
        if kh == 0:
            ze_ref[...] = pe
            zo_ref[...] = po
        else:
            ze_ref[...] += pe
            zo_ref[...] += po
    m = jnp.maximum(ze_ref[...], zo_ref[...])                     # pool over W
    m = jnp.maximum(mm(s1e_ref[...], m), mm(s1o_ref[...], m))     # pool over H -> (15, 480)
    a1_ref[...] = jnp.maximum(m + b1_ref[...], 0.0)               # bias + ReLU

    # ---- conv2: 3x3, 32->64, ReLU, 2x2 maxpool.  a1 = (15, 15*32) ---------
    ze = zo = None
    for kh in range(3):
        slab = a1_ref[kh:kh + 13, :]                              # (13, 480)
        pe = mm(slab, w2e_ref[kh])                                # (13, 384)
        po = mm(slab, w2o_ref[kh])
        ze = pe if ze is None else ze + pe
        zo = po if zo is None else zo + po
    m = jnp.maximum(ze, zo)
    m = jnp.maximum(mm(s2e_ref[...], m), mm(s2o_ref[...], m))     # (6, 384)
    a2_ref[...] = jnp.maximum(m + b2_ref[...], 0.0)

    # ---- conv3: 3x3, 64->128, ReLU, 2x2 maxpool.  a2 = (6, 6*64) ----------
    ze = zo = None
    for kh in range(3):
        slab = a2_ref[kh:kh + 4, :]                               # (4, 384)
        pe = mm(slab, w3e_ref[kh])                                # (4, 256)
        po = mm(slab, w3o_ref[kh])
        ze = pe if ze is None else ze + pe
        zo = po if zo is None else zo + po
    m = jnp.maximum(ze, zo)
    m = jnp.maximum(mm(s3e_ref[...], m), mm(s3o_ref[...], m))     # (2, 256)
    a3_ref[...] = jnp.maximum(m + b3_ref[...], 0.0)

    # ---- conv4: 2x2, 128->32, ReLU (no pool).  a3 = (2, 2*128) ------------
    z = None
    for kh in range(2):
        t = mm(a3_ref[kh:kh + 1, :], w4_ref[kh])                  # (1, 32)
        z = t if z is None else z + t
    h = jnp.maximum(z + b4_ref[...], 0.0)                         # (1, 32) == flatten

    # ---- fc1 (ReLU) + fc2 --------------------------------------------------
    h = jnp.maximum(mm(h, fw1_ref[...]) + fb1_ref[...], 0.0)      # (1, 64)
    y = mm(h, fw2_ref[...]) + fb2_ref[...]                        # (1, 8)
    out_ref[...] = y.reshape(1, 1, 8)


def _const_spec(arr):
    zeros = (0,) * arr.ndim
    return pl.BlockSpec(arr.shape, lambda n, _z=zeros: _z)


@jax.jit
def source2_forward(kp, x_nchw):
    N, C, H, W = x_nchw.shape
    assert (C, H, W) == (3, 64, 64), "Source2 requires 3x64x64 inputs"
    # One-time input prep (98 KB): NCHW -> rows of (w,c) lanes, split into
    # even/odd row phases so conv1's stride-2 becomes contiguous slices.
    x = jnp.transpose(x_nchw, (0, 2, 3, 1)).astype(jnp.float32)   # (N,64,64,3)
    x = x.reshape(N, 64, 192).reshape(N, 32, 2, 192).transpose(0, 2, 1, 3)  # (N,2,32,192)

    args = (x,
            kp["w1e"], kp["w1o"], kp["b1"], kp["s1e"], kp["s1o"],
            kp["w2e"], kp["w2o"], kp["b2"], kp["s2e"], kp["s2o"],
            kp["w3e"], kp["w3o"], kp["b3"], kp["s3e"], kp["s3o"],
            kp["w4"], kp["b4"], kp["fw1"], kp["fb1"], kp["fw2"], kp["fb2"])
    in_specs = [pl.BlockSpec((1, 2, 32, 192), lambda n: (n, 0, 0, 0))]
    in_specs += [_const_spec(a) for a in args[1:]]

    out = pl.pallas_call(
        _fused_kernel,
        out_shape=jax.ShapeDtypeStruct((N, 1, 8), jnp.float32),
        grid=(N,),
        in_specs=in_specs,
        out_specs=pl.BlockSpec((1, 1, 8), lambda n: (n, 0, 0)),
        scratch_shapes=[
            pltpu.VMEM((30, 480), jnp.float32),   # conv1 even-wo accumulator
            pltpu.VMEM((30, 480), jnp.float32),   # conv1 odd-wo  accumulator
            pltpu.VMEM((15, 480), jnp.float32),   # pooled conv1 activation
            pltpu.VMEM((6, 384), jnp.float32),    # pooled conv2 activation
            pltpu.VMEM((2, 256), jnp.float32),    # pooled conv3 activation
        ],
        compiler_params=pltpu.CompilerParams(
            dimension_semantics=("parallel",),
            vmem_limit_bytes=40 * 1024 * 1024),
    )(*args)
    return out.reshape(N, 8)


# ---------------------------------------------------------------------------
# Parameters (same shapes / init distributions as the PyTorch module)
# ---------------------------------------------------------------------------
def init_params(key):
    ks = jax.random.split(key, 6)

    def conv_w(k, cout, cin, kh, kw):
        # PyTorch init: normal(0, 1/sqrt(5*5*C_in)) for EVERY conv (as written).
        std = 1.0 / sqrt(5 * 5 * cin)
        return std * jax.random.normal(k, (cout, cin, kh, kw), jnp.float32)

    def fc_w(k, cout, cin):
        std = 1.0 / sqrt(cin)
        return std * jax.random.normal(k, (cout, cin), jnp.float32)

    return {
        "conv1_w": conv_w(ks[0], 32, 3, 5, 5), "conv1_b": jnp.zeros((32,), jnp.float32),
        "conv2_w": conv_w(ks[1], 64, 32, 3, 3), "conv2_b": jnp.zeros((64,), jnp.float32),
        "conv3_w": conv_w(ks[2], 128, 64, 3, 3), "conv3_b": jnp.zeros((128,), jnp.float32),
        "conv4_w": conv_w(ks[3], 32, 128, 2, 2), "conv4_b": jnp.zeros((32,), jnp.float32),
        "fc1_w": fc_w(ks[4], 64, 32), "fc1_b": jnp.zeros((64,), jnp.float32),
        "fc2_w": fc_w(ks[5], 8, 64), "fc2_b": jnp.zeros((8,), jnp.float32),
    }


def prepare_kernel_params(p):
    """Precompute all kernel-side parameter layouts once (no per-call transposes)."""

    def conv_lowered(w, stride, w_in, wos):
        # w: (Co, Ci, KH, KW) torch layout -> (KH, w_in*Ci, len(wos)*Co) banded
        # matrix so that out[ho, j*Co+co] = sum_kh slab_kh[ho] @ big[kh] at wo=wos[j].
        w = np.asarray(w, np.float32)
        Co, Ci, KH, KW = w.shape
        big = np.zeros((KH, w_in * Ci, len(wos) * Co), np.float32)
        for kh in range(KH):
            for j, wo in enumerate(wos):
                for kw in range(KW):
                    col = stride * wo + kw
                    big[kh, col * Ci:(col + 1) * Ci, j * Co:(j + 1) * Co] = w[:, :, kh, kw].T
        return jnp.asarray(big)

    def row_pool_sel(hp, ho):
        se = np.zeros((hp, ho), np.float32)
        so = np.zeros((hp, ho), np.float32)
        se[np.arange(hp), 2 * np.arange(hp)] = 1.0
        so[np.arange(hp), 2 * np.arange(hp) + 1] = 1.0
        return jnp.asarray(se), jnp.asarray(so)

    def tiled_bias(b, reps):
        return jnp.asarray(np.tile(np.asarray(b, np.float32), reps)[None, :])

    kp = {}
    kp["w1e"] = conv_lowered(p["conv1_w"], 2, 64, list(range(0, 30, 2)))  # (5,192,480)
    kp["w1o"] = conv_lowered(p["conv1_w"], 2, 64, list(range(1, 30, 2)))
    kp["b1"] = tiled_bias(p["conv1_b"], 15)                               # (1,480)
    kp["s1e"], kp["s1o"] = row_pool_sel(15, 30)
    kp["w2e"] = conv_lowered(p["conv2_w"], 1, 15, list(range(0, 12, 2)))  # (3,480,384)
    kp["w2o"] = conv_lowered(p["conv2_w"], 1, 15, list(range(1, 12, 2)))
    kp["b2"] = tiled_bias(p["conv2_b"], 6)                                # (1,384)
    kp["s2e"], kp["s2o"] = row_pool_sel(6, 13)
    kp["w3e"] = conv_lowered(p["conv3_w"], 1, 6, [0, 2])                  # (3,384,256)
    kp["w3o"] = conv_lowered(p["conv3_w"], 1, 6, [1, 3])
    kp["b3"] = tiled_bias(p["conv3_b"], 2)                                # (1,256)
    kp["s3e"], kp["s3o"] = row_pool_sel(2, 4)
    kp["w4"] = conv_lowered(p["conv4_w"], 1, 2, [0])                      # (2,256,32)
    kp["b4"] = jnp.asarray(np.asarray(p["conv4_b"], np.float32)[None, :])
    kp["fw1"] = jnp.asarray(np.asarray(p["fc1_w"], np.float32).T)         # (32,64)
    kp["fb1"] = jnp.asarray(np.asarray(p["fc1_b"], np.float32)[None, :])
    kp["fw2"] = jnp.asarray(np.asarray(p["fc2_w"], np.float32).T)         # (64,8)
    kp["fb2"] = jnp.asarray(np.asarray(p["fc2_b"], np.float32)[None, :])
    return kp


# ---------------------------------------------------------------------------
# Pure-JAX reference (NCHW, Precision.HIGHEST) for the correctness check
# ---------------------------------------------------------------------------
def ref_forward(params, x_nchw):
    def conv(x, w, b, stride):
        y = jax.lax.conv_general_dilated(
            x, w, (stride, stride), "VALID",
            dimension_numbers=("NCHW", "OIHW", "NCHW"),
            precision=jax.lax.Precision.HIGHEST)
        return y + b.reshape(1, -1, 1, 1)

    def pool(x):
        return jax.lax.reduce_window(
            x, -jnp.inf, jax.lax.max, (1, 1, 2, 2), (1, 1, 2, 2), "VALID")

    z = pool(jax.nn.relu(conv(x_nchw, params["conv1_w"], params["conv1_b"], 2)))
    z = pool(jax.nn.relu(conv(z, params["conv2_w"], params["conv2_b"], 1)))
    z = pool(jax.nn.relu(conv(z, params["conv3_w"], params["conv3_b"], 1)))
    z = jax.nn.relu(conv(z, params["conv4_w"], params["conv4_b"], 1))
    z = z.reshape(z.shape[0], -1)
    z = jax.nn.relu(z @ params["fc1_w"].T + params["fc1_b"])
    z = z @ params["fc2_w"].T + params["fc2_b"]
    return z


if __name__ == "__main__":
    key = jax.random.PRNGKey(0)
    pkey, xkey = jax.random.split(key)
    params = init_params(pkey)
    kparams = prepare_kernel_params(params)

    # 64x64 input: the architecture (conv/pool stack + Linear(32, 64)) requires
    # conv4's output to be 1x1 spatial, which a 64x64 input produces.
    x = jax.random.normal(xkey, (2, 3, 64, 64), jnp.float32)

    out = jax.block_until_ready(source2_forward(kparams, x))
    assert out.shape == (2, 8), out.shape

    ref = jax.block_until_ready(ref_forward(params, x))
    np.testing.assert_allclose(np.asarray(out), np.asarray(ref), rtol=2e-3, atol=2e-3)

    print("KERNEL_OK")
</pallas_src>

<mosaic_0001>
module attributes {stable_mosaic.version = 11 : i64} {
  func.func @_fused_kernel(%arg0: i32, %arg1: memref<1x2x32x192xf32, #tpu.memory_space<vmem>>, %arg2: memref<5x192x480xf32, #tpu.memory_space<vmem>>, %arg3: memref<5x192x480xf32, #tpu.memory_space<vmem>>, %arg4: memref<1x480xf32, #tpu.memory_space<vmem>>, %arg5: memref<15x30xf32, #tpu.memory_space<vmem>>, %arg6: memref<15x30xf32, #tpu.memory_space<vmem>>, %arg7: memref<3x480x384xf32, #tpu.memory_space<vmem>>, %arg8: memref<3x480x384xf32, #tpu.memory_space<vmem>>, %arg9: memref<1x384xf32, #tpu.memory_space<vmem>>, %arg10: memref<6x13xf32, #tpu.memory_space<vmem>>, %arg11: memref<6x13xf32, #tpu.memory_space<vmem>>, %arg12: memref<3x384x256xf32, #tpu.memory_space<vmem>>, %arg13: memref<3x384x256xf32, #tpu.memory_space<vmem>>, %arg14: memref<1x256xf32, #tpu.memory_space<vmem>>, %arg15: memref<2x4xf32, #tpu.memory_space<vmem>>, %arg16: memref<2x4xf32, #tpu.memory_space<vmem>>, %arg17: memref<2x256x32xf32, #tpu.memory_space<vmem>>, %arg18: memref<1x32xf32, #tpu.memory_space<vmem>>, %arg19: memref<32x64xf32, #tpu.memory_space<vmem>>, %arg20: memref<1x64xf32, #tpu.memory_space<vmem>>, %arg21: memref<64x8xf32, #tpu.memory_space<vmem>>, %arg22: memref<1x8xf32, #tpu.memory_space<vmem>>, %arg23: memref<1x1x8xf32, #tpu.memory_space<vmem>>, %arg24: memref<30x480xf32, #tpu.memory_space<vmem>>, %arg25: memref<30x480xf32, #tpu.memory_space<vmem>>, %arg26: memref<15x480xf32, #tpu.memory_space<vmem>>, %arg27: memref<6x384xf32, #tpu.memory_space<vmem>>, %arg28: memref<2x256xf32, #tpu.memory_space<vmem>>) attributes {dimension_semantics = [#tpu.dimension_semantics<parallel>], iteration_bounds = array<i64: 2>, scalar_prefetch = 0 : i64, scratch_operands = 5 : i64, tpu.core_type = #tpu.core_type<tc>, window_params = [{transform_indices = @transform_0, window_bounds = array<i64: 1, 2, 32, 192>}, {pipeline_mode = #tpu.pipeline_mode<synchronous>, transform_indices = @transform_1, window_bounds = array<i64: 5, 192, 480>}, {pipeline_mode = #tpu.pipeline_mode<synchronous>, transform_indices = @transform_2, window_bounds = array<i64: 5, 192, 480>}, {pipeline_mode = #tpu.pipeline_mode<synchronous>, transform_indices = @transform_3, window_bounds = array<i64: 1, 480>}, {pipeline_mode = #tpu.pipeline_mode<synchronous>, transform_indices = @transform_4, window_bounds = array<i64: 15, 30>}, {pipeline_mode = #tpu.pipeline_mode<synchronous>, transform_indices = @transform_5, window_bounds = array<i64: 15, 30>}, {pipeline_mode = #tpu.pipeline_mode<synchronous>, transform_indices = @transform_6, window_bounds = array<i64: 3, 480, 384>}, {pipeline_mode = #tpu.pipeline_mode<synchronous>, transform_indices = @transform_7, window_bounds = array<i64: 3, 480, 384>}, {pipeline_mode = #tpu.pipeline_mode<synchronous>, transform_indices = @transform_8, window_bounds = array<i64: 1, 384>}, {pipeline_mode = #tpu.pipeline_mode<synchronous>, transform_indices = @transform_9, window_bounds = array<i64: 6, 13>}, {pipeline_mode = #tpu.pipeline_mode<synchronous>, transform_indices = @transform_10, window_bounds = array<i64: 6, 13>}, {pipeline_mode = #tpu.pipeline_mode<synchronous>, transform_indices = @transform_11, window_bounds = array<i64: 3, 384, 256>}, {pipeline_mode = #tpu.pipeline_mode<synchronous>, transform_indices = @transform_12, window_bounds = array<i64: 3, 384, 256>}, {pipeline_mode = #tpu.pipeline_mode<synchronous>, transform_indices = @transform_13, window_bounds = array<i64: 1, 256>}, {pipeline_mode = #tpu.pipeline_mode<synchronous>, transform_indices = @transform_14, window_bounds = array<i64: 2, 4>}, {pipeline_mode = #tpu.pipeline_mode<synchronous>, transform_indices = @transform_15, window_bounds = array<i64: 2, 4>}, {pipeline_mode = #tpu.pipeline_mode<synchronous>, transform_indices = @transform_16, window_bounds = array<i64: 2, 256, 32>}, {pipeline_mode = #tpu.pipeline_mode<synchronous>, transform_indices = @transform_17, window_bounds = array<i64: 1, 32>}, {pipeline_mode = #tpu.pipeline_mode<synchronous>, transform_indices = @transform_18, window_bounds = array<i64: 32, 64>}, {pipeline_mode = #tpu.pipeline_mode<synchronous>, transform_indices = @transform_19, window_bounds = array<i64: 1, 64>}, {pipeline_mode = #tpu.pipeline_mode<synchronous>, transform_indices = @transform_20, window_bounds = array<i64: 64, 8>}, {pipeline_mode = #tpu.pipeline_mode<synchronous>, transform_indices = @transform_21, window_bounds = array<i64: 1, 8>}, {transform_indices = @transform_22, window_bounds = array<i64: 1, 1, 8>}]} {
    %c0 = arith.constant 0 : index
    %c0_0 = arith.constant 0 : index
    %c0_1 = arith.constant 0 : index
    %c0_2 = arith.constant 0 : index
    %0 = vector.load %arg1[%c0, %c0_0, %c0_1, %c0_2] : memref<1x2x32x192xf32, #tpu.memory_space<vmem>>, vector<1x1x30x192xf32>
    %1 = vector.shape_cast %0 : vector<1x1x30x192xf32> to vector<30x192xf32>
    %c0_3 = arith.constant 0 : index
    %c0_4 = arith.constant 0 : index
    %c0_5 = arith.constant 0 : index
    %2 = vector.load %arg2[%c0_3, %c0_4, %c0_5] : memref<5x192x480xf32, #tpu.memory_space<vmem>>, vector<1x192x480xf32>
    %3 = vector.shape_cast %2 : vector<1x192x480xf32> to vector<192x480xf32>
    %cst = arith.constant dense<0.000000e+00> : vector<30x480xf32>
    %4 = tpu.matmul %1, %3, %cst {dimension_numbers = #tpu.dot_dimension_numbers<[1], [0], [0], [1], [0, 0, 1, 1], [], []>} : vector<30x192xf32>, vector<192x480xf32>, vector<30x480xf32> -> vector<30x480xf32>
    %c0_6 = arith.constant 0 : index
    %c0_7 = arith.constant 0 : index
    %c0_8 = arith.constant 0 : index
    %5 = vector.load %arg3[%c0_6, %c0_7, %c0_8] : memref<5x192x480xf32, #tpu.memory_space<vmem>>, vector<1x192x480xf32>
    %6 = vector.shape_cast %5 : vector<1x192x480xf32> to vector<192x480xf32>
    %cst_9 = arith.constant dense<0.000000e+00> : vector<30x480xf32>
    %7 = tpu.matmul %1, %6, %cst_9 {dimension_numbers = #tpu.dot_dimension_numbers<[1], [0], [0], [1], [0, 0, 1, 1], [], []>} : vector<30x192xf32>, vector<192x480xf32>, vector<30x480xf32> -> vector<30x480xf32>
    %c0_10 = arith.constant 0 : index
    %c0_11 = arith.constant 0 : index
    %8 = vector.load %arg24[%c0_10, %c0_11] : memref<30x480xf32, #tpu.memory_space<vmem>>, vector<30x480xf32>
    tpu.vector_store %arg24[%c0_10, %c0_11], %4 {strides = array<i32>} : memref<30x480xf32, #tpu.memory_space<vmem>>, vector<30x480xf32>,
    %c0_12 = arith.constant 0 : index
    %c0_13 = arith.constant 0 : index
    %9 = vector.load %arg25[%c0_12, %c0_13] : memref<30x480xf32, #tpu.memory_space<vmem>>, vector<30x480xf32>
    tpu.vector_store %arg25[%c0_12, %c0_13], %7 {strides = array<i32>} : memref<30x480xf32, #tpu.memory_space<vmem>>, vector<30x480xf32>,
    %c0_14 = arith.constant 0 : index
    %c1 = arith.constant 1 : index
    %c0_15 = arith.constant 0 : index
    %c0_16 = arith.constant 0 : index
    %10 = vector.load %arg1[%c0_14, %c1, %c0_15, %c0_16] : memref<1x2x32x192xf32, #tpu.memory_space<vmem>>, vector<1x1x30x192xf32>
    %11 = vector.shape_cast %10 : vector<1x1x30x192xf32> to vector<30x192xf32>
    %c1_17 = arith.constant 1 : index
    %c0_18 = arith.constant 0 : index
    %c0_19 = arith.constant 0 : index
    %12 = vector.load %arg2[%c1_17, %c0_18, %c0_19] : memref<5x192x480xf32, #tpu.memory_space<vmem>>, vector<1x192x480xf32>
    %13 = vector.shape_cast %12 : vector<1x192x480xf32> to vector<192x480xf32>
    %cst_20 = arith.constant dense<0.000000e+00> : vector<30x480xf32>
    %14 = tpu.matmul %11, %13, %cst_20 {dimension_numbers = #tpu.dot_dimension_numbers<[1], [0], [0], [1], [0, 0, 1, 1], [], []>} : vector<30x192xf32>, vector<192x480xf32>, vector<30x480xf32> -> vector<30x480xf32>
    %c1_21 = arith.constant 1 : index
    %c0_22 = arith.constant 0 : index
    %c0_23 = arith.constant 0 : index
    %15 = vector.load %arg3[%c1_21, %c0_22, %c0_23] : memref<5x192x480xf32, #tpu.memory_space<vmem>>, vector<1x192x480xf32>
    %16 = vector.shape_cast %15 : vector<1x192x480xf32> to vector<192x480xf32>
    %cst_24 = arith.constant dense<0.000000e+00> : vector<30x480xf32>
    %17 = tpu.matmul %11, %16, %cst_24 {dimension_numbers = #tpu.dot_dimension_numbers<[1], [0], [0], [1], [0, 0, 1, 1], [], []>} : vector<30x192xf32>, vector<192x480xf32>, vector<30x480xf32> -> vector<30x480xf32>
    %c0_25 = arith.constant 0 : index
    %c0_26 = arith.constant 0 : index
    %18 = vector.load %arg24[%c0_25, %c0_26] : memref<30x480xf32, #tpu.memory_space<vmem>>, vector<30x480xf32>
    %19 = arith.addf %18, %14 : vector<30x480xf32>
    %c0_27 = arith.constant 0 : index
    %c0_28 = arith.constant 0 : index
    %20 = vector.load %arg24[%c0_27, %c0_28] : memref<30x480xf32, #tpu.memory_space<vmem>>, vector<30x480xf32>
    tpu.vector_store %arg24[%c0_27, %c0_28], %19 {strides = array<i32>} : memref<30x480xf32, #tpu.memory_space<vmem>>, vector<30x480xf32>,
    %c0_29 = arith.constant 0 : index
    %c0_30 = arith.constant 0 : index
    %21 = vector.load %arg25[%c0_29, %c0_30] : memref<30x480xf32, #tpu.memory_space<vmem>>, vector<30x480xf32>
    %22 = arith.addf %21, %17 : vector<30x480xf32>
    %c0_31 = arith.constant 0 : index
    %c0_32 = arith.constant 0 : index
    %23 = vector.load %arg25[%c0_31, %c0_32] : memref<30x480xf32, #tpu.memory_space<vmem>>, vector<30x480xf32>
    tpu.vector_store %arg25[%c0_31, %c0_32], %22 {strides = array<i32>} : memref<30x480xf32, #tpu.memory_space<vmem>>, vector<30x480xf32>,
    %c0_33 = arith.constant 0 : index
    %c0_34 = arith.constant 0 : index
    %c1_35 = arith.constant 1 : index
    %c0_36 = arith.constant 0 : index
    %24 = vector.load %arg1[%c0_33, %c0_34, %c1_35, %c0_36] : memref<1x2x32x192xf32, #tpu.memory_space<vmem>>, vector<1x1x30x192xf32>
    %25 = vector.shape_cast %24 : vector<1x1x30x192xf32> to vector<30x192xf32>
    %c2 = arith.constant 2 : index
    %c0_37 = arith.constant 0 : index
    %c0_38 = arith.constant 0 : index
    %26 = vector.load %arg2[%c2, %c0_37, %c0_38] : memref<5x192x480xf32, #tpu.memory_space<vmem>>, vector<1x192x480xf32>
    %27 = vector.shape_cast %26 : vector<1x192x480xf32> to vector<192x480xf32>
    %cst_39 = arith.constant dense<0.000000e+00> : vector<30x480xf32>
    %28 = tpu.matmul %25, %27, %cst_39 {dimension_numbers = #tpu.dot_dimension_numbers<[1], [0], [0], [1], [0, 0, 1, 1], [], []>} : vector<30x192xf32>, vector<192x480xf32>, vector<30x480xf32> -> vector<30x480xf32>
    %c2_40 = arith.constant 2 : index
    %c0_41 = arith.constant 0 : index
    %c0_42 = arith.constant 0 : index
    %29 = vector.load %arg3[%c2_40, %c0_41, %c0_42] : memref<5x192x480xf32, #tpu.memory_space<vmem>>, vector<1x192x480xf32>
    %30 = vector.shape_cast %29 : vector<1x192x480xf32> to vector<192x480xf32>
    %cst_43 = arith.constant dense<0.000000e+00> : vector<30x480xf32>
    %31 = tpu.matmul %25, %30, %cst_43 {dimension_numbers = #tpu.dot_dimension_numbers<[1], [0], [0], [1], [0, 0, 1, 1], [], []>} : vector<30x192xf32>, vector<192x480xf32>, vector<30x480xf32> -> vector<30x480xf32>
    %c0_44 = arith.constant 0 : index
    %c0_45 = arith.constant 0 : index
    %32 = vector.load %arg24[%c0_44, %c0_45] : memref<30x480xf32, #tpu.memory_space<vmem>>, vector<30x480xf32>
    %33 = arith.addf %32, %28 : vector<30x480xf32>
    %c0_46 = arith.constant 0 : index
    %c0_47 = arith.constant 0 : index
    %34 = vector.load %arg24[%c0_46, %c0_47] : memref<30x480xf32, #tpu.memory_space<vmem>>, vector<30x480xf32>
    tpu.vector_store %arg24[%c0_46, %c0_47], %33 {strides = array<i32>} : memref<30x480xf32, #tpu.memory_space<vmem>>, vector<30x480xf32>,
    %c0_48 = arith.constant 0 : index
    %c0_49 = arith.constant 0 : index
    %35 = vector.load %arg25[%c0_48, %c0_49] : memref<30x480xf32, #tpu.memory_space<vmem>>, vector<30x480xf32>
    %36 = arith.addf %35, %31 : vector<30x480xf32>
    %c0_50 = arith.constant 0 : index
    %c0_51 = arith.constant 0 : index
    %37 = vector.load %arg25[%c0_50, %c0_51] : memref<30x480xf32, #tpu.memory_space<vmem>>, vector<30x480xf32>
    tpu.vector_store %arg25[%c0_50, %c0_51], %36 {strides = array<i32>} : memref<30x480xf32, #tpu.memory_space<vmem>>, vector<30x480xf32>,
    %c0_52 = arith.constant 0 : index
    %c1_53 = arith.constant 1 : index
    %c1_54 = arith.constant 1 : index
    %c0_55 = arith.constant 0 : index
    %38 = vector.load %arg1[%c0_52, %c1_53, %c1_54, %c0_55] : memref<1x2x32x192xf32, #tpu.memory_space<vmem>>, vector<1x1x30x192xf32>
    %39 = vector.shape_cast %38 : vector<1x1x30x192xf32> to vector<30x192xf32>
    %c3 = arith.constant 3 : index
    %c0_56 = arith.constant 0 : index
    %c0_57 = arith.constant 0 : index
    %40 = vector.load %arg2[%c3, %c0_56, %c0_57] : memref<5x192x480xf32, #tpu.memory_space<vmem>>, vector<1x192x480xf32>
    %41 = vector.shape_cast %40 : vector<1x192x480xf32> to vector<192x480xf32>
    %cst_58 = arith.constant dense<0.000000e+00> : vector<30x480xf32>
    %42 = tpu.matmul %39, %41, %cst_58 {dimension_numbers = #tpu.dot_dimension_numbers<[1], [0], [0], [1], [0, 0, 1, 1], [], []>} : vector<30x192xf32>, vector<192x480xf32>, vector<30x480xf32> -> vector<30x480xf32>
    %c3_59 = arith.constant 3 : index
    %c0_60 = arith.constant 0 : index
    %c0_61 = arith.constant 0 : index
    %43 = vector.load %arg3[%c3_59, %c0_60, %c0_61] : memref<5x192x480xf32, #tpu.memory_space<vmem>>, vector<1x192x480xf32>
    %44 = vector.shape_cast %43 : vector<1x192x480xf32> to vector<192x480xf32>
    %cst_62 = arith.constant dense<0.000000e+00> : vector<30x480xf32>
    %45 = tpu.matmul %39, %44, %cst_62 {dimension_numbers = #tpu.dot_dimension_numbers<[1], [0], [0], [1], [0, 0, 1, 1], [], []>} : vector<30x192xf32>, vector<192x480xf32>, vector<30x480xf32> -> vector<30x480xf32>
    %c0_63 = arith.constant 0 : index
    %c0_64 = arith.constant 0 : index
    %46 = vector.load %arg24[%c0_63, %c0_64] : memref<30x480xf32, #tpu.memory_space<vmem>>, vector<30x480xf32>
    %47 = arith.addf %46, %42 : vector<30x480xf32>
    %c0_65 = arith.constant 0 : index
    %c0_66 = arith.constant 0 : index
    %48 = vector.load %arg24[%c0_65, %c0_66] : memref<30x480xf32, #tpu.memory_space<vmem>>, vector<30x480xf32>
    tpu.vector_store %arg24[%c0_65, %c0_66], %47 {strides = array<i32>} : memref<30x480xf32, #tpu.memory_space<vmem>>, vector<30x480xf32>,
    %c0_67 = arith.constant 0 : index
    %c0_68 = arith.constant 0 : index
    %49 = vector.load %arg25[%c0_67, %c0_68] : memref<30x480xf32, #tpu.memory_space<vmem>>, vector<30x480xf32>
    %50 = arith.addf %49, %45 : vector<30x480xf32>
    %c0_69 = arith.constant 0 : index
    %c0_70 = arith.constant 0 : index
    %51 = vector.load %arg25[%c0_69, %c0_70] : memref<30x480xf32, #tpu.memory_space<vmem>>, vector<30x480xf32>
    tpu.vector_store %arg25[%c0_69, %c0_70], %50 {strides = array<i32>} : memref<30x480xf32, #tpu.memory_space<vmem>>, vector<30x480xf32>,
    %c0_71 = arith.constant 0 : index
    %c0_72 = arith.constant 0 : index
    %c2_73 = arith.constant 2 : index
    %c0_74 = arith.constant 0 : index
    %52 = vector.load %arg1[%c0_71, %c0_72, %c2_73, %c0_74] : memref<1x2x32x192xf32, #tpu.memory_space<vmem>>, vector<1x1x30x192xf32>
    %53 = vector.shape_cast %52 : vector<1x1x30x192xf32> to vector<30x192xf32>
    %c4 = arith.constant 4 : index
    %c0_75 = arith.constant 0 : index
    %c0_76 = arith.constant 0 : index
    %54 = vector.load %arg2[%c4, %c0_75, %c0_76] : memref<5x192x480xf32, #tpu.memory_space<vmem>>, vector<1x192x480xf32>
    %55 = vector.shape_cast %54 : vector<1x192x480xf32> to vector<192x480xf32>
    %cst_77 = arith.constant dense<0.000000e+00> : vector<30x480xf32>
    %56 = tpu.matmul %53, %55, %cst_77 {dimension_numbers = #tpu.dot_dimension_numbers<[1], [0], [0], [1], [0, 0, 1, 1], [], []>} : vector<30x192xf32>, vector<192x480xf32>, vector<30x480xf32> -> vector<30x480xf32>
    %c4_78 = arith.constant 4 : index
    %c0_79 = arith.constant 0 : index
    %c0_80 = arith.constant 0 : index
    %57 = vector.load %arg3[%c4_78, %c0_79, %c0_80] : memref<5x192x480xf32, #tpu.memory_space<vmem>>, vector<1x192x480xf32>
    %58 = vector.shape_cast %57 : vector<1x192x480xf32> to vector<192x480xf32>
    %cst_81 = arith.constant dense<0.000000e+00> : vector<30x480xf32>
    %59 = tpu.matmul %53, %58, %cst_81 {dimension_numbers = #tpu.dot_dimension_numbers<[1], [0], [0], [1], [0, 0, 1, 1], [], []>} : vector<30x192xf32>, vector<192x480xf32>, vector<30x480xf32> -> vector<30x480xf32>
    %c0_82 = arith.constant 0 : index
    %c0_83 = arith.constant 0 : index
    %60 = vector.load %arg24[%c0_82, %c0_83] : memref<30x480xf32, #tpu.memory_space<vmem>>, vector<30x480xf32>
    %61 = arith.addf %60, %56 : vector<30x480xf32>
    %c0_84 = arith.constant 0 : index
    %c0_85 = arith.constant 0 : index
    %62 = vector.load %arg24[%c0_84, %c0_85] : memref<30x480xf32, #tpu.memory_space<vmem>>, vector<30x480xf32>
    tpu.vector_store %arg24[%c0_84, %c0_85], %61 {strides = array<i32>} : memref<30x480xf32, #tpu.memory_space<vmem>>, vector<30x480xf32>,
    %c0_86 = arith.constant 0 : index
    %c0_87 = arith.constant 0 : index
    %63 = vector.load %arg25[%c0_86, %c0_87] : memref<30x480xf32, #tpu.memory_space<vmem>>, vector<30x480xf32>
    %64 = arith.addf %63, %59 : vector<30x480xf32>
    %c0_88 = arith.constant 0 : index
    %c0_89 = arith.constant 0 : index
    %65 = vector.load %arg25[%c0_88, %c0_89] : memref<30x480xf32, #tpu.memory_space<vmem>>, vector<30x480xf32>
    tpu.vector_store %arg25[%c0_88, %c0_89], %64 {strides = array<i32>} : memref<30x480xf32, #tpu.memory_space<vmem>>, vector<30x480xf32>,
    %c0_90 = arith.constant 0 : index
    %c0_91 = arith.constant 0 : index
    %66 = vector.load %arg24[%c0_90, %c0_91] : memref<30x480xf32, #tpu.memory_space<vmem>>, vector<30x480xf32>
    %c0_92 = arith.constant 0 : index
    %c0_93 = arith.constant 0 : index
    %67 = vector.load %arg25[%c0_92, %c0_93] : memref<30x480xf32, #tpu.memory_space<vmem>>, vector<30x480xf32>
    %68 = arith.maximumf %66, %67 : vector<30x480xf32>
    %c0_94 = arith.constant 0 : index
    %c0_95 = arith.constant 0 : index
    %69 = vector.load %arg5[%c0_94, %c0_95] : memref<15x30xf32, #tpu.memory_space<vmem>>, vector<15x30xf32>
    %cst_96 = arith.constant dense<0.000000e+00> : vector<15x480xf32>
    %70 = tpu.matmul %69, %68, %cst_96 {dimension_numbers = #tpu.dot_dimension_numbers<[1], [0], [0], [1], [0, 0, 1, 1], [], []>} : vector<15x30xf32>, vector<30x480xf32>, vector<15x480xf32> -> vector<15x480xf32>
    %c0_97 = arith.constant 0 : index
    %c0_98 = arith.constant 0 : index
    %71 = vector.load %arg6[%c0_97, %c0_98] : memref<15x30xf32, #tpu.memory_space<vmem>>, vector<15x30xf32>
    %cst_99 = arith.constant dense<0.000000e+00> : vector<15x480xf32>
    %72 = tpu.matmul %71, %68, %cst_99 {dimension_numbers = #tpu.dot_dimension_numbers<[1], [0], [0], [1], [0, 0, 1, 1], [], []>} : vector<15x30xf32>, vector<30x480xf32>, vector<15x480xf32> -> vector<15x480xf32>
    %73 = arith.maximumf %70, %72 : vector<15x480xf32>
    %c0_100 = arith.constant 0 : index
    %c0_101 = arith.constant 0 : index
    %74 = vector.load %arg4[%c0_100, %c0_101] : memref<1x480xf32, #tpu.memory_space<vmem>>, vector<1x480xf32>
    %75 = vector.broadcast %74 : vector<1x480xf32> to vector<15x480xf32>
    %76 = arith.addf %73, %75 : vector<15x480xf32>
    %cst_102 = arith.constant 0.000000e+00 : f32
    %77 = vector.broadcast %cst_102 : f32 to vector<15x480xf32>
    %78 = arith.maximumf %76, %77 : vector<15x480xf32>
    %c0_103 = arith.constant 0 : index
    %c0_104 = arith.constant 0 : index
    %79 = vector.load %arg26[%c0_103, %c0_104] : memref<15x480xf32, #tpu.memory_space<vmem>>, vector<15x480xf32>
    tpu.vector_store %arg26[%c0_103, %c0_104], %78 {strides = array<i32>} : memref<15x480xf32, #tpu.memory_space<vmem>>, vector<15x480xf32>,
    %c0_105 = arith.constant 0 : index
    %c0_106 = arith.constant 0 : index
    %80 = vector.load %arg26[%c0_105, %c0_106] : memref<15x480xf32, #tpu.memory_space<vmem>>, vector<13x480xf32>
    %c0_107 = arith.constant 0 : index
    %c0_108 = arith.constant 0 : index
    %c0_109 = arith.constant 0 : index
    %81 = vector.load %arg7[%c0_107, %c0_108, %c0_109] : memref<3x480x384xf32, #tpu.memory_space<vmem>>, vector<1x480x384xf32>
    %82 = vector.shape_cast %81 : vector<1x480x384xf32> to vector<480x384xf32>
    %cst_110 = arith.constant dense<0.000000e+00> : vector<13x384xf32>
    %83 = tpu.matmul %80, %82, %cst_110 {dimension_numbers = #tpu.dot_dimension_numbers<[1], [0], [0], [1], [0, 0, 1, 1], [], []>} : vector<13x480xf32>, vector<480x384xf32>, vector<13x384xf32> -> vector<13x384xf32>
    %c0_111 = arith.constant 0 : index
    %c0_112 = arith.constant 0 : index
    %c0_113 = arith.constant 0 : index
    %84 = vector.load %arg8[%c0_111, %c0_112, %c0_113] : memref<3x480x384xf32, #tpu.memory_space<vmem>>, vector<1x480x384xf32>
    %85 = vector.shape_cast %84 : vector<1x480x384xf32> to vector<480x384xf32>
    %cst_114 = arith.constant dense<0.000000e+00> : vector<13x384xf32>
    %86 = tpu.matmul %80, %85, %cst_114 {dimension_numbers = #tpu.dot_dimension_numbers<[1], [0], [0], [1], [0, 0, 1, 1], [], []>} : vector<13x480xf32>, vector<480x384xf32>, vector<13x384xf32> -> vector<13x384xf32>
    %c1_115 = arith.constant 1 : index
    %c0_116 = arith.constant 0 : index
    %87 = vector.load %arg26[%c1_115, %c0_116] : memref<15x480xf32, #tpu.memory_space<vmem>>, vector<13x480xf32>
    %c1_117 = arith.constant 1 : index
    %c0_118 = arith.constant 0 : index
    %c0_119 = arith.constant 0 : index
    %88 = vector.load %arg7[%c1_117, %c0_118, %c0_119] : memref<3x480x384xf32, #tpu.memory_space<vmem>>, vector<1x480x384xf32>
    %89 = vector.shape_cast %88 : vector<1x480x384xf32> to vector<480x384xf32>
    %cst_120 = arith.constant dense<0.000000e+00> : vector<13x384xf32>
    %90 = tpu.matmul %87, %89, %cst_120 {dimension_numbers = #tpu.dot_dimension_numbers<[1], [0], [0], [1], [0, 0, 1, 1], [], []>} : vector<13x480xf32>, vector<480x384xf32>, vector<13x384xf32> -> vector<13x384xf32>
    %c1_121 = arith.constant 1 : index
    %c0_122 = arith.constant 0 : index
    %c0_123 = arith.constant 0 : index
    %91 = vector.load %arg8[%c1_121, %c0_122, %c0_123] : memref<3x480x384xf32, #tpu.memory_space<vmem>>, vector<1x480x384xf32>
    %92 = vector.shape_cast %91 : vector<1x480x384xf32> to vector<480x384xf32>
    %cst_124 = arith.constant dense<0.000000e+00> : vector<13x384xf32>
    %93 = tpu.matmul %87, %92, %cst_124 {dimension_numbers = #tpu.dot_dimension_numbers<[1], [0], [0], [1], [0, 0, 1, 1], [], []>} : vector<13x480xf32>, vector<480x384xf32>, vector<13x384xf32> -> vector<13x384xf32>
    %94 = arith.addf %83, %90 : vector<13x384xf32>
    %95 = arith.addf %86, %93 : vector<13x384xf32>
    %c2_125 = arith.constant 2 : index
    %c0_126 = arith.constant 0 : index
    %96 = vector.load %arg26[%c2_125, %c0_126] : memref<15x480xf32, #tpu.memory_space<vmem>>, vector<13x480xf32>
    %c2_127 = arith.constant 2 : index
    %c0_128 = arith.constant 0 : index
    %c0_129 = arith.constant 0 : index
    %97 = vector.load %arg7[%c2_127, %c0_128, %c0_129] : memref<3x480x384xf32, #tpu.memory_space<vmem>>, vector<1x480x384xf32>
    %98 = vector.shape_cast %97 : vector<1x480x384xf32> to vector<480x384xf32>
    %cst_130 = arith.constant dense<0.000000e+00> : vector<13x384xf32>
    %99 = tpu.matmul %96, %98, %cst_130 {dimension_numbers = #tpu.dot_dimension_numbers<[1], [0], [0], [1], [0, 0, 1, 1], [], []>} : vector<13x480xf32>, vector<480x384xf32>, vector<13x384xf32> -> vector<13x384xf32>
    %c2_131 = arith.constant 2 : index
    %c0_132 = arith.constant 0 : index
    %c0_133 = arith.constant 0 : index
    %100 = vector.load %arg8[%c2_131, %c0_132, %c0_133] : memref<3x480x384xf32, #tpu.memory_space<vmem>>, vector<1x480x384xf32>
    %101 = vector.shape_cast %100 : vector<1x480x384xf32> to vector<480x384xf32>
    %cst_134 = arith.constant dense<0.000000e+00> : vector<13x384xf32>
    %102 = tpu.matmul %96, %101, %cst_134 {dimension_numbers = #tpu.dot_dimension_numbers<[1], [0], [0], [1], [0, 0, 1, 1], [], []>} : vector<13x480xf32>, vector<480x384xf32>, vector<13x384xf32> -> vector<13x384xf32>
    %103 = arith.addf %94, %99 : vector<13x384xf32>
    %104 = arith.addf %95, %102 : vector<13x384xf32>
    %105 = arith.maximumf %103, %104 : vector<13x384xf32>
    %c0_135 = arith.constant 0 : index
    %c0_136 = arith.constant 0 : index
    %106 = vector.load %arg10[%c0_135, %c0_136] : memref<6x13xf32, #tpu.memory_space<vmem>>, vector<6x13xf32>
    %cst_137 = arith.constant dense<0.000000e+00> : vector<6x384xf32>
    %107 = tpu.matmul %106, %105, %cst_137 {dimension_numbers = #tpu.dot_dimension_numbers<[1], [0], [0], [1], [0, 0, 1, 1], [], []>} : vector<6x13xf32>, vector<13x384xf32>, vector<6x384xf32> -> vector<6x384xf32>
    %c0_138 = arith.constant 0 : index
    %c0_139 = arith.constant 0 : index
    %108 = vector.load %arg11[%c0_138, %c0_139] : memref<6x13xf32, #tpu.memory_space<vmem>>, vector<6x13xf32>
    %cst_140 = arith.constant dense<0.000000e+00> : vector<6x384xf32>
    %109 = tpu.matmul %108, %105, %cst_140 {dimension_numbers = #tpu.dot_dimension_numbers<[1], [0], [0], [1], [0, 0, 1, 1], [], []>} : vector<6x13xf32>, vector<13x384xf32>, vector<6x384xf32> -> vector<6x384xf32>
    %110 = arith.maximumf %107, %109 : vector<6x384xf32>
    %c0_141 = arith.constant 0 : index
    %c0_142 = arith.constant 0 : index
    %111 = vector.load %arg9[%c0_141, %c0_142] : memref<1x384xf32, #tpu.memory_space<vmem>>, vector<1x384xf32>
    %112 = vector.broadcast %111 : vector<1x384xf32> to vector<6x384xf32>
    %113 = arith.addf %110, %112 : vector<6x384xf32>
    %cst_143 = arith.constant 0.000000e+00 : f32
    %114 = vector.broadcast %cst_143 : f32 to vector<6x384xf32>
    %115 = arith.maximumf %113, %114 : vector<6x384xf32>
    %c0_144 = arith.constant 0 : index
    %c0_145 = arith.constant 0 : index
    %116 = vector.load %arg27[%c0_144, %c0_145] : memref<6x384xf32, #tpu.memory_space<vmem>>, vector<6x384xf32>
    tpu.vector_store %arg27[%c0_144, %c0_145], %115 {strides = array<i32>} : memref<6x384xf32, #tpu.memory_space<vmem>>, vector<6x384xf32>,
    %c0_146 = arith.constant 0 : index
    %c0_147 = arith.constant 0 : index
    %117 = vector.load %arg27[%c0_146, %c0_147] : memref<6x384xf32, #tpu.memory_space<vmem>>, vector<4x384xf32>
    %c0_148 = arith.constant 0 : index
    %c0_149 = arith.constant 0 : index
    %c0_150 = arith.constant 0 : index
    %118 = vector.load %arg12[%c0_148, %c0_149, %c0_150] : memref<3x384x256xf32, #tpu.memory_space<vmem>>, vector<1x384x256xf32>
    %119 = vector.shape_cast %118 : vector<1x384x256xf32> to vector<384x256xf32>
    %cst_151 = arith.constant dense<0.000000e+00> : vector<4x256xf32>
    %120 = tpu.matmul %117, %119, %cst_151 {dimension_numbers = #tpu.dot_dimension_numbers<[1], [0], [0], [1], [0, 0, 1, 1], [], []>} : vector<4x384xf32>, vector<384x256xf32>, vector<4x256xf32> -> vector<4x256xf32>
    %c0_152 = arith.constant 0 : index
    %c0_153 = arith.constant 0 : index
    %c0_154 = arith.constant 0 : index
    %121 = vector.load %arg13[%c0_152, %c0_153, %c0_154] : memref<3x384x256xf32, #tpu.memory_space<vmem>>, vector<1x384x256xf32>
    %122 = vector.shape_cast %121 : vector<1x384x256xf32> to vector<384x256xf32>
    %cst_155 = arith.constant dense<0.000000e+00> : vector<4x256xf32>
    %123 = tpu.matmul %117, %122, %cst_155 {dimension_numbers = #tpu.dot_dimension_numbers<[1], [0], [0], [1], [0, 0, 1, 1], [], []>} : vector<4x384xf32>, vector<384x256xf32>, vector<4x256xf32> -> vector<4x256xf32>
    %c1_156 = arith.constant 1 : index
    %c0_157 = arith.constant 0 : index
    %124 = vector.load %arg27[%c1_156, %c0_157] : memref<6x384xf32, #tpu.memory_space<vmem>>, vector<4x384xf32>
    %c1_158 = arith.constant 1 : index
    %c0_159 = arith.constant 0 : index
    %c0_160 = arith.constant 0 : index
    %125 = vector.load %arg12[%c1_158, %c0_159, %c0_160] : memref<3x384x256xf32, #tpu.memory_space<vmem>>, vector<1x384x256xf32>
    %126 = vector.shape_cast %125 : vector<1x384x256xf32> to vector<384x256xf32>
    %cst_161 = arith.constant dense<0.000000e+00> : vector<4x256xf32>
    %127 = tpu.matmul %124, %126, %cst_161 {dimension_numbers = #tpu.dot_dimension_numbers<[1], [0], [0], [1], [0, 0, 1, 1], [], []>} : vector<4x384xf32>, vector<384x256xf32>, vector<4x256xf32> -> vector<4x256xf32>
    %c1_162 = arith.constant 1 : index
    %c0_163 = arith.constant 0 : index
    %c0_164 = arith.constant 0 : index
    %128 = vector.load %arg13[%c1_162, %c0_163, %c0_164] : memref<3x384x256xf32, #tpu.memory_space<vmem>>, vector<1x384x256xf32>
    %129 = vector.shape_cast %128 : vector<1x384x256xf32> to vector<384x256xf32>
    %cst_165 = arith.constant dense<0.000000e+00> : vector<4x256xf32>
    %130 = tpu.matmul %124, %129, %cst_165 {dimension_numbers = #tpu.dot_dimension_numbers<[1], [0], [0], [1], [0, 0, 1, 1], [], []>} : vector<4x384xf32>, vector<384x256xf32>, vector<4x256xf32> -> vector<4x256xf32>
    %131 = arith.addf %120, %127 : vector<4x256xf32>
    %132 = arith.addf %123, %130 : vector<4x256xf32>
    %c2_166 = arith.constant 2 : index
    %c0_167 = arith.constant 0 : index
    %133 = vector.load %arg27[%c2_166, %c0_167] : memref<6x384xf32, #tpu.memory_space<vmem>>, vector<4x384xf32>
    %c2_168 = arith.constant 2 : index
    %c0_169 = arith.constant 0 : index
    %c0_170 = arith.constant 0 : index
    %134 = vector.load %arg12[%c2_168, %c0_169, %c0_170] : memref<3x384x256xf32, #tpu.memory_space<vmem>>, vector<1x384x256xf32>
    %135 = vector.shape_cast %134 : vector<1x384x256xf32> to vector<384x256xf32>
    %cst_171 = arith.constant dense<0.000000e+00> : vector<4x256xf32>
    %136 = tpu.matmul %133, %135, %cst_171 {dimension_numbers = #tpu.dot_dimension_numbers<[1], [0], [0], [1], [0, 0, 1, 1], [], []>} : vector<4x384xf32>, vector<384x256xf32>, vector<4x256xf32> -> vector<4x256xf32>
    %c2_172 = arith.constant 2 : index
    %c0_173 = arith.constant 0 : index
    %c0_174 = arith.constant 0 : index
    %137 = vector.load %arg13[%c2_172, %c0_173, %c0_174] : memref<3x384x256xf32, #tpu.memory_space<vmem>>, vector<1x384x256xf32>
    %138 = vector.shape_cast %137 : vector<1x384x256xf32> to vector<384x256xf32>
    %cst_175 = arith.constant dense<0.000000e+00> : vector<4x256xf32>
    %139 = tpu.matmul %133, %138, %cst_175 {dimension_numbers = #tpu.dot_dimension_numbers<[1], [0], [0], [1], [0, 0, 1, 1], [], []>} : vector<4x384xf32>, vector<384x256xf32>, vector<4x256xf32> -> vector<4x256xf32>
    %140 = arith.addf %131, %136 : vector<4x256xf32>
    %141 = arith.addf %132, %139 : vector<4x256xf32>
    %142 = arith.maximumf %140, %141 : vector<4x256xf32>
    %c0_176 = arith.constant 0 : index
    %c0_177 = arith.constant 0 : index
    %143 = vector.load %arg15[%c0_176, %c0_177] : memref<2x4xf32, #tpu.memory_space<vmem>>, vector<2x4xf32>
    %cst_178 = arith.constant dense<0.000000e+00> : vector<2x256xf32>
    %144 = tpu.matmul %143, %142, %cst_178 {dimension_numbers = #tpu.dot_dimension_numbers<[1], [0], [0], [1], [0, 0, 1, 1], [], []>} : vector<2x4xf32>, vector<4x256xf32>, vector<2x256xf32> -> vector<2x256xf32>
    %c0_179 = arith.constant 0 : index
    %c0_180 = arith.constant 0 : index
    %145 = vector.load %arg16[%c0_179, %c0_180] : memref<2x4xf32, #tpu.memory_space<vmem>>, vector<2x4xf32>
    %cst_181 = arith.constant dense<0.000000e+00> : vector<2x256xf32>
    %146 = tpu.matmul %145, %142, %cst_181 {dimension_numbers = #tpu.dot_dimension_numbers<[1], [0], [0], [1], [0, 0, 1, 1], [], []>} : vector<2x4xf32>, vector<4x256xf32>, vector<2x256xf32> -> vector<2x256xf32>
    %147 = arith.maximumf %144, %146 : vector<2x256xf32>
    %c0_182 = arith.constant 0 : index
    %c0_183 = arith.constant 0 : index
    %148 = vector.load %arg14[%c0_182, %c0_183] : memref<1x256xf32, #tpu.memory_space<vmem>>, vector<1x256xf32>
    %149 = vector.broadcast %148 : vector<1x256xf32> to vector<2x256xf32>
    %150 = arith.addf %147, %149 : vector<2x256xf32>
    %cst_184 = arith.constant 0.000000e+00 : f32
    %151 = vector.broadcast %cst_184 : f32 to vector<2x256xf32>
    %152 = arith.maximumf %150, %151 : vector<2x256xf32>
    %c0_185 = arith.constant 0 : index
    %c0_186 = arith.constant 0 : index
    %153 = vector.load %arg28[%c0_185, %c0_186] : memref<2x256xf32, #tpu.memory_space<vmem>>, vector<2x256xf32>
    tpu.vector_store %arg28[%c0_185, %c0_186], %152 {strides = array<i32>} : memref<2x256xf32, #tpu.memory_space<vmem>>, vector<2x256xf32>,
    %c0_187 = arith.constant 0 : index
    %c0_188 = arith.constant 0 : index
    %154 = vector.load %arg28[%c0_187, %c0_188] : memref<2x256xf32, #tpu.memory_space<vmem>>, vector<1x256xf32>
    %c0_189 = arith.constant 0 : index
    %c0_190 = arith.constant 0 : index
    %c0_191 = arith.constant 0 : index
    %155 = vector.load %arg17[%c0_189, %c0_190, %c0_191] : memref<2x256x32xf32, #tpu.memory_space<vmem>>, vector<1x256x32xf32>
    %156 = vector.shape_cast %155 : vector<1x256x32xf32> to vector<256x32xf32>
    %cst_192 = arith.constant dense<0.000000e+00> : vector<1x32xf32>
    %157 = tpu.matmul %154, %156, %cst_192 {dimension_numbers = #tpu.dot_dimension_numbers<[1], [0], [0], [1], [0, 0, 1, 1], [], []>} : vector<1x256xf32>, vector<256x32xf32>, vector<1x32xf32> -> vector<1x32xf32>
    %c1_193 = arith.constant 1 : index
    %c0_194 = arith.constant 0 : index
    %158 = vector.load %arg28[%c1_193, %c0_194] : memref<2x256xf32, #tpu.memory_space<vmem>>, vector<1x256xf32>
    %c1_195 = arith.constant 1 : index
    %c0_196 = arith.constant 0 : index
    %c0_197 = arith.constant 0 : index
    %159 = vector.load %arg17[%c1_195, %c0_196, %c0_197] : memref<2x256x32xf32, #tpu.memory_space<vmem>>, vector<1x256x32xf32>
    %160 = vector.shape_cast %159 : vector<1x256x32xf32> to vector<256x32xf32>
    %cst_198 = arith.constant dense<0.000000e+00> : vector<1x32xf32>
    %161 = tpu.matmul %158, %160, %cst_198 {dimension_numbers = #tpu.dot_dimension_numbers<[1], [0], [0], [1], [0, 0, 1, 1], [], []>} : vector<1x256xf32>, vector<256x32xf32>, vector<1x32xf32> -> vector<1x32xf32>
    %162 = arith.addf %157, %161 : vector<1x32xf32>
    %c0_199 = arith.constant 0 : index
    %c0_200 = arith.constant 0 : index
    %163 = vector.load %arg18[%c0_199, %c0_200] : memref<1x32xf32, #tpu.memory_space<vmem>>, vector<1x32xf32>
    %164 = arith.addf %162, %163 : vector<1x32xf32>
    %cst_201 = arith.constant 0.000000e+00 : f32
    %165 = vector.broadcast %cst_201 : f32 to vector<1x32xf32>
    %166 = arith.maximumf %164, %165 : vector<1x32xf32>
    %c0_202 = arith.constant 0 : index
    %c0_203 = arith.constant 0 : index
    %167 = vector.load %arg19[%c0_202, %c0_203] : memref<32x64xf32, #tpu.memory_space<vmem>>, vector<32x64xf32>
    %cst_204 = arith.constant dense<0.000000e+00> : vector<1x64xf32>
    %168 = tpu.matmul %166, %167, %cst_204 {dimension_numbers = #tpu.dot_dimension_numbers<[1], [0], [0], [1], [0, 0, 1, 1], [], []>} : vector<1x32xf32>, vector<32x64xf32>, vector<1x64xf32> -> vector<1x64xf32>
    %c0_205 = arith.constant 0 : index
    %c0_206 = arith.constant 0 : index
    %169 = vector.load %arg20[%c0_205, %c0_206] : memref<1x64xf32, #tpu.memory_space<vmem>>, vector<1x64xf32>
    %170 = arith.addf %168, %169 : vector<1x64xf32>
    %cst_207 = arith.constant 0.000000e+00 : f32
    %171 = vector.broadcast %cst_207 : f32 to vector<1x64xf32>
    %172 = arith.maximumf %170, %171 : vector<1x64xf32>
    %c0_208 = arith.constant 0 : index
    %c0_209 = arith.constant 0 : index
    %173 = vector.load %arg21[%c0_208, %c0_209] : memref<64x8xf32, #tpu.memory_space<vmem>>, vector<64x8xf32>
    %cst_210 = arith.constant dense<0.000000e+00> : vector<1x8xf32>
    %174 = tpu.matmul %172, %173, %cst_210 {dimension_numbers = #tpu.dot_dimension_numbers<[1], [0], [0], [1], [0, 0, 1, 1], [], []>} : vector<1x64xf32>, vector<64x8xf32>, vector<1x8xf32> -> vector<1x8xf32>
    %c0_211 = arith.constant 0 : index
    %c0_212 = arith.constant 0 : index
    %175 = vector.load %arg22[%c0_211, %c0_212] : memref<1x8xf32, #tpu.memory_space<vmem>>, vector<1x8xf32>
    %176 = arith.addf %174, %175 : vector<1x8xf32>
    %177 = vector.shape_cast %176 : vector<1x8xf32> to vector<1x1x8xf32>
    %c0_213 = arith.constant 0 : index
    %c0_214 = arith.constant 0 : index
    %c0_215 = arith.constant 0 : index
    %178 = vector.load %arg23[%c0_213, %c0_214, %c0_215] : memref<1x1x8xf32, #tpu.memory_space<vmem>>, vector<1x1x8xf32>
    tpu.vector_store %arg23[%c0_213, %c0_214, %c0_215], %177 {strides = array<i32>} : memref<1x1x8xf32, #tpu.memory_space<vmem>>, vector<1x1x8xf32>,
    return
  }
  func.func @transform_0(%arg0: i32) -> (i32, i32, i32, i32) {
    %c0_i32 = arith.constant 0 : i32
    %c0_i32_0 = arith.constant 0 : i32
    %c0_i32_1 = arith.constant 0 : i32
    %c0_i32_2 = arith.constant 0 : i32
    return %arg0, %c0_i32, %c0_i32_0, %c0_i32_1 : i32, i32, i32, i32
  }
  func.func @transform_1(%arg0: i32) -> (i32, i32, i32) {
    %c0_i32 = arith.constant 0 : i32
    %c0_i32_0 = arith.constant 0 : i32
    %c0_i32_1 = arith.constant 0 : i32
    %c0_i32_2 = arith.constant 0 : i32
    return %c0_i32, %c0_i32_0, %c0_i32_1 : i32, i32, i32
  }
  func.func @transform_2(%arg0: i32) -> (i32, i32, i32) {
    %c0_i32 = arith.constant 0 : i32
    %c0_i32_0 = arith.constant 0 : i32
    %c0_i32_1 = arith.constant 0 : i32
    %c0_i32_2 = arith.constant 0 : i32
    return %c0_i32, %c0_i32_0, %c0_i32_1 : i32, i32, i32
  }
  func.func @transform_3(%arg0: i32) -> (i32, i32) {
    %c0_i32 = arith.constant 0 : i32
    %c0_i32_0 = arith.constant 0 : i32
    %c0_i32_1 = arith.constant 0 : i32
    return %c0_i32, %c0_i32_0 : i32, i32
  }
  func.func @transform_4(%arg0: i32) -> (i32, i32) {
    %c0_i32 = arith.constant 0 : i32
    %c0_i32_0 = arith.constant 0 : i32
    %c0_i32_1 = arith.constant 0 : i32
    return %c0_i32, %c0_i32_0 : i32, i32
  }
  func.func @transform_5(%arg0: i32) -> (i32, i32) {
    %c0_i32 = arith.constant 0 : i32
    %c0_i32_0 = arith.constant 0 : i32
    %c0_i32_1 = arith.constant 0 : i32
    return %c0_i32, %c0_i32_0 : i32, i32
  }
  func.func @transform_6(%arg0: i32) -> (i32, i32, i32) {
    %c0_i32 = arith.constant 0 : i32
    %c0_i32_0 = arith.constant 0 : i32
    %c0_i32_1 = arith.constant 0 : i32
    %c0_i32_2 = arith.constant 0 : i32
    return %c0_i32, %c0_i32_0, %c0_i32_1 : i32, i32, i32
  }
  func.func @transform_7(%arg0: i32) -> (i32, i32, i32) {
    %c0_i32 = arith.constant 0 : i32
    %c0_i32_0 = arith.constant 0 : i32
    %c0_i32_1 = arith.constant 0 : i32
    %c0_i32_2 = arith.constant 0 : i32
    return %c0_i32, %c0_i32_0, %c0_i32_1 : i32, i32, i32
  }
  func.func @transform_8(%arg0: i32) -> (i32, i32) {
    %c0_i32 = arith.constant 0 : i32
    %c0_i32_0 = arith.constant 0 : i32
    %c0_i32_1 = arith.constant 0 : i32
    return %c0_i32, %c0_i32_0 : i32, i32
  }
  func.func @transform_9(%arg0: i32) -> (i32, i32) {
    %c0_i32 = arith.constant 0 : i32
    %c0_i32_0 = arith.constant 0 : i32
    %c0_i32_1 = arith.constant 0 : i32
    return %c0_i32, %c0_i32_0 : i32, i32
  }
  func.func @transform_10(%arg0: i32) -> (i32, i32) {
    %c0_i32 = arith.constant 0 : i32
    %c0_i32_0 = arith.constant 0 : i32
    %c0_i32_1 = arith.constant 0 : i32
    return %c0_i32, %c0_i32_0 : i32, i32
  }
  func.func @transform_11(%arg0: i32) -> (i32, i32, i32) {
    %c0_i32 = arith.constant 0 : i32
    %c0_i32_0 = arith.constant 0 : i32
    %c0_i32_1 = arith.constant 0 : i32
    %c0_i32_2 = arith.constant 0 : i32
    return %c0_i32, %c0_i32_0, %c0_i32_1 : i32, i32, i32
  }
  func.func @transform_12(%arg0: i32) -> (i32, i32, i32) {
    %c0_i32 = arith.constant 0 : i32
    %c0_i32_0 = arith.constant 0 : i32
    %c0_i32_1 = arith.constant 0 : i32
    %c0_i32_2 = arith.constant 0 : i32
    return %c0_i32, %c0_i32_0, %c0_i32_1 : i32, i32, i32
  }
  func.func @transform_13(%arg0: i32) -> (i32, i32) {
    %c0_i32 = arith.constant 0 : i32
    %c0_i32_0 = arith.constant 0 : i32
    %c0_i32_1 = arith.constant 0 : i32
    return %c0_i32, %c0_i32_0 : i32, i32
  }
  func.func @transform_14(%arg0: i32) -> (i32, i32) {
    %c0_i32 = arith.constant 0 : i32
    %c0_i32_0 = arith.constant 0 : i32
    %c0_i32_1 = arith.constant 0 : i32
    return %c0_i32, %c0_i32_0 : i32, i32
  }
  func.func @transform_15(%arg0: i32) -> (i32, i32) {
    %c0_i32 = arith.constant 0 : i32
    %c0_i32_0 = arith.constant 0 : i32
    %c0_i32_1 = arith.constant 0 : i32
    return %c0_i32, %c0_i32_0 : i32, i32
  }
  func.func @transform_16(%arg0: i32) -> (i32, i32, i32) {
    %c0_i32 = arith.constant 0 : i32
    %c0_i32_0 = arith.constant 0 : i32
    %c0_i32_1 = arith.constant 0 : i32
    %c0_i32_2 = arith.constant 0 : i32
    return %c0_i32, %c0_i32_0, %c0_i32_1 : i32, i32, i32
  }
  func.func @transform_17(%arg0: i32) -> (i32, i32) {
    %c0_i32 = arith.constant 0 : i32
    %c0_i32_0 = arith.constant 0 : i32
    %c0_i32_1 = arith.constant 0 : i32
    return %c0_i32, %c0_i32_0 : i32, i32
  }
  func.func @transform_18(%arg0: i32) -> (i32, i32) {
    %c0_i32 = arith.constant 0 : i32
    %c0_i32_0 = arith.constant 0 : i32
    %c0_i32_1 = arith.constant 0 : i32
    return %c0_i32, %c0_i32_0 : i32, i32
  }
  func.func @transform_19(%arg0: i32) -> (i32, i32) {
    %c0_i32 = arith.constant 0 : i32
    %c0_i32_0 = arith.constant 0 : i32
    %c0_i32_1 = arith.constant 0 : i32
    return %c0_i32, %c0_i32_0 : i32, i32
  }
  func.func @transform_20(%arg0: i32) -> (i32, i32) {
    %c0_i32 = arith.constant 0 : i32
    %c0_i32_0 = arith.constant 0 : i32
    %c0_i32_1 = arith.constant 0 : i32
    return %c0_i32, %c0_i32_0 : i32, i32
  }
  func.func @transform_21(%arg0: i32) -> (i32, i32) {
    %c0_i32 = arith.constant 0 : i32
    %c0_i32_0 = arith.constant 0 : i32
    %c0_i32_1 = arith.constant 0 : i32
    return %c0_i32, %c0_i32_0 : i32, i32
  }
  func.func @transform_22(%arg0: i32) -> (i32, i32, i32) {
    %c0_i32 = arith.constant 0 : i32
    %c0_i32_0 = arith.constant 0 : i32
    %c0_i32_1 = arith.constant 0 : i32
    return %arg0, %c0_i32, %c0_i32_0 : i32, i32, i32
  }
}

</mosaic_0001>

<bundles_post_ra>
// kernel: source2_forward.1
= control target key start
LH: loop header
LB: loop body
LE: loop exit
PB: predicated region body
PF: predicated region fallthrough
CT: control target
= control target key end

     0   :  { %s20139_s0 = inlined_call_operand.vmem [shape: f32[2,2,32,192], index: 0, kind: input, shape index: {}]   ;;  %s20140_s1 = inlined_call_operand.vmem [shape: f32[5,192,480], index: 1, kind: input, shape index: {}]   ;;  %s20141_s2 = inlined_call_operand.vmem [shape: f32[5,192,480], index: 2, kind: input, shape index: {}]   ;;  %s20142_s3 = inlined_call_operand.vmem [shape: f32[1,480], index: 3, kind: input, shape index: {}]   ;;  %s20143_s4 = inlined_call_operand.vmem [shape: f32[15,30], index: 4, kind: input, shape index: {}]   ;;  %s20144_s5 = inlined_call_operand.vmem [shape: f32[15,30], index: 5, kind: input, shape index: {}]   ;;  %s20145_s6 = inlined_call_operand.vmem [shape: f32[3,480,384], index: 6, kind: input, shape index: {}]   ;;  %s20146_s7 = inlined_call_operand.vmem [shape: f32[3,480,384], index: 7, kind: input, shape index: {}]   ;;  %s20147_s8 = inlined_call_operand.vmem [shape: f32[1,384], index: 8, kind: input, shape index: {}]   ;;  %s20148_s9 = inlined_call_operand.vmem [shape: f32[6,13], index: 9, kind: input, shape index: {}]   ;;  %s20149_s10 = inlined_call_operand.vmem [shape: f32[6,13], index: 10, kind: input, shape index: {}]   ;;  %s20150_s11 = inlined_call_operand.hbm [shape: f32[3,384,256], index: 11, kind: input, shape index: {}]   ;;  %s20151_s12 = inlined_call_operand.hbm [shape: f32[3,384,256], index: 12, kind: input, shape index: {}]   ;;  %s20152_s13 = inlined_call_operand.vmem [shape: f32[1,256], index: 13, kind: input, shape index: {}]   ;;  %s20153_s14 = inlined_call_operand.vmem [shape: f32[2,4], index: 14, kind: input, shape index: {}]   ;;  %s20154_s15 = inlined_call_operand.vmem [shape: f32[2,4], index: 15, kind: input, shape index: {}]   ;;  %s20155_s16 = inlined_call_operand.vmem [shape: f32[2,256,32], index: 16, kind: input, shape index: {}]   ;;  %s20156_s17 = inlined_call_operand.vmem [shape: f32[1,32], index: 17, kind: input, shape index: {}]   ;;  %s20157_s18 = inlined_call_operand.vmem [shape: f32[32,64], index: 18, kind: input, shape index: {}]   ;;  %s20158_s19 = inlined_call_operand.vmem [shape: f32[1,64], index: 19, kind: input, shape index: {}]   ;;  %s20159_s20 = inlined_call_operand.vmem [shape: f32[64,8], index: 20, kind: input, shape index: {}]   ;;  %s20160_s21 = inlined_call_operand.vmem [shape: f32[1,8], index: 21, kind: input, shape index: {}]   ;;  %s20161_s22 = inlined_call_operand.hbm [shape: f32[2,1,8], index: 22, kind: output, shape index: {}]  }
   0x1   :  { %20175 = sst [smem:[#allocation22_spill]] %s20139_s0 }
   0x2   :  { %20176 = sst [smem:[#allocation23_spill]] %s20140_s1 }
   0x3   :  { %20177 = sst [smem:[#allocation24_spill]] %s20141_s2 }
   0x4   :  { %20178 = sst [smem:[#allocation25_spill]] %s20142_s3 }
   0x5   :  { %20179 = sst [smem:[#allocation26_spill]] %s20143_s4 }
   0x6   :  { %20180 = sst [smem:[#allocation27_spill]] %s20144_s5 }
   0x7   :  { %20181 = sst [smem:[#allocation28_spill]] %s20145_s6 }
   0x8   :  { %20182 = sst [smem:[#allocation29_spill]] %s20146_s7 }
   0x9   :  { %20183 = sst [smem:[#allocation30_spill]] %s20147_s8 }
   0xa   :  { %20184 = sst [smem:[#allocation31_spill]] %s20150_s11 }
   0xb   :  { %20185 = sst [smem:[#allocation32_spill]] %s20151_s12 }
   0xc   :  { %27 = vsyncpa [#allocation8], 0 }
   0xd   :  { %28 = vsyncpa [#allocation11], 0 }
   0xe   :  { %29 = vsyncpa [#allocation9], 0 }
   0xf   :  { %31 = vsyncpa [#allocation9 + $0x1], 0  ;;  %s12340_s3 = smov 0   ;;  %s12342_s28 = smov 0  }
  0x10   :  { %s12344_s29 = smov 0   ;;  %s12346_s30 = smov 0  }
  0x11 LB: > { %20186 = sst [smem:[#allocation16_spill]] %s12204_s3  ;;  %s12361_s4 = sadd.s32 4294967295, %s12216_s30   ;;  %s12216_s30 = sphi %s12346_s30, %s20217_s30   ;;  %s12212_s29 = sphi %s12344_s29, %s20219_s29   ;;  %s12208_s28 = sphi %s12342_s28, %s20221_s28   ;;  %s12204_s3 = sphi %s12340_s3, %s20220_s3  }
  0x12   : > { %20187 = sst [smem:[#allocation17_spill]] %s12212_s29  ;;  %s9973_s0 = sadd.s32 4294967294, %s12216_s30  }
  0x13   : > { %20188 = sst [smem:[#allocation18_spill]] %s12216_s30  ;;  %s12365_s23 = sadd.s32 1, %s12216_s30  }
  0x14   : > { %20189 = sst [smem:[#allocation19_spill]] %s12365_s23  ;;  %s511_s1 = sadd.s32 1, %s12212_s29 }
  0x15   : > { %s508_s5 = ssub.s32 %s12216_s30, %s12365_s23  ;;  %p521_p0 = scmp.ne.s32.totalorder %s12212_s29, %s12208_s28 }
  0x16   : > { %p509_p1 = scmp.eq.s32.totalorder %s508_s5, 0  ;;  %p522_p2 = scmp.eq.s32.totalorder %s12361_s4, 1 }
  0x17   : > { %p527_p3 = scmp.ne.s32.totalorder %s12208_s28, %s12204_s3  ;;  %p528_p4 = scmp.eq.s32.totalorder %s9973_s0, 1 }
  0x18   : > { %s12376_s24 = scalar_select %p509_p1, %s12212_s29, %s511_s1  }
  0x19   : > { %p12378_p5 = por %p522_p2, %p521_p0  ;;  %p12382_p6 = por %p528_p4, %p527_p3 }
  0x1a   : > { %20190 = sst [smem:[#allocation20_spill]] %s12376_s24  ;;  %p9974_p7 = scmp.ge.s32.totalorder %s12216_s30, 1 }
  0x1b   : > { %s20192_s25 = scalar_select %p12382_p6, 1, 0 }
  0x1c   : > { %p535_p8 = scmp.lt.s32.totalorder %s12216_s30, 3  ;;  %p20171_p9 = scmp.eq.s32.totalorder %s12361_s4, 0 }
  0x1d   : > { %20193 = sst [smem:[#allocation21_spill]] %s20192_s25  ;;  %s12218_s2 = smov [#allocation7]  }
  0x1e   : > { %p12389_p10 = pnand %p9974_p7, %p535_p8  ;;  %s577_s27 = sshll.u32 %s12218_s2, 4  ;;  %s578_s27 = int_to_ptr.vmem [resolvable:$true] %s577_s27 }
  0x1f   : > { %s12219_s1 = smov [#allocation10]   ;;  %s12107_s24 = scalar_lea.vmem %s578_s27, 36864 }
  0x20   : > { %p12034_p11 = pneg %p12389_p10  ;;  %s590_s5 = sshll.u32 %s12219_s1, 4  ;;  %s591_s5 = int_to_ptr.vmem [resolvable:$true] %s590_s5 }
  0x21   : > { %p12108_p0 = scmp.ne.s32.totalorder %s578_s27, %s12107_s24  ;;  %p12115_p3 = scmp.lt.s32.totalorder %s578_s27, %s578_s27 }
  0x22   : > { %p12397_p12 = pnand %p20171_p9, %p12034_p11  ;;  %p12116_p4 = scmp.lt.s32.totalorder %s12107_s24, %s12107_s24 }
  0x24   : > { %p12098_p13 = pneg %p12397_p12  ;;  %p12117_p7 = por %p12116_p4, %p12115_p3 }
  0x26   : > { %p12110_p1 = pnand %p12108_p0, %p12098_p13 }
  0x28   : > { %p12111_p2 = pneg %p12110_p1 }
  0x2a   : > { %p12118_p8 = pnand %p12117_p7, %p12111_p2 }
  0x2c   : > { %12121 = shalt.err (!%p12118_p8)
}
  0x2d   : > { %s12220_s2 = smov 256   ;;  %s12221_s29 = smov 16  }
  0x2e   : > { %s20196_s11 = sld [smem:[#allocation31_spill]]  ;;  %s12133_s25 = scalar_lea.vmem %s591_s5, 36864 }
  0x2f   : > { %p12134_p11 = scmp.ne.s32.totalorder %s591_s5, %s12133_s25  ;;  %p12141_p9 = scmp.lt.s32.totalorder %s591_s5, %s591_s5 }
  0x30   : > { %p12142_p6 = scmp.lt.s32.totalorder %s12133_s25, %s12133_s25 }
  0x31   : > { %p12136_p0 = pnand %p12134_p11, %p12098_p13 }
  0x32   : > { %p12143_p3 = por %p12142_p6, %p12141_p9 }
  0x33   : > { %p12137_p1 = pneg %p12136_p0 }
  0x34   : > { %12037 = dma.hbm_to_vmem [thread:$0]  (!%p12397_p12), %s20196_s11, 36864, %s578_s27, [#allocation8], %s12220_s2, %s12220_s2, %s12221_s29  }
  0x35   : > { %p12144_p2 = pnand %p12143_p3, %p12137_p1 }
  0x37   : > { %12147 = shalt.err (!%p12144_p2)
}
  0x38   : > { %s20197_s12 = sld [smem:[#allocation32_spill]]  ;;  %p20198_p4 = scmp.eq.s32.totalorder (!%p12389_p10), %s12361_s4, 0 }
  0x3a   : > { %641 = sbr.rel (%p12389_p10) target bundleno = 3427 (0xd63), region = 108 }
  0x3e   : > { %12040 = dma.hbm_to_vmem [thread:$0]  (!%p12397_p12), %s20197_s12, 36864, %s591_s5, [#allocation11], %s12220_s2, %s12220_s2, %s12221_s29  }
  0x3f   : > { %12191 = dma.done.wait (%p20198_p4), [#allocation8], 36864   ;;  %p20199_p13 = pmov %p20198_p4 }
  0x40   : > { %p20200_p7 = pmov %p20198_p4 }
  0x41   : > { %12193 = vsyncadd (%p20199_p13), [#allocation8], 4294930432 }
  0x42   : > { %12195 = dma.done.wait (%p20200_p7), [#allocation11], 36864   ;;  %p20201_p6 = pmov %p20198_p4 }
  0x43   : > { %s20202_s27 = sld [smem:[#allocation23_spill]]  ;;  %p706_p9 = scmp.lt.s32.totalorder %s12361_s4, 1  ;;  %vm815_vm0 = vcmask 523264   ;;  %vm1283_vm1 = vcmask 785408   ;;  %vm2094_vm2 = vcmask 1046528   ;;  %vm1296_vm3 = vcmask 783360  }
  0x44   : > { %12197 = vsyncadd (%p20201_p6), [#allocation11], 4294930432  ;;  %s20203_s12 = sld [smem:[#allocation22_spill]]  ;;  %vm3471_vm4 = vcmask 1045504   ;;  %vm4097_vm5 = vcmask 244736   ;;  %vm4485_vm6 = vcmask 784384  }
  0x45   : > { %s12661_s3 = scalar_select %p706_p9, %s12361_s4, 1  ;;  %vm7508_vm7 = vcmask 1044480   ;;  %vm7504_vm8 = vcmask 105472   ;;  %vm12223_vm9 = vmmov 0   ;;  %vm9303_vm10 = vcmask 1043456  }
  0x46   : > { %s20204_s5 = sld [smem:[#allocation24_spill]]  ;;  %vm9299_vm11 = vcmask 31744   ;;  %vm9724_vm12 = vcmask 261120   ;;  %s704_s0 = sand.u32 1, %s12208_s28   ;;  %vm9881_vm13 = vcmask 57344  }
  0x47   : > { %s11661_s24 = sshll.u32 %s12661_s3, 7  ;;  %s20205_s29 = sld [smem:[#allocation26_spill]] }
  0x48   : > { %s20209_s11 = sld [smem:[#allocation28_spill]]  ;;  %s705_s1 = scalar_lea.vmem [#allocation12], %s704_s0 }
  0x49   : > { %v780_v0 = vld [vmem:[%s20202_s27 + $0x1e8] sm:$0xff]  ;;  %v782_v1 = vld [vmem:[%s20202_s27 + $0x1f8] sm:$0xff]  ;;  %v779_v2 = vld [vmem:[%s20202_s27 + $0x1e0] sm:$0xff]  ;;  %s20210_s3 = sld [smem:[#allocation25_spill]] }
  0x4a   : > { %828 = vmatprep.subr.mxu0 %v780_v0  ;;  %917 = vmatprep.subr.mxu1 %v782_v1  ;;  %v781_v3 = vld [vmem:[%s20202_s27 + $0x1f0] sm:$0xff]  ;;  %v776_v4 = vld [vmem:[%s20202_s27 + $0x1c8] sm:$0xff]  ;;  %v778_v5 = vld [vmem:[%s20202_s27 + $0x1d8] sm:$0xff]  ;;  %s12709_s30 = scalar_lea.vmem %s20203_s12, %s11661_s24  ;;  %s20211_s7 = sld [smem:[#allocation29_spill]] }
  0x4b   : > { %829 = vmatpush1.msra.mxu0 %v779_v2  ;;  %918 = vmatpush1.msra.mxu1 %v781_v3  ;;  %v775_v6 = vld [vmem:[%s20202_s27 + $0x1c0] sm:$0xff]  ;;  %v777_v7 = vld [vmem:[%s20202_s27 + $0x1d0] sm:$0xff]  ;;  %v772_v8 = vld [vmem:[%s20202_s27 + $0x1a8] sm:$0xff]  ;;  %s20212_s8 = sld [smem:[#allocation30_spill]] }
  0x4c   : > { %830 = vmatprep.subr.mxu0 %v776_v4  ;;  %919 = vmatprep.subr.mxu1 %v778_v5  ;;  %v774_v9 = vld [vmem:[%s20202_s27 + $0x1b8] sm:$0xff]  ;;  %v771_v10 = vld [vmem:[%s20202_s27 + $0x1a0] sm:$0xff]  ;;  %v773_v11 = vld [vmem:[%s20202_s27 + $0x1b0] sm:$0xff] }
  0x4d   : > { %831 = vmatpush1.msra.mxu0 %v775_v6  ;;  %920 = vmatpush1.msra.mxu1 %v777_v7  ;;  %v768_v12 = vld [vmem:[%s20202_s27 + $0x188] sm:$0xff]  ;;  %v770_v13 = vld [vmem:[%s20202_s27 + $0x198] sm:$0xff]  ;;  %v767_v14 = vld [vmem:[%s20202_s27 + $0x180] sm:$0xff]  ;;  %s20206_s26 = smov %s20205_s29 }
  0x4e   : > { %832 = vmatprep.subr.mxu0 %v772_v8  ;;  %921 = vmatprep.subr.mxu1 %v774_v9  ;;  %v769_v15 = vld [vmem:[%s20202_s27 + $0x190] sm:$0xff]  ;;  %v764_v16 = vld [vmem:[%s20202_s27 + $0x168] sm:$0xff]  ;;  %v766_v17 = vld [vmem:[%s20202_s27 + $0x178] sm:$0xff] }
  0x4f   : > { %833 = vmatpush1.msra.mxu0 %v771_v10  ;;  %922 = vmatpush1.msra.mxu1 %v773_v11  ;;  %v763_v18 = vld [vmem:[%s20202_s27 + $0x160] sm:$0xff]  ;;  %v765_v19 = vld [vmem:[%s20202_s27 + $0x170] sm:$0xff]  ;;  %v760_v20 = vld [vmem:[%s20202_s27 + $0x148] sm:$0xff] }
  0x50   : > { %834 = vmatprep.subr.mxu0 %v768_v12  ;;  %923 = vmatprep.subr.mxu1 %v770_v13  ;;  %v762_v21 = vld [vmem:[%s20202_s27 + $0x158] sm:$0xff]  ;;  %v759_v22 = vld [vmem:[%s20202_s27 + $0x140] sm:$0xff]  ;;  %v761_v23 = vld [vmem:[%s20202_s27 + $0x150] sm:$0xff] }
  0x51   : > { %835 = vmatpush1.msra.mxu0 %v767_v14  ;;  %924 = vmatpush1.msra.mxu1 %v769_v15  ;;  %v756_v24 = vld [vmem:[%s20202_s27 + $0x128] sm:$0xff]  ;;  %v758_v25 = vld [vmem:[%s20202_s27 + $0x138] sm:$0xff]  ;;  %v755_v26 = vld [vmem:[%s20202_s27 + $0x120] sm:$0xff] }
  0x52   : > { %836 = vmatprep.subr.mxu0 %v764_v16  ;;  %925 = vmatprep.subr.mxu1 %v766_v17  ;;  %v757_v27 = vld [vmem:[%s20202_s27 + $0x130] sm:$0xff]  ;;  %v752_v28 = vld [vmem:[%s20202_s27 + $0x108] sm:$0xff]  ;;  %v754_v29 = vld [vmem:[%s20202_s27 + $0x118] sm:$0xff] }
  0x53   : > { %837 = vmatpush1.msra.mxu0 %v763_v18  ;;  %926 = vmatpush1.msra.mxu1 %v765_v19  ;;  %v751_v30 = vld [vmem:[%s20202_s27 + $0x100] sm:$0xff]  ;;  %v753_v31 = vld [vmem:[%s20202_s27 + $0x110] sm:$0xff]  ;;  %v748_v32 = vld [vmem:[%s20202_s27 + $0xe8] sm:$0xff] }
  0x54   : > { %838 = vmatprep.subr.mxu0 %v760_v20  ;;  %927 = vmatprep.subr.mxu1 %v762_v21  ;;  %v750_v33 = vld [vmem:[%s20202_s27 + $0xf8] sm:$0xff]  ;;  %v747_v34 = vld [vmem:[%s20202_s27 + $0xe0] sm:$0xff]  ;;  %v749_v35 = vld [vmem:[%s20202_s27 + $0xf0] sm:$0xff] }
  0x55   : > { %839 = vmatpush1.msra.mxu0 %v759_v22  ;;  %928 = vmatpush1.msra.mxu1 %v761_v23  ;;  %v744_v36 = vld [vmem:[%s20202_s27 + $0xc8] sm:$0xff]  ;;  %v746_v37 = vld [vmem:[%s20202_s27 + $0xd8] sm:$0xff]  ;;  %v743_v38 = vld [vmem:[%s20202_s27 + $0xc0] sm:$0xff] }
  0x56   : > { %840 = vmatprep.subr.mxu0 %v756_v24  ;;  %929 = vmatprep.subr.mxu1 %v758_v25  ;;  %v745_v39 = vld [vmem:[%s20202_s27 + $0xd0] sm:$0xff]  ;;  %v740_v40 = vld [vmem:[%s20202_s27 + $0xa8] sm:$0xff]  ;;  %v742_v41 = vld [vmem:[%s20202_s27 + $0xb8] sm:$0xff] }
  0x57   : > { %841 = vmatpush1.msra.mxu0 %v755_v26  ;;  %930 = vmatpush1.msra.mxu1 %v757_v27  ;;  %v739_v42 = vld [vmem:[%s20202_s27 + $0xa0] sm:$0xff]  ;;  %v741_v43 = vld [vmem:[%s20202_s27 + $0xb0] sm:$0xff]  ;;  %v736_v44 = vld [vmem:[%s20202_s27 + $0x88] sm:$0xff] }
  0x58   : > { %842 = vmatprep.subr.mxu0 %v752_v28  ;;  %931 = vmatprep.subr.mxu1 %v754_v29  ;;  %v738_v45 = vld [vmem:[%s20202_s27 + $0x98] sm:$0xff]  ;;  %v735_v46 = vld [vmem:[%s20202_s27 + $0x80] sm:$0xff]  ;;  %v737_v47 = vld [vmem:[%s20202_s27 + $0x90] sm:$0xff] }
  0x59   : > { %843 = vmatpush1.msra.mxu0 %v751_v30  ;;  %932 = vmatpush1.msra.mxu1 %v753_v31  ;;  %v732_v48 = vld [vmem:[%s20202_s27 + $0x68] sm:$0xff]  ;;  %v734_v49 = vld [vmem:[%s20202_s27 + $0x78] sm:$0xff]  ;;  %v731_v50 = vld [vmem:[%s20202_s27 + $0x60] sm:$0xff] }
  0x5a   : > { %844 = vmatprep.subr.mxu0 %v748_v32  ;;  %933 = vmatprep.subr.mxu1 %v750_v33  ;;  %v733_v51 = vld [vmem:[%s20202_s27 + $0x70] sm:$0xff]  ;;  %v728_v52 = vld [vmem:[%s20202_s27 + $0x48] sm:$0xff]  ;;  %v730_v53 = vld [vmem:[%s20202_s27 + $0x58] sm:$0xff] }
  0x5b   : > { %845 = vmatpush1.msra.mxu0 %v747_v34  ;;  %934 = vmatpush1.msra.mxu1 %v749_v35  ;;  %v727_v54 = vld [vmem:[%s20202_s27 + $0x40] sm:$0xff]  ;;  %v729_v55 = vld [vmem:[%s20202_s27 + $0x50] sm:$0xff]  ;;  %v724_v56 = vld [vmem:[%s20202_s27 + $0x28] sm:$0xff] }
  0x5c   : > { %846 = vmatprep.subr.mxu0 %v744_v36  ;;  %935 = vmatprep.subr.mxu1 %v746_v37  ;;  %v726_v57 = vld [vmem:[%s20202_s27 + $0x38] sm:$0xff]  ;;  %v723_v58 = vld [vmem:[%s20202_s27 + $0x20] sm:$0xff]  ;;  %v725_v59 = vld [vmem:[%s20202_s27 + $0x30] sm:$0xff] }
  0x5d   : > { %847 = vmatpush1.msra.mxu0 %v743_v38  ;;  %936 = vmatpush1.msra.mxu1 %v745_v39  ;;  %v720_v60 = vld [vmem:[%s20202_s27 + $0x8] sm:$0xff]  ;;  %v722_v61 = vld [vmem:[%s20202_s27 + $0x18] sm:$0xff]  ;;  %v719_v62 = vld [vmem:[%s20202_s27] sm:$0xff] }
  0x5e   : > { %848 = vmatprep.subr.mxu0 %v740_v40  ;;  %937 = vmatprep.subr.mxu1 %v742_v41  ;;  %v721_v63 = vld [vmem:[%s20202_s27 + $0x10] sm:$0xff]  ;;  %v812_v0 = vld [vmem:[%s20202_s27 + $0x2e8] sm:$0xff]  ;;  %v814_v1 = vld [vmem:[%s20202_s27 + $0x2f8] sm:$0xff] }
  0x5f   : > { %849 = vmatpush1.msra.mxu0 %v739_v42  ;;  %938 = vmatpush1.msra.mxu1 %v741_v43  ;;  %v811_v2 = vld [vmem:[%s20202_s27 + $0x2e0] sm:$0xff]  ;;  %v813_v3 = vld [vmem:[%s20202_s27 + $0x2f0] sm:$0xff]  ;;  %v808_v4 = vld [vmem:[%s20202_s27 + $0x2c8] sm:$0xff] }
  0x60   : > { %850 = vmatprep.subr.mxu0 %v736_v44  ;;  %939 = vmatprep.subr.mxu1 %v738_v45  ;;  %v810_v5 = vld [vmem:[%s20202_s27 + $0x2d8] sm:$0xff]  ;;  %v807_v6 = vld [vmem:[%s20202_s27 + $0x2c0] sm:$0xff]  ;;  %v809_v7 = vld [vmem:[%s20202_s27 + $0x2d0] sm:$0xff] }
  0x61   : > { %851 = vmatpush1.msra.mxu0 %v735_v46  ;;  %940 = vmatpush1.msra.mxu1 %v737_v47  ;;  %v804_v8 = vld [vmem:[%s20202_s27 + $0x2a8] sm:$0xff]  ;;  %v806_v9 = vld [vmem:[%s20202_s27 + $0x2b8] sm:$0xff]  ;;  %v803_v10 = vld [vmem:[%s20202_s27 + $0x2a0] sm:$0xff] }
  0x62   : > { %852 = vmatprep.subr.mxu0 %v732_v48  ;;  %941 = vmatprep.subr.mxu1 %v734_v49  ;;  %v805_v11 = vld [vmem:[%s20202_s27 + $0x2b0] sm:$0xff]  ;;  %v800_v12 = vld [vmem:[%s20202_s27 + $0x288] sm:$0xff]  ;;  %v802_v13 = vld [vmem:[%s20202_s27 + $0x298] sm:$0xff] }
  0x63   : > { %853 = vmatpush1.msra.mxu0 %v731_v50  ;;  %942 = vmatpush1.msra.mxu1 %v733_v51  ;;  %v799_v14 = vld [vmem:[%s20202_s27 + $0x280] sm:$0xff]  ;;  %v801_v15 = vld [vmem:[%s20202_s27 + $0x290] sm:$0xff]  ;;  %v796_v16 = vld [vmem:[%s20202_s27 + $0x268] sm:$0xff] }
  0x64   : > { %854 = vmatprep.subr.mxu0 %v728_v52  ;;  %943 = vmatprep.subr.mxu1 %v730_v53  ;;  %v798_v17 = vld [vmem:[%s20202_s27 + $0x278] sm:$0xff]  ;;  %v795_v18 = vld [vmem:[%s20202_s27 + $0x260] sm:$0xff]  ;;  %v797_v19 = vld [vmem:[%s20202_s27 + $0x270] sm:$0xff] }
  0x65   : > { %855 = vmatpush1.msra.mxu0 %v727_v54  ;;  %944 = vmatpush1.msra.mxu1 %v729_v55  ;;  %v792_v20 = vld [vmem:[%s20202_s27 + $0x248] sm:$0xff]  ;;  %v794_v21 = vld [vmem:[%s20202_s27 + $0x258] sm:$0xff]  ;;  %v791_v22 = vld [vmem:[%s20202_s27 + $0x240] sm:$0xff] }
  0x66   : > { %856 = vmatprep.subr.mxu0 %v724_v56  ;;  %945 = vmatprep.subr.mxu1 %v726_v57  ;;  %v793_v23 = vld [vmem:[%s20202_s27 + $0x250] sm:$0xff]  ;;  %v788_v24 = vld [vmem:[%s20202_s27 + $0x228] sm:$0xff]  ;;  %v790_v25 = vld [vmem:[%s20202_s27 + $0x238] sm:$0xff] }
  0x67   : > { %857 = vmatpush1.msra.mxu0 %v723_v58  ;;  %946 = vmatpush1.msra.mxu1 %v725_v59  ;;  %v787_v26 = vld [vmem:[%s20202_s27 + $0x220] sm:$0xff]  ;;  %v789_v27 = vld [vmem:[%s20202_s27 + $0x230] sm:$0xff]  ;;  %v784_v28 = vld [vmem:[%s20202_s27 + $0x208] sm:$0xff] }
  0x68   : > { %858 = vmatprep.subr.mxu0 %v720_v60  ;;  %947 = vmatprep.subr.mxu1 %v722_v61  ;;  %v786_v29 = vld [vmem:[%s20202_s27 + $0x218] sm:$0xff]  ;;  %v783_v30 = vld [vmem:[%s20202_s27 + $0x200] sm:$0xff]  ;;  %v12727_v31 = vld [vmem:[%s12709_s30 + $0x8] sm:$0xff] }
  0x69   : > { %859 = vmatpush1.msra.mxu0 %v719_v62  ;;  %948 = vmatpush1.msra.mxu1 %v721_v63  ;;  %v785_v32 = vld [vmem:[%s20202_s27 + $0x210] sm:$0xff]  ;;  %v12733_v33 = vld [vmem:[%s12709_s30] sm:$0xff]  ;;  %v1067_v34 = vld [vmem:[%s20204_s5 + $0x1e8] sm:$0xff] }
  0x6a   : > { %876 = vmatprep.subr.mxu0 %v812_v0  ;;  %965 = vmatprep.subr.mxu1 %v814_v1  ;;  %v1069_v35 = vld [vmem:[%s20204_s5 + $0x1f8] sm:$0xff]  ;;  %v1066_v36 = vld [vmem:[%s20204_s5 + $0x1e0] sm:$0xff]  ;;  %v1068_v37 = vld [vmem:[%s20204_s5 + $0x1f0] sm:$0xff] }
  0x6b   : > { %877 = vmatpush2.msra.mxu0 %v811_v2  ;;  %966 = vmatpush2.msra.mxu1 %v813_v3  ;;  %v1063_v38 = vld [vmem:[%s20204_s5 + $0x1c8] sm:$0xff]  ;;  %v1065_v39 = vld [vmem:[%s20204_s5 + $0x1d8] sm:$0xff]  ;;  %v1062_v40 = vld [vmem:[%s20204_s5 + $0x1c0] sm:$0xff] }
  0x6c   : > { %878 = vmatprep.subr.mxu0 %v808_v4  ;;  %967 = vmatprep.subr.mxu1 %v810_v5  ;;  %v1064_v41 = vld [vmem:[%s20204_s5 + $0x1d0] sm:$0xff]  ;;  %v1059_v42 = vld [vmem:[%s20204_s5 + $0x1a8] sm:$0xff]  ;;  %v1061_v43 = vld [vmem:[%s20204_s5 + $0x1b8] sm:$0xff] }
  0x6d   : > { %879 = vmatpush2.msra.mxu0 %v807_v6  ;;  %968 = vmatpush2.msra.mxu1 %v809_v7  ;;  %v1058_v44 = vld [vmem:[%s20204_s5 + $0x1a0] sm:$0xff]  ;;  %v1060_v45 = vld [vmem:[%s20204_s5 + $0x1b0] sm:$0xff]  ;;  %v1055_v46 = vld [vmem:[%s20204_s5 + $0x188] sm:$0xff] }
  0x6e   : > { %880 = vmatprep.subr.mxu0 %v804_v8  ;;  %969 = vmatprep.subr.mxu1 %v806_v9  ;;  %v1057_v47 = vld [vmem:[%s20204_s5 + $0x198] sm:$0xff]  ;;  %v1054_v48 = vld [vmem:[%s20204_s5 + $0x180] sm:$0xff]  ;;  %v1056_v49 = vld [vmem:[%s20204_s5 + $0x190] sm:$0xff] }
  0x6f   : > { %881 = vmatpush2.msra.mxu0 %v803_v10  ;;  %970 = vmatpush2.msra.mxu1 %v805_v11  ;;  %v1051_v50 = vld [vmem:[%s20204_s5 + $0x168] sm:$0xff]  ;;  %v1053_v51 = vld [vmem:[%s20204_s5 + $0x178] sm:$0xff]  ;;  %v1050_v52 = vld [vmem:[%s20204_s5 + $0x160] sm:$0xff] }
  0x70   : > { %882 = vmatprep.subr.mxu0 %v800_v12  ;;  %971 = vmatprep.subr.mxu1 %v802_v13  ;;  %v1052_v53 = vld [vmem:[%s20204_s5 + $0x170] sm:$0xff]  ;;  %v1047_v54 = vld [vmem:[%s20204_s5 + $0x148] sm:$0xff]  ;;  %v1049_v55 = vld [vmem:[%s20204_s5 + $0x158] sm:$0xff] }
  0x71   : > { %883 = vmatpush2.msra.mxu0 %v799_v14  ;;  %972 = vmatpush2.msra.mxu1 %v801_v15  ;;  %v1046_v56 = vld [vmem:[%s20204_s5 + $0x140] sm:$0xff]  ;;  %v1048_v57 = vld [vmem:[%s20204_s5 + $0x150] sm:$0xff]  ;;  %v1043_v58 = vld [vmem:[%s20204_s5 + $0x128] sm:$0xff] }
  0x72   : > { %884 = vmatprep.subr.mxu0 %v796_v16  ;;  %973 = vmatprep.subr.mxu1 %v798_v17  ;;  %v1045_v59 = vld [vmem:[%s20204_s5 + $0x138] sm:$0xff]  ;;  %v1042_v60 = vld [vmem:[%s20204_s5 + $0x120] sm:$0xff]  ;;  %v1044_v61 = vld [vmem:[%s20204_s5 + $0x130] sm:$0xff] }
  0x73   : > { %885 = vmatpush2.msra.mxu0 %v795_v18  ;;  %974 = vmatpush2.msra.mxu1 %v797_v19  ;;  %v1039_v62 = vld [vmem:[%s20204_s5 + $0x108] sm:$0xff]  ;;  %v1041_v63 = vld [vmem:[%s20204_s5 + $0x118] sm:$0xff]  ;;  %v1038_v0 = vld [vmem:[%s20204_s5 + $0x100] sm:$0xff] }
  0x74   : > { %886 = vmatprep.subr.mxu0 %v792_v20  ;;  %975 = vmatprep.subr.mxu1 %v794_v21  ;;  %v1040_v1 = vld [vmem:[%s20204_s5 + $0x110] sm:$0xff]  ;;  %v1035_v2 = vld [vmem:[%s20204_s5 + $0xe8] sm:$0xff]  ;;  %v1037_v3 = vld [vmem:[%s20204_s5 + $0xf8] sm:$0xff] }
  0x75   : > { %887 = vmatpush2.msra.mxu0 %v791_v22  ;;  %976 = vmatpush2.msra.mxu1 %v793_v23  ;;  %v1034_v4 = vld [vmem:[%s20204_s5 + $0xe0] sm:$0xff]  ;;  %v1036_v5 = vld [vmem:[%s20204_s5 + $0xf0] sm:$0xff]  ;;  %v1031_v6 = vld [vmem:[%s20204_s5 + $0xc8] sm:$0xff] }
  0x76   : > { %888 = vmatprep.subr.mxu0 %v788_v24  ;;  %977 = vmatprep.subr.mxu1 %v790_v25  ;;  %v1033_v7 = vld [vmem:[%s20204_s5 + $0xd8] sm:$0xff]  ;;  %v1030_v8 = vld [vmem:[%s20204_s5 + $0xc0] sm:$0xff]  ;;  %v1032_v9 = vld [vmem:[%s20204_s5 + $0xd0] sm:$0xff] }
  0x77   : > { %889 = vmatpush2.msra.mxu0 %v787_v26  ;;  %978 = vmatpush2.msra.mxu1 %v789_v27  ;;  %v1027_v10 = vld [vmem:[%s20204_s5 + $0xa8] sm:$0xff]  ;;  %v1029_v11 = vld [vmem:[%s20204_s5 + $0xb8] sm:$0xff]  ;;  %v1026_v12 = vld [vmem:[%s20204_s5 + $0xa0] sm:$0xff] }
  0x78   : > { %890 = vmatprep.subr.mxu0 %v784_v28  ;;  %979 = vmatprep.subr.mxu1 %v786_v29  ;;  %v1028_v13 = vld [vmem:[%s20204_s5 + $0xb0] sm:$0xff]  ;;  %v1023_v14 = vld [vmem:[%s20204_s5 + $0x88] sm:$0xff]  ;;  %v1025_v15 = vld [vmem:[%s20204_s5 + $0x98] sm:$0xff] }
  0x79   : > { %891 = vmatpush2.msra.mxu0 %v783_v30  ;;  %9983 = vmatprep.mubr.msk.f32.mxu0 %vm815_vm0, %v12727_v31  ;;  %v1022_v16 = vld [vmem:[%s20204_s5 + $0x80] sm:$0xff]  ;;  %v1024_v17 = vld [vmem:[%s20204_s5 + $0x90] sm:$0xff]  ;;  %v1019_v18 = vld [vmem:[%s20204_s5 + $0x68] sm:$0xff] }
  0x7a   : > { %980 = vmatpush2.msra.mxu1 %v785_v32  ;;  %893 = vmatmul.mubr.f32.vlgmr.msra.gmra.mxu0 %v12733_v33  ;;  %v1021_v19 = vld [vmem:[%s20204_s5 + $0x78] sm:$0xff]  ;;  %v1018_v20 = vld [vmem:[%s20204_s5 + $0x60] sm:$0xff]  ;;  %v1020_v21 = vld [vmem:[%s20204_s5 + $0x70] sm:$0xff] }
  0x7b   : > { %9987 = vmatprep.mubr.msk.f32.mxu1 %vm815_vm0, %v12727_v31  ;;  %1102 = vmatprep.subr.mxu0 %v1067_v34  ;;  %v1015_v22 = vld [vmem:[%s20204_s5 + $0x48] sm:$0xff]  ;;  %v1017_v23 = vld [vmem:[%s20204_s5 + $0x58] sm:$0xff]  ;;  %v1014_v24 = vld [vmem:[%s20204_s5 + $0x40] sm:$0xff] }
  0x7c   : > { %1191 = vmatprep.subr.mxu1 %v1069_v35  ;;  %982 = vmatmul.mubr.f32.vlgmr.msra.gmra.mxu1 %v12733_v33  ;;  %v1016_v25 = vld [vmem:[%s20204_s5 + $0x50] sm:$0xff]  ;;  %v1011_v26 = vld [vmem:[%s20204_s5 + $0x28] sm:$0xff]  ;;  %v1013_v27 = vld [vmem:[%s20204_s5 + $0x38] sm:$0xff] }
  0x7d   : > { %1103 = vmatpush1.msra.mxu0 %v1066_v36  ;;  %1192 = vmatpush1.msra.mxu1 %v1068_v37  ;;  %v1010_v28 = vld [vmem:[%s20204_s5 + $0x20] sm:$0xff]  ;;  %v1012_v29 = vld [vmem:[%s20204_s5 + $0x30] sm:$0xff]  ;;  %v1007_v30 = vld [vmem:[%s20204_s5 + $0x8] sm:$0xff] }
  0x7e   : > { %1104 = vmatprep.subr.mxu0 %v1063_v38  ;;  %1193 = vmatprep.subr.mxu1 %v1065_v39  ;;  %v1009_v32 = vld [vmem:[%s20204_s5 + $0x18] sm:$0xff]  ;;  %v1006_v34 = vld [vmem:[%s20204_s5] sm:$0xff]  ;;  %v1008_v35 = vld [vmem:[%s20204_s5 + $0x10] sm:$0xff] }
  0x7f   : > { %1105 = vmatpush1.msra.mxu0 %v1062_v40  ;;  %1194 = vmatpush1.msra.mxu1 %v1064_v41  ;;  %v1099_v36 = vld [vmem:[%s20204_s5 + $0x2e8] sm:$0xff]  ;;  %v1101_v37 = vld [vmem:[%s20204_s5 + $0x2f8] sm:$0xff]  ;;  %v1098_v38 = vld [vmem:[%s20204_s5 + $0x2e0] sm:$0xff] }
  0x80   : > { %1106 = vmatprep.subr.mxu0 %v1059_v42  ;;  %1195 = vmatprep.subr.mxu1 %v1061_v43  ;;  %v1100_v39 = vld [vmem:[%s20204_s5 + $0x2f0] sm:$0xff]  ;;  %v12946_v40 = vld [vmem:[%s12709_s30 + $0x18] sm:$0xff]  ;;  %v1095_v41 = vld [vmem:[%s20204_s5 + $0x2c8] sm:$0xff] }
  0x81   : > { %1107 = vmatpush1.msra.mxu0 %v1058_v44  ;;  %1196 = vmatpush1.msra.mxu1 %v1060_v45  ;;  %v1097_v42 = vld [vmem:[%s20204_s5 + $0x2d8] sm:$0xff]  ;;  %v12955_v43 = vld [vmem:[%s12709_s30 + $0x10] sm:$0xff]  ;;  %v1094_v44 = vld [vmem:[%s20204_s5 + $0x2c0] sm:$0xff] }
  0x82   : > { %1108 = vmatprep.subr.mxu0 %v1055_v46  ;;  %1197 = vmatprep.subr.mxu1 %v1057_v47  ;;  %v1096_v45 = vld [vmem:[%s20204_s5 + $0x2d0] sm:$0xff]  ;;  %v1091_v46 = vld [vmem:[%s20204_s5 + $0x2a8] sm:$0xff]  ;;  %v1093_v47 = vld [vmem:[%s20204_s5 + $0x2b8] sm:$0xff] }
  0x83   : > { %1109 = vmatpush1.msra.mxu0 %v1054_v48  ;;  %1198 = vmatpush1.msra.mxu1 %v1056_v49  ;;  %v1090_v48 = vld [vmem:[%s20204_s5 + $0x2a0] sm:$0xff]  ;;  %v1092_v49 = vld [vmem:[%s20204_s5 + $0x2b0] sm:$0xff] }
  0x84   : > { %1110 = vmatprep.subr.mxu0 %v1051_v50  ;;  %1199 = vmatprep.subr.mxu1 %v1053_v51  ;;  %v12981_v50 = vld [vmem:[%s12709_s30 + $0x28] sm:$0xff] }
  0x85   : > { %1111 = vmatpush1.msra.mxu0 %v1050_v52  ;;  %1200 = vmatpush1.msra.mxu1 %v1052_v53  ;;  %v1087_v51 = vld [vmem:[%s20204_s5 + $0x288] sm:$0xff]  ;;  %v1089_v52 = vld [vmem:[%s20204_s5 + $0x298] sm:$0xff]  ;;  %v12991_v53 = vld [vmem:[%s12709_s30 + $0x20] sm:$0xff] }
  0x86   : > { %1112 = vmatprep.subr.mxu0 %v1047_v54  ;;  %1201 = vmatprep.subr.mxu1 %v1049_v55  ;;  %v1086_v54 = vld [vmem:[%s20204_s5 + $0x280] sm:$0xff]  ;;  %v1088_v55 = vld [vmem:[%s20204_s5 + $0x290] sm:$0xff] }
  0x87   : > { %1113 = vmatpush1.msra.mxu0 %v1046_v56  ;;  %1202 = vmatpush1.msra.mxu1 %v1048_v57  ;;  %v1083_v56 = vld [vmem:[%s20204_s5 + $0x268] sm:$0xff]  ;;  %v1085_v57 = vld [vmem:[%s20204_s5 + $0x278] sm:$0xff] }
  0x88   : > { %1114 = vmatprep.subr.mxu0 %v1043_v58  ;;  %1203 = vmatprep.subr.mxu1 %v1045_v59  ;;  %v1082_v58 = vld [vmem:[%s20204_s5 + $0x260] sm:$0xff]  ;;  %v1084_v59 = vld [vmem:[%s20204_s5 + $0x270] sm:$0xff] }
  0x89   : > { %1115 = vmatpush1.msra.mxu0 %v1042_v60  ;;  %1204 = vmatpush1.msra.mxu1 %v1044_v61  ;;  %v13017_v60 = vld [vmem:[%s12709_s30 + $0x38] sm:$0x3f]  ;;  %v1079_v61 = vld [vmem:[%s20204_s5 + $0x248] sm:$0xff] }
  0x8a   : > { %1116 = vmatprep.subr.mxu0 %v1039_v62  ;;  %1205 = vmatprep.subr.mxu1 %v1041_v63  ;;  %v1081_v62 = vld [vmem:[%s20204_s5 + $0x258] sm:$0xff]  ;;  %v13027_v63 = vld [vmem:[%s12709_s30 + $0x30] sm:$0x3f] }
  0x8b   : > { %1117 = vmatpush1.msra.mxu0 %v1038_v0  ;;  %1206 = vmatpush1.msra.mxu1 %v1040_v1  ;;  %v1078_v0 = vld [vmem:[%s20204_s5 + $0x240] sm:$0xff]  ;;  %v1080_v1 = vld [vmem:[%s20204_s5 + $0x250] sm:$0xff] }
  0x8c   : > { %1118 = vmatprep.subr.mxu0 %v1035_v2  ;;  %1207 = vmatprep.subr.mxu1 %v1037_v3  ;;  %v1075_v2 = vld [vmem:[%s20204_s5 + $0x228] sm:$0xff]  ;;  %v1077_v3 = vld [vmem:[%s20204_s5 + $0x238] sm:$0xff] }
  0x8d   : > { %1119 = vmatpush1.msra.mxu0 %v1034_v4  ;;  %1208 = vmatpush1.msra.mxu1 %v1036_v5  ;;  %v1074_v4 = vld [vmem:[%s20204_s5 + $0x220] sm:$0xff]  ;;  %v1076_v5 = vld [vmem:[%s20204_s5 + $0x230] sm:$0xff] }
  0x8e   : > { %1120 = vmatprep.subr.mxu0 %v1031_v6  ;;  %1209 = vmatprep.subr.mxu1 %v1033_v7  ;;  %v1071_v6 = vld [vmem:[%s20204_s5 + $0x208] sm:$0xff]  ;;  %v1073_v7 = vld [vmem:[%s20204_s5 + $0x218] sm:$0xff] }
  0x8f   : > { %1121 = vmatpush1.msra.mxu0 %v1030_v8  ;;  %1210 = vmatpush1.msra.mxu1 %v1032_v9  ;;  %v1070_v8 = vld [vmem:[%s20204_s5 + $0x200] sm:$0xff]  ;;  %v1072_v9 = vld [vmem:[%s20204_s5 + $0x210] sm:$0xff] }
  0x90   : > { %1122 = vmatprep.subr.mxu0 %v1027_v10  ;;  %1211 = vmatprep.subr.mxu1 %v1029_v11  ;;  %v10068_v10 = vld [vmem:[%s20202_s27 + $0x4e8] sm:$0xff]  ;;  %v10070_v11 = vld [vmem:[%s20202_s27 + $0x4f8] sm:$0xff] }
  0x91   : > { %1123 = vmatpush1.msra.mxu0 %v1026_v12  ;;  %1212 = vmatpush1.msra.mxu1 %v1028_v13  ;;  %v10067_v12 = vld [vmem:[%s20202_s27 + $0x4e0] sm:$0xff]  ;;  %v10069_v13 = vld [vmem:[%s20202_s27 + $0x4f0] sm:$0xff] }
  0x92   : > { %1124 = vmatprep.subr.mxu0 %v1023_v14  ;;  %1213 = vmatprep.subr.mxu1 %v1025_v15  ;;  %v10064_v14 = vld [vmem:[%s20202_s27 + $0x4c8] sm:$0xff]  ;;  %v10066_v15 = vld [vmem:[%s20202_s27 + $0x4d8] sm:$0xff] }
  0x93   : > { %1125 = vmatpush1.msra.mxu0 %v1022_v16  ;;  %1214 = vmatpush1.msra.mxu1 %v1024_v17  ;;  %v10063_v16 = vld [vmem:[%s20202_s27 + $0x4c0] sm:$0xff]  ;;  %v10060_v17 = vld [vmem:[%s20202_s27 + $0x4a8] sm:$0xff] }
  0x94   : > { %1126 = vmatprep.subr.mxu0 %v1019_v18  ;;  %1215 = vmatprep.subr.mxu1 %v1021_v19  ;;  %v10062_v18 = vld [vmem:[%s20202_s27 + $0x4b8] sm:$0xff]  ;;  %v10061_v19 = vld [vmem:[%s20202_s27 + $0x4b0] sm:$0xff] }
  0x95   : > { %1127 = vmatpush1.msra.mxu0 %v1018_v20  ;;  %1216 = vmatpush1.msra.mxu1 %v1020_v21  ;;  %v10056_v20 = vld [vmem:[%s20202_s27 + $0x488] sm:$0xff]  ;;  %v10058_v21 = vld [vmem:[%s20202_s27 + $0x498] sm:$0xff] }
  0x96   : > { %1128 = vmatprep.subr.mxu0 %v1015_v22  ;;  %1217 = vmatprep.subr.mxu1 %v1017_v23  ;;  %v10055_v22 = vld [vmem:[%s20202_s27 + $0x480] sm:$0xff]  ;;  %v10057_v23 = vld [vmem:[%s20202_s27 + $0x490] sm:$0xff] }
  0x97   : > { %1129 = vmatpush1.msra.mxu0 %v1014_v24  ;;  %1218 = vmatpush1.msra.mxu1 %v1016_v25  ;;  %v10052_v24 = vld [vmem:[%s20202_s27 + $0x468] sm:$0xff]  ;;  %v10054_v25 = vld [vmem:[%s20202_s27 + $0x478] sm:$0xff] }
  0x98   : > { %1130 = vmatprep.subr.mxu0 %v1011_v26  ;;  %1219 = vmatprep.subr.mxu1 %v1013_v27  ;;  %v10051_v26 = vld [vmem:[%s20202_s27 + $0x460] sm:$0xff]  ;;  %v10053_v27 = vld [vmem:[%s20202_s27 + $0x470] sm:$0xff] }
  0x99   : > { %1131 = vmatpush1.msra.mxu0 %v1010_v28  ;;  %1220 = vmatpush1.msra.mxu1 %v1012_v29  ;;  %v10048_v28 = vld [vmem:[%s20202_s27 + $0x448] sm:$0xff]  ;;  %v10050_v29 = vld [vmem:[%s20202_s27 + $0x458] sm:$0xff] }
  0x9a   : > { %1132 = vmatprep.subr.mxu0 %v1007_v30  ;;  %1221 = vmatprep.subr.mxu1 %v1009_v32  ;;  %v10047_v30 = vld [vmem:[%s20202_s27 + $0x440] sm:$0xff]  ;;  %v10049_v32 = vld [vmem:[%s20202_s27 + $0x450] sm:$0xff] }
  0x9b   : > { %1133 = vmatpush1.msra.mxu0 %v1006_v34  ;;  %1222 = vmatpush1.msra.mxu1 %v1008_v35  ;;  %v10044_v34 = vld [vmem:[%s20202_s27 + $0x428] sm:$0xff]  ;;  %v10046_v35 = vld [vmem:[%s20202_s27 + $0x438] sm:$0xff] }
  0x9c   : > { %1150 = vmatprep.subr.mxu0 %v1099_v36  ;;  %1239 = vmatprep.subr.mxu1 %v1101_v37  ;;  %v10043_v36 = vld [vmem:[%s20202_s27 + $0x420] sm:$0xff]  ;;  %v10045_v37 = vld [vmem:[%s20202_s27 + $0x430] sm:$0xff] }
  0x9d   : > { %1151 = vmatpush2.msra.mxu0 %v1098_v38  ;;  %1240 = vmatpush2.msra.mxu1 %v1100_v39  ;;  %v10040_v38 = vld [vmem:[%s20202_s27 + $0x408] sm:$0xff]  ;;  %v10042_v39 = vld [vmem:[%s20202_s27 + $0x418] sm:$0xff] }
  0x9e   : > { %9984 = vmatprep.mubr.msk.f32.mxu0 %vm815_vm0, %v12946_v40  ;;  %1152 = vmatprep.subr.mxu0 %v1095_v41  ;;  %v10039_v41 = vld [vmem:[%s20202_s27 + $0x400] sm:$0xff] }
  0x9f   : > { %1241 = vmatprep.subr.mxu1 %v1097_v42  ;;  %899 = vmatmul.mubr.f32.gmra.mxu0 %v12955_v43  ;;  %v10041_v42 = vld [vmem:[%s20202_s27 + $0x410] sm:$0xff] }
  0xa0   : > { %1153 = vmatpush2.msra.mxu0 %v1094_v44  ;;  %1242 = vmatpush2.msra.mxu1 %v1096_v45  ;;  %v10036_v44 = vld [vmem:[%s20202_s27 + $0x3e8] sm:$0xff]  ;;  %v10038_v45 = vld [vmem:[%s20202_s27 + $0x3f8] sm:$0xff] }
  0xa1   : > { %9988 = vmatprep.mubr.msk.f32.mxu1 %vm815_vm0, %v12946_v40  ;;  %1154 = vmatprep.subr.mxu0 %v1091_v46  ;;  %v10035_v46 = vld [vmem:[%s20202_s27 + $0x3e0] sm:$0xff] }
  0xa2   : > { %1243 = vmatprep.subr.mxu1 %v1093_v47  ;;  %988 = vmatmul.mubr.f32.gmra.mxu1 %v12955_v43  ;;  %v10037_v47 = vld [vmem:[%s20202_s27 + $0x3f0] sm:$0xff] }
  0xa3   : > { %1155 = vmatpush2.msra.mxu0 %v1090_v48  ;;  %1244 = vmatpush2.msra.mxu1 %v1092_v49  ;;  %v10032_v48 = vld [vmem:[%s20202_s27 + $0x3c8] sm:$0xff]  ;;  %v10034_v49 = vld [vmem:[%s20202_s27 + $0x3d8] sm:$0xff] }
  0xa4   : > { %9985 = vmatprep.mubr.msk.f32.mxu0 %vm815_vm0, %v12981_v50  ;;  %1156 = vmatprep.subr.mxu0 %v1087_v51  ;;  %v10031_v51 = vld [vmem:[%s20202_s27 + $0x3c0] sm:$0xff] }
  0xa5   : > { %1245 = vmatprep.subr.mxu1 %v1089_v52  ;;  %905 = vmatmul.mubr.f32.gmra.mxu0 %v12991_v53  ;;  %v10033_v52 = vld [vmem:[%s20202_s27 + $0x3d0] sm:$0xff] }
  0xa6   : > { %1157 = vmatpush2.msra.mxu0 %v1086_v54  ;;  %1246 = vmatpush2.msra.mxu1 %v1088_v55  ;;  %v10028_v54 = vld [vmem:[%s20202_s27 + $0x3a8] sm:$0xff]  ;;  %v10030_v55 = vld [vmem:[%s20202_s27 + $0x3b8] sm:$0xff] }
  0xa7   : > { %9989 = vmatprep.mubr.msk.f32.mxu1 %vm815_vm0, %v12981_v50  ;;  %1158 = vmatprep.subr.mxu0 %v1083_v56  ;;  %v10027_v56 = vld [vmem:[%s20202_s27 + $0x3a0] sm:$0xff] }
  0xa8   : > { %1247 = vmatprep.subr.mxu1 %v1085_v57  ;;  %994 = vmatmul.mubr.f32.gmra.mxu1 %v12991_v53  ;;  %v10029_v57 = vld [vmem:[%s20202_s27 + $0x3b0] sm:$0xff] }
  0xa9   : > { %1159 = vmatpush2.msra.mxu0 %v1082_v58  ;;  %1248 = vmatpush2.msra.mxu1 %v1084_v59  ;;  %v10024_v58 = vld [vmem:[%s20202_s27 + $0x388] sm:$0xff]  ;;  %v10026_v59 = vld [vmem:[%s20202_s27 + $0x398] sm:$0xff] }
  0xaa   : > { %9986 = vmatprep.mubr.msk.f32.mxu0 %vm815_vm0, %v13017_v60  ;;  %1160 = vmatprep.subr.mxu0 %v1079_v61  ;;  %v10023_v61 = vld [vmem:[%s20202_s27 + $0x380] sm:$0xff] }
  0xab   : > { %1249 = vmatprep.subr.mxu1 %v1081_v62  ;;  %911 = vmatmul.mubr.f32.gmra.mxu0 %v13027_v63  ;;  %v10025_v62 = vld [vmem:[%s20202_s27 + $0x390] sm:$0xff] }
  0xac   : > { %1161 = vmatpush2.msra.mxu0 %v1078_v0  ;;  %1250 = vmatpush2.msra.mxu1 %v1080_v1  ;;  %v10020_v0 = vld [vmem:[%s20202_s27 + $0x368] sm:$0xff]  ;;  %v10022_v1 = vld [vmem:[%s20202_s27 + $0x378] sm:$0xff] }
  0xad   : > { %9990 = vmatprep.mubr.msk.f32.mxu1 %vm815_vm0, %v13017_v60  ;;  %1162 = vmatprep.subr.mxu0 %v1075_v2  ;;  %v10019_v2 = vld [vmem:[%s20202_s27 + $0x360] sm:$0xff] }
  0xae   : > { %1251 = vmatprep.subr.mxu1 %v1077_v3  ;;  %1000 = vmatmul.mubr.f32.gmra.mxu1 %v13027_v63  ;;  %v10021_v3 = vld [vmem:[%s20202_s27 + $0x370] sm:$0xff] }
  0xaf   : > { %1163 = vmatpush2.msra.mxu0 %v1074_v4  ;;  %1252 = vmatpush2.msra.mxu1 %v1076_v5  ;;  %v10016_v4 = vld [vmem:[%s20202_s27 + $0x348] sm:$0xff]  ;;  %v10018_v5 = vld [vmem:[%s20202_s27 + $0x358] sm:$0xff] }
  0xb0   : > { %1164 = vmatprep.subr.mxu0 %v1071_v6  ;;  %1253 = vmatprep.subr.mxu1 %v1073_v7  ;;  %v10015_v6 = vld [vmem:[%s20202_s27 + $0x340] sm:$0xff]  ;;  %v10017_v7 = vld [vmem:[%s20202_s27 + $0x350] sm:$0xff] }
  0xb1   : > { %1165 = vmatpush2.msra.mxu0 %v1070_v8  ;;  %9991 = vmatprep.mubr.msk.f32.mxu0 %vm815_vm0, %v12727_v31  ;;  %v10012_v8 = vld [vmem:[%s20202_s27 + $0x328] sm:$0xff] }
  0xb2   : > { %1254 = vmatpush2.msra.mxu1 %v1072_v9  ;;  %1167 = vmatmul.mubr.f32.vlgmr.msra.gmra.mxu0 %v12733_v33  ;;  %v10014_v9 = vld [vmem:[%s20202_s27 + $0x338] sm:$0xff] }
  0xb3   : > { %9995 = vmatprep.mubr.msk.f32.mxu1 %vm815_vm0, %v12727_v31  ;;  %1432 = vmatprep.subr.mxu0 %v10068_v10  ;;  %v10065_v31 = vld [vmem:[%s20202_s27 + $0x4d0] sm:$0xff]  ;;  %v10011_v10 = vld [vmem:[%s20202_s27 + $0x320] sm:$0xff] }
  0xb4   : > { %1521 = vmatprep.subr.mxu1 %v10070_v11  ;;  %1256 = vmatmul.mubr.f32.vlgmr.msra.gmra.mxu1 %v12733_v33  ;;  %v10059_v33 = vld [vmem:[%s20202_s27 + $0x4a0] sm:$0xff]  ;;  %v10013_v11 = vld [vmem:[%s20202_s27 + $0x330] sm:$0xff] }
  0xb5   : > { %1433 = vmatpush1.msra.mxu0 %v10067_v12  ;;  %1522 = vmatpush1.msra.mxu1 %v10069_v13  ;;  %v10008_v12 = vld [vmem:[%s20202_s27 + $0x308] sm:$0xff]  ;;  %v10010_v13 = vld [vmem:[%s20202_s27 + $0x318] sm:$0xff] }
  0xb6   : > { %1434 = vmatprep.subr.mxu0 %v10064_v14  ;;  %1523 = vmatprep.subr.mxu1 %v10066_v15  ;;  %v10007_v14 = vld [vmem:[%s20202_s27 + $0x300] sm:$0xff]  ;;  %v10009_v15 = vld [vmem:[%s20202_s27 + $0x310] sm:$0xff] }
  0xb7   : > { %1435 = vmatpush1.msra.mxu0 %v10063_v16  ;;  %1524 = vmatpush1.msra.mxu1 %v10065_v31  ;;  %v10100_v16 = vld [vmem:[%s20202_s27 + $0x5e8] sm:$0xff]  ;;  %v10102_v31 = vld [vmem:[%s20202_s27 + $0x5f8] sm:$0xff] }
  0xb8   : > { %1436 = vmatprep.subr.mxu0 %v10060_v17  ;;  %1525 = vmatprep.subr.mxu1 %v10062_v18  ;;  %v10099_v17 = vld [vmem:[%s20202_s27 + $0x5e0] sm:$0xff]  ;;  %v10101_v18 = vld [vmem:[%s20202_s27 + $0x5f0] sm:$0xff] }
  0xb9   : > { %1437 = vmatpush1.msra.mxu0 %v10059_v33  ;;  %1526 = vmatpush1.msra.mxu1 %v10061_v19  ;;  %v10096_v33 = vld [vmem:[%s20202_s27 + $0x5c8] sm:$0xff]  ;;  %v10098_v19 = vld [vmem:[%s20202_s27 + $0x5d8] sm:$0xff] }
  0xba   : > { %1438 = vmatprep.subr.mxu0 %v10056_v20  ;;  %1527 = vmatprep.subr.mxu1 %v10058_v21  ;;  %v10095_v20 = vld [vmem:[%s20202_s27 + $0x5c0] sm:$0xff]  ;;  %v10097_v21 = vld [vmem:[%s20202_s27 + $0x5d0] sm:$0xff] }
  0xbb   : > { %1439 = vmatpush1.msra.mxu0 %v10055_v22  ;;  %1528 = vmatpush1.msra.mxu1 %v10057_v23  ;;  %v10092_v22 = vld [vmem:[%s20202_s27 + $0x5a8] sm:$0xff]  ;;  %v10094_v23 = vld [vmem:[%s20202_s27 + $0x5b8] sm:$0xff] }
  0xbc   : > { %1440 = vmatprep.subr.mxu0 %v10052_v24  ;;  %1529 = vmatprep.subr.mxu1 %v10054_v25  ;;  %v10091_v24 = vld [vmem:[%s20202_s27 + $0x5a0] sm:$0xff]  ;;  %v10093_v25 = vld [vmem:[%s20202_s27 + $0x5b0] sm:$0xff] }
  0xbd   : > { %1441 = vmatpush1.msra.mxu0 %v10051_v26  ;;  %1530 = vmatpush1.msra.mxu1 %v10053_v27  ;;  %v10088_v26 = vld [vmem:[%s20202_s27 + $0x588] sm:$0xff]  ;;  %v10087_v27 = vld [vmem:[%s20202_s27 + $0x580] sm:$0xff] }
  0xbe   : > { %1442 = vmatprep.subr.mxu0 %v10048_v28  ;;  %1531 = vmatprep.subr.mxu1 %v10050_v29  ;;  %v10089_v28 = vld [vmem:[%s20202_s27 + $0x590] sm:$0xff]  ;;  %v10086_v29 = vld [vmem:[%s20202_s27 + $0x578] sm:$0xff] }
  0xbf   : > { %1443 = vmatpush1.msra.mxu0 %v10047_v30  ;;  %1532 = vmatpush1.msra.mxu1 %v10049_v32  ;;  %v10083_v30 = vld [vmem:[%s20202_s27 + $0x560] sm:$0xff]  ;;  %v10085_v32 = vld [vmem:[%s20202_s27 + $0x570] sm:$0xff] }
  0xc0   : > { %1444 = vmatprep.subr.mxu0 %v10044_v34  ;;  %1533 = vmatprep.subr.mxu1 %v10046_v35  ;;  %v10080_v34 = vld [vmem:[%s20202_s27 + $0x548] sm:$0xff]  ;;  %v10079_v35 = vld [vmem:[%s20202_s27 + $0x540] sm:$0xff] }
  0xc1   : > { %1445 = vmatpush1.msra.mxu0 %v10043_v36  ;;  %1534 = vmatpush1.msra.mxu1 %v10045_v37  ;;  %v10081_v36 = vld [vmem:[%s20202_s27 + $0x550] sm:$0xff]  ;;  %v10078_v37 = vld [vmem:[%s20202_s27 + $0x538] sm:$0xff] }
  0xc2   : > { %1446 = vmatprep.subr.mxu0 %v10040_v38  ;;  %1535 = vmatprep.subr.mxu1 %v10042_v39  ;;  %v10075_v38 = vld [vmem:[%s20202_s27 + $0x520] sm:$0xff]  ;;  %v10077_v39 = vld [vmem:[%s20202_s27 + $0x530] sm:$0xff] }
  0xc3   : > { %1447 = vmatpush1.msra.mxu0 %v10039_v41  ;;  %1536 = vmatpush1.msra.mxu1 %v10041_v42  ;;  %v10072_v41 = vld [vmem:[%s20202_s27 + $0x508] sm:$0xff]  ;;  %v10071_v42 = vld [vmem:[%s20202_s27 + $0x500] sm:$0xff] }
  0xc4   : > { %1448 = vmatprep.subr.mxu0 %v10036_v44  ;;  %1537 = vmatprep.subr.mxu1 %v10038_v45  ;;  %v13375_v44 = vld [vmem:[%s12709_s30 + $0x48] sm:$0xff]  ;;  %v10073_v45 = vld [vmem:[%s20202_s27 + $0x510] sm:$0xff] }
  0xc5   : > { %1449 = vmatpush1.msra.mxu0 %v10035_v46  ;;  %1538 = vmatpush1.msra.mxu1 %v10037_v47  ;;  %v13381_v46 = vld [vmem:[%s12709_s30 + $0x40] sm:$0xff]  ;;  %v10174_v47 = vld [vmem:[%s20204_s5 + $0x4f8] sm:$0xff] }
  0xc6   : > { %1450 = vmatprep.subr.mxu0 %v10032_v48  ;;  %1539 = vmatprep.subr.mxu1 %v10034_v49  ;;  %v10171_v48 = vld [vmem:[%s20204_s5 + $0x4e0] sm:$0xff]  ;;  %v10173_v49 = vld [vmem:[%s20204_s5 + $0x4f0] sm:$0xff] }
  0xc7   : > { %1451 = vmatpush1.msra.mxu0 %v10031_v51  ;;  %1540 = vmatpush1.msra.mxu1 %v10033_v52  ;;  %v10168_v51 = vld [vmem:[%s20204_s5 + $0x4c8] sm:$0xff]  ;;  %v10170_v52 = vld [vmem:[%s20204_s5 + $0x4d8] sm:$0xff] }
  0xc8   : > { %1452 = vmatprep.subr.mxu0 %v10028_v54  ;;  %1541 = vmatprep.subr.mxu1 %v10030_v55  ;;  %v13408_v54 = vld [vmem:[%s12709_s30 + $0x58] sm:$0xff]  ;;  %v10167_v55 = vld [vmem:[%s20204_s5 + $0x4c0] sm:$0xff] }
  0xc9   : > { %1453 = vmatpush1.msra.mxu0 %v10027_v56  ;;  %1542 = vmatpush1.msra.mxu1 %v10029_v57  ;;  %v10169_v56 = vld [vmem:[%s20204_s5 + $0x4d0] sm:$0xff] }
  0xca   : > { %1454 = vmatprep.subr.mxu0 %v10024_v58  ;;  %1543 = vmatprep.subr.mxu1 %v10026_v59  ;;  %v13417_v57 = vld [vmem:[%s12709_s30 + $0x50] sm:$0xff]  ;;  %v10164_v58 = vld [vmem:[%s20204_s5 + $0x4a8] sm:$0xff]  ;;  %v10166_v59 = vld [vmem:[%s20204_s5 + $0x4b8] sm:$0xff] }
  0xcb   : > { %1455 = vmatpush1.msra.mxu0 %v10023_v61  ;;  %1544 = vmatpush1.msra.mxu1 %v10025_v62  ;;  %v10163_v61 = vld [vmem:[%s20204_s5 + $0x4a0] sm:$0xff]  ;;  %v10165_v62 = vld [vmem:[%s20204_s5 + $0x4b0] sm:$0xff] }
  0xcc   : > { %1456 = vmatprep.subr.mxu0 %v10020_v0  ;;  %1545 = vmatprep.subr.mxu1 %v10022_v1  ;;  %v10160_v0 = vld [vmem:[%s20204_s5 + $0x488] sm:$0xff]  ;;  %v10162_v1 = vld [vmem:[%s20204_s5 + $0x498] sm:$0xff] }
  0xcd   : > { %1457 = vmatpush1.msra.mxu0 %v10019_v2  ;;  %1546 = vmatpush1.msra.mxu1 %v10021_v3  ;;  %v13444_v2 = vld [vmem:[%s12709_s30 + $0x68] sm:$0xff]  ;;  %v10159_v3 = vld [vmem:[%s20204_s5 + $0x480] sm:$0xff] }
  0xce   : > { %1458 = vmatprep.subr.mxu0 %v10016_v4  ;;  %1547 = vmatprep.subr.mxu1 %v10018_v5  ;;  %v10161_v4 = vld [vmem:[%s20204_s5 + $0x490] sm:$0xff]  ;;  %v13453_v5 = vld [vmem:[%s12709_s30 + $0x60] sm:$0xff] }
  0xcf   : > { %1459 = vmatpush1.msra.mxu0 %v10015_v6  ;;  %1548 = vmatpush1.msra.mxu1 %v10017_v7  ;;  %v10156_v6 = vld [vmem:[%s20204_s5 + $0x468] sm:$0xff]  ;;  %v10158_v7 = vld [vmem:[%s20204_s5 + $0x478] sm:$0xff] }
  0xd0   : > { %1460 = vmatprep.subr.mxu0 %v10012_v8  ;;  %1549 = vmatprep.subr.mxu1 %v10014_v9  ;;  %v10155_v8 = vld [vmem:[%s20204_s5 + $0x460] sm:$0xff]  ;;  %v10157_v9 = vld [vmem:[%s20204_s5 + $0x470] sm:$0xff] }
  0xd1   : > { %1461 = vmatpush1.msra.mxu0 %v10011_v10  ;;  %1550 = vmatpush1.msra.mxu1 %v10013_v11  ;;  %v10152_v10 = vld [vmem:[%s20204_s5 + $0x448] sm:$0xff]  ;;  %v10154_v11 = vld [vmem:[%s20204_s5 + $0x458] sm:$0xff] }
  0xd2   : > { %1462 = vmatprep.subr.mxu0 %v10008_v12  ;;  %1551 = vmatprep.subr.mxu1 %v10010_v13  ;;  %v13480_v12 = vld [vmem:[%s12709_s30 + $0x78] sm:$0x3f]  ;;  %v10151_v13 = vld [vmem:[%s20204_s5 + $0x440] sm:$0xff] }
  0xd3   : > { %1463 = vmatpush1.msra.mxu0 %v10007_v14  ;;  %1552 = vmatpush1.msra.mxu1 %v10009_v15  ;;  %v10153_v14 = vld [vmem:[%s20204_s5 + $0x450] sm:$0xff] }
  0xd4   : > { %1480 = vmatprep.subr.mxu0 %v10100_v16  ;;  %1569 = vmatprep.subr.mxu1 %v10102_v31  ;;  %v13489_v15 = vld [vmem:[%s12709_s30 + $0x70] sm:$0x3f]  ;;  %v10148_v16 = vld [vmem:[%s20204_s5 + $0x428] sm:$0xff]  ;;  %v10150_v31 = vld [vmem:[%s20204_s5 + $0x438] sm:$0xff] }
  0xd5   : > { %1481 = vmatpush2.msra.mxu0 %v10099_v17  ;;  %1570 = vmatpush2.msra.mxu1 %v10101_v18  ;;  %v10147_v17 = vld [vmem:[%s20204_s5 + $0x420] sm:$0xff]  ;;  %v10149_v18 = vld [vmem:[%s20204_s5 + $0x430] sm:$0xff] }
  0xd6   : > { %9992 = vmatprep.mubr.msk.f32.mxu0 %vm815_vm0, %v12946_v40  ;;  %1482 = vmatprep.subr.mxu0 %v10096_v33  ;;  %v10144_v33 = vld [vmem:[%s20204_s5 + $0x408] sm:$0xff] }
  0xd7   : > { %1571 = vmatprep.subr.mxu1 %v10098_v19  ;;  %1173 = vmatmul.mubr.f32.gmra.mxu0 %v12955_v43  ;;  %v10146_v19 = vld [vmem:[%s20204_s5 + $0x418] sm:$0xff] }
  0xd8   : > { %9996 = vmatprep.mubr.msk.f32.mxu1 %vm815_vm0, %v12946_v40  ;;  %1483 = vmatpush2.msra.mxu0 %v10095_v20  ;;  %v10090_v40 = vld [vmem:[%s20202_s27 + $0x598] sm:$0xff]  ;;  %v10143_v20 = vld [vmem:[%s20204_s5 + $0x400] sm:$0xff] }
  0xd9   : > { %1572 = vmatpush2.msra.mxu1 %v10097_v21  ;;  %1484 = vmatprep.subr.mxu0 %v10092_v22  ;;  %v10145_v21 = vld [vmem:[%s20204_s5 + $0x410] sm:$0xff]  ;;  %v10140_v22 = vld [vmem:[%s20204_s5 + $0x3e8] sm:$0xff] }
  0xda   : > { %1262 = vmatmul.mubr.f32.gmra.mxu1 %v12955_v43  ;;  %1573 = vmatprep.subr.mxu1 %v10094_v23  ;;  %v10084_v43 = vld [vmem:[%s20202_s27 + $0x568] sm:$0xff]  ;;  %v10142_v23 = vld [vmem:[%s20204_s5 + $0x3f8] sm:$0xff] }
  0xdb   : > { %1485 = vmatpush2.msra.mxu0 %v10091_v24  ;;  %1574 = vmatpush2.msra.mxu1 %v10093_v25  ;;  %v10139_v24 = vld [vmem:[%s20204_s5 + $0x3e0] sm:$0xff]  ;;  %v10141_v25 = vld [vmem:[%s20204_s5 + $0x3f0] sm:$0xff] }
  0xdc   : > { %9993 = vmatprep.mubr.msk.f32.mxu0 %vm815_vm0, %v12981_v50  ;;  %1486 = vmatprep.subr.mxu0 %v10088_v26  ;;  %v10136_v26 = vld [vmem:[%s20204_s5 + $0x3c8] sm:$0xff] }
  0xdd   : > { %1575 = vmatprep.subr.mxu1 %v10090_v40  ;;  %1179 = vmatmul.mubr.f32.gmra.mxu0 %v12991_v53  ;;  %v10138_v40 = vld [vmem:[%s20204_s5 + $0x3d8] sm:$0xff] }
  0xde   : > { %9997 = vmatprep.mubr.msk.f32.mxu1 %vm815_vm0, %v12981_v50  ;;  %1487 = vmatpush2.msra.mxu0 %v10087_v27  ;;  %v10082_v50 = vld [vmem:[%s20202_s27 + $0x558] sm:$0xff]  ;;  %v10135_v27 = vld [vmem:[%s20204_s5 + $0x3c0] sm:$0xff] }
  0xdf   : > { %1576 = vmatpush2.msra.mxu1 %v10089_v28  ;;  %1488 = vmatprep.subr.mxu0 %v10084_v43  ;;  %v10137_v28 = vld [vmem:[%s20204_s5 + $0x3d0] sm:$0xff]  ;;  %v10132_v43 = vld [vmem:[%s20204_s5 + $0x3a8] sm:$0xff] }
  0xe0   : > { %1268 = vmatmul.mubr.f32.gmra.mxu1 %v12991_v53  ;;  %1577 = vmatprep.subr.mxu1 %v10086_v29  ;;  %v10076_v53 = vld [vmem:[%s20202_s27 + $0x528] sm:$0xff]  ;;  %v10134_v29 = vld [vmem:[%s20204_s5 + $0x3b8] sm:$0xff] }
  0xe1   : > { %1489 = vmatpush2.msra.mxu0 %v10083_v30  ;;  %1578 = vmatpush2.msra.mxu1 %v10085_v32  ;;  %v10131_v30 = vld [vmem:[%s20204_s5 + $0x3a0] sm:$0xff]  ;;  %v10133_v32 = vld [vmem:[%s20204_s5 + $0x3b0] sm:$0xff] }
  0xe2   : > { %9994 = vmatprep.mubr.msk.f32.mxu0 %vm815_vm0, %v13017_v60  ;;  %1490 = vmatprep.subr.mxu0 %v10080_v34  ;;  %v10128_v34 = vld [vmem:[%s20204_s5 + $0x388] sm:$0xff] }
  0xe3   : > { %1579 = vmatprep.subr.mxu1 %v10082_v50  ;;  %1185 = vmatmul.mubr.f32.gmra.mxu0 %v13027_v63  ;;  %v10130_v50 = vld [vmem:[%s20204_s5 + $0x398] sm:$0xff] }
  0xe4   : > { %9998 = vmatprep.mubr.msk.f32.mxu1 %vm815_vm0, %v13017_v60  ;;  %1491 = vmatpush2.msra.mxu0 %v10079_v35  ;;  %v10074_v60 = vld [vmem:[%s20202_s27 + $0x518] sm:$0xff]  ;;  %v10127_v35 = vld [vmem:[%s20204_s5 + $0x380] sm:$0xff] }
  0xe5   : > { %1580 = vmatpush2.msra.mxu1 %v10081_v36  ;;  %1492 = vmatprep.subr.mxu0 %v10076_v53  ;;  %v10129_v36 = vld [vmem:[%s20204_s5 + $0x390] sm:$0xff]  ;;  %v10124_v53 = vld [vmem:[%s20204_s5 + $0x368] sm:$0xff] }
  0xe6   : > { %1274 = vmatmul.mubr.f32.gmra.mxu1 %v13027_v63  ;;  %1581 = vmatprep.subr.mxu1 %v10078_v37  ;;  %v10172_v63 = vld [vmem:[%s20204_s5 + $0x4e8] sm:$0xff]  ;;  %v10126_v37 = vld [vmem:[%s20204_s5 + $0x378] sm:$0xff] }
  0xe7   : > { %1493 = vmatpush2.msra.mxu0 %v10075_v38  ;;  %1582 = vmatpush2.msra.mxu1 %v10077_v39  ;;  %v10123_v38 = vld [vmem:[%s20204_s5 + $0x360] sm:$0xff]  ;;  %v10125_v39 = vld [vmem:[%s20204_s5 + $0x370] sm:$0xff] }
  0xe8   : > { %1494 = vmatprep.subr.mxu0 %v10072_v41  ;;  %1583 = vmatprep.subr.mxu1 %v10074_v60  ;;  %v10120_v41 = vld [vmem:[%s20204_s5 + $0x348] sm:$0xff]  ;;  %v10122_v60 = vld [vmem:[%s20204_s5 + $0x358] sm:$0xff] }
  0xe9   : > { %1495 = vmatpush2.msra.mxu0 %v10071_v42  ;;  %10103 = vmatprep.mubr.msk.f32.mxu0 %vm815_vm0, %v13375_v44  ;;  %v10119_v42 = vld [vmem:[%s20204_s5 + $0x340] sm:$0xff] }
  0xea   : > { %1584 = vmatpush2.msra.mxu1 %v10073_v45  ;;  %10107 = vmatprep.mubr.msk.f32.mxu1 %vm815_vm0, %v13375_v44  ;;  %v10121_v45 = vld [vmem:[%s20204_s5 + $0x350] sm:$0xff] }
  0xeb   : > { %1497 = vmatmul.mubr.f32.vlgmr.msra.gmra.mxu0 %v13381_v46  ;;  %1586 = vmatmul.mubr.f32.vlgmr.msra.gmra.mxu1 %v13381_v46 }
  0xec   : > { %1707 = vmatprep.subr.mxu0 %v10172_v63  ;;  %1796 = vmatprep.subr.mxu1 %v10174_v47  ;;  %v10116_v63 = vld [vmem:[%s20204_s5 + $0x328] sm:$0xff]  ;;  %v10118_v47 = vld [vmem:[%s20204_s5 + $0x338] sm:$0xff] }
  0xed   : > { %1708 = vmatpush1.msra.mxu0 %v10171_v48  ;;  %1797 = vmatpush1.msra.mxu1 %v10173_v49  ;;  %v10115_v48 = vld [vmem:[%s20204_s5 + $0x320] sm:$0xff]  ;;  %v10117_v49 = vld [vmem:[%s20204_s5 + $0x330] sm:$0xff] }
  0xee   : > { %1709 = vmatprep.subr.mxu0 %v10168_v51  ;;  %1798 = vmatprep.subr.mxu1 %v10170_v52  ;;  %v10112_v51 = vld [vmem:[%s20204_s5 + $0x308] sm:$0xff]  ;;  %v10114_v52 = vld [vmem:[%s20204_s5 + $0x318] sm:$0xff] }
  0xef   : > { %10104 = vmatprep.mubr.msk.f32.mxu0 %vm815_vm0, %v13408_v54  ;;  %10108 = vmatprep.mubr.msk.f32.mxu1 %vm815_vm0, %v13408_v54 }
  0xf0   : > { %1710 = vmatpush1.msra.mxu0 %v10167_v55  ;;  %1799 = vmatpush1.msra.mxu1 %v10169_v56  ;;  %v10111_v55 = vld [vmem:[%s20204_s5 + $0x300] sm:$0xff]  ;;  %v10113_v56 = vld [vmem:[%s20204_s5 + $0x310] sm:$0xff] }
  0xf1   : > { %1503 = vmatmul.mubr.f32.gmra.mxu0 %v13417_v57  ;;  %1592 = vmatmul.mubr.f32.gmra.mxu1 %v13417_v57 }
  0xf2   : > { %1711 = vmatprep.subr.mxu0 %v10164_v58  ;;  %1800 = vmatprep.subr.mxu1 %v10166_v59  ;;  %v10204_v58 = vld [vmem:[%s20204_s5 + $0x5e8] sm:$0xff]  ;;  %v10206_v59 = vld [vmem:[%s20204_s5 + $0x5f8] sm:$0xff] }
  0xf3   : > { %1712 = vmatpush1.msra.mxu0 %v10163_v61  ;;  %1801 = vmatpush1.msra.mxu1 %v10165_v62  ;;  %v10203_v61 = vld [vmem:[%s20204_s5 + $0x5e0] sm:$0xff]  ;;  %v10205_v62 = vld [vmem:[%s20204_s5 + $0x5f0] sm:$0xff] }
  0xf4   : > { %1713 = vmatprep.subr.mxu0 %v10160_v0  ;;  %1802 = vmatprep.subr.mxu1 %v10162_v1  ;;  %v10200_v0 = vld [vmem:[%s20204_s5 + $0x5c8] sm:$0xff]  ;;  %v10202_v1 = vld [vmem:[%s20204_s5 + $0x5d8] sm:$0xff] }
  0xf5   : > { %10105 = vmatprep.mubr.msk.f32.mxu0 %vm815_vm0, %v13444_v2  ;;  %10109 = vmatprep.mubr.msk.f32.mxu1 %vm815_vm0, %v13444_v2 }
  0xf6   : > { %1714 = vmatpush1.msra.mxu0 %v10159_v3  ;;  %1803 = vmatpush1.msra.mxu1 %v10161_v4  ;;  %v10199_v3 = vld [vmem:[%s20204_s5 + $0x5c0] sm:$0xff]  ;;  %v10201_v4 = vld [vmem:[%s20204_s5 + $0x5d0] sm:$0xff] }
  0xf7   : > { %1509 = vmatmul.mubr.f32.gmra.mxu0 %v13453_v5  ;;  %1598 = vmatmul.mubr.f32.gmra.mxu1 %v13453_v5 }
  0xf8   : > { %1715 = vmatprep.subr.mxu0 %v10156_v6  ;;  %1804 = vmatprep.subr.mxu1 %v10158_v7  ;;  %v10196_v6 = vld [vmem:[%s20204_s5 + $0x5a8] sm:$0xff]  ;;  %v10198_v7 = vld [vmem:[%s20204_s5 + $0x5b8] sm:$0xff] }
  0xf9   : > { %1716 = vmatpush1.msra.mxu0 %v10155_v8  ;;  %1805 = vmatpush1.msra.mxu1 %v10157_v9  ;;  %v10195_v8 = vld [vmem:[%s20204_s5 + $0x5a0] sm:$0xff]  ;;  %v10197_v9 = vld [vmem:[%s20204_s5 + $0x5b0] sm:$0xff] }
  0xfa   : > { %1717 = vmatprep.subr.mxu0 %v10152_v10  ;;  %1806 = vmatprep.subr.mxu1 %v10154_v11  ;;  %v10192_v10 = vld [vmem:[%s20204_s5 + $0x588] sm:$0xff]  ;;  %v10194_v11 = vld [vmem:[%s20204_s5 + $0x598] sm:$0xff] }
  0xfb   : > { %10106 = vmatprep.mubr.msk.f32.mxu0 %vm815_vm0, %v13480_v12  ;;  %10110 = vmatprep.mubr.msk.f32.mxu1 %vm815_vm0, %v13480_v12 }
  0xfc   : > { %1718 = vmatpush1.msra.mxu0 %v10151_v13  ;;  %1807 = vmatpush1.msra.mxu1 %v10153_v14  ;;  %v10191_v13 = vld [vmem:[%s20204_s5 + $0x580] sm:$0xff]  ;;  %v10193_v14 = vld [vmem:[%s20204_s5 + $0x590] sm:$0xff] }
  0xfd   : > { %1515 = vmatmul.mubr.f32.gmra.mxu0 %v13489_v15  ;;  %1604 = vmatmul.mubr.f32.gmra.mxu1 %v13489_v15 }
  0xfe   : > { %1719 = vmatprep.subr.mxu0 %v10148_v16  ;;  %1808 = vmatprep.subr.mxu1 %v10150_v31  ;;  %v10188_v16 = vld [vmem:[%s20204_s5 + $0x568] sm:$0xff]  ;;  %v10190_v31 = vld [vmem:[%s20204_s5 + $0x578] sm:$0xff] }
  0xff   : > { %1720 = vmatpush1.msra.mxu0 %v10147_v17  ;;  %1809 = vmatpush1.msra.mxu1 %v10149_v18  ;;  %v10187_v17 = vld [vmem:[%s20204_s5 + $0x560] sm:$0xff]  ;;  %v10189_v18 = vld [vmem:[%s20204_s5 + $0x570] sm:$0xff] }
 0x100   : > { %1721 = vmatprep.subr.mxu0 %v10144_v33  ;;  %1810 = vmatprep.subr.mxu1 %v10146_v19  ;;  %v10184_v33 = vld [vmem:[%s20204_s5 + $0x548] sm:$0xff]  ;;  %v10186_v19 = vld [vmem:[%s20204_s5 + $0x558] sm:$0xff] }
 0x101   : > { %1722 = vmatpush1.msra.mxu0 %v10143_v20  ;;  %1811 = vmatpush1.msra.mxu1 %v10145_v21  ;;  %v10183_v20 = vld [vmem:[%s20204_s5 + $0x540] sm:$0xff]  ;;  %v10185_v21 = vld [vmem:[%s20204_s5 + $0x550] sm:$0xff] }
 0x102   : > { %1723 = vmatprep.subr.mxu0 %v10140_v22  ;;  %1812 = vmatprep.subr.mxu1 %v10142_v23  ;;  %v10180_v22 = vld [vmem:[%s20204_s5 + $0x528] sm:$0xff]  ;;  %v10182_v23 = vld [vmem:[%s20204_s5 + $0x538] sm:$0xff] }
 0x103   : > { %1724 = vmatpush1.msra.mxu0 %v10139_v24  ;;  %1813 = vmatpush1.msra.mxu1 %v10141_v25  ;;  %v10179_v24 = vld [vmem:[%s20204_s5 + $0x520] sm:$0xff]  ;;  %v10181_v25 = vld [vmem:[%s20204_s5 + $0x530] sm:$0xff] }
 0x104   : > { %1725 = vmatprep.subr.mxu0 %v10136_v26  ;;  %1814 = vmatprep.subr.mxu1 %v10138_v40  ;;  %v10176_v26 = vld [vmem:[%s20204_s5 + $0x508] sm:$0xff]  ;;  %v10178_v40 = vld [vmem:[%s20204_s5 + $0x518] sm:$0xff] }
 0x105   : > { %1726 = vmatpush1.msra.mxu0 %v10135_v27  ;;  %1815 = vmatpush1.msra.mxu1 %v10137_v28  ;;  %v10175_v27 = vld [vmem:[%s20204_s5 + $0x500] sm:$0xff]  ;;  %v10177_v28 = vld [vmem:[%s20204_s5 + $0x510] sm:$0xff] }
 0x106   : > { %1727 = vmatprep.subr.mxu0 %v10132_v43  ;;  %1816 = vmatprep.subr.mxu1 %v10134_v29  ;;  %v10276_v43 = vld [vmem:[%s20202_s27 + $0x7e8] sm:$0xff]  ;;  %v10278_v29 = vld [vmem:[%s20202_s27 + $0x7f8] sm:$0xff] }
 0x107   : > { %1728 = vmatpush1.msra.mxu0 %v10131_v30  ;;  %1817 = vmatpush1.msra.mxu1 %v10133_v32  ;;  %v10275_v30 = vld [vmem:[%s20202_s27 + $0x7e0] sm:$0xff]  ;;  %v10277_v32 = vld [vmem:[%s20202_s27 + $0x7f0] sm:$0xff] }
 0x108   : > { %1729 = vmatprep.subr.mxu0 %v10128_v34  ;;  %1818 = vmatprep.subr.mxu1 %v10130_v50  ;;  %v10272_v34 = vld [vmem:[%s20202_s27 + $0x7c8] sm:$0xff]  ;;  %v10271_v50 = vld [vmem:[%s20202_s27 + $0x7c0] sm:$0xff] }
 0x109   : > { %1730 = vmatpush1.msra.mxu0 %v10127_v35  ;;  %1819 = vmatpush1.msra.mxu1 %v10129_v36  ;;  %v10268_v35 = vld [vmem:[%s20202_s27 + $0x7a8] sm:$0xff]  ;;  %v10270_v36 = vld [vmem:[%s20202_s27 + $0x7b8] sm:$0xff] }
 0x10a   : > { %1731 = vmatprep.subr.mxu0 %v10124_v53  ;;  %1820 = vmatprep.subr.mxu1 %v10126_v37  ;;  %v10267_v53 = vld [vmem:[%s20202_s27 + $0x7a0] sm:$0xff]  ;;  %v10269_v37 = vld [vmem:[%s20202_s27 + $0x7b0] sm:$0xff] }
 0x10b   : > { %1732 = vmatpush1.msra.mxu0 %v10123_v38  ;;  %1821 = vmatpush1.msra.mxu1 %v10125_v39  ;;  %v10266_v38 = vld [vmem:[%s20202_s27 + $0x798] sm:$0xff]  ;;  %v10263_v39 = vld [vmem:[%s20202_s27 + $0x780] sm:$0xff] }
 0x10c   : > { %1733 = vmatprep.subr.mxu0 %v10120_v41  ;;  %1822 = vmatprep.subr.mxu1 %v10122_v60  ;;  %v10260_v41 = vld [vmem:[%s20202_s27 + $0x768] sm:$0xff]  ;;  %v10262_v60 = vld [vmem:[%s20202_s27 + $0x778] sm:$0xff] }
 0x10d   : > { %1734 = vmatpush1.msra.mxu0 %v10119_v42  ;;  %1823 = vmatpush1.msra.mxu1 %v10121_v45  ;;  %v10259_v42 = vld [vmem:[%s20202_s27 + $0x760] sm:$0xff]  ;;  %v10261_v45 = vld [vmem:[%s20202_s27 + $0x770] sm:$0xff] }
 0x10e   : > { %1735 = vmatprep.subr.mxu0 %v10116_v63  ;;  %1824 = vmatprep.subr.mxu1 %v10118_v47  ;;  %v10258_v63 = vld [vmem:[%s20202_s27 + $0x758] sm:$0xff]  ;;  %v10255_v47 = vld [vmem:[%s20202_s27 + $0x740] sm:$0xff] }
 0x10f   : > { %1736 = vmatpush1.msra.mxu0 %v10115_v48  ;;  %1825 = vmatpush1.msra.mxu1 %v10117_v49  ;;  %v10252_v48 = vld [vmem:[%s20202_s27 + $0x728] sm:$0xff]  ;;  %v10254_v49 = vld [vmem:[%s20202_s27 + $0x738] sm:$0xff] }
 0x110   : > { %1737 = vmatprep.subr.mxu0 %v10112_v51  ;;  %1826 = vmatprep.subr.mxu1 %v10114_v52  ;;  %v10251_v51 = vld [vmem:[%s20202_s27 + $0x720] sm:$0xff]  ;;  %v10253_v52 = vld [vmem:[%s20202_s27 + $0x730] sm:$0xff] }
 0x111   : > { %1738 = vmatpush1.msra.mxu0 %v10111_v55  ;;  %1827 = vmatpush1.msra.mxu1 %v10113_v56  ;;  %v10250_v55 = vld [vmem:[%s20202_s27 + $0x718] sm:$0xff]  ;;  %v10247_v56 = vld [vmem:[%s20202_s27 + $0x700] sm:$0xff] }
 0x112   : > { %1755 = vmatprep.subr.mxu0 %v10204_v58  ;;  %1844 = vmatprep.subr.mxu1 %v10206_v59  ;;  %v10249_v58 = vld [vmem:[%s20202_s27 + $0x710] sm:$0xff]  ;;  %v10246_v59 = vld [vmem:[%s20202_s27 + $0x6f8] sm:$0xff] }
 0x113   : > { %1756 = vmatpush2.msra.mxu0 %v10203_v61  ;;  %1845 = vmatpush2.msra.mxu1 %v10205_v62  ;;  %v10243_v61 = vld [vmem:[%s20202_s27 + $0x6e0] sm:$0xff]  ;;  %v10245_v62 = vld [vmem:[%s20202_s27 + $0x6f0] sm:$0xff] }
 0x114   : > { %1757 = vmatprep.subr.mxu0 %v10200_v0  ;;  %1846 = vmatprep.subr.mxu1 %v10202_v1  ;;  %v10240_v0 = vld [vmem:[%s20202_s27 + $0x6c8] sm:$0xff]  ;;  %v10242_v1 = vld [vmem:[%s20202_s27 + $0x6d8] sm:$0xff] }
 0x115   : > { %1758 = vmatpush2.msra.mxu0 %v10199_v3  ;;  %1847 = vmatpush2.msra.mxu1 %v10201_v4  ;;  %v10239_v3 = vld [vmem:[%s20202_s27 + $0x6c0] sm:$0xff]  ;;  %v10241_v4 = vld [vmem:[%s20202_s27 + $0x6d0] sm:$0xff] }
 0x116   : > { %1759 = vmatprep.subr.mxu0 %v10196_v6  ;;  %1848 = vmatprep.subr.mxu1 %v10198_v7  ;;  %v10236_v6 = vld [vmem:[%s20202_s27 + $0x6a8] sm:$0xff]  ;;  %v10238_v7 = vld [vmem:[%s20202_s27 + $0x6b8] sm:$0xff] }
 0x117   : > { %1760 = vmatpush2.msra.mxu0 %v10195_v8  ;;  %1849 = vmatpush2.msra.mxu1 %v10197_v9  ;;  %v10235_v8 = vld [vmem:[%s20202_s27 + $0x6a0] sm:$0xff]  ;;  %v10237_v9 = vld [vmem:[%s20202_s27 + $0x6b0] sm:$0xff] }
 0x118   : > { %1761 = vmatprep.subr.mxu0 %v10192_v10  ;;  %1850 = vmatprep.subr.mxu1 %v10194_v11  ;;  %v10232_v11 = vld [vmem:[%s20202_s27 + $0x688] sm:$0xff] }
 0x119   : > { %1762 = vmatpush2.msra.mxu0 %v10191_v13  ;;  %1851 = vmatpush2.msra.mxu1 %v10193_v14  ;;  %v10234_v13 = vld [vmem:[%s20202_s27 + $0x698] sm:$0xff]  ;;  %v10231_v14 = vld [vmem:[%s20202_s27 + $0x680] sm:$0xff] }
 0x11a   : > { %1763 = vmatprep.subr.mxu0 %v10188_v16  ;;  %1852 = vmatprep.subr.mxu1 %v10190_v31  ;;  %v10233_v16 = vld [vmem:[%s20202_s27 + $0x690] sm:$0xff] }
 0x11b   : > { %1764 = vmatpush2.msra.mxu0 %v10187_v17  ;;  %1853 = vmatpush2.msra.mxu1 %v10189_v18  ;;  %v10228_v17 = vld [vmem:[%s20202_s27 + $0x668] sm:$0xff]  ;;  %v10230_v18 = vld [vmem:[%s20202_s27 + $0x678] sm:$0xff] }
 0x11c   : > { %1765 = vmatprep.subr.mxu0 %v10184_v33  ;;  %1854 = vmatprep.subr.mxu1 %v10186_v19  ;;  %v10227_v33 = vld [vmem:[%s20202_s27 + $0x660] sm:$0xff]  ;;  %v10229_v19 = vld [vmem:[%s20202_s27 + $0x670] sm:$0xff] }
 0x11d   : > { %1766 = vmatpush2.msra.mxu0 %v10183_v20  ;;  %1855 = vmatpush2.msra.mxu1 %v10185_v21  ;;  %v10224_v20 = vld [vmem:[%s20202_s27 + $0x648] sm:$0xff]  ;;  %v10226_v21 = vld [vmem:[%s20202_s27 + $0x658] sm:$0xff] }
 0x11e   : > { %1767 = vmatprep.subr.mxu0 %v10180_v22  ;;  %1856 = vmatprep.subr.mxu1 %v10182_v23  ;;  %v10223_v22 = vld [vmem:[%s20202_s27 + $0x640] sm:$0xff]  ;;  %v10225_v23 = vld [vmem:[%s20202_s27 + $0x650] sm:$0xff] }
 0x11f   : > { %1768 = vmatpush2.msra.mxu0 %v10179_v24  ;;  %1857 = vmatpush2.msra.mxu1 %v10181_v25  ;;  %v10220_v24 = vld [vmem:[%s20202_s27 + $0x628] sm:$0xff]  ;;  %v10222_v25 = vld [vmem:[%s20202_s27 + $0x638] sm:$0xff] }
 0x120   : > { %1769 = vmatprep.subr.mxu0 %v10176_v26  ;;  %1858 = vmatprep.subr.mxu1 %v10178_v40  ;;  %v10219_v26 = vld [vmem:[%s20202_s27 + $0x620] sm:$0xff]  ;;  %v10221_v40 = vld [vmem:[%s20202_s27 + $0x630] sm:$0xff] }
 0x121   : > { %1770 = vmatpush2.msra.mxu0 %v10175_v27  ;;  %10207 = vmatprep.mubr.msk.f32.mxu0 %vm815_vm0, %v13375_v44  ;;  %v10216_v27 = vld [vmem:[%s20202_s27 + $0x608] sm:$0xff] }
 0x122   : > { %1859 = vmatpush2.msra.mxu1 %v10177_v28  ;;  %10211 = vmatprep.mubr.msk.f32.mxu1 %vm815_vm0, %v13375_v44  ;;  %v10274_v44 = vld [vmem:[%s20202_s27 + $0x7d8] sm:$0xff] }
 0x123   : > { %1772 = vmatmul.mubr.f32.vlgmr.msra.gmra.mxu0 %v13381_v46  ;;  %1861 = vmatmul.mubr.f32.vlgmr.msra.gmra.mxu1 %v13381_v46  ;;  %v10273_v46 = vld [vmem:[%s20202_s27 + $0x7d0] sm:$0xff]  ;;  %v10218_v28 = vld [vmem:[%s20202_s27 + $0x618] sm:$0xff] }
 0x124   : > { %2121 = vmatprep.subr.mxu0 %v10276_v43  ;;  %2210 = vmatprep.subr.mxu1 %v10278_v29  ;;  %v10215_v43 = vld [vmem:[%s20202_s27 + $0x600] sm:$0xff]  ;;  %v10217_v29 = vld [vmem:[%s20202_s27 + $0x610] sm:$0xff] }
 0x125   : > { %2122 = vmatpush1.msra.mxu0 %v10275_v30  ;;  %2211 = vmatpush1.msra.mxu1 %v10277_v32  ;;  %v10308_v30 = vld [vmem:[%s20202_s27 + $0x8e8] sm:$0xff]  ;;  %v10310_v32 = vld [vmem:[%s20202_s27 + $0x8f8] sm:$0xff] }
 0x126   : > { %2123 = vmatprep.subr.mxu0 %v10272_v34  ;;  %2212 = vmatprep.subr.mxu1 %v10274_v44  ;;  %v10307_v34 = vld [vmem:[%s20202_s27 + $0x8e0] sm:$0xff]  ;;  %v10309_v44 = vld [vmem:[%s20202_s27 + $0x8f0] sm:$0xff] }
 0x127   : > { %10208 = vmatprep.mubr.msk.f32.mxu0 %vm815_vm0, %v13408_v54  ;;  %10212 = vmatprep.mubr.msk.f32.mxu1 %vm815_vm0, %v13408_v54  ;;  %v10264_v54 = vld [vmem:[%s20202_s27 + $0x788] sm:$0xff] }
 0x128   : > { %2124 = vmatpush1.msra.mxu0 %v10271_v50  ;;  %2213 = vmatpush1.msra.mxu1 %v10273_v46  ;;  %v10304_v50 = vld [vmem:[%s20202_s27 + $0x8c8] sm:$0xff]  ;;  %v10306_v46 = vld [vmem:[%s20202_s27 + $0x8d8] sm:$0xff] }
 0x129   : > { %1778 = vmatmul.mubr.f32.gmra.mxu0 %v13417_v57  ;;  %1867 = vmatmul.mubr.f32.gmra.mxu1 %v13417_v57  ;;  %v10265_v57 = vld [vmem:[%s20202_s27 + $0x790] sm:$0xff] }
 0x12a   : > { %2125 = vmatprep.subr.mxu0 %v10268_v35  ;;  %2214 = vmatprep.subr.mxu1 %v10270_v36  ;;  %v10303_v35 = vld [vmem:[%s20202_s27 + $0x8c0] sm:$0xff]  ;;  %v10305_v36 = vld [vmem:[%s20202_s27 + $0x8d0] sm:$0xff] }
 0x12b   : > { %2126 = vmatpush1.msra.mxu0 %v10267_v53  ;;  %2215 = vmatpush1.msra.mxu1 %v10269_v37  ;;  %v10300_v53 = vld [vmem:[%s20202_s27 + $0x8a8] sm:$0xff]  ;;  %v10302_v37 = vld [vmem:[%s20202_s27 + $0x8b8] sm:$0xff] }
 0x12c   : > { %2127 = vmatprep.subr.mxu0 %v10264_v54  ;;  %2216 = vmatprep.subr.mxu1 %v10266_v38  ;;  %v10299_v54 = vld [vmem:[%s20202_s27 + $0x8a0] sm:$0xff]  ;;  %v10301_v38 = vld [vmem:[%s20202_s27 + $0x8b0] sm:$0xff] }
 0x12d   : > { %10209 = vmatprep.mubr.msk.f32.mxu0 %vm815_vm0, %v13444_v2  ;;  %10213 = vmatprep.mubr.msk.f32.mxu1 %vm815_vm0, %v13444_v2  ;;  %v10256_v2 = vld [vmem:[%s20202_s27 + $0x748] sm:$0xff] }
 0x12e   : > { %2128 = vmatpush1.msra.mxu0 %v10263_v39  ;;  %2217 = vmatpush1.msra.mxu1 %v10265_v57  ;;  %v10296_v39 = vld [vmem:[%s20202_s27 + $0x888] sm:$0xff]  ;;  %v10298_v57 = vld [vmem:[%s20202_s27 + $0x898] sm:$0xff] }
 0x12f   : > { %1784 = vmatmul.mubr.f32.gmra.mxu0 %v13453_v5  ;;  %1873 = vmatmul.mubr.f32.gmra.mxu1 %v13453_v5  ;;  %v10257_v5 = vld [vmem:[%s20202_s27 + $0x750] sm:$0xff] }
 0x130   : > { %2129 = vmatprep.subr.mxu0 %v10260_v41  ;;  %2218 = vmatprep.subr.mxu1 %v10262_v60  ;;  %v10295_v41 = vld [vmem:[%s20202_s27 + $0x880] sm:$0xff]  ;;  %v10297_v60 = vld [vmem:[%s20202_s27 + $0x890] sm:$0xff] }
 0x131   : > { %2130 = vmatpush1.msra.mxu0 %v10259_v42  ;;  %2219 = vmatpush1.msra.mxu1 %v10261_v45  ;;  %v10292_v42 = vld [vmem:[%s20202_s27 + $0x868] sm:$0xff]  ;;  %v10294_v45 = vld [vmem:[%s20202_s27 + $0x878] sm:$0xff] }
 0x132   : > { %2131 = vmatprep.subr.mxu0 %v10256_v2  ;;  %2220 = vmatprep.subr.mxu1 %v10258_v63  ;;  %v1982_v2 = vld [vmem:[%s12709_s30 + $0x8] sm:$0xfe]  ;;  %v13988_v63 = vld [vmem:[%s12709_s30 + $0x18] sm:$0xff] }
 0x133   : > { %10210 = vmatprep.mubr.msk.f32.mxu0 %vm815_vm0, %v13480_v12  ;;  %10214 = vmatprep.mubr.msk.f32.mxu1 %vm815_vm0, %v13480_v12  ;;  %v10248_v12 = vld [vmem:[%s20202_s27 + $0x708] sm:$0xff] }
 0x134   : > { %2132 = vmatpush1.msra.mxu0 %v10255_v47  ;;  %2221 = vmatpush1.msra.mxu1 %v10257_v5  ;;  %v10291_v47 = vld [vmem:[%s20202_s27 + $0x860] sm:$0xff]  ;;  %v10293_v5 = vld [vmem:[%s20202_s27 + $0x870] sm:$0xff] }
 0x135   : > { %1790 = vmatmul.mubr.f32.gmra.mxu0 %v13489_v15  ;;  %1879 = vmatmul.mubr.f32.gmra.mxu1 %v13489_v15  ;;  %v10244_v15 = vld [vmem:[%s20202_s27 + $0x6e8] sm:$0xff] }
 0x136   : > { %2133 = vmatprep.subr.mxu0 %v10252_v48  ;;  %2222 = vmatprep.subr.mxu1 %v10254_v49  ;;  %v10288_v48 = vld [vmem:[%s20202_s27 + $0x848] sm:$0xff]  ;;  %v10290_v49 = vld [vmem:[%s20202_s27 + $0x858] sm:$0xff] }
 0x137   : > { %2134 = vmatpush1.msra.mxu0 %v10251_v51  ;;  %2223 = vmatpush1.msra.mxu1 %v10253_v52  ;;  %v1981_v51 = vld [vmem:[%s12709_s30] sm:$0xfe]  ;;  %v14004_v52 = vld [vmem:[%s12709_s30 + $0x10] sm:$0xff] }
 0x138   : > { %2135 = vmatprep.subr.mxu0 %v10248_v12  ;;  %2224 = vmatprep.subr.mxu1 %v10250_v55  ;;  %v10287_v12 = vld [vmem:[%s20202_s27 + $0x840] sm:$0xff]  ;;  %v10289_v55 = vld [vmem:[%s20202_s27 + $0x850] sm:$0xff] }
 0x139   : > { %2136 = vmatpush1.msra.mxu0 %v10247_v56  ;;  %2225 = vmatpush1.msra.mxu1 %v10249_v58  ;;  %v2098_v56 = vrot.slane %v1982_v2, 1  ;;  %v2099_v58 = vrot.slane %v13988_v63, 1  ;;  %v10360_v2 = vld [vmem:[%s20204_s5 + $0x748] sm:$0xff]  ;;  %v10362_v63 = vld [vmem:[%s20204_s5 + $0x758] sm:$0xff] }
 0x13a   : > { %2137 = vmatprep.subr.mxu0 %v10244_v15  ;;  %2226 = vmatprep.subr.mxu1 %v10246_v59  ;;  %v10284_v15 = vld [vmem:[%s20202_s27 + $0x828] sm:$0xff]  ;;  %v10286_v59 = vld [vmem:[%s20202_s27 + $0x838] sm:$0xff] }
 0x13b   : > { %2138 = vmatpush1.msra.mxu0 %v10243_v61  ;;  %2227 = vmatpush1.msra.mxu1 %v10245_v62  ;;  %v10283_v61 = vld [vmem:[%s20202_s27 + $0x820] sm:$0xff]  ;;  %v10285_v62 = vld [vmem:[%s20202_s27 + $0x830] sm:$0xff] }
 0x13c   : > { %2139 = vmatprep.subr.mxu0 %v10240_v0  ;;  %2228 = vmatprep.subr.mxu1 %v10242_v1  ;;  %v13869_v10 = vpop.f32.mrf.mxu1  ;;  %v2095_v0 = vrot.slane %v1981_v51, 1  ;;  %v2096_v1 = vrot.slane %v14004_v52, 1  ;;  %v10356_v52 = vld [vmem:[%s20204_s5 + $0x728] sm:$0xff] }
 0x13d   : > { %2140 = vmatpush1.msra.mxu0 %v10239_v3  ;;  %2229 = vmatpush1.msra.mxu1 %v10241_v4  ;;  %v10280_v3 = vld [vmem:[%s20202_s27 + $0x808] sm:$0xff]  ;;  %v10282_v4 = vld [vmem:[%s20202_s27 + $0x818] sm:$0xff] }
 0x13e   : > { %2141 = vmatprep.subr.mxu0 %v10236_v6  ;;  %2230 = vmatprep.subr.mxu1 %v10238_v7  ;;  %v985_v31 = vpop.f32.mrf.mxu1  ;;  %v1986_v6 = vld [vmem:[%s12709_s30 + $0x28] sm:$0xff]  ;;  %v10279_v7 = vld [vmem:[%s20202_s27 + $0x800] sm:$0xff] }
 0x13f   : > { %2142 = vmatpush1.msra.mxu0 %v10235_v8  ;;  %2231 = vmatpush1.msra.mxu1 %v10237_v9  ;;  %1284 = vst.msk [vmem:[#allocation2 + $0x18] sm:$0xff] %vm1283_vm1, %v985_v31  ;;  %v14037_v8 = vsel %vm2094_vm2, %v2098_v56, %v2099_v58  ;;  %v10281_v9 = vld [vmem:[%s20202_s27 + $0x810] sm:$0xff]  ;;  %v10380_v31 = vld [vmem:[%s20204_s5 + $0x7e8] sm:$0xff]  ;;  %v10355_v56 = vld [vmem:[%s20204_s5 + $0x720] sm:$0xff] }
 0x140   : > { %2143 = vmatprep.subr.mxu0 %v10232_v11  ;;  %2232 = vmatprep.subr.mxu1 %v10234_v13  ;;  %v1985_v11 = vld [vmem:[%s12709_s30 + $0x20] sm:$0xff]  ;;  %v14044_v13 = vsel %vm2094_vm2, %v2095_v0, %v2096_v1  ;;  %v10353_v0 = vld [vmem:[%s20204_s5 + $0x710] sm:$0xff] }
 0x141   : > { %2144 = vmatpush1.msra.mxu0 %v10231_v14  ;;  %2233 = vmatpush1.msra.mxu1 %v10233_v16  ;;  %v2103_v14 = vrot.slane %v1986_v6, 1  ;;  %v14048_v16 = vpop.f32.mrf.mxu0  ;;  %v10347_v6 = vld [vmem:[%s20204_s5 + $0x6e0] sm:$0xff] }
 0x142   : > { %2145 = vmatprep.subr.mxu0 %v10228_v17  ;;  %2234 = vmatprep.subr.mxu1 %v10230_v18  ;;  %v10382_v17 = vld [vmem:[%s20204_s5 + $0x7f8] sm:$0xff]  ;;  %v10379_v18 = vld [vmem:[%s20204_s5 + $0x7e0] sm:$0xff] }
 0x143   : > { %2146 = vmatpush1.msra.mxu0 %v10227_v33  ;;  %2235 = vmatpush1.msra.mxu1 %v10229_v19  ;;  %v10381_v33 = vld [vmem:[%s20204_s5 + $0x7f0] sm:$0xff]  ;;  %v2101_v19 = vrot.slane %v1985_v11, 1  ;;  %v10344_v11 = vld [vmem:[%s20204_s5 + $0x6c8] sm:$0xff] }
 0x144   : > { %2147 = vmatprep.subr.mxu0 %v10224_v20  ;;  %2236 = vmatprep.subr.mxu1 %v10226_v21  ;;  %v10376_v20 = vld [vmem:[%s20204_s5 + $0x7c8] sm:$0xff]  ;;  %v10378_v21 = vld [vmem:[%s20204_s5 + $0x7d8] sm:$0xff] }
 0x145   : > { %2148 = vmatpush1.msra.mxu0 %v10223_v22  ;;  %2237 = vmatpush1.msra.mxu1 %v10225_v23  ;;  %v1988_v22 = vld [vmem:[%s12709_s30 + $0x38] sm:$0x7f]  ;;  %v14074_v23 = vsel %vm2094_vm2, %v2099_v58, %v2103_v14  ;;  %v10357_v58 = vld [vmem:[%s20204_s5 + $0x730] sm:$0xff] }
 0x146   : > { %2149 = vmatprep.subr.mxu0 %v10220_v24  ;;  %2238 = vmatprep.subr.mxu1 %v10222_v25  ;;  %v14076_v24 = vpop.f32.mrf.mxu0  ;;  %v10375_v25 = vld [vmem:[%s20204_s5 + $0x7c0] sm:$0xff] }
 0x147   : > { %2150 = vmatpush1.msra.mxu0 %v10219_v26  ;;  %2239 = vmatpush1.msra.mxu1 %v10221_v40  ;;  %v10377_v26 = vld [vmem:[%s20204_s5 + $0x7d0] sm:$0xff] }
 0x148   : > { %2151 = vmatprep.subr.mxu0 %v10216_v27  ;;  %2240 = vmatprep.subr.mxu1 %v10218_v28  ;;  %v1987_v40 = vld [vmem:[%s12709_s30 + $0x30] sm:$0x7f]  ;;  %v14086_v27 = vsel %vm2094_vm2, %v2096_v1, %v2101_v19  ;;  %v14088_v28 = vrot.slane %v1988_v22, 1 }
 0x149   : > { %2152 = vmatpush1.msra.mxu0 %v10215_v43  ;;  %2241 = vmatpush1.msra.mxu1 %v10217_v29  ;;  %v10372_v43 = vld [vmem:[%s20204_s5 + $0x7a8] sm:$0xff]  ;;  %v10374_v29 = vld [vmem:[%s20204_s5 + $0x7b8] sm:$0xff] }
 0x14a   : > { %2169 = vmatprep.subr.mxu0 %v10308_v30  ;;  %2258 = vmatprep.subr.mxu1 %v10310_v32  ;;  %v10371_v32 = vld [vmem:[%s20204_s5 + $0x7a0] sm:$0xff] }
 0x14b   : > { %2170 = vmatpush2.msra.mxu0 %v10307_v34  ;;  %2259 = vmatpush2.msra.mxu1 %v10309_v44  ;;  %v10373_v34 = vld [vmem:[%s20204_s5 + $0x7b0] sm:$0xff]  ;;  %v14108_v44 = vrot.slane %v1987_v40, 1  ;;  %v10338_v40 = vld [vmem:[%s20204_s5 + $0x698] sm:$0xff] }
 0x14c   : > { %2171 = vmatprep.subr.mxu0 %v10304_v50  ;;  %2260 = vmatprep.subr.mxu1 %v10306_v46  ;;  %v10368_v50 = vld [vmem:[%s20204_s5 + $0x788] sm:$0xff]  ;;  %v10370_v46 = vld [vmem:[%s20204_s5 + $0x798] sm:$0xff] }
 0x14d   : > { %2172 = vmatpush2.msra.mxu0 %v10303_v35  ;;  %2261 = vmatpush2.msra.mxu1 %v10305_v36  ;;  %v14122_v36 = vsel %vm2094_vm2, %v2103_v14, %v14088_v28  ;;  %v10346_v14 = vld [vmem:[%s20204_s5 + $0x6d8] sm:$0xff] }
 0x14e   : > { %2173 = vmatprep.subr.mxu0 %v10300_v53  ;;  %2262 = vmatprep.subr.mxu1 %v10302_v37  ;;  %v10367_v37 = vld [vmem:[%s20204_s5 + $0x780] sm:$0xff] }
 0x14f   : > { %2174 = vmatpush2.msra.mxu0 %v10299_v54  ;;  %2263 = vmatpush2.msra.mxu1 %v10301_v38  ;;  %v10369_v54 = vld [vmem:[%s20204_s5 + $0x790] sm:$0xff]  ;;  %v14134_v38 = vsel %vm2094_vm2, %v2101_v19, %v14108_v44  ;;  %v10342_v19 = vld [vmem:[%s20204_s5 + $0x6b8] sm:$0xff] }
 0x150   : > { %2175 = vmatprep.subr.mxu0 %v10296_v39  ;;  %2264 = vmatprep.subr.mxu1 %v10298_v57  ;;  %v10364_v57 = vld [vmem:[%s20204_s5 + $0x768] sm:$0xff] }
 0x151   : > { %2176 = vmatpush2.msra.mxu0 %v10295_v41  ;;  %2265 = vmatpush2.msra.mxu1 %v10297_v60  ;;  %v10366_v41 = vld [vmem:[%s20204_s5 + $0x778] sm:$0xff] }
 0x152   : > { %2177 = vmatprep.subr.mxu0 %v10292_v42  ;;  %2266 = vmatprep.subr.mxu1 %v10294_v45  ;;  %v10363_v42 = vld [vmem:[%s20204_s5 + $0x760] sm:$0xff]  ;;  %v10365_v45 = vld [vmem:[%s20204_s5 + $0x770] sm:$0xff] }
 0x153   : > { %2178 = vmatpush2.msra.mxu0 %v10291_v47  ;;  %2267 = vmatpush2.msra.mxu1 %v10293_v5 }
 0x154   : > { %2179 = vmatprep.subr.mxu0 %v10288_v48  ;;  %2268 = vmatprep.subr.mxu1 %v10290_v49  ;;  %v10359_v48 = vld [vmem:[%s20204_s5 + $0x740] sm:$0xff]  ;;  %v10361_v49 = vld [vmem:[%s20204_s5 + $0x750] sm:$0xff] }
 0x155   : > { %2180 = vmatpush2.msra.mxu0 %v10287_v12  ;;  %2269 = vmatpush2.msra.mxu1 %v10289_v55  ;;  %v10358_v12 = vld [vmem:[%s20204_s5 + $0x738] sm:$0xff] }
 0x156   : > { %2181 = vmatprep.subr.mxu0 %v10284_v15  ;;  %2270 = vmatprep.subr.mxu1 %v10286_v59  ;;  %v10352_v15 = vld [vmem:[%s20204_s5 + $0x708] sm:$0xff]  ;;  %v10354_v59 = vld [vmem:[%s20204_s5 + $0x718] sm:$0xff] }
 0x157   : > { %2182 = vmatpush2.msra.mxu0 %v10283_v61  ;;  %2271 = vmatpush2.msra.mxu1 %v10285_v62  ;;  %v10351_v62 = vld [vmem:[%s20204_s5 + $0x700] sm:$0xff] }
 0x158   : > { %2183 = vmatprep.subr.mxu0 %v10280_v3  ;;  %2272 = vmatprep.subr.mxu1 %v10282_v4  ;;  %v10348_v3 = vld [vmem:[%s20204_s5 + $0x6e8] sm:$0xff]  ;;  %v10350_v4 = vld [vmem:[%s20204_s5 + $0x6f8] sm:$0xff] }
 0x159   : > { %2184 = vmatpush2.msra.mxu0 %v10279_v7  ;;  %10311 = vmatprep.mubr.msk.f32.mxu0 %vm815_vm0, %v14037_v8  ;;  %v10349_v7 = vld [vmem:[%s20204_s5 + $0x6f0] sm:$0xff] }
 0x15a   : > { %2273 = vmatpush2.msra.mxu1 %v10281_v9  ;;  %10315 = vmatprep.mubr.msk.f32.mxu1 %vm815_vm0, %v14037_v8 }
 0x15b   : > { %2186 = vmatmul.mubr.f32.vlgmr.msra.gmra.mxu0 %v14044_v13  ;;  %2275 = vmatmul.mubr.f32.vlgmr.msra.gmra.mxu1 %v14044_v13 }
 0x15c   : > { %2396 = vmatprep.subr.mxu0 %v10380_v31  ;;  %2485 = vmatprep.subr.mxu1 %v10382_v17  ;;  %v10343_v31 = vld [vmem:[%s20204_s5 + $0x6c0] sm:$0xff]  ;;  %v10345_v17 = vld [vmem:[%s20204_s5 + $0x6d0] sm:$0xff] }
 0x15d   : > { %2397 = vmatpush1.msra.mxu0 %v10379_v18  ;;  %2486 = vmatpush1.msra.mxu1 %v10381_v33  ;;  %v10340_v33 = vld [vmem:[%s20204_s5 + $0x6a8] sm:$0xff] }
 0x15e   : > { %2398 = vmatprep.subr.mxu0 %v10376_v20  ;;  %2487 = vmatprep.subr.mxu1 %v10378_v21  ;;  %v10339_v20 = vld [vmem:[%s20204_s5 + $0x6a0] sm:$0xff]  ;;  %v10341_v21 = vld [vmem:[%s20204_s5 + $0x6b0] sm:$0xff] }
 0x15f   : > { %10312 = vmatprep.mubr.msk.f32.mxu0 %vm815_vm0, %v14074_v23  ;;  %10316 = vmatprep.mubr.msk.f32.mxu1 %vm815_vm0, %v14074_v23  ;;  %v14100_v30 = vpop.f32.mrf.mxu0 }
 0x160   : > { %2399 = vmatpush1.msra.mxu0 %v10375_v25  ;;  %2488 = vmatpush1.msra.mxu1 %v10377_v26  ;;  %v10336_v26 = vld [vmem:[%s20204_s5 + $0x688] sm:$0xff] }
 0x161   : > { %2192 = vmatmul.mubr.f32.gmra.mxu0 %v14086_v27  ;;  %2281 = vmatmul.mubr.f32.gmra.mxu1 %v14086_v27  ;;  %v14118_v35 = vpop.f32.mrf.mxu0 }
 0x162   : > { %2400 = vmatprep.subr.mxu0 %v10372_v43  ;;  %2489 = vmatprep.subr.mxu1 %v10374_v29  ;;  %v14124_v53 = vpop.f32.mrf.mxu1  ;;  %v10335_v43 = vld [vmem:[%s20204_s5 + $0x680] sm:$0xff]  ;;  %v10337_v29 = vld [vmem:[%s20204_s5 + $0x690] sm:$0xff] }
 0x163   : > { %2401 = vmatpush1.msra.mxu0 %v10371_v32  ;;  %2490 = vmatpush1.msra.mxu1 %v10373_v34  ;;  %v10332_v34 = vld [vmem:[%s20204_s5 + $0x668] sm:$0xff] }
 0x164   : > { %2402 = vmatprep.subr.mxu0 %v10368_v50  ;;  %2491 = vmatprep.subr.mxu1 %v10370_v46  ;;  %v991_v39 = vpop.f32.mrf.mxu1  ;;  %v10334_v50 = vld [vmem:[%s20204_s5 + $0x678] sm:$0xff]  ;;  %v10331_v46 = vld [vmem:[%s20204_s5 + $0x660] sm:$0xff] }
 0x165   : > { %10313 = vmatprep.mubr.msk.f32.mxu0 %vm815_vm0, %v14122_v36  ;;  %10317 = vmatprep.mubr.msk.f32.mxu1 %vm815_vm0, %v14122_v36  ;;  %v14146_v60 = vpop.f32.mrf.mxu0  ;;  %1288 = vst.msk [vmem:[#allocation2 + $0x38] sm:$0xff] %vm1283_vm1, %v991_v39  ;;  %v10330_v39 = vld [vmem:[%s20204_s5 + $0x658] sm:$0xff] }
 0x166   : > { %2403 = vmatpush1.msra.mxu0 %v10367_v37  ;;  %2492 = vmatpush1.msra.mxu1 %v10369_v54  ;;  %v10333_v37 = vld [vmem:[%s20204_s5 + $0x670] sm:$0xff]  ;;  %v10328_v54 = vld [vmem:[%s20204_s5 + $0x648] sm:$0xff] }
 0x167   : > { %2198 = vmatmul.mubr.f32.gmra.mxu0 %v14134_v38  ;;  %2287 = vmatmul.mubr.f32.gmra.mxu1 %v14134_v38  ;;  %v14163_v47 = vpop.f32.mrf.mxu0 }
 0x168   : > { %2404 = vmatprep.subr.mxu0 %v10364_v57  ;;  %2493 = vmatprep.subr.mxu1 %v10366_v41  ;;  %v14165_v5 = vpop.f32.mrf.mxu1  ;;  %v10327_v57 = vld [vmem:[%s20204_s5 + $0x640] sm:$0xff]  ;;  %v10329_v41 = vld [vmem:[%s20204_s5 + $0x650] sm:$0xff] }
 0x169   : > { %2405 = vmatpush1.msra.mxu0 %v10363_v42  ;;  %2494 = vmatpush1.msra.mxu1 %v10365_v45  ;;  %v10324_v42 = vld [vmem:[%s20204_s5 + $0x628] sm:$0xff]  ;;  %v10326_v45 = vld [vmem:[%s20204_s5 + $0x638] sm:$0xff] }
 0x16a   : > { %2406 = vmatprep.subr.mxu0 %v10360_v2  ;;  %2495 = vmatprep.subr.mxu1 %v10362_v63  ;;  %v997_v51 = vpop.f32.mrf.mxu1  ;;  %v10323_v2 = vld [vmem:[%s20204_s5 + $0x620] sm:$0xff]  ;;  %v10325_v63 = vld [vmem:[%s20204_s5 + $0x630] sm:$0xff] }
 0x16b   : > { %10314 = vmatprep.mubr.msk.f32.mxu0 %vm815_vm0, %v14088_v28  ;;  %10318 = vmatprep.mubr.msk.f32.mxu1 %vm815_vm0, %v14088_v28  ;;  %v912_v55 = vpop.f32.mrf.mxu0  ;;  %1292 = vst.msk [vmem:[#allocation2 + $0x58] sm:$0xff] %vm1283_vm1, %v997_v51  ;;  %v10319_v51 = vld [vmem:[%s20204_s5 + $0x600] sm:$0xff] }
 0x16c   : > { %2407 = vmatpush1.msra.mxu0 %v10359_v48  ;;  %2496 = vmatpush1.msra.mxu1 %v10361_v49  ;;  %1293 = vst [vmem:[#allocation2 + $0x60] sm:$0x3f] %v912_v55  ;;  %v10320_v48 = vld [vmem:[%s20204_s5 + $0x608] sm:$0xff]  ;;  %v10322_v49 = vld [vmem:[%s20204_s5 + $0x618] sm:$0xff] }
 0x16d   : > { %2204 = vmatmul.mubr.f32.gmra.mxu0 %v14108_v44  ;;  %2293 = vmatmul.mubr.f32.gmra.mxu1 %v14108_v44  ;;  %v914_v61 = vpop.f32.mrf.mxu0  ;;  %v10414_v55 = vld [vmem:[%s20204_s5 + $0x8f8] sm:$0xff] }
 0x16e   : > { %2408 = vmatprep.subr.mxu0 %v10356_v52  ;;  %2497 = vmatprep.subr.mxu1 %v10358_v12  ;;  %1294 = vst [vmem:[#allocation2 + $0x68] sm:$0x3f] %v914_v61  ;;  %v1001_v1 = vpop.f32.mrf.mxu1  ;;  %v10321_v52 = vld [vmem:[%s20204_s5 + $0x610] sm:$0xff]  ;;  %v10412_v12 = vld [vmem:[%s20204_s5 + $0x8e8] sm:$0xff]  ;;  %v10407_v61 = vld [vmem:[%s20204_s5 + $0x8c0] sm:$0xff] }
 0x16f   : > { %2409 = vmatpush1.msra.mxu0 %v10355_v56  ;;  %2498 = vmatpush1.msra.mxu1 %v10357_v58  ;;  %1295 = vst [vmem:[#allocation2 + $0x70] sm:$0x3f] %v1001_v1  ;;  %v10411_v56 = vld [vmem:[%s20204_s5 + $0x8e0] sm:$0xff]  ;;  %v10413_v58 = vld [vmem:[%s20204_s5 + $0x8f0] sm:$0xff]  ;;  %v10406_v1 = vld [vmem:[%s20204_s5 + $0x8b8] sm:$0xff] }
 0x170   : > { %2410 = vmatprep.subr.mxu0 %v10352_v15  ;;  %2499 = vmatprep.subr.mxu1 %v10354_v59  ;;  %v1003_v9 = vpop.f32.mrf.mxu1  ;;  %v10408_v15 = vld [vmem:[%s20204_s5 + $0x8c8] sm:$0xff]  ;;  %v10410_v59 = vld [vmem:[%s20204_s5 + $0x8d8] sm:$0xff] }
 0x171   : > { %2411 = vmatpush1.msra.mxu0 %v10351_v62  ;;  %2500 = vmatpush1.msra.mxu1 %v10353_v0  ;;  %1297 = vst.msk [vmem:[#allocation2 + $0x78] sm:$0x3f] %vm1296_vm3, %v1003_v9  ;;  %v10409_v62 = vld [vmem:[%s20204_s5 + $0x8d0] sm:$0xff]  ;;  %v10404_v0 = vld [vmem:[%s20204_s5 + $0x8a8] sm:$0xff]  ;;  %v10399_v9 = vld [vmem:[%s20204_s5 + $0x880] sm:$0xff] }
 0x172   : > { %2412 = vmatprep.subr.mxu0 %v10348_v3  ;;  %2501 = vmatprep.subr.mxu1 %v10350_v4  ;;  %v1168_v18 = vpop.f32.mrf.mxu0  ;;  %v10403_v3 = vld [vmem:[%s20204_s5 + $0x8a0] sm:$0xff]  ;;  %v10405_v4 = vld [vmem:[%s20204_s5 + $0x8b0] sm:$0xff] }
 0x173   : > { %2413 = vmatpush1.msra.mxu0 %v10347_v6  ;;  %2502 = vmatpush1.msra.mxu1 %v10349_v7  ;;  %1298 = vst [vmem:[#allocation3] sm:$0xff] %v1168_v18  ;;  %v10400_v6 = vld [vmem:[%s20204_s5 + $0x888] sm:$0xff]  ;;  %v10402_v7 = vld [vmem:[%s20204_s5 + $0x898] sm:$0xff]  ;;  %v10397_v18 = vld [vmem:[%s20204_s5 + $0x870] sm:$0xff] }
 0x174   : > { %2414 = vmatprep.subr.mxu0 %v10344_v11  ;;  %2503 = vmatprep.subr.mxu1 %v10346_v14  ;;  %v1170_v22 = vpop.f32.mrf.mxu0  ;;  %v14241_v25 = vpop.f32.mrf.mxu1  ;;  %v10401_v11 = vld [vmem:[%s20204_s5 + $0x890] sm:$0xff]  ;;  %v10396_v14 = vld [vmem:[%s20204_s5 + $0x868] sm:$0xff] }
 0x175   : > { %2415 = vmatpush1.msra.mxu0 %v10343_v31  ;;  %2504 = vmatpush1.msra.mxu1 %v10345_v17  ;;  %1299 = vst [vmem:[#allocation3 + $0x8] sm:$0xff] %v1170_v22  ;;  %v10398_v31 = vld [vmem:[%s20204_s5 + $0x878] sm:$0xff]  ;;  %v10395_v17 = vld [vmem:[%s20204_s5 + $0x860] sm:$0xff]  ;;  %v10388_v22 = vld [vmem:[%s20204_s5 + $0x828] sm:$0xff] }
 0x176   : > { %2416 = vmatprep.subr.mxu0 %v10340_v33  ;;  %2505 = vmatprep.subr.mxu1 %v10342_v19  ;;  %v1259_v32 = vpop.f32.mrf.mxu1  ;;  %v10392_v33 = vld [vmem:[%s20204_s5 + $0x848] sm:$0xff]  ;;  %v10394_v19 = vld [vmem:[%s20204_s5 + $0x858] sm:$0xff] }
 0x177   : > { %2417 = vmatpush1.msra.mxu0 %v10339_v20  ;;  %2506 = vmatpush1.msra.mxu1 %v10341_v21  ;;  %1301 = vst.msk [vmem:[#allocation3 + $0x18] sm:$0xff] %vm1283_vm1, %v1259_v32  ;;  %v10391_v20 = vld [vmem:[%s20204_s5 + $0x840] sm:$0xff]  ;;  %v10393_v21 = vld [vmem:[%s20204_s5 + $0x850] sm:$0xff]  ;;  %v10386_v32 = vld [vmem:[%s20204_s5 + $0x818] sm:$0xff] }
 0x178   : > { %2418 = vmatprep.subr.mxu0 %v10336_v26  ;;  %2507 = vmatprep.subr.mxu1 %v10338_v40  ;;  %v10390_v26 = vld [vmem:[%s20204_s5 + $0x838] sm:$0xff]  ;;  %v10387_v40 = vld [vmem:[%s20204_s5 + $0x820] sm:$0xff] }
 0x179   : > { %2419 = vmatpush1.msra.mxu0 %v10335_v43  ;;  %2508 = vmatpush1.msra.mxu1 %v10337_v29  ;;  %v10389_v43 = vld [vmem:[%s20204_s5 + $0x830] sm:$0xff]  ;;  %v10384_v29 = vld [vmem:[%s20204_s5 + $0x808] sm:$0xff] }
 0x17a   : > { %2420 = vmatprep.subr.mxu0 %v10332_v34  ;;  %2509 = vmatprep.subr.mxu1 %v10334_v50  ;;  %v10383_v34 = vld [vmem:[%s20204_s5 + $0x800] sm:$0xff]  ;;  %v10385_v50 = vld [vmem:[%s20204_s5 + $0x810] sm:$0xff] }
 0x17b   : > { %2421 = vmatpush1.msra.mxu0 %v10331_v46  ;;  %2510 = vmatpush1.msra.mxu1 %v10333_v37  ;;  %v10492_v46 = vld [vmem:[%s20202_s27 + $0xae8] sm:$0xff]  ;;  %v10494_v37 = vld [vmem:[%s20202_s27 + $0xaf8] sm:$0xff] }
 0x17c   : > { %2422 = vmatprep.subr.mxu0 %v10328_v54  ;;  %2511 = vmatprep.subr.mxu1 %v10330_v39  ;;  %v10491_v54 = vld [vmem:[%s20202_s27 + $0xae0] sm:$0xff]  ;;  %v10493_v39 = vld [vmem:[%s20202_s27 + $0xaf0] sm:$0xff] }
 0x17d   : > { %2423 = vmatpush1.msra.mxu0 %v10327_v57  ;;  %2512 = vmatpush1.msra.mxu1 %v10329_v41  ;;  %v10488_v57 = vld [vmem:[%s20202_s27 + $0xac8] sm:$0xff]  ;;  %v10487_v41 = vld [vmem:[%s20202_s27 + $0xac0] sm:$0xff] }
 0x17e   : > { %2424 = vmatprep.subr.mxu0 %v10324_v42  ;;  %2513 = vmatprep.subr.mxu1 %v10326_v45  ;;  %v10484_v42 = vld [vmem:[%s20202_s27 + $0xaa8] sm:$0xff]  ;;  %v10486_v45 = vld [vmem:[%s20202_s27 + $0xab8] sm:$0xff] }
 0x17f   : > { %2425 = vmatpush1.msra.mxu0 %v10323_v2  ;;  %2514 = vmatpush1.msra.mxu1 %v10325_v63  ;;  %v10483_v63 = vld [vmem:[%s20202_s27 + $0xaa0] sm:$0xff] }
 0x180   : > { %2426 = vmatprep.subr.mxu0 %v10320_v48  ;;  %2515 = vmatprep.subr.mxu1 %v10322_v49  ;;  %v10480_v48 = vld [vmem:[%s20202_s27 + $0xa88] sm:$0xff]  ;;  %v10482_v49 = vld [vmem:[%s20202_s27 + $0xa98] sm:$0xff] }
 0x181   : > { %2427 = vmatpush1.msra.mxu0 %v10319_v51  ;;  %2516 = vmatpush1.msra.mxu1 %v10321_v52 }
 0x182   : > { %2444 = vmatprep.subr.mxu0 %v10412_v12  ;;  %2533 = vmatprep.subr.mxu1 %v10414_v55  ;;  %v10481_v12 = vld [vmem:[%s20202_s27 + $0xa90] sm:$0xff] }
 0x183   : > { %2445 = vmatpush2.msra.mxu0 %v10411_v56  ;;  %2534 = vmatpush2.msra.mxu1 %v10413_v58  ;;  %v10476_v56 = vld [vmem:[%s20202_s27 + $0xa68] sm:$0xff]  ;;  %v10478_v58 = vld [vmem:[%s20202_s27 + $0xa78] sm:$0xff] }
 0x184   : > { %2446 = vmatprep.subr.mxu0 %v10408_v15  ;;  %2535 = vmatprep.subr.mxu1 %v10410_v59  ;;  %v10475_v59 = vld [vmem:[%s20202_s27 + $0xa60] sm:$0xff] }
 0x185   : > { %2447 = vmatpush2.msra.mxu0 %v10407_v61  ;;  %2536 = vmatpush2.msra.mxu1 %v10409_v62  ;;  %v10472_v61 = vld [vmem:[%s20202_s27 + $0xa48] sm:$0xff]  ;;  %v10474_v62 = vld [vmem:[%s20202_s27 + $0xa58] sm:$0xff] }
 0x186   : > { %2448 = vmatprep.subr.mxu0 %v10404_v0  ;;  %2537 = vmatprep.subr.mxu1 %v10406_v1 }
 0x187   : > { %2449 = vmatpush2.msra.mxu0 %v10403_v3  ;;  %2538 = vmatpush2.msra.mxu1 %v10405_v4  ;;  %v10473_v3 = vld [vmem:[%s20202_s27 + $0xa50] sm:$0xff] }
 0x188   : > { %2450 = vmatprep.subr.mxu0 %v10400_v6  ;;  %2539 = vmatprep.subr.mxu1 %v10402_v7  ;;  %v10468_v6 = vld [vmem:[%s20202_s27 + $0xa28] sm:$0xff]  ;;  %v10470_v7 = vld [vmem:[%s20202_s27 + $0xa38] sm:$0xff] }
 0x189   : > { %2451 = vmatpush2.msra.mxu0 %v10399_v9  ;;  %2540 = vmatpush2.msra.mxu1 %v10401_v11  ;;  %v10467_v11 = vld [vmem:[%s20202_s27 + $0xa20] sm:$0xff] }
 0x18a   : > { %2452 = vmatprep.subr.mxu0 %v10396_v14  ;;  %2541 = vmatprep.subr.mxu1 %v10398_v31  ;;  %v10464_v14 = vld [vmem:[%s20202_s27 + $0xa08] sm:$0xff]  ;;  %v10466_v31 = vld [vmem:[%s20202_s27 + $0xa18] sm:$0xff] }
 0x18b   : > { %2453 = vmatpush2.msra.mxu0 %v10395_v17  ;;  %2542 = vmatpush2.msra.mxu1 %v10397_v18  ;;  %v10463_v18 = vld [vmem:[%s20202_s27 + $0xa00] sm:$0xff] }
 0x18c   : > { %2454 = vmatprep.subr.mxu0 %v10392_v33  ;;  %2543 = vmatprep.subr.mxu1 %v10394_v19  ;;  %v10465_v33 = vld [vmem:[%s20202_s27 + $0xa10] sm:$0xff]  ;;  %v10460_v19 = vld [vmem:[%s20202_s27 + $0x9e8] sm:$0xff] }
 0x18d   : > { %2455 = vmatpush2.msra.mxu0 %v10391_v20  ;;  %2544 = vmatpush2.msra.mxu1 %v10393_v21  ;;  %v10462_v20 = vld [vmem:[%s20202_s27 + $0x9f8] sm:$0xff]  ;;  %v10459_v21 = vld [vmem:[%s20202_s27 + $0x9e0] sm:$0xff] }
 0x18e   : > { %2456 = vmatprep.subr.mxu0 %v10388_v22  ;;  %2545 = vmatprep.subr.mxu1 %v10390_v26  ;;  %v10461_v22 = vld [vmem:[%s20202_s27 + $0x9f0] sm:$0xff] }
 0x18f   : > { %2457 = vmatpush2.msra.mxu0 %v10387_v40  ;;  %2546 = vmatpush2.msra.mxu1 %v10389_v43  ;;  %v10456_v40 = vld [vmem:[%s20202_s27 + $0x9c8] sm:$0xff]  ;;  %v10458_v43 = vld [vmem:[%s20202_s27 + $0x9d8] sm:$0xff] }
 0x190   : > { %2458 = vmatprep.subr.mxu0 %v10384_v29  ;;  %2547 = vmatprep.subr.mxu1 %v10386_v32  ;;  %v10455_v29 = vld [vmem:[%s20202_s27 + $0x9c0] sm:$0xff]  ;;  %v10457_v32 = vld [vmem:[%s20202_s27 + $0x9d0] sm:$0xff] }
 0x191   : > { %2459 = vmatpush2.msra.mxu0 %v10383_v34  ;;  %10415 = vmatprep.mubr.msk.f32.mxu0 %vm815_vm0, %v14037_v8  ;;  %v10452_v34 = vld [vmem:[%s20202_s27 + $0x9a8] sm:$0xff] }
 0x192   : > { %2548 = vmatpush2.msra.mxu1 %v10385_v50  ;;  %10419 = vmatprep.mubr.msk.f32.mxu1 %vm815_vm0, %v14037_v8  ;;  %v10490_v8 = vld [vmem:[%s20202_s27 + $0xad8] sm:$0xff] }
 0x193   : > { %2461 = vmatmul.mubr.f32.vlgmr.msra.gmra.mxu0 %v14044_v13  ;;  %2550 = vmatmul.mubr.f32.vlgmr.msra.gmra.mxu1 %v14044_v13  ;;  %v10489_v13 = vld [vmem:[%s20202_s27 + $0xad0] sm:$0xff]  ;;  %v10454_v50 = vld [vmem:[%s20202_s27 + $0x9b8] sm:$0xff] }
 0x194   : > { %2809 = vmatprep.subr.mxu0 %v10492_v46  ;;  %2898 = vmatprep.subr.mxu1 %v10494_v37 }
 0x195   : > { %2810 = vmatpush1.msra.mxu0 %v10491_v54  ;;  %2899 = vmatpush1.msra.mxu1 %v10493_v39  ;;  %v10451_v54 = vld [vmem:[%s20202_s27 + $0x9a0] sm:$0xff]  ;;  %v10453_v39 = vld [vmem:[%s20202_s27 + $0x9b0] sm:$0xff] }
 0x196   : > { %2811 = vmatprep.subr.mxu0 %v10488_v57  ;;  %2900 = vmatprep.subr.mxu1 %v10490_v8 }
 0x197   : > { %10416 = vmatprep.mubr.msk.f32.mxu0 %vm815_vm0, %v14074_v23  ;;  %10420 = vmatprep.mubr.msk.f32.mxu1 %vm815_vm0, %v14074_v23  ;;  %v14440_v2 = vpop.f32.mrf.mxu0  ;;  %v10485_v23 = vld [vmem:[%s20202_s27 + $0xab0] sm:$0xff] }
 0x198   : > { %2812 = vmatpush1.msra.mxu0 %v10487_v41  ;;  %2901 = vmatpush1.msra.mxu1 %v10489_v13  ;;  %v10448_v41 = vld [vmem:[%s20202_s27 + $0x988] sm:$0xff]  ;;  %v10450_v13 = vld [vmem:[%s20202_s27 + $0x998] sm:$0xff] }
 0x199   : > { %2467 = vmatmul.mubr.f32.gmra.mxu0 %v14086_v27  ;;  %2556 = vmatmul.mubr.f32.gmra.mxu1 %v14086_v27  ;;  %v14456_v51 = vpop.f32.mrf.mxu0  ;;  %v10479_v27 = vld [vmem:[%s20202_s27 + $0xa80] sm:$0xff] }
 0x19a   : > { %2813 = vmatprep.subr.mxu0 %v10484_v42  ;;  %2902 = vmatprep.subr.mxu1 %v10486_v45  ;;  %v14458_v52 = vpop.f32.mrf.mxu1 }
 0x19b   : > { %2814 = vmatpush1.msra.mxu0 %v10483_v63  ;;  %2903 = vmatpush1.msra.mxu1 %v10485_v23  ;;  %v1888_v63 = vld [vmem:[#allocation2 + $0x18] sm:$0xff] }
 0x19c   : > { %2815 = vmatprep.subr.mxu0 %v10480_v48  ;;  %2904 = vmatprep.subr.mxu1 %v10482_v49  ;;  %v1265_v55 = vpop.f32.mrf.mxu1  ;;  %v10444_v49 = vld [vmem:[%s20202_s27 + $0x968] sm:$0xff] }
 0x19d   : > { %10417 = vmatprep.mubr.msk.f32.mxu0 %vm815_vm0, %v14122_v36  ;;  %10421 = vmatprep.mubr.msk.f32.mxu1 %vm815_vm0, %v14122_v36  ;;  %1305 = vst.msk [vmem:[#allocation3 + $0x38] sm:$0xff] %vm1283_vm1, %v1265_v55  ;;  %v14477_v15 = vpop.f32.mrf.mxu0  ;;  %v10477_v36 = vld [vmem:[%s20202_s27 + $0xa70] sm:$0xff]  ;;  %v10440_v55 = vld [vmem:[%s20202_s27 + $0x948] sm:$0xff] }
 0x19e   : > { %2816 = vmatpush1.msra.mxu0 %v10479_v27  ;;  %2905 = vmatpush1.msra.mxu1 %v10481_v12  ;;  %v10446_v27 = vld [vmem:[%s20202_s27 + $0x978] sm:$0xff]  ;;  %v10443_v12 = vld [vmem:[%s20202_s27 + $0x960] sm:$0xff] }
 0x19f   : > { %2473 = vmatmul.mubr.f32.gmra.mxu0 %v14134_v38  ;;  %2562 = vmatmul.mubr.f32.gmra.mxu1 %v14134_v38  ;;  %v14493_v0 = vpop.f32.mrf.mxu0  ;;  %v10471_v38 = vld [vmem:[%s20202_s27 + $0xa40] sm:$0xff] }
 0x1a0   : > { %2817 = vmatprep.subr.mxu0 %v10476_v56  ;;  %2906 = vmatprep.subr.mxu1 %v10478_v58  ;;  %v14495_v1 = vpop.f32.mrf.mxu1  ;;  %v10442_v56 = vld [vmem:[%s20202_s27 + $0x958] sm:$0xff] }
 0x1a1   : > { %2818 = vmatpush1.msra.mxu0 %v10475_v59  ;;  %2907 = vmatpush1.msra.mxu1 %v10477_v36  ;;  %v10439_v36 = vld [vmem:[%s20202_s27 + $0x940] sm:$0xff] }
 0x1a2   : > { %2819 = vmatprep.subr.mxu0 %v10472_v61  ;;  %2908 = vmatprep.subr.mxu1 %v10474_v62  ;;  %v1271_v4 = vpop.f32.mrf.mxu1  ;;  %v10441_v61 = vld [vmem:[%s20202_s27 + $0x950] sm:$0xff] }
 0x1a3   : > { %10418 = vmatprep.mubr.msk.f32.mxu0 %vm815_vm0, %v14088_v28  ;;  %10422 = vmatprep.mubr.msk.f32.mxu1 %vm815_vm0, %v14088_v28  ;;  %1309 = vst.msk [vmem:[#allocation3 + $0x58] sm:$0xff] %vm1283_vm1, %v1271_v4  ;;  %v1186_v9 = vpop.f32.mrf.mxu0  ;;  %v10469_v28 = vld [vmem:[%s20202_s27 + $0xa30] sm:$0xff]  ;;  %v10438_v4 = vld [vmem:[%s20202_s27 + $0x938] sm:$0xff] }
 0x1a4   : > { %2820 = vmatpush1.msra.mxu0 %v10471_v38  ;;  %2909 = vmatpush1.msra.mxu1 %v10473_v3  ;;  %1310 = vst [vmem:[#allocation3 + $0x60] sm:$0x3f] %v1186_v9  ;;  %v10436_v3 = vld [vmem:[%s20202_s27 + $0x928] sm:$0xff]  ;;  %v1892_v9 = vld [vmem:[#allocation2 + $0x38] sm:$0xff] }
 0x1a5   : > { %2479 = vmatmul.mubr.f32.gmra.mxu0 %v14108_v44  ;;  %2568 = vmatmul.mubr.f32.gmra.mxu1 %v14108_v44  ;;  %v1188_v17 = vpop.f32.mrf.mxu0 }
 0x1a6   : > { %2821 = vmatprep.subr.mxu0 %v10468_v6  ;;  %2910 = vmatprep.subr.mxu1 %v10470_v7  ;;  %v1275_v44 = vpop.f32.mrf.mxu1  ;;  %1311 = vst [vmem:[#allocation3 + $0x68] sm:$0x3f] %v1188_v17  ;;  %v10431_v17 = vld [vmem:[%s20202_s27 + $0x900] sm:$0xff] }
 0x1a7   : > { %2822 = vmatpush1.msra.mxu0 %v10467_v11  ;;  %2911 = vmatpush1.msra.mxu1 %v10469_v28  ;;  %1312 = vst [vmem:[#allocation3 + $0x70] sm:$0x3f] %v1275_v44 }
 0x1a8   : > { %2823 = vmatprep.subr.mxu0 %v10464_v14  ;;  %2912 = vmatprep.subr.mxu1 %v10466_v31  ;;  %v1277_v26 = vpop.f32.mrf.mxu1  ;;  %v10432_v14 = vld [vmem:[%s20202_s27 + $0x908] sm:$0xff]  ;;  %v10434_v31 = vld [vmem:[%s20202_s27 + $0x918] sm:$0xff] }
 0x1a9   : > { %2824 = vmatpush1.msra.mxu0 %v10463_v18  ;;  %2913 = vmatpush1.msra.mxu1 %v10465_v33  ;;  %1313 = vst.msk [vmem:[#allocation3 + $0x78] sm:$0x3f] %vm1296_vm3, %v1277_v26  ;;  %v10524_v18 = vld [vmem:[%s20202_s27 + $0xbe8] sm:$0xff]  ;;  %v10526_v33 = vld [vmem:[%s20202_s27 + $0xbf8] sm:$0xff] }
 0x1aa   : > { %2825 = vmatprep.subr.mxu0 %v10460_v19  ;;  %2914 = vmatprep.subr.mxu1 %v10462_v20  ;;  %v10523_v20 = vld [vmem:[%s20202_s27 + $0xbe0] sm:$0xff] }
 0x1ab   : > { %2826 = vmatpush1.msra.mxu0 %v10459_v21  ;;  %2915 = vmatpush1.msra.mxu1 %v10461_v22  ;;  %v1498_v46 = vpop.f32.mrf.mxu0  ;;  %v1587_v37 = vpop.f32.mrf.mxu1  ;;  %v10525_v21 = vld [vmem:[%s20202_s27 + $0xbf0] sm:$0xff] }
 0x1ac   : > { %2827 = vmatprep.subr.mxu0 %v10456_v40  ;;  %2916 = vmatprep.subr.mxu1 %v10458_v43  ;;  %v1901_v57 = vadd.f32 %v1498_v46, %v14048_v16  ;;  %v1903_v8 = vadd.f32 %v1587_v37, %v13869_v10  ;;  %v10447_v16 = vld [vmem:[%s20202_s27 + $0x980] sm:$0xff]  ;;  %v10449_v10 = vld [vmem:[%s20202_s27 + $0x990] sm:$0xff]  ;;  %v10520_v40 = vld [vmem:[%s20202_s27 + $0xbc8] sm:$0xff] }
 0x1ad   : > { %2828 = vmatpush1.msra.mxu0 %v10455_v29  ;;  %2917 = vmatpush1.msra.mxu1 %v10457_v32  ;;  %v1500_v42 = vpop.f32.mrf.mxu0  ;;  %v1589_v45 = vpop.f32.mrf.mxu1  ;;  %v10522_v43 = vld [vmem:[%s20202_s27 + $0xbd8] sm:$0xff] }
 0x1ae   : > { %2829 = vmatprep.subr.mxu0 %v10452_v34  ;;  %2918 = vmatprep.subr.mxu1 %v10454_v50  ;;  %1917 = vst [vmem:[#allocation2] sm:$0xff] %v1901_v57  ;;  %1919 = vst [vmem:[#allocation2 + $0x10] sm:$0xff] %v1903_v8  ;;  %v1902_v23 = vadd.f32 %v1500_v42, %v14076_v24  ;;  %v1904_v48 = vadd.f32 %v1888_v63, %v1589_v45  ;;  %v10445_v24 = vld [vmem:[%s20202_s27 + $0x970] sm:$0xff]  ;;  %v1896_v34 = vld [vmem:[#allocation2 + $0x58] sm:$0xff] }
 0x1af   : > { %2830 = vmatpush1.msra.mxu0 %v10451_v54  ;;  %2919 = vmatpush1.msra.mxu1 %v10453_v39  ;;  %v10516_v50 = vld [vmem:[%s20202_s27 + $0xba8] sm:$0xff]  ;;  %v10518_v54 = vld [vmem:[%s20202_s27 + $0xbb8] sm:$0xff]  ;;  %v10515_v39 = vld [vmem:[%s20202_s27 + $0xba0] sm:$0xff] }
 0x1b0   : > { %2831 = vmatprep.subr.mxu0 %v10448_v41  ;;  %2920 = vmatprep.subr.mxu1 %v10450_v13  ;;  %1918 = vst [vmem:[#allocation2 + $0x8] sm:$0xff] %v1902_v23  ;;  %1920 = vst.msk [vmem:[#allocation2 + $0x18] sm:$0xff] %vm1283_vm1, %v1904_v48  ;;  %v10517_v57 = vld [vmem:[%s20202_s27 + $0xbb0] sm:$0xff]  ;;  %v10514_v8 = vld [vmem:[%s20202_s27 + $0xb98] sm:$0xff] }
 0x1b1   : > { %2832 = vmatpush1.msra.mxu0 %v10447_v16  ;;  %2921 = vmatpush1.msra.mxu1 %v10449_v10  ;;  %v1504_v58 = vpop.f32.mrf.mxu0  ;;  %v1593_v59 = vpop.f32.mrf.mxu1  ;;  %v10511_v41 = vld [vmem:[%s20202_s27 + $0xb80] sm:$0xff]  ;;  %v10513_v13 = vld [vmem:[%s20202_s27 + $0xb90] sm:$0xff]  ;;  %v10508_v10 = vld [vmem:[%s20202_s27 + $0xb68] sm:$0xff] }
 0x1b2   : > { %2833 = vmatprep.subr.mxu0 %v10444_v49  ;;  %2922 = vmatprep.subr.mxu1 %v10446_v27  ;;  %v1905_v62 = vadd.f32 %v1504_v58, %v14100_v30  ;;  %v1907_v38 = vadd.f32 %v1593_v59, %v14124_v53  ;;  %v10435_v30 = vld [vmem:[%s20202_s27 + $0x920] sm:$0xff]  ;;  %v10437_v53 = vld [vmem:[%s20202_s27 + $0x930] sm:$0xff]  ;;  %v10510_v23 = vld [vmem:[%s20202_s27 + $0xb78] sm:$0xff] }
 0x1b3   : > { %2834 = vmatpush1.msra.mxu0 %v10443_v12  ;;  %2923 = vmatpush1.msra.mxu1 %v10445_v24  ;;  %v1506_v6 = vpop.f32.mrf.mxu0  ;;  %v1595_v7 = vpop.f32.mrf.mxu1  ;;  %v1897_v45 = vld [vmem:[#allocation2 + $0x60] sm:$0x3f]  ;;  %v1899_v16 = vld [vmem:[#allocation2 + $0x70] sm:$0x3f]  ;;  %v10424_v48 = vld [vmem:[%s12709_s30 + $0x48] sm:$0xfe] }
 0x1b4   : > { %2835 = vmatprep.subr.mxu0 %v10440_v55  ;;  %2924 = vmatprep.subr.mxu1 %v10442_v56  ;;  %1921 = vst [vmem:[#allocation2 + $0x20] sm:$0xff] %v1905_v62  ;;  %1923 = vst [vmem:[#allocation2 + $0x30] sm:$0xff] %v1907_v38  ;;  %v1906_v11 = vadd.f32 %v1506_v6, %v14118_v35  ;;  %v1908_v28 = vadd.f32 %v1892_v9, %v1595_v7  ;;  %v10433_v35 = vld [vmem:[%s20202_s27 + $0x910] sm:$0xff]  ;;  %v14699_v12 = vld [vmem:[%s12709_s30 + $0x58] sm:$0xff] }
 0x1b5   : > { %2836 = vmatpush1.msra.mxu0 %v10439_v36  ;;  %2925 = vmatpush1.msra.mxu1 %v10441_v61  ;;  %v1898_v55 = vld [vmem:[#allocation2 + $0x68] sm:$0x3f]  ;;  %v1900_v58 = vld [vmem:[#allocation2 + $0x78] sm:$0x3f]  ;;  %v10507_v59 = vld [vmem:[%s20202_s27 + $0xb60] sm:$0xff] }
 0x1b6   : > { %2837 = vmatprep.subr.mxu0 %v10436_v3  ;;  %2926 = vmatprep.subr.mxu1 %v10438_v4  ;;  %1922 = vst [vmem:[#allocation2 + $0x28] sm:$0xff] %v1906_v11  ;;  %1924 = vst.msk [vmem:[#allocation2 + $0x38] sm:$0xff] %vm1283_vm1, %v1908_v28  ;;  %v10509_v36 = vld [vmem:[%s20202_s27 + $0xb70] sm:$0xff]  ;;  %v10504_v61 = vld [vmem:[%s20202_s27 + $0xb48] sm:$0xff] }
 0x1b7   : > { %2838 = vmatpush1.msra.mxu0 %v10435_v30  ;;  %2927 = vmatpush1.msra.mxu1 %v10437_v53  ;;  %v1510_v44 = vpop.f32.mrf.mxu0  ;;  %v1599_v19 = vpop.f32.mrf.mxu1  ;;  %v10506_v3 = vld [vmem:[%s20202_s27 + $0xb58] sm:$0xff]  ;;  %v10423_v4 = vld [vmem:[%s12709_s30 + $0x40] sm:$0xfe]  ;;  %v10425_v6 = vld [vmem:[%s12709_s30 + $0x50] sm:$0xff]  ;;  %v2786_v30 = vrot.slane %v10424_v48, 1  ;;  %v2787_v53 = vrot.slane %v14699_v12, 1 }
 0x1b8   : > { %2839 = vmatprep.subr.mxu0 %v10432_v14  ;;  %2928 = vmatprep.subr.mxu1 %v10434_v31  ;;  %v1909_v22 = vadd.f32 %v1510_v44, %v14146_v60  ;;  %v1911_v26 = vadd.f32 %v1599_v19, %v14165_v5  ;;  %v10519_v60 = vld [vmem:[%s20202_s27 + $0xbc0] sm:$0xff]  ;;  %v10521_v5 = vld [vmem:[%s20202_s27 + $0xbd0] sm:$0xff]  ;;  %v10500_v11 = vld [vmem:[%s20202_s27 + $0xb28] sm:$0xff] }
 0x1b9   : > { %2840 = vmatpush1.msra.mxu0 %v10431_v17  ;;  %2929 = vmatpush1.msra.mxu1 %v10433_v35  ;;  %v1512_v29 = vpop.f32.mrf.mxu0  ;;  %v1601_v32 = vpop.f32.mrf.mxu1  ;;  %v10503_v7 = vld [vmem:[%s20202_s27 + $0xb40] sm:$0xff]  ;;  %v10505_v9 = vld [vmem:[%s20202_s27 + $0xb50] sm:$0xff]  ;;  %v10502_v28 = vld [vmem:[%s20202_s27 + $0xb38] sm:$0xff]  ;;  %v2783_v17 = vrot.slane %v10423_v4, 1  ;;  %v2784_v35 = vrot.slane %v10425_v6, 1 }
 0x1ba   : > { %2857 = vmatprep.subr.mxu0 %v10524_v18  ;;  %2946 = vmatprep.subr.mxu1 %v10526_v33  ;;  %1925 = vst [vmem:[#allocation2 + $0x40] sm:$0xff] %v1909_v22  ;;  %1927 = vst [vmem:[#allocation2 + $0x50] sm:$0xff] %v1911_v26  ;;  %v1910_v46 = vadd.f32 %v1512_v29, %v14163_v47  ;;  %v1912_v37 = vadd.f32 %v1896_v34, %v1601_v32  ;;  %v10512_v47 = vld [vmem:[%s20202_s27 + $0xb88] sm:$0xff]  ;;  %v10499_v14 = vld [vmem:[%s20202_s27 + $0xb20] sm:$0xff] }
 0x1bb   : > { %2858 = vmatpush2.msra.mxu0 %v10523_v20  ;;  %2947 = vmatpush2.msra.mxu1 %v10525_v21  ;;  %v10501_v31 = vld [vmem:[%s20202_s27 + $0xb30] sm:$0xff]  ;;  %v10496_v18 = vld [vmem:[%s20202_s27 + $0xb08] sm:$0xff]  ;;  %v10498_v33 = vld [vmem:[%s20202_s27 + $0xb18] sm:$0xff]  ;;  %v14746_v20 = vsel %vm2094_vm2, %v2786_v30, %v2787_v53  ;;  %v14753_v26 = vsel %vm2094_vm2, %v2783_v17, %v2784_v35 }
 0x1bc   : > { %2859 = vmatprep.subr.mxu0 %v10520_v40  ;;  %2948 = vmatprep.subr.mxu1 %v10522_v43  ;;  %1926 = vst [vmem:[#allocation2 + $0x48] sm:$0xff] %v1910_v46  ;;  %1928 = vst.msk [vmem:[#allocation2 + $0x58] sm:$0xff] %vm1283_vm1, %v1912_v37  ;;  %v10428_v44 = vld [vmem:[%s12709_s30 + $0x68] sm:$0xff]  ;;  %v10495_v19 = vld [vmem:[%s20202_s27 + $0xb00] sm:$0xff] }
 0x1bd   : > { %2860 = vmatpush2.msra.mxu0 %v10519_v60  ;;  %2949 = vmatpush2.msra.mxu1 %v10521_v5  ;;  %v1516_v42 = vpop.f32.mrf.mxu0  ;;  %v1605_v63 = vpop.f32.mrf.mxu1  ;;  %v10497_v21 = vld [vmem:[%s20202_s27 + $0xb10] sm:$0xff]  ;;  %v10427_v22 = vld [vmem:[%s12709_s30 + $0x60] sm:$0xff]  ;;  %v2791_v40 = vrot.slane %v10428_v44, 1  ;;  %v10596_v43 = vld [vmem:[%s20204_s5 + $0xae8] sm:$0xff] }
 0x1be   : > { %2861 = vmatprep.subr.mxu0 %v10516_v50  ;;  %2950 = vmatprep.subr.mxu1 %v10518_v54  ;;  %v1913_v49 = vadd.f32 %v1897_v45, %v1516_v42  ;;  %v1915_v27 = vadd.f32 %v1899_v16, %v1605_v63  ;;  %v10598_v29 = vld [vmem:[%s20204_s5 + $0xaf8] sm:$0xff]  ;;  %v10595_v32 = vld [vmem:[%s20204_s5 + $0xae0] sm:$0xff]  ;;  %v10597_v34 = vld [vmem:[%s20204_s5 + $0xaf0] sm:$0xff]  ;;  %v2789_v60 = vrot.slane %v10427_v22, 1 }
 0x1bf   : > { %2862 = vmatpush2.msra.mxu0 %v10515_v39  ;;  %2951 = vmatpush2.msra.mxu1 %v10517_v57  ;;  %v1518_v24 = vpop.f32.mrf.mxu0  ;;  %v1607_v56 = vpop.f32.mrf.mxu1  ;;  %v10592_v5 = vld [vmem:[%s20204_s5 + $0xac8] sm:$0xff]  ;;  %v10594_v50 = vld [vmem:[%s20204_s5 + $0xad8] sm:$0xff]  ;;  %v14781_v37 = vsel %vm2094_vm2, %v2787_v53, %v2791_v40  ;;  %v10591_v54 = vld [vmem:[%s20204_s5 + $0xac0] sm:$0xff] }
 0x1c0   : > { %2863 = vmatprep.subr.mxu0 %v10512_v47  ;;  %2952 = vmatprep.subr.mxu1 %v10514_v8  ;;  %1929 = vst [vmem:[#allocation2 + $0x60] sm:$0x3f] %v1913_v49  ;;  %1931 = vst [vmem:[#allocation2 + $0x70] sm:$0x3f] %v1915_v27  ;;  %v1914_v62 = vadd.f32 %v1898_v55, %v1518_v24  ;;  %v1916_v38 = vadd.f32 %v1900_v58, %v1607_v56  ;;  %v10430_v46 = vld [vmem:[%s12709_s30 + $0x78] sm:$0x7f] }
 0x1c1   : > { %2864 = vmatpush2.msra.mxu0 %v10511_v41  ;;  %2953 = vmatpush2.msra.mxu1 %v10513_v13  ;;  %v10593_v39 = vld [vmem:[%s20204_s5 + $0xad0] sm:$0xff]  ;;  %v14791_v47 = vsel %vm2094_vm2, %v2784_v35, %v2789_v60  ;;  %v14793_v8 = vrot.slane %v10430_v46, 1  ;;  %v10588_v41 = vld [vmem:[%s20204_s5 + $0xaa8] sm:$0xff]  ;;  %v10590_v13 = vld [vmem:[%s20204_s5 + $0xab8] sm:$0xff] }
 0x1c2   : > { %2865 = vmatprep.subr.mxu0 %v10508_v10  ;;  %2954 = vmatprep.subr.mxu1 %v10510_v23  ;;  %1930 = vst [vmem:[#allocation2 + $0x68] sm:$0x3f] %v1914_v62  ;;  %1932 = vst.msk [vmem:[#allocation2 + $0x78] sm:$0x3f] %vm1296_vm3, %v1916_v38  ;;  %v10429_v57 = vld [vmem:[%s12709_s30 + $0x70] sm:$0x7f] }
 0x1c3   : > { %2866 = vmatpush2.msra.mxu0 %v10507_v59  ;;  %2955 = vmatpush2.msra.mxu1 %v10509_v36  ;;  %v10587_v42 = vld [vmem:[%s20204_s5 + $0xaa0] sm:$0xff]  ;;  %v10589_v45 = vld [vmem:[%s20204_s5 + $0xab0] sm:$0xff]  ;;  %v14811_v63 = vrot.slane %v10429_v57, 1  ;;  %v10584_v16 = vld [vmem:[%s20204_s5 + $0xa88] sm:$0xff]  ;;  %v14823_v23 = vsel %vm2094_vm2, %v2791_v40, %v14793_v8 }
 0x1c4   : > { %2867 = vmatprep.subr.mxu0 %v10504_v61  ;;  %2956 = vmatprep.subr.mxu1 %v10506_v3  ;;  %v10586_v10 = vld [vmem:[%s20204_s5 + $0xa98] sm:$0xff]  ;;  %v10583_v48 = vld [vmem:[%s20204_s5 + $0xa80] sm:$0xff]  ;;  %v10585_v49 = vld [vmem:[%s20204_s5 + $0xa90] sm:$0xff] }
 0x1c5   : > { %2868 = vmatpush2.msra.mxu0 %v10503_v7  ;;  %2957 = vmatpush2.msra.mxu1 %v10505_v9  ;;  %v14833_v27 = vsel %vm2094_vm2, %v2789_v60, %v14811_v63  ;;  %v10580_v12 = vld [vmem:[%s20204_s5 + $0xa68] sm:$0xff]  ;;  %v10582_v24 = vld [vmem:[%s20204_s5 + $0xa78] sm:$0xff]  ;;  %v10579_v55 = vld [vmem:[%s20204_s5 + $0xa60] sm:$0xff] }
 0x1c6   : > { %2869 = vmatprep.subr.mxu0 %v10500_v11  ;;  %2958 = vmatprep.subr.mxu1 %v10502_v28  ;;  %v10581_v56 = vld [vmem:[%s20204_s5 + $0xa70] sm:$0xff]  ;;  %v10576_v58 = vld [vmem:[%s20204_s5 + $0xa48] sm:$0xff]  ;;  %v10578_v59 = vld [vmem:[%s20204_s5 + $0xa58] sm:$0xff] }
 0x1c7   : > { %2870 = vmatpush2.msra.mxu0 %v10499_v14  ;;  %2959 = vmatpush2.msra.mxu1 %v10501_v31  ;;  %v10575_v36 = vld [vmem:[%s20204_s5 + $0xa40] sm:$0xff]  ;;  %v10577_v61 = vld [vmem:[%s20204_s5 + $0xa50] sm:$0xff]  ;;  %v10572_v62 = vld [vmem:[%s20204_s5 + $0xa28] sm:$0xff] }
 0x1c8   : > { %2871 = vmatprep.subr.mxu0 %v10496_v18  ;;  %2960 = vmatprep.subr.mxu1 %v10498_v33  ;;  %v10574_v38 = vld [vmem:[%s20204_s5 + $0xa38] sm:$0xff]  ;;  %v10571_v3 = vld [vmem:[%s20204_s5 + $0xa20] sm:$0xff]  ;;  %v10573_v4 = vld [vmem:[%s20204_s5 + $0xa30] sm:$0xff] }
 0x1c9   : > { %2872 = vmatpush2.msra.mxu0 %v10495_v19  ;;  %10527 = vmatprep.mubr.msk.f32.mxu0 %vm815_vm0, %v14746_v20  ;;  %v10568_v6 = vld [vmem:[%s20204_s5 + $0xa08] sm:$0xff]  ;;  %v10570_v7 = vld [vmem:[%s20204_s5 + $0xa18] sm:$0xff]  ;;  %v10567_v9 = vld [vmem:[%s20204_s5 + $0xa00] sm:$0xff] }
 0x1ca   : > { %2961 = vmatpush2.msra.mxu1 %v10497_v21  ;;  %10531 = vmatprep.mubr.msk.f32.mxu1 %vm815_vm0, %v14746_v20  ;;  %v10569_v30 = vld [vmem:[%s20204_s5 + $0xa10] sm:$0xff]  ;;  %v10564_v53 = vld [vmem:[%s20204_s5 + $0x9e8] sm:$0xff]  ;;  %v10566_v11 = vld [vmem:[%s20204_s5 + $0x9f8] sm:$0xff] }
 0x1cb   : > { %2874 = vmatmul.mubr.f32.vlgmr.msra.gmra.mxu0 %v14753_v26  ;;  %2963 = vmatmul.mubr.f32.vlgmr.msra.gmra.mxu1 %v14753_v26  ;;  %v10563_v28 = vld [vmem:[%s20204_s5 + $0x9e0] sm:$0xff]  ;;  %v10565_v14 = vld [vmem:[%s20204_s5 + $0x9f0] sm:$0xff]  ;;  %v10560_v31 = vld [vmem:[%s20204_s5 + $0x9c8] sm:$0xff] }
 0x1cc   : > { %3084 = vmatprep.subr.mxu0 %v10596_v43  ;;  %3173 = vmatprep.subr.mxu1 %v10598_v29  ;;  %v10562_v17 = vld [vmem:[%s20204_s5 + $0x9d8] sm:$0xff]  ;;  %v10559_v35 = vld [vmem:[%s20204_s5 + $0x9c0] sm:$0xff]  ;;  %v10561_v18 = vld [vmem:[%s20204_s5 + $0x9d0] sm:$0xff] }
 0x1cd   : > { %3085 = vmatpush1.msra.mxu0 %v10595_v32  ;;  %3174 = vmatpush1.msra.mxu1 %v10597_v34  ;;  %v10556_v33 = vld [vmem:[%s20204_s5 + $0x9a8] sm:$0xff]  ;;  %v10558_v44 = vld [vmem:[%s20204_s5 + $0x9b8] sm:$0xff]  ;;  %v1933_v21 = vld [vmem:[#allocation3] sm:$0xff] }
 0x1ce   : > { %3086 = vmatprep.subr.mxu0 %v10592_v5  ;;  %3175 = vmatprep.subr.mxu1 %v10594_v50  ;;  %v10555_v40 = vld [vmem:[%s20204_s5 + $0x9a0] sm:$0xff]  ;;  %v10557_v43 = vld [vmem:[%s20204_s5 + $0x9b0] sm:$0xff]  ;;  %v10552_v29 = vld [vmem:[%s20204_s5 + $0x988] sm:$0xff] }
 0x1cf   : > { %10528 = vmatprep.mubr.msk.f32.mxu0 %vm815_vm0, %v14781_v37  ;;  %10532 = vmatprep.mubr.msk.f32.mxu1 %vm815_vm0, %v14781_v37  ;;  %v10554_v60 = vld [vmem:[%s20204_s5 + $0x998] sm:$0xff]  ;;  %v1934_v50 = vld [vmem:[#allocation3 + $0x8] sm:$0xff] }
 0x1d0   : > { %3087 = vmatpush1.msra.mxu0 %v10591_v54  ;;  %3176 = vmatpush1.msra.mxu1 %v10593_v39  ;;  %v1936_v54 = vld [vmem:[#allocation3 + $0x18] sm:$0xff]  ;;  %v10551_v39 = vld [vmem:[%s20204_s5 + $0x980] sm:$0xff] }
 0x1d1   : > { %2880 = vmatmul.mubr.f32.gmra.mxu0 %v14791_v47  ;;  %2969 = vmatmul.mubr.f32.gmra.mxu1 %v14791_v47 }
 0x1d2   : > { %3088 = vmatprep.subr.mxu0 %v10588_v41  ;;  %3177 = vmatprep.subr.mxu1 %v10590_v13  ;;  %v10548_v13 = vld [vmem:[%s20204_s5 + $0x968] sm:$0xff] }
 0x1d3   : > { %3089 = vmatpush1.msra.mxu0 %v10587_v42  ;;  %3178 = vmatpush1.msra.mxu1 %v10589_v45  ;;  %v10550_v42 = vld [vmem:[%s20204_s5 + $0x978] sm:$0xff]  ;;  %v10547_v45 = vld [vmem:[%s20204_s5 + $0x960] sm:$0xff] }
 0x1d4   : > { %3090 = vmatprep.subr.mxu0 %v10584_v16  ;;  %3179 = vmatprep.subr.mxu1 %v10586_v10  ;;  %v10549_v16 = vld [vmem:[%s20204_s5 + $0x970] sm:$0xff]  ;;  %v10544_v10 = vld [vmem:[%s20204_s5 + $0x948] sm:$0xff] }
 0x1d5   : > { %10529 = vmatprep.mubr.msk.f32.mxu0 %vm815_vm0, %v14823_v23  ;;  %10533 = vmatprep.mubr.msk.f32.mxu1 %vm815_vm0, %v14823_v23 }
 0x1d6   : > { %3091 = vmatpush1.msra.mxu0 %v10583_v48  ;;  %3180 = vmatpush1.msra.mxu1 %v10585_v49  ;;  %v10546_v48 = vld [vmem:[%s20204_s5 + $0x958] sm:$0xff] }
 0x1d7   : > { %2886 = vmatmul.mubr.f32.gmra.mxu0 %v14833_v27  ;;  %2975 = vmatmul.mubr.f32.gmra.mxu1 %v14833_v27 }
 0x1d8   : > { %3092 = vmatprep.subr.mxu0 %v10580_v12  ;;  %3181 = vmatprep.subr.mxu1 %v10582_v24  ;;  %v10543_v24 = vld [vmem:[%s20204_s5 + $0x940] sm:$0xff] }
 0x1d9   : > { %3093 = vmatpush1.msra.mxu0 %v10579_v55  ;;  %3182 = vmatpush1.msra.mxu1 %v10581_v56  ;;  %v10545_v55 = vld [vmem:[%s20204_s5 + $0x950] sm:$0xff] }
 0x1da   : > { %3094 = vmatprep.subr.mxu0 %v10576_v58  ;;  %3183 = vmatprep.subr.mxu1 %v10578_v59  ;;  %v10540_v59 = vld [vmem:[%s20204_s5 + $0x928] sm:$0xff] }
 0x1db   : > { %10530 = vmatprep.mubr.msk.f32.mxu0 %vm815_vm0, %v14793_v8  ;;  %10534 = vmatprep.mubr.msk.f32.mxu1 %vm815_vm0, %v14793_v8 }
 0x1dc   : > { %3095 = vmatpush1.msra.mxu0 %v10575_v36  ;;  %3184 = vmatpush1.msra.mxu1 %v10577_v61  ;;  %v10542_v36 = vld [vmem:[%s20204_s5 + $0x938] sm:$0xff] }
 0x1dd   : > { %2892 = vmatmul.mubr.f32.gmra.mxu0 %v14811_v63  ;;  %2981 = vmatmul.mubr.f32.gmra.mxu1 %v14811_v63 }
 0x1de   : > { %3096 = vmatprep.subr.mxu0 %v10572_v62  ;;  %3185 = vmatprep.subr.mxu1 %v10574_v38  ;;  %v1940_v38 = vld [vmem:[#allocation3 + $0x38] sm:$0xff] }
 0x1df   : > { %3097 = vmatpush1.msra.mxu0 %v10571_v3  ;;  %3186 = vmatpush1.msra.mxu1 %v10573_v4 }
 0x1e0   : > { %3098 = vmatprep.subr.mxu0 %v10568_v6  ;;  %3187 = vmatprep.subr.mxu1 %v10570_v7  ;;  %v10536_v6 = vld [vmem:[%s20204_s5 + $0x908] sm:$0xff]  ;;  %v10538_v7 = vld [vmem:[%s20204_s5 + $0x918] sm:$0xff] }
 0x1e1   : > { %3099 = vmatpush1.msra.mxu0 %v10567_v9  ;;  %3188 = vmatpush1.msra.mxu1 %v10569_v30  ;;  %v10535_v9 = vld [vmem:[%s20204_s5 + $0x900] sm:$0xff]  ;;  %v10628_v30 = vld [vmem:[%s20204_s5 + $0xbe8] sm:$0xff] }
 0x1e2   : > { %3100 = vmatprep.subr.mxu0 %v10564_v53  ;;  %3189 = vmatprep.subr.mxu1 %v10566_v11  ;;  %v10630_v53 = vld [vmem:[%s20204_s5 + $0xbf8] sm:$0xff] }
 0x1e3   : > { %3101 = vmatpush1.msra.mxu0 %v10563_v28  ;;  %3190 = vmatpush1.msra.mxu1 %v10565_v14  ;;  %v1773_v19 = vpop.f32.mrf.mxu0  ;;  %v1862_v22 = vpop.f32.mrf.mxu1  ;;  %v10627_v14 = vld [vmem:[%s20204_s5 + $0xbe0] sm:$0xff] }
 0x1e4   : > { %3102 = vmatprep.subr.mxu0 %v10560_v31  ;;  %3191 = vmatprep.subr.mxu1 %v10562_v17  ;;  %v1949_v32 = vadd.f32 %v1933_v21, %v1773_v19  ;;  %v1951_v34 = vadd.f32 %v1862_v22, %v14241_v25  ;;  %v10553_v25 = vld [vmem:[%s20204_s5 + $0x990] sm:$0xff]  ;;  %v1944_v21 = vld [vmem:[#allocation3 + $0x58] sm:$0xff] }
 0x1e5   : > { %3103 = vmatpush1.msra.mxu0 %v10559_v35  ;;  %3192 = vmatpush1.msra.mxu1 %v10561_v18  ;;  %v1775_v5 = vpop.f32.mrf.mxu0  ;;  %v1864_v46 = vpop.f32.mrf.mxu1  ;;  %v10629_v31 = vld [vmem:[%s20204_s5 + $0xbf0] sm:$0xff]  ;;  %v10624_v18 = vld [vmem:[%s20204_s5 + $0xbc8] sm:$0xff] }
 0x1e6   : > { %3104 = vmatprep.subr.mxu0 %v10556_v33  ;;  %3193 = vmatprep.subr.mxu1 %v10558_v44  ;;  %1965 = vst [vmem:[#allocation3] sm:$0xff] %v1949_v32  ;;  %1967 = vst [vmem:[#allocation3 + $0x10] sm:$0xff] %v1951_v34  ;;  %v1950_v57 = vadd.f32 %v1934_v50, %v1775_v5  ;;  %v1952_v41 = vadd.f32 %v1936_v54, %v1864_v46  ;;  %v10626_v33 = vld [vmem:[%s20204_s5 + $0xbd8] sm:$0xff]  ;;  %v10619_v32 = vld [vmem:[%s20204_s5 + $0xba0] sm:$0xff] }
 0x1e7   : > { %3105 = vmatpush1.msra.mxu0 %v10555_v40  ;;  %3194 = vmatpush1.msra.mxu1 %v10557_v43  ;;  %v10620_v43 = vld [vmem:[%s20204_s5 + $0xba8] sm:$0xff]  ;;  %v1945_v50 = vld [vmem:[#allocation3 + $0x60] sm:$0x3f]  ;;  %v1947_v54 = vld [vmem:[#allocation3 + $0x70] sm:$0x3f] }
 0x1e8   : > { %3106 = vmatprep.subr.mxu0 %v10552_v29  ;;  %3195 = vmatprep.subr.mxu1 %v10554_v60  ;;  %1966 = vst [vmem:[#allocation3 + $0x8] sm:$0xff] %v1950_v57  ;;  %1968 = vst.msk [vmem:[#allocation3 + $0x18] sm:$0xff] %vm1283_vm1, %v1952_v41  ;;  %v10622_v29 = vld [vmem:[%s20204_s5 + $0xbb8] sm:$0xff]  ;;  %v10616_v34 = vld [vmem:[%s20204_s5 + $0xb88] sm:$0xff] }
 0x1e9   : > { %3107 = vmatpush1.msra.mxu0 %v10551_v39  ;;  %3196 = vmatpush1.msra.mxu1 %v10553_v25  ;;  %v1779_v49 = vpop.f32.mrf.mxu0  ;;  %v1868_v12 = vpop.f32.mrf.mxu1  ;;  %v10618_v60 = vld [vmem:[%s20204_s5 + $0xb98] sm:$0xff]  ;;  %v10615_v39 = vld [vmem:[%s20204_s5 + $0xb80] sm:$0xff]  ;;  %v10617_v25 = vld [vmem:[%s20204_s5 + $0xb90] sm:$0xff] }
 0x1ea   : > { %3108 = vmatprep.subr.mxu0 %v10548_v13  ;;  %3197 = vmatprep.subr.mxu1 %v10550_v42  ;;  %v1953_v56 = vadd.f32 %v1779_v49, %v14440_v2  ;;  %v1955_v58 = vadd.f32 %v1868_v12, %v14458_v52  ;;  %v10539_v2 = vld [vmem:[%s20204_s5 + $0x920] sm:$0xff]  ;;  %v10541_v52 = vld [vmem:[%s20204_s5 + $0x930] sm:$0xff]  ;;  %v10612_v57 = vld [vmem:[%s20204_s5 + $0xb68] sm:$0xff] }
 0x1eb   : > { %3109 = vmatpush1.msra.mxu0 %v10547_v45  ;;  %3198 = vmatpush1.msra.mxu1 %v10549_v16  ;;  %v1781_v61 = vpop.f32.mrf.mxu0  ;;  %v1870_v62 = vpop.f32.mrf.mxu1  ;;  %v10614_v42 = vld [vmem:[%s20204_s5 + $0xb78] sm:$0xff]  ;;  %v1946_v16 = vld [vmem:[#allocation3 + $0x68] sm:$0x3f]  ;;  %v10611_v49 = vld [vmem:[%s20204_s5 + $0xb60] sm:$0xff] }
 0x1ec   : > { %3110 = vmatprep.subr.mxu0 %v10544_v10  ;;  %3199 = vmatprep.subr.mxu1 %v10546_v48  ;;  %1969 = vst [vmem:[#allocation3 + $0x20] sm:$0xff] %v1953_v56  ;;  %1971 = vst [vmem:[#allocation3 + $0x30] sm:$0xff] %v1955_v58  ;;  %v1954_v3 = vadd.f32 %v1781_v61, %v14456_v51  ;;  %v1956_v4 = vadd.f32 %v1940_v38, %v1870_v62  ;;  %v10537_v51 = vld [vmem:[%s20204_s5 + $0x910] sm:$0xff]  ;;  %v1948_v48 = vld [vmem:[#allocation3 + $0x78] sm:$0x3f] }
 0x1ed   : > { %3111 = vmatpush1.msra.mxu0 %v10543_v24  ;;  %3200 = vmatpush1.msra.mxu1 %v10545_v55  ;;  %v10613_v12 = vld [vmem:[%s20204_s5 + $0xb70] sm:$0xff]  ;;  %v10608_v56 = vld [vmem:[%s20204_s5 + $0xb48] sm:$0xff]  ;;  %v10610_v58 = vld [vmem:[%s20204_s5 + $0xb58] sm:$0xff] }
 0x1ee   : > { %3112 = vmatprep.subr.mxu0 %v10540_v59  ;;  %3201 = vmatprep.subr.mxu1 %v10542_v36  ;;  %1970 = vst [vmem:[#allocation3 + $0x28] sm:$0xff] %v1954_v3  ;;  %1972 = vst.msk [vmem:[#allocation3 + $0x38] sm:$0xff] %vm1283_vm1, %v1956_v4  ;;  %v10607_v59 = vld [vmem:[%s20204_s5 + $0xb40] sm:$0xff]  ;;  %v10609_v36 = vld [vmem:[%s20204_s5 + $0xb50] sm:$0xff] }
 0x1ef   : > { %3113 = vmatpush1.msra.mxu0 %v10539_v2  ;;  %3202 = vmatpush1.msra.mxu1 %v10541_v52  ;;  %v1785_v11 = vpop.f32.mrf.mxu0  ;;  %v1874_v28 = vpop.f32.mrf.mxu1  ;;  %v10604_v61 = vld [vmem:[%s20204_s5 + $0xb28] sm:$0xff]  ;;  %v10606_v62 = vld [vmem:[%s20204_s5 + $0xb38] sm:$0xff]  ;;  %v10603_v38 = vld [vmem:[%s20204_s5 + $0xb20] sm:$0xff] }
 0x1f0   : > { %3114 = vmatprep.subr.mxu0 %v10536_v6  ;;  %3203 = vmatprep.subr.mxu1 %v10538_v7  ;;  %v1957_v17 = vadd.f32 %v1785_v11, %v14477_v15  ;;  %v1959_v35 = vadd.f32 %v1874_v28, %v14495_v1  ;;  %v10623_v15 = vld [vmem:[%s20204_s5 + $0xbc0] sm:$0xff]  ;;  %v10625_v1 = vld [vmem:[%s20204_s5 + $0xbd0] sm:$0xff]  ;;  %v10600_v52 = vld [vmem:[%s20204_s5 + $0xb08] sm:$0xff] }
 0x1f1   : > { %3115 = vmatpush1.msra.mxu0 %v10535_v9  ;;  %3204 = vmatpush1.msra.mxu1 %v10537_v51  ;;  %v1787_v44 = vpop.f32.mrf.mxu0  ;;  %v1876_v19 = vpop.f32.mrf.mxu1  ;;  %v10605_v2 = vld [vmem:[%s20204_s5 + $0xb30] sm:$0xff]  ;;  %v10602_v3 = vld [vmem:[%s20204_s5 + $0xb18] sm:$0xff]  ;;  %v10599_v4 = vld [vmem:[%s20204_s5 + $0xb00] sm:$0xff] }
 0x1f2   : > { %3132 = vmatprep.subr.mxu0 %v10628_v30  ;;  %3221 = vmatprep.subr.mxu1 %v10630_v53  ;;  %1973 = vst [vmem:[#allocation3 + $0x40] sm:$0xff] %v1957_v17  ;;  %1975 = vst [vmem:[#allocation3 + $0x50] sm:$0xff] %v1959_v35  ;;  %v1958_v22 = vadd.f32 %v1787_v44, %v14493_v0  ;;  %v1960_v40 = vadd.f32 %v1944_v21, %v1876_v19  ;;  %v10621_v0 = vld [vmem:[%s20204_s5 + $0xbb0] sm:$0xff]  ;;  %v10700_v7 = vld [vmem:[%s20202_s27 + $0xde8] sm:$0xff] }
 0x1f3   : > { %3133 = vmatpush2.msra.mxu0 %v10627_v14  ;;  %3222 = vmatpush2.msra.mxu1 %v10629_v31  ;;  %v10601_v6 = vld [vmem:[%s20204_s5 + $0xb10] sm:$0xff]  ;;  %v10702_v9 = vld [vmem:[%s20202_s27 + $0xdf8] sm:$0xff]  ;;  %v10699_v51 = vld [vmem:[%s20202_s27 + $0xde0] sm:$0xff] }
 0x1f4   : > { %3134 = vmatprep.subr.mxu0 %v10624_v18  ;;  %3223 = vmatprep.subr.mxu1 %v10626_v33  ;;  %1974 = vst [vmem:[#allocation3 + $0x48] sm:$0xff] %v1958_v22  ;;  %1976 = vst.msk [vmem:[#allocation3 + $0x58] sm:$0xff] %vm1283_vm1, %v1960_v40  ;;  %v10701_v30 = vld [vmem:[%s20202_s27 + $0xdf0] sm:$0xff]  ;;  %v10696_v53 = vld [vmem:[%s20202_s27 + $0xdc8] sm:$0xff] }
 0x1f5   : > { %3135 = vmatpush2.msra.mxu0 %v10623_v15  ;;  %3224 = vmatpush2.msra.mxu1 %v10625_v1  ;;  %v1791_v5 = vpop.f32.mrf.mxu0  ;;  %v1880_v46 = vpop.f32.mrf.mxu1  ;;  %v10695_v11 = vld [vmem:[%s20202_s27 + $0xdc0] sm:$0xff]  ;;  %v10692_v28 = vld [vmem:[%s20202_s27 + $0xda8] sm:$0xff]  ;;  %v10694_v14 = vld [vmem:[%s20202_s27 + $0xdb8] sm:$0xff] }
 0x1f6   : > { %3136 = vmatprep.subr.mxu0 %v10620_v43  ;;  %3225 = vmatprep.subr.mxu1 %v10622_v29  ;;  %v1961_v41 = vadd.f32 %v1945_v50, %v1791_v5  ;;  %v1963_v13 = vadd.f32 %v1947_v54, %v1880_v46  ;;  %v10691_v31 = vld [vmem:[%s20202_s27 + $0xda0] sm:$0xff]  ;;  %v10693_v17 = vld [vmem:[%s20202_s27 + $0xdb0] sm:$0xff]  ;;  %v10690_v35 = vld [vmem:[%s20202_s27 + $0xd98] sm:$0xff] }
 0x1f7   : > { %3137 = vmatpush2.msra.mxu0 %v10619_v32  ;;  %3226 = vmatpush2.msra.mxu1 %v10621_v0  ;;  %v1793_v45 = vpop.f32.mrf.mxu0  ;;  %v1882_v10 = vpop.f32.mrf.mxu1  ;;  %v10687_v18 = vld [vmem:[%s20202_s27 + $0xd80] sm:$0xff]  ;;  %v10684_v33 = vld [vmem:[%s20202_s27 + $0xd68] sm:$0xff]  ;;  %v10686_v44 = vld [vmem:[%s20202_s27 + $0xd78] sm:$0xff] }
 0x1f8   : > { %3138 = vmatprep.subr.mxu0 %v10616_v34  ;;  %3227 = vmatprep.subr.mxu1 %v10618_v60  ;;  %1977 = vst [vmem:[#allocation3 + $0x60] sm:$0x3f] %v1961_v41  ;;  %1979 = vst [vmem:[#allocation3 + $0x70] sm:$0x3f] %v1963_v13  ;;  %v1962_v24 = vadd.f32 %v1946_v16, %v1793_v45  ;;  %v1964_v55 = vadd.f32 %v1948_v48, %v1882_v10  ;;  %v10683_v19 = vld [vmem:[%s20202_s27 + $0xd60] sm:$0xff]  ;;  %v10685_v21 = vld [vmem:[%s20202_s27 + $0xd70] sm:$0xff] }
 0x1f9   : > { %3139 = vmatpush2.msra.mxu0 %v10615_v39  ;;  %3228 = vmatpush2.msra.mxu1 %v10617_v25  ;;  %v10682_v15 = vld [vmem:[%s20202_s27 + $0xd58] sm:$0xff]  ;;  %v10679_v1 = vld [vmem:[%s20202_s27 + $0xd40] sm:$0xff]  ;;  %v10676_v22 = vld [vmem:[%s20202_s27 + $0xd28] sm:$0xff] }
 0x1fa   : > { %3140 = vmatprep.subr.mxu0 %v10612_v57  ;;  %3229 = vmatprep.subr.mxu1 %v10614_v42  ;;  %1978 = vst [vmem:[#allocation3 + $0x68] sm:$0x3f] %v1962_v24  ;;  %1980 = vst.msk [vmem:[#allocation3 + $0x78] sm:$0x3f] %vm1296_vm3, %v1964_v55  ;;  %v10678_v40 = vld [vmem:[%s20202_s27 + $0xd38] sm:$0xff]  ;;  %v10675_v43 = vld [vmem:[%s20202_s27 + $0xd20] sm:$0xff] }
 0x1fb   : > { %3141 = vmatpush2.msra.mxu0 %v10611_v49  ;;  %3230 = vmatpush2.msra.mxu1 %v10613_v12  ;;  %v10677_v29 = vld [vmem:[%s20202_s27 + $0xd30] sm:$0xff]  ;;  %v10674_v32 = vld [vmem:[%s20202_s27 + $0xd18] sm:$0xff]  ;;  %v10671_v0 = vld [vmem:[%s20202_s27 + $0xd00] sm:$0xff] }
 0x1fc   : > { %3142 = vmatprep.subr.mxu0 %v10608_v56  ;;  %3231 = vmatprep.subr.mxu1 %v10610_v58  ;;  %v10673_v34 = vld [vmem:[%s20202_s27 + $0xd10] sm:$0xff]  ;;  %v10670_v60 = vld [vmem:[%s20202_s27 + $0xcf8] sm:$0xff]  ;;  %v10667_v5 = vld [vmem:[%s20202_s27 + $0xce0] sm:$0xff] }
 0x1fd   : > { %3143 = vmatpush2.msra.mxu0 %v10607_v59  ;;  %3232 = vmatpush2.msra.mxu1 %v10609_v36  ;;  %v10669_v50 = vld [vmem:[%s20202_s27 + $0xcf0] sm:$0xff]  ;;  %v10664_v46 = vld [vmem:[%s20202_s27 + $0xcc8] sm:$0xff]  ;;  %v10666_v54 = vld [vmem:[%s20202_s27 + $0xcd8] sm:$0xff] }
 0x1fe   : > { %3144 = vmatprep.subr.mxu0 %v10604_v61  ;;  %3233 = vmatprep.subr.mxu1 %v10606_v62  ;;  %v10663_v39 = vld [vmem:[%s20202_s27 + $0xcc0] sm:$0xff]  ;;  %v10665_v25 = vld [vmem:[%s20202_s27 + $0xcd0] sm:$0xff]  ;;  %v10660_v57 = vld [vmem:[%s20202_s27 + $0xca8] sm:$0xff] }
 0x1ff   : > { %3145 = vmatpush2.msra.mxu0 %v10603_v38  ;;  %3234 = vmatpush2.msra.mxu1 %v10605_v2  ;;  %v10662_v41 = vld [vmem:[%s20202_s27 + $0xcb8] sm:$0xff]  ;;  %v10659_v45 = vld [vmem:[%s20202_s27 + $0xca0] sm:$0xff]  ;;  %v10661_v16 = vld [vmem:[%s20202_s27 + $0xcb0] sm:$0xff] }
 0x200   : > { %3146 = vmatprep.subr.mxu0 %v10600_v52  ;;  %3235 = vmatprep.subr.mxu1 %v10602_v3  ;;  %v10656_v10 = vld [vmem:[%s20202_s27 + $0xc88] sm:$0xff]  ;;  %v10658_v48 = vld [vmem:[%s20202_s27 + $0xc98] sm:$0xff]  ;;  %v10655_v55 = vld [vmem:[%s20202_s27 + $0xc80] sm:$0xff] }
 0x201   : > { %3147 = vmatpush2.msra.mxu0 %v10599_v4  ;;  %10631 = vmatprep.mubr.msk.f32.mxu0 %vm815_vm0, %v14746_v20  ;;  %v2577_v24 = vld [vmem:[#allocation2 + $0x18] sm:$0xff]  ;;  %v10657_v56 = vld [vmem:[%s20202_s27 + $0xc90] sm:$0xff]  ;;  %v10652_v59 = vld [vmem:[%s20202_s27 + $0xc68] sm:$0xff] }
 0x202   : > { %3236 = vmatpush2.msra.mxu1 %v10601_v6  ;;  %10635 = vmatprep.mubr.msk.f32.mxu1 %vm815_vm0, %v14746_v20  ;;  %v10698_v20 = vld [vmem:[%s20202_s27 + $0xdd8] sm:$0xff]  ;;  %v10651_v61 = vld [vmem:[%s20202_s27 + $0xc60] sm:$0xff]  ;;  %v10653_v62 = vld [vmem:[%s20202_s27 + $0xc70] sm:$0xff] }
 0x203   : > { %3149 = vmatmul.mubr.f32.vlgmr.msra.gmra.mxu0 %v14753_v26  ;;  %3238 = vmatmul.mubr.f32.vlgmr.msra.gmra.mxu1 %v14753_v26  ;;  %v10697_v26 = vld [vmem:[%s20202_s27 + $0xdd0] sm:$0xff]  ;;  %v10654_v36 = vld [vmem:[%s20202_s27 + $0xc78] sm:$0xff]  ;;  %v10648_v38 = vld [vmem:[%s20202_s27 + $0xc48] sm:$0xff] }
 0x204   : > { %3498 = vmatprep.subr.mxu0 %v10700_v7  ;;  %3587 = vmatprep.subr.mxu1 %v10702_v9  ;;  %v10650_v2 = vld [vmem:[%s20202_s27 + $0xc58] sm:$0xff]  ;;  %v10647_v4 = vld [vmem:[%s20202_s27 + $0xc40] sm:$0xff]  ;;  %v10649_v6 = vld [vmem:[%s20202_s27 + $0xc50] sm:$0xff] }
 0x205   : > { %3499 = vmatpush1.msra.mxu0 %v10699_v51  ;;  %3588 = vmatpush1.msra.mxu1 %v10701_v30  ;;  %v10644_v7 = vld [vmem:[%s20202_s27 + $0xc28] sm:$0xff]  ;;  %v10646_v9 = vld [vmem:[%s20202_s27 + $0xc38] sm:$0xff] }
 0x206   : > { %3500 = vmatprep.subr.mxu0 %v10696_v53  ;;  %3589 = vmatprep.subr.mxu1 %v10698_v20  ;;  %v2581_v53 = vld [vmem:[#allocation2 + $0x38] sm:$0xff]  ;;  %v10643_v20 = vld [vmem:[%s20202_s27 + $0xc20] sm:$0xff] }
 0x207   : > { %10632 = vmatprep.mubr.msk.f32.mxu0 %vm815_vm0, %v14781_v37  ;;  %10636 = vmatprep.mubr.msk.f32.mxu1 %vm815_vm0, %v14781_v37  ;;  %v10688_v37 = vld [vmem:[%s20202_s27 + $0xd88] sm:$0xff] }
 0x208   : > { %3501 = vmatpush1.msra.mxu0 %v10695_v11  ;;  %3590 = vmatpush1.msra.mxu1 %v10697_v26  ;;  %v10645_v11 = vld [vmem:[%s20202_s27 + $0xc30] sm:$0xff] }
 0x209   : > { %3155 = vmatmul.mubr.f32.gmra.mxu0 %v14791_v47  ;;  %3244 = vmatmul.mubr.f32.gmra.mxu1 %v14791_v47  ;;  %v10689_v47 = vld [vmem:[%s20202_s27 + $0xd90] sm:$0xff] }
 0x20a   : > { %3502 = vmatprep.subr.mxu0 %v10692_v28  ;;  %3591 = vmatprep.subr.mxu1 %v10694_v14  ;;  %v10640_v28 = vld [vmem:[%s20202_s27 + $0xc08] sm:$0xff]  ;;  %v10642_v14 = vld [vmem:[%s20202_s27 + $0xc18] sm:$0xff] }
 0x20b   : > { %3503 = vmatpush1.msra.mxu0 %v10691_v31  ;;  %3592 = vmatpush1.msra.mxu1 %v10693_v17  ;;  %v10639_v31 = vld [vmem:[%s20202_s27 + $0xc00] sm:$0xff]  ;;  %v10641_v17 = vld [vmem:[%s20202_s27 + $0xc10] sm:$0xff] }
 0x20c   : > { %3504 = vmatprep.subr.mxu0 %v10688_v37  ;;  %3593 = vmatprep.subr.mxu1 %v10690_v35  ;;  %v10732_v37 = vld [vmem:[%s20202_s27 + $0xee8] sm:$0xff]  ;;  %v10734_v35 = vld [vmem:[%s20202_s27 + $0xef8] sm:$0xff] }
 0x20d   : > { %10633 = vmatprep.mubr.msk.f32.mxu0 %vm815_vm0, %v14823_v23  ;;  %10637 = vmatprep.mubr.msk.f32.mxu1 %vm815_vm0, %v14823_v23  ;;  %v10680_v23 = vld [vmem:[%s20202_s27 + $0xd48] sm:$0xff] }
 0x20e   : > { %3505 = vmatpush1.msra.mxu0 %v10687_v18  ;;  %3594 = vmatpush1.msra.mxu1 %v10689_v47 }
 0x20f   : > { %3161 = vmatmul.mubr.f32.gmra.mxu0 %v14833_v27  ;;  %3250 = vmatmul.mubr.f32.gmra.mxu1 %v14833_v27  ;;  %v10681_v27 = vld [vmem:[%s20202_s27 + $0xd50] sm:$0xff] }
 0x210   : > { %3506 = vmatprep.subr.mxu0 %v10684_v33  ;;  %3595 = vmatprep.subr.mxu1 %v10686_v44  ;;  %v10731_v33 = vld [vmem:[%s20202_s27 + $0xee0] sm:$0xff]  ;;  %v10733_v44 = vld [vmem:[%s20202_s27 + $0xef0] sm:$0xff] }
 0x211   : > { %3507 = vmatpush1.msra.mxu0 %v10683_v19  ;;  %3596 = vmatpush1.msra.mxu1 %v10685_v21  ;;  %v10728_v19 = vld [vmem:[%s20202_s27 + $0xec8] sm:$0xff]  ;;  %v10730_v21 = vld [vmem:[%s20202_s27 + $0xed8] sm:$0xff] }
 0x212   : > { %3508 = vmatprep.subr.mxu0 %v10680_v23  ;;  %3597 = vmatprep.subr.mxu1 %v10682_v15 }
 0x213   : > { %10634 = vmatprep.mubr.msk.f32.mxu0 %vm815_vm0, %v14793_v8  ;;  %10638 = vmatprep.mubr.msk.f32.mxu1 %vm815_vm0, %v14793_v8  ;;  %v10672_v8 = vld [vmem:[%s20202_s27 + $0xd08] sm:$0xff] }
 0x214   : > { %3509 = vmatpush1.msra.mxu0 %v10679_v1  ;;  %3598 = vmatpush1.msra.mxu1 %v10681_v27  ;;  %v2585_v1 = vld [vmem:[#allocation2 + $0x58] sm:$0xff]  ;;  %v10727_v27 = vld [vmem:[%s20202_s27 + $0xec0] sm:$0xff] }
 0x215   : > { %3167 = vmatmul.mubr.f32.gmra.mxu0 %v14811_v63  ;;  %3256 = vmatmul.mubr.f32.gmra.mxu1 %v14811_v63  ;;  %v10668_v63 = vld [vmem:[%s20202_s27 + $0xce8] sm:$0xff] }
 0x216   : > { %3510 = vmatprep.subr.mxu0 %v10676_v22  ;;  %3599 = vmatprep.subr.mxu1 %v10678_v40  ;;  %v10729_v22 = vld [vmem:[%s20202_s27 + $0xed0] sm:$0xff]  ;;  %v10724_v40 = vld [vmem:[%s20202_s27 + $0xea8] sm:$0xff] }
 0x217   : > { %3511 = vmatpush1.msra.mxu0 %v10675_v43  ;;  %3600 = vmatpush1.msra.mxu1 %v10677_v29  ;;  %v10726_v29 = vld [vmem:[%s20202_s27 + $0xeb8] sm:$0xff] }
 0x218   : > { %3512 = vmatprep.subr.mxu0 %v10672_v8  ;;  %3601 = vmatprep.subr.mxu1 %v10674_v32  ;;  %v10723_v8 = vld [vmem:[%s20202_s27 + $0xea0] sm:$0xff]  ;;  %v10725_v32 = vld [vmem:[%s20202_s27 + $0xeb0] sm:$0xff] }
 0x219   : > { %3513 = vmatpush1.msra.mxu0 %v10671_v0  ;;  %3602 = vmatpush1.msra.mxu1 %v10673_v34  ;;  %v10720_v0 = vld [vmem:[%s20202_s27 + $0xe88] sm:$0xff]  ;;  %v10722_v34 = vld [vmem:[%s20202_s27 + $0xe98] sm:$0xff] }
 0x21a   : > { %3514 = vmatprep.subr.mxu0 %v10668_v63  ;;  %3603 = vmatprep.subr.mxu1 %v10670_v60  ;;  %v10719_v63 = vld [vmem:[%s20202_s27 + $0xe80] sm:$0xff]  ;;  %v10721_v60 = vld [vmem:[%s20202_s27 + $0xe90] sm:$0xff] }
 0x21b   : > { %3515 = vmatpush1.msra.mxu0 %v10667_v5  ;;  %3604 = vmatpush1.msra.mxu1 %v10669_v50  ;;  %v15248_v13 = vpop.f32.mrf.mxu0  ;;  %v15250_v42 = vpop.f32.mrf.mxu1  ;;  %v2586_v50 = vld [vmem:[#allocation2 + $0x60] sm:$0x3f] }
 0x21c   : > { %3516 = vmatprep.subr.mxu0 %v10664_v46  ;;  %3605 = vmatprep.subr.mxu1 %v10666_v54  ;;  %v2588_v54 = vld [vmem:[#allocation2 + $0x70] sm:$0x3f] }
 0x21d   : > { %3517 = vmatpush1.msra.mxu0 %v10663_v39  ;;  %3606 = vmatpush1.msra.mxu1 %v10665_v25  ;;  %v15264_v49 = vpop.f32.mrf.mxu0  ;;  %v2278_v12 = vpop.f32.mrf.mxu1  ;;  %v10716_v39 = vld [vmem:[%s20202_s27 + $0xe68] sm:$0xff]  ;;  %v10718_v25 = vld [vmem:[%s20202_s27 + $0xe78] sm:$0xff] }
 0x21e   : > { %3518 = vmatprep.subr.mxu0 %v10660_v57  ;;  %3607 = vmatprep.subr.mxu1 %v10662_v41  ;;  %v2593_v58 = vadd.f32 %v2577_v24, %v2278_v12  ;;  %v3359_v57 = vld [vmem:[%s12709_s30 + $0x8] sm:$0xfc]  ;;  %v2589_v24 = vld [vmem:[#allocation2 + $0x78] sm:$0x3f] }
 0x21f   : > { %3519 = vmatpush1.msra.mxu0 %v10659_v45  ;;  %3608 = vmatpush1.msra.mxu1 %v10661_v16  ;;  %v15391_v16 = vld [vmem:[%s12709_s30 + $0x18] sm:$0xff] }
 0x220   : > { %3520 = vmatprep.subr.mxu0 %v10656_v10  ;;  %3609 = vmatprep.subr.mxu1 %v10658_v48  ;;  %2609 = vst.msk [vmem:[#allocation2 + $0x18] sm:$0xff] %vm1283_vm1, %v2593_v58  ;;  %v2587_v48 = vld [vmem:[#allocation2 + $0x68] sm:$0x3f] }
 0x221   : > { %3521 = vmatpush1.msra.mxu0 %v10655_v55  ;;  %3610 = vmatpush1.msra.mxu1 %v10657_v56  ;;  %v15291_v52 = vpop.f32.mrf.mxu0  ;;  %v15293_v3 = vpop.f32.mrf.mxu1  ;;  %v10715_v55 = vld [vmem:[%s20202_s27 + $0xe60] sm:$0xff]  ;;  %v10717_v56 = vld [vmem:[%s20202_s27 + $0xe70] sm:$0xff]  ;;  %v10712_v58 = vld [vmem:[%s20202_s27 + $0xe48] sm:$0xff] }
 0x222   : > { %3522 = vmatprep.subr.mxu0 %v10652_v59  ;;  %3611 = vmatprep.subr.mxu1 %v10654_v36 }
 0x223   : > { %3523 = vmatpush1.msra.mxu0 %v10651_v61  ;;  %3612 = vmatpush1.msra.mxu1 %v10653_v62  ;;  %v15307_v51 = vpop.f32.mrf.mxu0  ;;  %v2284_v30 = vpop.f32.mrf.mxu1  ;;  %v10714_v61 = vld [vmem:[%s20202_s27 + $0xe58] sm:$0xff]  ;;  %v3358_v62 = vld [vmem:[%s12709_s30] sm:$0xfc] }
 0x224   : > { %3524 = vmatprep.subr.mxu0 %v10648_v38  ;;  %3613 = vmatprep.subr.mxu1 %v10650_v2  ;;  %v2597_v26 = vadd.f32 %v2581_v53, %v2284_v30  ;;  %v15407_v38 = vld [vmem:[%s12709_s30 + $0x10] sm:$0xff]  ;;  %v10711_v2 = vld [vmem:[%s20202_s27 + $0xe40] sm:$0xff]  ;;  %v10710_v30 = vld [vmem:[%s20202_s27 + $0xe38] sm:$0xff] }
 0x225   : > { %3525 = vmatpush1.msra.mxu0 %v10647_v4  ;;  %3614 = vmatpush1.msra.mxu1 %v10649_v6  ;;  %v10713_v4 = vld [vmem:[%s20202_s27 + $0xe50] sm:$0xff]  ;;  %v3475_v6 = vrot.slane %v3359_v57, 2  ;;  %v10707_v53 = vld [vmem:[%s20202_s27 + $0xe20] sm:$0xff]  ;;  %v10794_v57 = vld [vmem:[%s20204_s5 + $0xd98] sm:$0xff] }
 0x226   : > { %3526 = vmatprep.subr.mxu0 %v10644_v7  ;;  %3615 = vmatprep.subr.mxu1 %v10646_v9  ;;  %2613 = vst.msk [vmem:[#allocation2 + $0x38] sm:$0xff] %vm1283_vm1, %v2597_v26  ;;  %v3476_v7 = vrot.slane %v15391_v16, 2  ;;  %v10708_v9 = vld [vmem:[%s20202_s27 + $0xe28] sm:$0xff]  ;;  %v3473_v26 = vrot.slane %v15407_v38, 2  ;;  %v10793_v16 = vld [vmem:[%s20204_s5 + $0xd90] sm:$0xff]  ;;  %v10779_v38 = vld [vmem:[%s20204_s5 + $0xd20] sm:$0xff] }
 0x227   : > { %3527 = vmatpush1.msra.mxu0 %v10643_v20  ;;  %3616 = vmatpush1.msra.mxu1 %v10645_v11  ;;  %v15334_v18 = vpop.f32.mrf.mxu0  ;;  %v15336_v47 = vpop.f32.mrf.mxu1  ;;  %v10709_v20 = vld [vmem:[%s20202_s27 + $0xe30] sm:$0xff]  ;;  %v3472_v11 = vrot.slane %v3358_v62, 2  ;;  %v10782_v62 = vld [vmem:[%s20204_s5 + $0xd38] sm:$0xff] }
 0x228   : > { %3528 = vmatprep.subr.mxu0 %v10640_v28  ;;  %3617 = vmatprep.subr.mxu1 %v10642_v14  ;;  %v10704_v28 = vld [vmem:[%s20202_s27 + $0xe08] sm:$0xff]  ;;  %v10706_v14 = vld [vmem:[%s20202_s27 + $0xe18] sm:$0xff] }
 0x229   : > { %3529 = vmatpush1.msra.mxu0 %v10639_v31  ;;  %3618 = vmatpush1.msra.mxu1 %v10641_v17  ;;  %v15350_v23 = vpop.f32.mrf.mxu0  ;;  %v2290_v15 = vpop.f32.mrf.mxu1  ;;  %v3363_v31 = vld [vmem:[%s12709_s30 + $0x28] sm:$0xff]  ;;  %v10703_v17 = vld [vmem:[%s20202_s27 + $0xe00] sm:$0xff] }
 0x22a   : > { %3546 = vmatprep.subr.mxu0 %v10732_v37  ;;  %3635 = vmatprep.subr.mxu1 %v10734_v35  ;;  %v2601_v43 = vadd.f32 %v2585_v1, %v2290_v15  ;;  %v15441_v37 = vsel %vm3471_vm4, %v3475_v6, %v3476_v7  ;;  %v10705_v35 = vld [vmem:[%s20202_s27 + $0xe10] sm:$0xff]  ;;  %v10806_v15 = vld [vmem:[%s20204_s5 + $0xdf8] sm:$0xff]  ;;  %v10803_v1 = vld [vmem:[%s20204_s5 + $0xde0] sm:$0xff] }
 0x22b   : > { %3547 = vmatpush2.msra.mxu0 %v10731_v33  ;;  %3636 = vmatpush2.msra.mxu1 %v10733_v44  ;;  %v3362_v33 = vld [vmem:[%s12709_s30 + $0x20] sm:$0xff]  ;;  %v15448_v44 = vsel %vm3471_vm4, %v3472_v11, %v3473_v26  ;;  %v10778_v6 = vld [vmem:[%s20204_s5 + $0xd18] sm:$0xff]  ;;  %v10773_v11 = vld [vmem:[%s20204_s5 + $0xcf0] sm:$0xff] }
 0x22c   : > { %3548 = vmatprep.subr.mxu0 %v10728_v19  ;;  %3637 = vmatprep.subr.mxu1 %v10730_v21  ;;  %2617 = vst.msk [vmem:[#allocation2 + $0x58] sm:$0xff] %vm1283_vm1, %v2601_v43  ;;  %v3480_v19 = vrot.slane %v3363_v31, 2  ;;  %v10804_v21 = vld [vmem:[%s20204_s5 + $0xde8] sm:$0xff]  ;;  %v10802_v43 = vld [vmem:[%s20204_s5 + $0xdd8] sm:$0xff]  ;;  %v10769_v31 = vld [vmem:[%s20204_s5 + $0xcd0] sm:$0xff] }
 0x22d   : > { %3549 = vmatpush2.msra.mxu0 %v10727_v27  ;;  %3638 = vmatpush2.msra.mxu1 %v10729_v22  ;;  %v2205_v5 = vpop.f32.mrf.mxu0  ;;  %v2294_v46 = vpop.f32.mrf.mxu1  ;;  %v10805_v27 = vld [vmem:[%s20204_s5 + $0xdf0] sm:$0xff]  ;;  %v3478_v22 = vrot.slane %v3362_v33, 2 }
 0x22e   : > { %3550 = vmatprep.subr.mxu0 %v10724_v40  ;;  %3639 = vmatprep.subr.mxu1 %v10726_v29  ;;  %v2602_v41 = vadd.f32 %v2586_v50, %v2205_v5  ;;  %v2604_v45 = vadd.f32 %v2588_v54, %v2294_v46  ;;  %v10800_v40 = vld [vmem:[%s20204_s5 + $0xdc8] sm:$0xff]  ;;  %v3365_v29 = vld [vmem:[%s12709_s30 + $0x38] sm:$0xff]  ;;  %v10795_v46 = vld [vmem:[%s20204_s5 + $0xda0] sm:$0xff] }
 0x22f   : > { %3551 = vmatpush2.msra.mxu0 %v10723_v8  ;;  %3640 = vmatpush2.msra.mxu1 %v10725_v32  ;;  %v2207_v10 = vpop.f32.mrf.mxu0  ;;  %v2296_v12 = vpop.f32.mrf.mxu1  ;;  %v15476_v8 = vsel %vm3471_vm4, %v3476_v7, %v3480_v19  ;;  %v10799_v32 = vld [vmem:[%s20204_s5 + $0xdc0] sm:$0xff]  ;;  %v10796_v5 = vld [vmem:[%s20204_s5 + $0xda8] sm:$0xff]  ;;  %v10798_v50 = vld [vmem:[%s20204_s5 + $0xdb8] sm:$0xff] }
 0x230   : > { %3552 = vmatprep.subr.mxu0 %v10720_v0  ;;  %3641 = vmatprep.subr.mxu1 %v10722_v34  ;;  %2618 = vst [vmem:[#allocation2 + $0x60] sm:$0x3f] %v2602_v41  ;;  %2620 = vst [vmem:[#allocation2 + $0x70] sm:$0x3f] %v2604_v45  ;;  %v2603_v59 = vadd.f32 %v2587_v48, %v2207_v10  ;;  %v2605_v36 = vadd.f32 %v2589_v24, %v2296_v12  ;;  %v10801_v0 = vld [vmem:[%s20204_s5 + $0xdd0] sm:$0xff]  ;;  %v10791_v45 = vld [vmem:[%s20204_s5 + $0xd80] sm:$0xff] }
 0x231   : > { %3553 = vmatpush2.msra.mxu0 %v10719_v63  ;;  %3642 = vmatpush2.msra.mxu1 %v10721_v60  ;;  %v3364_v34 = vld [vmem:[%s12709_s30 + $0x30] sm:$0xff]  ;;  %v15486_v63 = vsel %vm3471_vm4, %v3473_v26, %v3478_v22  ;;  %v15488_v60 = vrot.slane %v3365_v29, 2  ;;  %v10788_v48 = vld [vmem:[%s20204_s5 + $0xd68] sm:$0xff]  ;;  %v10790_v12 = vld [vmem:[%s20204_s5 + $0xd78] sm:$0xff]  ;;  %s20207_s30 = sld [smem:[#allocation27_spill]] }
 0x232   : > { %3554 = vmatprep.subr.mxu0 %v10716_v39  ;;  %3643 = vmatprep.subr.mxu1 %v10718_v25  ;;  %2619 = vst [vmem:[#allocation2 + $0x68] sm:$0x3f] %v2603_v59  ;;  %2621 = vst.msk [vmem:[#allocation2 + $0x78] sm:$0x3f] %vm1296_vm3, %v2605_v36  ;;  %v10797_v54 = vld [vmem:[%s20204_s5 + $0xdb0] sm:$0xff]  ;;  %v15506_v39 = vrot.slane %v3364_v34, 2 }
 0x233   : > { %3555 = vmatpush2.msra.mxu0 %v10715_v55  ;;  %3644 = vmatpush2.msra.mxu1 %v10717_v56  ;;  %v10792_v25 = vld [vmem:[%s20204_s5 + $0xd88] sm:$0xff]  ;;  %v15518_v41 = vsel %vm3471_vm4, %v3480_v19, %v15488_v60  ;;  %v10787_v24 = vld [vmem:[%s20204_s5 + $0xd60] sm:$0xff]  ;;  %v10789_v55 = vld [vmem:[%s20204_s5 + $0xd70] sm:$0xff] }
 0x234   : > { %3556 = vmatprep.subr.mxu0 %v10712_v58  ;;  %3645 = vmatprep.subr.mxu1 %v10714_v61  ;;  %v15528_v10 = vsel %vm3471_vm4, %v3478_v22, %v15506_v39  ;;  %v10784_v56 = vld [vmem:[%s20204_s5 + $0xd48] sm:$0xff]  ;;  %v10786_v58 = vld [vmem:[%s20204_s5 + $0xd58] sm:$0xff]  ;;  %v10783_v59 = vld [vmem:[%s20204_s5 + $0xd40] sm:$0xff] }
 0x235   : > { %3557 = vmatpush2.msra.mxu0 %v10711_v2  ;;  %3646 = vmatpush2.msra.mxu1 %v10713_v4  ;;  %v10785_v36 = vld [vmem:[%s20204_s5 + $0xd50] sm:$0xff]  ;;  %v10780_v61 = vld [vmem:[%s20204_s5 + $0xd28] sm:$0xff]  ;;  %v10775_v7 = vld [vmem:[%s20204_s5 + $0xd00] sm:$0xff] }
 0x236   : > { %3558 = vmatprep.subr.mxu0 %v10708_v9  ;;  %3647 = vmatprep.subr.mxu1 %v10710_v30  ;;  %v10781_v2 = vld [vmem:[%s20204_s5 + $0xd30] sm:$0xff]  ;;  %v10776_v4 = vld [vmem:[%s20204_s5 + $0xd08] sm:$0xff]  ;;  %v10759_v29 = vld [vmem:[%s20204_s5 + $0xc80] sm:$0xff] }
 0x237   : > { %3559 = vmatpush2.msra.mxu0 %v10707_v53  ;;  %3648 = vmatpush2.msra.mxu1 %v10709_v20  ;;  %v10777_v9 = vld [vmem:[%s20204_s5 + $0xd10] sm:$0xff]  ;;  %v10772_v30 = vld [vmem:[%s20204_s5 + $0xce8] sm:$0xff]  ;;  %v10774_v53 = vld [vmem:[%s20204_s5 + $0xcf8] sm:$0xff]  ;;  %s20208_s12 = smov %s20207_s30 }
 0x238   : > { %3560 = vmatprep.subr.mxu0 %v10704_v28  ;;  %3649 = vmatprep.subr.mxu1 %v10706_v14  ;;  %v10771_v20 = vld [vmem:[%s20204_s5 + $0xce0] sm:$0xff]  ;;  %v10768_v26 = vld [vmem:[%s20204_s5 + $0xcc8] sm:$0xff]  ;;  %v10770_v28 = vld [vmem:[%s20204_s5 + $0xcd8] sm:$0xff] }
 0x239   : > { %3561 = vmatpush2.msra.mxu0 %v10703_v17  ;;  %10735 = vmatprep.mubr.msk.f32.mxu0 %vm815_vm0, %v15441_v37  ;;  %v10767_v14 = vld [vmem:[%s20204_s5 + $0xcc0] sm:$0xff]  ;;  %v10764_v17 = vld [vmem:[%s20204_s5 + $0xca8] sm:$0xff] }
 0x23a   : > { %3650 = vmatpush2.msra.mxu1 %v10705_v35  ;;  %10739 = vmatprep.mubr.msk.f32.mxu1 %vm815_vm0, %v15441_v37  ;;  %v10766_v35 = vld [vmem:[%s20204_s5 + $0xcb8] sm:$0xff]  ;;  %v10756_v34 = vld [vmem:[%s20204_s5 + $0xc68] sm:$0xff] }
 0x23b   : > { %3563 = vmatmul.mubr.f32.vlgmr.msra.gmra.mxu0 %v15448_v44  ;;  %3652 = vmatmul.mubr.f32.vlgmr.msra.gmra.mxu1 %v15448_v44 }
 0x23c   : > { %3773 = vmatprep.subr.mxu0 %v10804_v21  ;;  %3862 = vmatprep.subr.mxu1 %v10806_v15  ;;  %v10763_v21 = vld [vmem:[%s20204_s5 + $0xca0] sm:$0xff]  ;;  %v10765_v15 = vld [vmem:[%s20204_s5 + $0xcb0] sm:$0xff] }
 0x23d   : > { %3774 = vmatpush1.msra.mxu0 %v10803_v1  ;;  %3863 = vmatpush1.msra.mxu1 %v10805_v27  ;;  %v10760_v1 = vld [vmem:[%s20204_s5 + $0xc88] sm:$0xff]  ;;  %v10762_v27 = vld [vmem:[%s20204_s5 + $0xc98] sm:$0xff] }
 0x23e   : > { %3775 = vmatprep.subr.mxu0 %v10800_v40  ;;  %3864 = vmatprep.subr.mxu1 %v10802_v43  ;;  %v2625_v43 = vld [vmem:[#allocation3 + $0x18] sm:$0xff] }
 0x23f   : > { %10736 = vmatprep.mubr.msk.f32.mxu0 %vm815_vm0, %v15476_v8  ;;  %10740 = vmatprep.mubr.msk.f32.mxu1 %vm815_vm0, %v15476_v8 }
 0x240   : > { %3776 = vmatpush1.msra.mxu0 %v10799_v32  ;;  %3865 = vmatpush1.msra.mxu1 %v10801_v0  ;;  %v10761_v32 = vld [vmem:[%s20204_s5 + $0xc90] sm:$0xff] }
 0x241   : > { %3569 = vmatmul.mubr.f32.gmra.mxu0 %v15486_v63  ;;  %3658 = vmatmul.mubr.f32.gmra.mxu1 %v15486_v63 }
 0x242   : > { %3777 = vmatprep.subr.mxu0 %v10796_v5  ;;  %3866 = vmatprep.subr.mxu1 %v10798_v50  ;;  %v10758_v5 = vld [vmem:[%s20204_s5 + $0xc78] sm:$0xff]  ;;  %v10755_v50 = vld [vmem:[%s20204_s5 + $0xc60] sm:$0xff] }
 0x243   : > { %3778 = vmatpush1.msra.mxu0 %v10795_v46  ;;  %3867 = vmatpush1.msra.mxu1 %v10797_v54  ;;  %v10757_v46 = vld [vmem:[%s20204_s5 + $0xc70] sm:$0xff]  ;;  %v10752_v54 = vld [vmem:[%s20204_s5 + $0xc48] sm:$0xff] }
 0x244   : > { %3779 = vmatprep.subr.mxu0 %v10792_v25  ;;  %3868 = vmatprep.subr.mxu1 %v10794_v57  ;;  %v10754_v25 = vld [vmem:[%s20204_s5 + $0xc58] sm:$0xff] }
 0x245   : > { %10737 = vmatprep.mubr.msk.f32.mxu0 %vm815_vm0, %v15518_v41  ;;  %10741 = vmatprep.mubr.msk.f32.mxu1 %vm815_vm0, %v15518_v41 }
 0x246   : > { %3780 = vmatpush1.msra.mxu0 %v10791_v45  ;;  %3869 = vmatpush1.msra.mxu1 %v10793_v16  ;;  %v10751_v16 = vld [vmem:[%s20204_s5 + $0xc40] sm:$0xff] }
 0x247   : > { %3575 = vmatmul.mubr.f32.gmra.mxu0 %v15528_v10  ;;  %3664 = vmatmul.mubr.f32.gmra.mxu1 %v15528_v10 }
 0x248   : > { %3781 = vmatprep.subr.mxu0 %v10788_v48  ;;  %3870 = vmatprep.subr.mxu1 %v10790_v12  ;;  %v10753_v48 = vld [vmem:[%s20204_s5 + $0xc50] sm:$0xff]  ;;  %v10748_v12 = vld [vmem:[%s20204_s5 + $0xc28] sm:$0xff] }
 0x249   : > { %3782 = vmatpush1.msra.mxu0 %v10787_v24  ;;  %3871 = vmatpush1.msra.mxu1 %v10789_v55  ;;  %v10750_v24 = vld [vmem:[%s20204_s5 + $0xc38] sm:$0xff] }
 0x24a   : > { %3783 = vmatprep.subr.mxu0 %v10784_v56  ;;  %3872 = vmatprep.subr.mxu1 %v10786_v58  ;;  %v2629_v58 = vld [vmem:[#allocation3 + $0x38] sm:$0xff] }
 0x24b   : > { %10738 = vmatprep.mubr.msk.f32.mxu0 %vm815_vm0, %v15488_v60  ;;  %10742 = vmatprep.mubr.msk.f32.mxu1 %vm815_vm0, %v15488_v60 }
 0x24c   : > { %3784 = vmatpush1.msra.mxu0 %v10783_v59  ;;  %3873 = vmatpush1.msra.mxu1 %v10785_v36  ;;  %v10747_v59 = vld [vmem:[%s20204_s5 + $0xc20] sm:$0xff]  ;;  %v10749_v36 = vld [vmem:[%s20204_s5 + $0xc30] sm:$0xff] }
 0x24d   : > { %3581 = vmatmul.mubr.f32.gmra.mxu0 %v15506_v39  ;;  %3670 = vmatmul.mubr.f32.gmra.mxu1 %v15506_v39 }
 0x24e   : > { %3785 = vmatprep.subr.mxu0 %v10780_v61  ;;  %3874 = vmatprep.subr.mxu1 %v10782_v62  ;;  %v10744_v62 = vld [vmem:[%s20204_s5 + $0xc08] sm:$0xff] }
 0x24f   : > { %3786 = vmatpush1.msra.mxu0 %v10779_v38  ;;  %3875 = vmatpush1.msra.mxu1 %v10781_v2  ;;  %v10746_v38 = vld [vmem:[%s20204_s5 + $0xc18] sm:$0xff]  ;;  %v10743_v2 = vld [vmem:[%s20204_s5 + $0xc00] sm:$0xff] }
 0x250   : > { %3787 = vmatprep.subr.mxu0 %v10776_v4  ;;  %3876 = vmatprep.subr.mxu1 %v10778_v6  ;;  %v10745_v4 = vld [vmem:[%s20204_s5 + $0xc10] sm:$0xff]  ;;  %v10836_v6 = vld [vmem:[%s20204_s5 + $0xee8] sm:$0xff] }
 0x251   : > { %3788 = vmatpush1.msra.mxu0 %v10775_v7  ;;  %3877 = vmatpush1.msra.mxu1 %v10777_v9  ;;  %v10838_v7 = vld [vmem:[%s20204_s5 + $0xef8] sm:$0xff] }
 0x252   : > { %3789 = vmatprep.subr.mxu0 %v10772_v30  ;;  %3878 = vmatprep.subr.mxu1 %v10774_v53  ;;  %v10835_v53 = vld [vmem:[%s20204_s5 + $0xee0] sm:$0xff] }
 0x253   : > { %3790 = vmatpush1.msra.mxu0 %v10771_v20  ;;  %3879 = vmatpush1.msra.mxu1 %v10773_v11  ;;  %v15620_v33 = vpop.f32.mrf.mxu0  ;;  %v15622_v19 = vpop.f32.mrf.mxu1  ;;  %v10837_v20 = vld [vmem:[%s20204_s5 + $0xef0] sm:$0xff]  ;;  %v10832_v11 = vld [vmem:[%s20204_s5 + $0xec8] sm:$0xff] }
 0x254   : > { %3791 = vmatprep.subr.mxu0 %v10768_v26  ;;  %3880 = vmatprep.subr.mxu1 %v10770_v28  ;;  %v10834_v26 = vld [vmem:[%s20204_s5 + $0xed8] sm:$0xff] }
 0x255   : > { %3792 = vmatpush1.msra.mxu0 %v10767_v14  ;;  %3881 = vmatpush1.msra.mxu1 %v10769_v31  ;;  %v15636_v22 = vpop.f32.mrf.mxu0  ;;  %v2553_v40 = vpop.f32.mrf.mxu1  ;;  %v2633_v31 = vld [vmem:[#allocation3 + $0x58] sm:$0xff] }
 0x256   : > { %3793 = vmatprep.subr.mxu0 %v10764_v17  ;;  %3882 = vmatprep.subr.mxu1 %v10766_v35  ;;  %v2641_v0 = vadd.f32 %v2625_v43, %v2553_v40  ;;  %v10831_v17 = vld [vmem:[%s20204_s5 + $0xec0] sm:$0xff]  ;;  %v10833_v35 = vld [vmem:[%s20204_s5 + $0xed0] sm:$0xff]  ;;  %v10824_v43 = vld [vmem:[%s20204_s5 + $0xe88] sm:$0xff] }
 0x257   : > { %3794 = vmatpush1.msra.mxu0 %v10763_v21  ;;  %3883 = vmatpush1.msra.mxu1 %v10765_v15  ;;  %v10828_v15 = vld [vmem:[%s20204_s5 + $0xea8] sm:$0xff]  ;;  %v10829_v40 = vld [vmem:[%s20204_s5 + $0xeb0] sm:$0xff] }
 0x258   : > { %3795 = vmatprep.subr.mxu0 %v10760_v1  ;;  %3884 = vmatprep.subr.mxu1 %v10762_v27  ;;  %2657 = vst.msk [vmem:[#allocation3 + $0x18] sm:$0xff] %vm1283_vm1, %v2641_v0  ;;  %v10830_v1 = vld [vmem:[%s20204_s5 + $0xeb8] sm:$0xff]  ;;  %v10827_v27 = vld [vmem:[%s20204_s5 + $0xea0] sm:$0xff] }
 0x259   : > { %3796 = vmatpush1.msra.mxu0 %v10759_v29  ;;  %3885 = vmatpush1.msra.mxu1 %v10761_v32  ;;  %v15663_v57 = vpop.f32.mrf.mxu0  ;;  %v15665_v45 = vpop.f32.mrf.mxu1  ;;  %v10826_v29 = vld [vmem:[%s20204_s5 + $0xe98] sm:$0xff]  ;;  %v2634_v0 = vld [vmem:[#allocation3 + $0x60] sm:$0x3f] }
 0x25a   : > { %3797 = vmatprep.subr.mxu0 %v10756_v34  ;;  %3886 = vmatprep.subr.mxu1 %v10758_v5  ;;  %v2636_v5 = vld [vmem:[#allocation3 + $0x70] sm:$0x3f] }
 0x25b   : > { %3798 = vmatpush1.msra.mxu0 %v10755_v50  ;;  %3887 = vmatpush1.msra.mxu1 %v10757_v46  ;;  %v15679_v55 = vpop.f32.mrf.mxu0  ;;  %v2559_v56 = vpop.f32.mrf.mxu1  ;;  %v10823_v50 = vld [vmem:[%s20204_s5 + $0xe80] sm:$0xff]  ;;  %v10825_v46 = vld [vmem:[%s20204_s5 + $0xe90] sm:$0xff] }
 0x25c   : > { %3799 = vmatprep.subr.mxu0 %v10752_v54  ;;  %3888 = vmatprep.subr.mxu1 %v10754_v25  ;;  %v2645_v61 = vadd.f32 %v2629_v58, %v2559_v56  ;;  %v10820_v54 = vld [vmem:[%s20204_s5 + $0xe68] sm:$0xff]  ;;  %v2637_v58 = vld [vmem:[#allocation3 + $0x78] sm:$0x3f] }
 0x25d   : > { %3800 = vmatpush1.msra.mxu0 %v10751_v16  ;;  %3889 = vmatpush1.msra.mxu1 %v10753_v48  ;;  %v10822_v48 = vld [vmem:[%s20204_s5 + $0xe78] sm:$0xff] }
 0x25e   : > { %3801 = vmatprep.subr.mxu0 %v10748_v12  ;;  %3890 = vmatprep.subr.mxu1 %v10750_v24  ;;  %2661 = vst.msk [vmem:[#allocation3 + $0x38] sm:$0xff] %vm1283_vm1, %v2645_v61  ;;  %v2635_v24 = vld [vmem:[#allocation3 + $0x68] sm:$0x3f] }
 0x25f   : > { %3802 = vmatpush1.msra.mxu0 %v10747_v59  ;;  %3891 = vmatpush1.msra.mxu1 %v10749_v36  ;;  %v15706_v9 = vpop.f32.mrf.mxu0  ;;  %v15708_v30 = vpop.f32.mrf.mxu1  ;;  %v10819_v59 = vld [vmem:[%s20204_s5 + $0xe60] sm:$0xff]  ;;  %v10821_v36 = vld [vmem:[%s20204_s5 + $0xe70] sm:$0xff] }
 0x260   : > { %3803 = vmatprep.subr.mxu0 %v10744_v62  ;;  %3892 = vmatprep.subr.mxu1 %v10746_v38  ;;  %v10816_v38 = vld [vmem:[%s20204_s5 + $0xe48] sm:$0xff] }
 0x261   : > { %3804 = vmatpush1.msra.mxu0 %v10743_v2  ;;  %3893 = vmatpush1.msra.mxu1 %v10745_v4  ;;  %v15722_v28 = vpop.f32.mrf.mxu0  ;;  %v2565_v14 = vpop.f32.mrf.mxu1  ;;  %v10818_v2 = vld [vmem:[%s20204_s5 + $0xe58] sm:$0xff]  ;;  %v10815_v4 = vld [vmem:[%s20204_s5 + $0xe40] sm:$0xff] }
 0x262   : > { %3821 = vmatprep.subr.mxu0 %v10836_v6  ;;  %3910 = vmatprep.subr.mxu1 %v10838_v7  ;;  %v2649_v21 = vadd.f32 %v2633_v31, %v2565_v14  ;;  %v10817_v6 = vld [vmem:[%s20204_s5 + $0xe50] sm:$0xff]  ;;  %v10812_v7 = vld [vmem:[%s20204_s5 + $0xe28] sm:$0xff]  ;;  %v10810_v14 = vld [vmem:[%s20204_s5 + $0xe18] sm:$0xff] }
 0x263   : > { %3822 = vmatpush2.msra.mxu0 %v10835_v53  ;;  %3911 = vmatpush2.msra.mxu1 %v10837_v20  ;;  %v10814_v53 = vld [vmem:[%s20204_s5 + $0xe38] sm:$0xff]  ;;  %v10811_v20 = vld [vmem:[%s20204_s5 + $0xe20] sm:$0xff] }
 0x264   : > { %3823 = vmatprep.subr.mxu0 %v10832_v11  ;;  %3912 = vmatprep.subr.mxu1 %v10834_v26  ;;  %2665 = vst.msk [vmem:[#allocation3 + $0x58] sm:$0xff] %vm1283_vm1, %v2649_v21  ;;  %v10813_v11 = vld [vmem:[%s20204_s5 + $0xe30] sm:$0xff]  ;;  %v10808_v26 = vld [vmem:[%s20204_s5 + $0xe08] sm:$0xff]  ;;  %v10807_v31 = vld [vmem:[%s20204_s5 + $0xe00] sm:$0xff] }
 0x265   : > { %3824 = vmatpush2.msra.mxu0 %v10831_v17  ;;  %3913 = vmatpush2.msra.mxu1 %v10833_v35  ;;  %v2480_v32 = vpop.f32.mrf.mxu0  ;;  %v2569_v34 = vpop.f32.mrf.mxu1  ;;  %v10809_v17 = vld [vmem:[%s20204_s5 + $0xe10] sm:$0xff] }
 0x266   : > { %3825 = vmatprep.subr.mxu0 %v10828_v15  ;;  %3914 = vmatprep.subr.mxu1 %v10830_v1  ;;  %v2650_v25 = vadd.f32 %v2634_v0, %v2480_v32  ;;  %v2652_v16 = vadd.f32 %v2636_v5, %v2569_v34 }
 0x267   : > { %3826 = vmatpush2.msra.mxu0 %v10827_v27  ;;  %3915 = vmatpush2.msra.mxu1 %v10829_v40  ;;  %v2482_v12 = vpop.f32.mrf.mxu0  ;;  %v2571_v56 = vpop.f32.mrf.mxu1  ;;  %v2578_v40 = vld [vmem:[#allocation2 + $0x20] sm:$0xff] }
 0x268   : > { %3827 = vmatprep.subr.mxu0 %v10824_v43  ;;  %3916 = vmatprep.subr.mxu1 %v10826_v29  ;;  %2666 = vst [vmem:[#allocation3 + $0x60] sm:$0x3f] %v2650_v25  ;;  %2668 = vst [vmem:[#allocation3 + $0x70] sm:$0x3f] %v2652_v16  ;;  %v2651_v61 = vadd.f32 %v2635_v24, %v2482_v12  ;;  %v2653_v62 = vadd.f32 %v2637_v58, %v2571_v56  ;;  %v2580_v43 = vld [vmem:[#allocation2 + $0x30] sm:$0xff] }
 0x269   : > { %3828 = vmatpush2.msra.mxu0 %v10823_v50  ;;  %3917 = vmatpush2.msra.mxu1 %v10825_v46  ;;  %v2596_v29 = vadd.f32 %v2580_v43, %v15293_v3  ;;  %v3269_v50 = vld [vmem:[#allocation2 + $0x38] sm:$0xff]  ;;  %v2584_v25 = vld [vmem:[#allocation2 + $0x50] sm:$0xff] }
 0x26a   : > { %3829 = vmatprep.subr.mxu0 %v10820_v54  ;;  %3918 = vmatprep.subr.mxu1 %v10822_v48  ;;  %2667 = vst [vmem:[#allocation3 + $0x68] sm:$0x3f] %v2651_v61  ;;  %2669 = vst.msk [vmem:[#allocation3 + $0x78] sm:$0x3f] %vm1296_vm3, %v2653_v62  ;;  %v2582_v54 = vld [vmem:[#allocation2 + $0x40] sm:$0xff] }
 0x26b   : > { %3830 = vmatpush2.msra.mxu0 %v10819_v59  ;;  %3919 = vmatpush2.msra.mxu1 %v10821_v36  ;;  %v2598_v16 = vadd.f32 %v2582_v54, %v15334_v18  ;;  %v3273_v59 = vld [vmem:[#allocation2 + $0x58] sm:$0xff]  ;;  %v3274_v62 = vld [vmem:[#allocation2 + $0x60] sm:$0x3f] }
 0x26c   : > { %3831 = vmatprep.subr.mxu0 %v10816_v38  ;;  %3920 = vmatprep.subr.mxu1 %v10818_v2  ;;  %v3276_v38 = vld [vmem:[#allocation2 + $0x70] sm:$0x3f] }
 0x26d   : > { %3832 = vmatpush2.msra.mxu0 %v10815_v4  ;;  %3921 = vmatpush2.msra.mxu1 %v10817_v6  ;;  %v3275_v6 = vld [vmem:[#allocation2 + $0x68] sm:$0x3f] }
 0x26e   : > { %3833 = vmatprep.subr.mxu0 %v10812_v7  ;;  %3922 = vmatprep.subr.mxu1 %v10814_v53  ;;  %v3277_v53 = vld [vmem:[#allocation2 + $0x78] sm:$0x3f] }
 0x26f   : > { %3834 = vmatpush2.msra.mxu0 %v10811_v20  ;;  %3923 = vmatpush2.msra.mxu1 %v10813_v11 }
 0x270   : > { %3835 = vmatprep.subr.mxu0 %v10808_v26  ;;  %3924 = vmatprep.subr.mxu1 %v10810_v14  ;;  %v2622_v26 = vld [vmem:[#allocation3] sm:$0xff]  ;;  %v2624_v14 = vld [vmem:[#allocation3 + $0x10] sm:$0xff] }
 0x271   : > { %3836 = vmatpush2.msra.mxu0 %v10807_v31  ;;  %10839 = vmatprep.mubr.msk.f32.mxu0 %vm815_vm0, %v15441_v37  ;;  %v2638_v31 = vadd.f32 %v2622_v26, %v15620_v33 }
 0x272   : > { %3925 = vmatpush2.msra.mxu1 %v10809_v17  ;;  %10843 = vmatprep.mubr.msk.f32.mxu1 %vm815_vm0, %v15441_v37  ;;  %v2574_v37 = vld [vmem:[#allocation2] sm:$0xff]  ;;  %v2640_v17 = vadd.f32 %v2624_v14, %v15622_v19  ;;  %v3323_v14 = vld [vmem:[#allocation3 + $0x68] sm:$0x3f] }
 0x273   : > { %3838 = vmatmul.mubr.f32.vlgmr.msra.gmra.mxu0 %v15448_v44  ;;  %3927 = vmatmul.mubr.f32.vlgmr.msra.gmra.mxu1 %v15448_v44  ;;  %v2576_v44 = vld [vmem:[#allocation2 + $0x10] sm:$0xff] }
 0x274   : > { %10840 = vmatprep.mubr.msk.f32.mxu0 %vm815_vm0, %v15476_v8  ;;  %10844 = vmatprep.mubr.msk.f32.mxu1 %vm815_vm0, %v15476_v8  ;;  %v2590_v8 = vadd.f32 %v2574_v37, %v15248_v13  ;;  %v2623_v37 = vld [vmem:[#allocation3 + $0x8] sm:$0xff] }
 0x277   : > { %3844 = vmatmul.mubr.f32.gmra.mxu0 %v15486_v63  ;;  %3933 = vmatmul.mubr.f32.gmra.mxu1 %v15486_v63  ;;  %v2592_v63 = vadd.f32 %v2576_v44, %v15250_v42 }
 0x278   : > { %10841 = vmatprep.mubr.msk.f32.mxu0 %vm815_vm0, %v15518_v41  ;;  %10845 = vmatprep.mubr.msk.f32.mxu1 %vm815_vm0, %v15518_v41 }
 0x27b   : > { %3850 = vmatmul.mubr.f32.gmra.mxu0 %v15528_v10  ;;  %3939 = vmatmul.mubr.f32.gmra.mxu1 %v15528_v10 }
 0x27c   : > { %10842 = vmatprep.mubr.msk.f32.mxu0 %vm815_vm0, %v15488_v60  ;;  %10846 = vmatprep.mubr.msk.f32.mxu1 %vm815_vm0, %v15488_v60  ;;  %v3265_v60 = vld [vmem:[#allocation2 + $0x18] sm:$0xff] }
 0x27f   : > { %3856 = vmatmul.mubr.f32.gmra.mxu0 %v15506_v39  ;;  %3945 = vmatmul.mubr.f32.gmra.mxu1 %v15506_v39  ;;  %v2594_v39 = vadd.f32 %v2578_v40, %v15291_v52  ;;  %v2600_v52 = vadd.f32 %v2584_v25, %v15336_v47 }
 0x28b   : > { %v2875_v41 = vpop.f32.mrf.mxu0  ;;  %v2964_v35 = vpop.f32.mrf.mxu1 }
 0x28c   : > { %v15830_v21 = vadd.f32 %v2875_v41, %v2590_v8  ;;  %v15832_v10 = vadd.f32 %v2964_v35, %v2592_v63  ;;  %v2639_v63 = vadd.f32 %v2623_v37, %v15636_v22 }
 0x28d   : > { %v15834_v15 = vpop.f32.mrf.mxu0  ;;  %v2966_v1 = vpop.f32.mrf.mxu1 }
 0x28e   : > { %v3281_v27 = vadd.f32 %v3265_v60, %v2966_v1 }
 0x290   : > { %3297 = vst.msk [vmem:[#allocation2 + $0x18] sm:$0xff] %vm1283_vm1, %v3281_v27  ;;  %v3313_v27 = vld [vmem:[#allocation3 + $0x18] sm:$0xff] }
 0x291   : > { %v2881_v13 = vpop.f32.mrf.mxu0  ;;  %v2970_v42 = vpop.f32.mrf.mxu1 }
 0x292   : > { %v15839_v32 = vadd.f32 %v2881_v13, %v2594_v39  ;;  %v15841_v0 = vadd.f32 %v2970_v42, %v2596_v29  ;;  %v2626_v39 = vld [vmem:[#allocation3 + $0x20] sm:$0xff]  ;;  %v2628_v29 = vld [vmem:[#allocation3 + $0x30] sm:$0xff]  ;;  %v2627_v13 = vld [vmem:[#allocation3 + $0x28] sm:$0xff] }
 0x293   : > { %v15843_v34 = vpop.f32.mrf.mxu0  ;;  %v2972_v5 = vpop.f32.mrf.mxu1  ;;  %v2642_v33 = vadd.f32 %v2626_v39, %v15663_v57  ;;  %v2644_v19 = vadd.f32 %v2628_v29, %v15665_v45  ;;  %v2630_v57 = vld [vmem:[#allocation3 + $0x40] sm:$0xff] }
 0x294   : > { %v3285_v46 = vadd.f32 %v3269_v50, %v2972_v5  ;;  %v2643_v5 = vadd.f32 %v2627_v13, %v15679_v55  ;;  %v2646_v45 = vadd.f32 %v2630_v57, %v15706_v9 }
 0x296   : > { %3301 = vst.msk [vmem:[#allocation2 + $0x38] sm:$0xff] %vm1283_vm1, %v3285_v46 }
 0x297   : > { %v2887_v3 = vpop.f32.mrf.mxu0  ;;  %v2976_v48 = vpop.f32.mrf.mxu1 }
 0x298   : > { %v15848_v12 = vadd.f32 %v2887_v3, %v2598_v16  ;;  %v15850_v24 = vadd.f32 %v2976_v48, %v2600_v52  ;;  %v3317_v16 = vld [vmem:[#allocation3 + $0x38] sm:$0xff]  ;;  %v2632_v48 = vld [vmem:[#allocation3 + $0x50] sm:$0xff] }
 0x299   : > { %v15852_v56 = vpop.f32.mrf.mxu0  ;;  %v2978_v58 = vpop.f32.mrf.mxu1 }
 0x29a   : > { %v3289_v36 = vadd.f32 %v3273_v59, %v2978_v58  ;;  %v2648_v58 = vadd.f32 %v2632_v48, %v15708_v30  ;;  %v2631_v59 = vld [vmem:[#allocation3 + $0x48] sm:$0xff]  ;;  %v3322_v30 = vld [vmem:[#allocation3 + $0x60] sm:$0x3f] }
 0x29b   : > { %v2583_v48 = vld [vmem:[#allocation2 + $0x48] sm:$0xff] }
 0x29c   : > { %3305 = vst.msk [vmem:[#allocation2 + $0x58] sm:$0xff] %vm1283_vm1, %v3289_v36 }
 0x29d   : > { %v2893_v61 = vpop.f32.mrf.mxu0  ;;  %v2982_v18 = vpop.f32.mrf.mxu1 }
 0x29e   : > { %v3290_v47 = vadd.f32 %v3274_v62, %v2893_v61  ;;  %v3292_v2 = vadd.f32 %v3276_v38, %v2982_v18  ;;  %v2647_v61 = vadd.f32 %v2631_v59, %v15722_v28 }
 0x29f   : > { %v2895_v4 = vpop.f32.mrf.mxu0  ;;  %v2984_v7 = vpop.f32.mrf.mxu1 }
 0x2a0   : > { %3306 = vst [vmem:[#allocation2 + $0x60] sm:$0x3f] %v3290_v47  ;;  %3308 = vst [vmem:[#allocation2 + $0x70] sm:$0x3f] %v3292_v2  ;;  %v3291_v20 = vadd.f32 %v3275_v6, %v2895_v4  ;;  %v3293_v11 = vadd.f32 %v3277_v53, %v2984_v7  ;;  %v3321_v2 = vld [vmem:[#allocation3 + $0x58] sm:$0xff] }
 0x2a1   : > { %v3324_v53 = vld [vmem:[#allocation3 + $0x70] sm:$0x3f] }
 0x2a2   : > { %3307 = vst [vmem:[#allocation2 + $0x68] sm:$0x3f] %v3291_v20  ;;  %3309 = vst.msk [vmem:[#allocation2 + $0x78] sm:$0x3f] %vm1296_vm3, %v3293_v11  ;;  %v12222_v20 = vmov 0.0  }
 0x2a3   : > { %4180 = vmatprep.mubr.f32.mxu0 %v12222_v20  ;;  %4257 = vmatprep.mubr.f32.mxu1 %v12222_v20 }
 0x2c3   : > { %v3150_v44 = vpop.f32.mrf.mxu0  ;;  %v3239_v8 = vpop.f32.mrf.mxu1 }
 0x2c4   : > { %v15859_v41 = vadd.f32 %v3150_v44, %v2638_v31  ;;  %v15861_v35 = vadd.f32 %v3239_v8, %v2640_v17  ;;  %v3325_v17 = vld [vmem:[#allocation3 + $0x78] sm:$0x3f]  ;;  %v2575_v8 = vld [vmem:[#allocation2 + $0x8] sm:$0xff] }
 0x2c5   : > { %v3152_v1 = vpop.f32.mrf.mxu0  ;;  %v3241_v60 = vpop.f32.mrf.mxu1 }
 0x2c6   : > { %v15863_v40 = vadd.f32 %v3152_v1, %v2639_v63  ;;  %v3329_v43 = vadd.f32 %v3313_v27, %v3241_v60  ;;  %v2591_v63 = vadd.f32 %v2575_v8, %v15264_v49 }
 0x2c8   : > { %3345 = vst.msk [vmem:[#allocation3 + $0x18] sm:$0xff] %vm1283_vm1, %v3329_v43  ;;  %v3279_v27 = vadd.f32 %v15834_v15, %v2591_v63 }
 0x2c9   : > { %v3156_v22 = vpop.f32.mrf.mxu0  ;;  %v3245_v42 = vpop.f32.mrf.mxu1 }
 0x2ca   : > { %v15869_v50 = vadd.f32 %v3156_v22, %v2642_v33  ;;  %v15871_v46 = vadd.f32 %v3245_v42, %v2644_v19  ;;  %v3954_v19 = vld [vmem:[#allocation2 + $0x18] sm:$0xff]  ;;  %v2579_v22 = vld [vmem:[#allocation2 + $0x28] sm:$0xff] }
 0x2cb   : > { %v3158_v54 = vpop.f32.mrf.mxu0  ;;  %v3247_v25 = vpop.f32.mrf.mxu1  ;;  %v2595_v42 = vadd.f32 %v2579_v22, %v15307_v51 }
 0x2cc   : > { %v15873_v52 = vadd.f32 %v3158_v54, %v2643_v5  ;;  %v3333_v3 = vadd.f32 %v3317_v16, %v3247_v25 }
 0x2cd   : > { %v3283_v15 = vadd.f32 %v15843_v34, %v2595_v42 }
 0x2ce   : > { %3349 = vst.msk [vmem:[#allocation3 + $0x38] sm:$0xff] %vm1283_vm1, %v3333_v3  ;;  %v3958_v3 = vld [vmem:[#allocation2 + $0x38] sm:$0xff] }
 0x2cf   : > { %v3162_v55 = vpop.f32.mrf.mxu0  ;;  %v3251_v36 = vpop.f32.mrf.mxu1  ;;  %v4002_v8 = vld [vmem:[#allocation3 + $0x18] sm:$0xff] }
 0x2d0   : > { %v15879_v62 = vadd.f32 %v3162_v55, %v2646_v45  ;;  %v15881_v18 = vadd.f32 %v3251_v36, %v2648_v58  ;;  %v2599_v45 = vadd.f32 %v2583_v48, %v15350_v23 }
 0x2d1   : > { %v3164_v38 = vpop.f32.mrf.mxu0  ;;  %v3253_v47 = vpop.f32.mrf.mxu1 }
 0x2d2   : > { %v15883_v4 = vadd.f32 %v3164_v38, %v2647_v61  ;;  %v3337_v6 = vadd.f32 %v3321_v2, %v3253_v47  ;;  %v3287_v34 = vadd.f32 %v15852_v56, %v2599_v45  ;;  %v3962_v61 = vld [vmem:[#allocation2 + $0x58] sm:$0xff]  ;;  %v3965_v2 = vld [vmem:[#allocation2 + $0x70] sm:$0x3f] }
 0x2d4   : > { %3353 = vst.msk [vmem:[#allocation3 + $0x58] sm:$0xff] %vm1283_vm1, %v3337_v6 }
 0x2d5   : > { %v3168_v9 = vpop.f32.mrf.mxu0  ;;  %v3257_v7 = vpop.f32.mrf.mxu1  ;;  %v4006_v22 = vld [vmem:[#allocation3 + $0x38] sm:$0xff] }
 0x2d6   : > { %v3338_v28 = vadd.f32 %v3322_v30, %v3168_v9  ;;  %v3340_v11 = vadd.f32 %v3324_v53, %v3257_v7  ;;  %v3964_v30 = vld [vmem:[#allocation2 + $0x68] sm:$0x3f]  ;;  %v3966_v53 = vld [vmem:[#allocation2 + $0x78] sm:$0x3f] }
 0x2d7   : > { %v3170_v26 = vpop.f32.mrf.mxu0  ;;  %v3259_v31 = vpop.f32.mrf.mxu1 }
 0x2d8   : > { %3354 = vst [vmem:[#allocation3 + $0x60] sm:$0x3f] %v3338_v28  ;;  %3356 = vst [vmem:[#allocation3 + $0x70] sm:$0x3f] %v3340_v11  ;;  %v3339_v37 = vadd.f32 %v3323_v14, %v3170_v26  ;;  %v3341_v44 = vadd.f32 %v3325_v17, %v3259_v31 }
 0x2da   : > { %3355 = vst [vmem:[#allocation3 + $0x68] sm:$0x3f] %v3339_v37  ;;  %3357 = vst.msk [vmem:[#allocation3 + $0x78] sm:$0x3f] %vm1296_vm3, %v3341_v44 }
 0x2df   : > { %v4011_v48 = vld [vmem:[#allocation3 + $0x60] sm:$0x3f]  ;;  %v4013_v45 = vld [vmem:[#allocation3 + $0x70] sm:$0x3f] }
 0x2fb   : > { %v3564_v1 = vpop.f32.mrf.mxu0  ;;  %v3653_v60 = vpop.f32.mrf.mxu1 }
 0x2fc   : > { %v15892_v43 = vadd.f32 %v3564_v1, %v15830_v21  ;;  %v15895_v39 = vadd.f32 %v3653_v60, %v15832_v10 }
 0x2fd   : > { %v3566_v29 = vpop.f32.mrf.mxu0  ;;  %v3655_v33 = vpop.f32.mrf.mxu1 }
 0x2fe   : > { %3983 = vst [vmem:[#allocation2] sm:$0xff] %v15892_v43  ;;  %3985 = vst [vmem:[#allocation2 + $0x10] sm:$0xff] %v15895_v39  ;;  %v15899_v13 = vadd.f32 %v3566_v29, %v3279_v27  ;;  %v3970_v49 = vadd.f32 %v3954_v19, %v3655_v33 }
 0x300   : > { %3984 = vst [vmem:[#allocation2 + $0x8] sm:$0xff] %v15899_v13  ;;  %3986 = vst.msk [vmem:[#allocation2 + $0x18] sm:$0xff] %vm1283_vm1, %v3970_v49 }
 0x301   : > { %v3570_v21 = vpop.f32.mrf.mxu0  ;;  %v3659_v10 = vpop.f32.mrf.mxu1 }
 0x302   : > { %v15906_v5 = vadd.f32 %v3570_v21, %v15839_v32  ;;  %v15909_v54 = vadd.f32 %v3659_v10, %v15841_v0 }
 0x303   : > { %v3572_v25 = vpop.f32.mrf.mxu0  ;;  %v3661_v16 = vpop.f32.mrf.mxu1 }
 0x304   : > { %3987 = vst [vmem:[#allocation2 + $0x20] sm:$0xff] %v15906_v5  ;;  %3989 = vst [vmem:[#allocation2 + $0x30] sm:$0xff] %v15909_v54  ;;  %v15913_v51 = vadd.f32 %v3572_v25, %v3283_v15  ;;  %v3974_v57 = vadd.f32 %v3958_v3, %v3661_v16  ;;  %v4010_v16 = vld [vmem:[#allocation3 + $0x58] sm:$0xff] }
 0x306   : > { %3988 = vst [vmem:[#allocation2 + $0x28] sm:$0xff] %v15913_v51  ;;  %3990 = vst.msk [vmem:[#allocation2 + $0x38] sm:$0xff] %vm1283_vm1, %v3974_v57 }
 0x307   : > { %v3576_v32 = vpop.f32.mrf.mxu0  ;;  %v3665_v0 = vpop.f32.mrf.mxu1 }
 0x308   : > { %v15920_v58 = vadd.f32 %v3576_v32, %v15848_v12  ;;  %v15923_v59 = vadd.f32 %v3665_v0, %v15850_v24  ;;  %v3963_v12 = vld [vmem:[#allocation2 + $0x60] sm:$0x3f] }
 0x309   : > { %v3578_v55 = vpop.f32.mrf.mxu0  ;;  %v3667_v36 = vpop.f32.mrf.mxu1 }
 0x30a   : > { %3991 = vst [vmem:[#allocation2 + $0x40] sm:$0xff] %v15920_v58  ;;  %3993 = vst [vmem:[#allocation2 + $0x50] sm:$0xff] %v15923_v59  ;;  %v15927_v23 = vadd.f32 %v3578_v55, %v3287_v34  ;;  %v3978_v38 = vadd.f32 %v3962_v61, %v3667_v36  ;;  %v4014_v36 = vld [vmem:[#allocation3 + $0x78] sm:$0x3f] }
 0x30c   : > { %3992 = vst [vmem:[#allocation2 + $0x48] sm:$0xff] %v15927_v23  ;;  %3994 = vst.msk [vmem:[#allocation2 + $0x58] sm:$0xff] %vm1283_vm1, %v3978_v38 }
 0x30d   : > { %v3582_v56 = vpop.f32.mrf.mxu0  ;;  %v3671_v47 = vpop.f32.mrf.mxu1 }
 0x30e   : > { %v3979_v24 = vadd.f32 %v3963_v12, %v3582_v56  ;;  %v3981_v6 = vadd.f32 %v3965_v2, %v3671_v47 }
 0x30f   : > { %v3584_v9 = vpop.f32.mrf.mxu0  ;;  %v3673_v7 = vpop.f32.mrf.mxu1 }
 0x310   : > { %3995 = vst [vmem:[#allocation2 + $0x60] sm:$0x3f] %v3979_v24  ;;  %3997 = vst [vmem:[#allocation2 + $0x70] sm:$0x3f] %v3981_v6  ;;  %v3980_v28 = vadd.f32 %v3964_v30, %v3584_v9  ;;  %v3982_v11 = vadd.f32 %v3966_v53, %v3673_v7 }
 0x312   : > { %3996 = vst [vmem:[#allocation2 + $0x68] sm:$0x3f] %v3980_v28  ;;  %3998 = vst.msk [vmem:[#allocation2 + $0x78] sm:$0x3f] %vm1296_vm3, %v3982_v11 }
 0x313   : > { %v4058_v28 = vld [vmem:[#allocation2 + $0x58] sm:$0xff] }
 0x317   : > { %v4059_v9 = vld [vmem:[#allocation2 + $0x60] sm:$0x3f]  ;;  %v4061_v30 = vld [vmem:[#allocation2 + $0x70] sm:$0x3f] }
 0x319   : > { %v4060_v61 = vld [vmem:[#allocation2 + $0x68] sm:$0x3f]  ;;  %v4062_v38 = vld [vmem:[#allocation2 + $0x78] sm:$0x3f] }
 0x333   : > { %v3839_v26 = vpop.f32.mrf.mxu0  ;;  %v3928_v14 = vpop.f32.mrf.mxu1 }
 0x334   : > { %v4015_v31 = vadd.f32 %v3839_v26, %v15859_v41  ;;  %v4017_v17 = vadd.f32 %v3928_v14, %v15861_v35  ;;  %v4054_v14 = vld [vmem:[#allocation2 + $0x38] sm:$0xff] }
 0x335   : > { %v3841_v37 = vpop.f32.mrf.mxu0  ;;  %v3930_v44 = vpop.f32.mrf.mxu1 }
 0x336   : > { %4031 = vst [vmem:[#allocation3] sm:$0xff] %v4015_v31  ;;  %4033 = vst [vmem:[#allocation3 + $0x10] sm:$0xff] %v4017_v17  ;;  %v4016_v63 = vadd.f32 %v3841_v37, %v15863_v40  ;;  %v4018_v1 = vadd.f32 %v4002_v8, %v3930_v44  ;;  %v15936_v60 = vmax.f32 %v15892_v43, %v4015_v31  ;;  %v4050_v37 = vld [vmem:[#allocation2 + $0x18] sm:$0xff]  ;;  %v4095_v8 = vld [vmem:[%s20205_s29] sm:$0xff]  ;;  %s9884_s29 = scalar_lea.sflag [#allocation9], %s704_s0 }
 0x337   : > { %v15939_v27 = vmax.f32 %v15895_v39, %v4017_v17  ;;  %v3845_v29 = vpop.f32.mrf.mxu0  ;;  %v3934_v33 = vpop.f32.mrf.mxu1 }
 0x338   : > { %4032 = vst [vmem:[#allocation3 + $0x8] sm:$0xff] %v4016_v63  ;;  %4034 = vst.msk [vmem:[#allocation3 + $0x18] sm:$0xff] %vm1283_vm1, %v4018_v1  ;;  %v4019_v41 = vadd.f32 %v3845_v29, %v15869_v50  ;;  %v4021_v35 = vadd.f32 %v3934_v33, %v15871_v46  ;;  %v15945_v19 = vmax.f32 %v15899_v13, %v4016_v63  ;;  %v4096_v63 = vld [vmem:[%s20206_s26 + $0x8] sm:$0x7f]  ;;  %v4270_v1 = vld [vmem:[%s20207_s30] sm:$0xff]  ;;  %s9896_s30 = sshll.u32 %s705_s1, 4  ;;  %s9897_s30 = int_to_ptr.vmem [resolvable:$true] %s9896_s30 }
 0x339   : > { %v3847_v40 = vpop.f32.mrf.mxu0  ;;  %v3936_v49 = vpop.f32.mrf.mxu1  ;;  %v10909_v29 = vld [vmem:[%s20209_s11 + $0x710] sm:$0xff] }
 0x33a   : > { %4035 = vst [vmem:[#allocation3 + $0x20] sm:$0xff] %v4019_v41  ;;  %4037 = vst [vmem:[#allocation3 + $0x30] sm:$0xff] %v4021_v35  ;;  %v4020_v43 = vadd.f32 %v3847_v40, %v15873_v52  ;;  %v4022_v39 = vadd.f32 %v4006_v22, %v3936_v49  ;;  %v15949_v42 = vmax.f32 %v15906_v5, %v4019_v41  ;;  %v11005_v33 = vld [vmem:[%s20209_s11 + $0xa10] sm:$0xff]  ;;  %v4271_v41 = vld [vmem:[%s20208_s12 + $0x8] sm:$0x7f] }
 0x33b   : > { %v15952_v21 = vmax.f32 %v15909_v54, %v4021_v35  ;;  %v3851_v50 = vpop.f32.mrf.mxu0  ;;  %v3940_v10 = vpop.f32.mrf.mxu1  ;;  %v10906_v35 = vld [vmem:[%s20209_s11 + $0x6f8] sm:$0xff]  ;;  %v10905_v40 = vld [vmem:[%s20209_s11 + $0x6f0] sm:$0xff]  ;;  %v10903_v22 = vld [vmem:[%s20209_s11 + $0x6e0] sm:$0xff] }
 0x33c   : > { %4036 = vst [vmem:[#allocation3 + $0x28] sm:$0xff] %v4020_v43  ;;  %4038 = vst.msk [vmem:[#allocation3 + $0x38] sm:$0xff] %vm1283_vm1, %v4022_v39  ;;  %v4023_v46 = vadd.f32 %v3851_v50, %v15879_v62  ;;  %v4025_v13 = vadd.f32 %v3940_v10, %v15881_v18  ;;  %v15958_v15 = vmax.f32 %v15913_v51, %v4020_v43  ;;  %v11001_v49 = vld [vmem:[%s20209_s11 + $0x9f0] sm:$0xff]  ;;  %v10999_v43 = vld [vmem:[%s20209_s11 + $0x9e0] sm:$0xff] }
 0x33d   : > { %v3853_v52 = vpop.f32.mrf.mxu0  ;;  %v3942_v25 = vpop.f32.mrf.mxu1  ;;  %v10902_v39 = vld [vmem:[%s20209_s11 + $0x6d8] sm:$0xff]  ;;  %v10996_v50 = vld [vmem:[%s20209_s11 + $0x9c8] sm:$0xff]  ;;  %v10899_v10 = vld [vmem:[%s20209_s11 + $0x6c0] sm:$0xff] }
 0x33e   : > { %4039 = vst [vmem:[#allocation3 + $0x40] sm:$0xff] %v4023_v46  ;;  %4041 = vst [vmem:[#allocation3 + $0x50] sm:$0xff] %v4025_v13  ;;  %v4024_v5 = vadd.f32 %v3853_v52, %v15883_v4  ;;  %v4026_v54 = vadd.f32 %v4010_v16, %v3942_v25  ;;  %v15962_v3 = vmax.f32 %v15920_v58, %v4023_v46  ;;  %v4012_v4 = vld [vmem:[#allocation3 + $0x68] sm:$0x3f]  ;;  %v10995_v46 = vld [vmem:[%s20209_s11 + $0x9c0] sm:$0xff] }
 0x33f   : > { %v15965_v57 = vmax.f32 %v15923_v59, %v4025_v13  ;;  %v3857_v62 = vpop.f32.mrf.mxu0  ;;  %v3946_v18 = vpop.f32.mrf.mxu1  ;;  %v4066_v31 = vld [vmem:[#allocation3 + $0x18] sm:$0xff]  ;;  %v10897_v13 = vld [vmem:[%s20209_s11 + $0x6b0] sm:$0xff]  ;;  %v10896_v52 = vld [vmem:[%s20209_s11 + $0x6a8] sm:$0xff] }
 0x340   : > { %4040 = vst [vmem:[#allocation3 + $0x48] sm:$0xff] %v4024_v5  ;;  %4042 = vst.msk [vmem:[#allocation3 + $0x58] sm:$0xff] %vm1283_vm1, %v4026_v54  ;;  %v4027_v51 = vadd.f32 %v4011_v48, %v3857_v62  ;;  %v4029_v32 = vadd.f32 %v4013_v45, %v3946_v18  ;;  %v4088_v0 = vmax.f32 %v15927_v23, %v4024_v5  ;;  %v10992_v25 = vld [vmem:[%s20209_s11 + $0x9a8] sm:$0xff]  ;;  %v10894_v16 = vld [vmem:[%s20209_s11 + $0x698] sm:$0xff] }
 0x341   : > { %v3859_v34 = vpop.f32.mrf.mxu0  ;;  %v3948_v55 = vpop.f32.mrf.mxu1  ;;  %v4082_v44 = vmax.f32 %v4050_v37, %v4066_v31  ;;  %v10990_v5 = vld [vmem:[%s20209_s11 + $0x998] sm:$0xff]  ;;  %v10893_v54 = vld [vmem:[%s20209_s11 + $0x690] sm:$0xff]  ;;  %v10987_v62 = vld [vmem:[%s20209_s11 + $0x980] sm:$0xff] }
 0x342   : > { %4043 = vst [vmem:[#allocation3 + $0x60] sm:$0x3f] %v4027_v51  ;;  %4045 = vst [vmem:[#allocation3 + $0x70] sm:$0x3f] %v4029_v32  ;;  %v4028_v58 = vadd.f32 %v4012_v4, %v3859_v34  ;;  %v4030_v59 = vadd.f32 %v4014_v36, %v3948_v55  ;;  %v10890_v48 = vld [vmem:[%s20209_s11 + $0x678] sm:$0xff]  ;;  %v10888_v45 = vld [vmem:[%s20209_s11 + $0x668] sm:$0xff] }
 0x343   : > { %v4070_v11 = vld [vmem:[#allocation3 + $0x38] sm:$0xff]  ;;  %v10984_v51 = vld [vmem:[%s20209_s11 + $0x968] sm:$0xff]  ;;  %v10887_v32 = vld [vmem:[%s20209_s11 + $0x660] sm:$0xff] }
 0x344   : > { %4044 = vst [vmem:[#allocation3 + $0x68] sm:$0x3f] %v4028_v58  ;;  %4046 = vst.msk [vmem:[#allocation3 + $0x78] sm:$0x3f] %vm1296_vm3, %v4030_v59  ;;  %v4086_v17 = vmax.f32 %v4054_v14, %v4070_v11  ;;  %v10986_v18 = vld [vmem:[%s20209_s11 + $0x978] sm:$0xff]  ;;  %v10885_v34 = vld [vmem:[%s20209_s11 + $0x650] sm:$0xff] }
 0x345   : > { %v10981_v4 = vld [vmem:[%s20209_s11 + $0x950] sm:$0xff]  ;;  %v10884_v55 = vld [vmem:[%s20209_s11 + $0x648] sm:$0xff]  ;;  %v10882_v58 = vld [vmem:[%s20209_s11 + $0x638] sm:$0xff] }
 0x346   : > { %v10980_v36 = vld [vmem:[%s20209_s11 + $0x948] sm:$0xff]  ;;  %v10978_v59 = vld [vmem:[%s20209_s11 + $0x938] sm:$0xff]  ;;  %v10867_v11 = vld [vmem:[%s20209_s11 + $0x5c0] sm:$0xff] }
 0x347   : > { %v4074_v24 = vld [vmem:[#allocation3 + $0x58] sm:$0xff]  ;;  %v10864_v14 = vld [vmem:[%s20209_s11 + $0x5a8] sm:$0xff]  ;;  %v10863_v31 = vld [vmem:[%s20209_s11 + $0x5a0] sm:$0xff] }
 0x348   : > { %v4090_v26 = vmax.f32 %v4058_v28, %v4074_v24  ;;  %v10876_v24 = vld [vmem:[%s20209_s11 + $0x608] sm:$0xff]  ;;  %v10869_v28 = vld [vmem:[%s20209_s11 + $0x5d0] sm:$0xff] }
 0x349   : > { %v4075_v56 = vld [vmem:[#allocation3 + $0x60] sm:$0x3f]  ;;  %v4077_v12 = vld [vmem:[#allocation3 + $0x70] sm:$0x3f] }
 0x34a   : > { %v4091_v7 = vmax.f32 %v4059_v9, %v4075_v56  ;;  %v4093_v53 = vmax.f32 %v4061_v30, %v4077_v12  ;;  %v10879_v56 = vld [vmem:[%s20209_s11 + $0x620] sm:$0xff]  ;;  %v10873_v30 = vld [vmem:[%s20209_s11 + $0x5f0] sm:$0xff] }
 0x34b   : > { %v4076_v47 = vld [vmem:[#allocation3 + $0x68] sm:$0x3f]  ;;  %v4078_v2 = vld [vmem:[#allocation3 + $0x78] sm:$0x3f]  ;;  %v10975_v12 = vld [vmem:[%s20209_s11 + $0x920] sm:$0xff] }
 0x34c   : > { %v4092_v6 = vmax.f32 %v4060_v61, %v4076_v47  ;;  %v4094_v23 = vmax.f32 %v4062_v38, %v4078_v2  ;;  %v10881_v61 = vld [vmem:[%s20209_s11 + $0x630] sm:$0xff]  ;;  %v10878_v47 = vld [vmem:[%s20209_s11 + $0x618] sm:$0xff]  ;;  %v10971_v9 = vld [vmem:[%s20209_s11 + $0x900] sm:$0xff] }
 0x34d   : > { %v10977_v38 = vld [vmem:[%s20209_s11 + $0x930] sm:$0xff]  ;;  %v10974_v2 = vld [vmem:[%s20209_s11 + $0x918] sm:$0xff] }
 0x34e   : > { %10847 = vmatprep.subr.msk.mxu0 %vm3471_vm4, %v4092_v6  ;;  %10851 = vmatprep.subr.msk.mxu1 %vm3471_vm4, %v4094_v23  ;;  %v10969_v37 = vld [vmem:[%s20209_s11 + $0x8f0] sm:$0xff] }
 0x34f   : > { %10848 = vmatpush1.msk.msra.mxu0 %vm3471_vm4, %v4091_v7  ;;  %10852 = vmatpush1.msk.msra.mxu1 %vm3471_vm4, %v4093_v53 }
 0x350   : > { %4142 = vmatprep.subr.mxu0 %v4088_v0  ;;  %4219 = vmatprep.subr.mxu1 %v4090_v26 }
 0x351   : > { %4143 = vmatpush1.msra.mxu0 %v15962_v3  ;;  %4220 = vmatpush1.msra.mxu1 %v15965_v57 }
 0x352   : > { %4144 = vmatprep.subr.mxu0 %v15958_v15  ;;  %4221 = vmatprep.subr.mxu1 %v4086_v17 }
 0x353   : > { %4145 = vmatpush1.msra.mxu0 %v15949_v42  ;;  %4222 = vmatpush1.msra.mxu1 %v15952_v21 }
 0x354   : > { %4146 = vmatprep.subr.mxu0 %v15945_v19  ;;  %4223 = vmatprep.subr.mxu1 %v4082_v44 }
 0x355   : > { %4147 = vmatpush1.msra.mxu0 %v15936_v60  ;;  %4224 = vmatpush1.msra.mxu1 %v15939_v27 }
 0x356   : > { %10849 = vmatmul.mubr.msk.f32.vlgmr.msra.gmra.mxu0 %vm4097_vm5, %v4095_v8  ;;  %10853 = vmatmul.mubr.msk.f32.vlgmr.msra.gmra.mxu1 %vm4097_vm5, %v4095_v8  ;;  %v10968_v8 = vld [vmem:[%s20209_s11 + $0x8e8] sm:$0xff] }
 0x357   : > { %10855 = vmatprep.subr.msk.mxu0 %vm3471_vm4, %v4092_v6  ;;  %10859 = vmatprep.subr.msk.mxu1 %vm3471_vm4, %v4094_v23  ;;  %v10972_v6 = vld [vmem:[%s20209_s11 + $0x908] sm:$0xff]  ;;  %v10875_v23 = vld [vmem:[%s20209_s11 + $0x600] sm:$0xff] }
 0x358   : > { %10856 = vmatpush1.msk.msra.mxu0 %vm3471_vm4, %v4091_v7  ;;  %10860 = vmatpush1.msk.msra.mxu1 %vm3471_vm4, %v4093_v53  ;;  %v10872_v7 = vld [vmem:[%s20209_s11 + $0x5e8] sm:$0xff]  ;;  %v10870_v53 = vld [vmem:[%s20209_s11 + $0x5d8] sm:$0xff] }
 0x359   : > { %4304 = vmatprep.subr.mxu0 %v4088_v0  ;;  %4381 = vmatprep.subr.mxu1 %v4090_v26  ;;  %v10983_v0 = vld [vmem:[%s20209_s11 + $0x960] sm:$0xff]  ;;  %v10866_v26 = vld [vmem:[%s20209_s11 + $0x5b8] sm:$0xff] }
 0x35a   : > { %4186 = vmatprep.mubr.f32.mxu0 %v12222_v20  ;;  %4263 = vmatprep.mubr.f32.mxu1 %v12222_v20 }
 0x35b   : > { %4305 = vmatpush1.msra.mxu0 %v15962_v3  ;;  %4382 = vmatpush1.msra.mxu1 %v15965_v57  ;;  %v10989_v3 = vld [vmem:[%s20209_s11 + $0x990] sm:$0xff]  ;;  %v10891_v57 = vld [vmem:[%s20209_s11 + $0x680] sm:$0xff] }
 0x35c   : > { %10850 = vmatmul.mubr.msk.f32.gmra.mxu0 %vm4097_vm5, %v4096_v63  ;;  %10854 = vmatmul.mubr.msk.f32.gmra.mxu1 %vm4097_vm5, %v4096_v63  ;;  %v10954_v63 = vld [vmem:[%s20209_s11 + $0x878] sm:$0xff] }
 0x35d   : > { %4306 = vmatprep.subr.mxu0 %v15958_v15  ;;  %4383 = vmatprep.subr.mxu1 %v4086_v17  ;;  %v10993_v15 = vld [vmem:[%s20209_s11 + $0x9b0] sm:$0xff] }
 0x35e   : > { %4307 = vmatpush1.msra.mxu0 %v15949_v42  ;;  %4384 = vmatpush1.msra.mxu1 %v15952_v21  ;;  %v10998_v42 = vld [vmem:[%s20209_s11 + $0x9d8] sm:$0xff]  ;;  %v10900_v21 = vld [vmem:[%s20209_s11 + $0x6c8] sm:$0xff]  ;;  %v10957_v17 = vld [vmem:[%s20209_s11 + $0x890] sm:$0xff] }
 0x35f   : > { %4308 = vmatprep.subr.mxu0 %v15945_v19  ;;  %4385 = vmatprep.subr.mxu1 %v4082_v44  ;;  %v11002_v19 = vld [vmem:[%s20209_s11 + $0x9f8] sm:$0xff]  ;;  %v10956_v44 = vld [vmem:[%s20209_s11 + $0x888] sm:$0xff] }
 0x360   : > { %4309 = vmatpush1.msra.mxu0 %v15936_v60  ;;  %4342 = vmatprep.mubr.f32.mxu0 %v12222_v20  ;;  %v10908_v60 = vld [vmem:[%s20209_s11 + $0x708] sm:$0xff] }
 0x361   : > { %4386 = vmatpush1.msra.mxu1 %v15939_v27  ;;  %4419 = vmatprep.mubr.f32.mxu1 %v12222_v20  ;;  %v11004_v27 = vld [vmem:[%s20209_s11 + $0xa08] sm:$0xff] }
 0x362   : > { %10857 = vmatmul.mubr.msk.f32.vlgmr.msra.gmra.mxu0 %vm4097_vm5, %v4270_v1  ;;  %10861 = vmatmul.mubr.msk.f32.vlgmr.msra.gmra.mxu1 %vm4097_vm5, %v4270_v1  ;;  %v10966_v1 = vld [vmem:[%s20209_s11 + $0x8d8] sm:$0xff] }
 0x363   : > { %4348 = vmatprep.mubr.f32.mxu0 %v12222_v20  ;;  %4425 = vmatprep.mubr.f32.mxu1 %v12222_v20 }
 0x364   : > { %5074 = vmatprep.subr.mxu0 %v10909_v29  ;;  %5151 = vmatprep.subr.mxu1 %v11005_v33  ;;  %v10953_v29 = vld [vmem:[%s20209_s11 + $0x870] sm:$0xff] }
 0x365   : > { %5075 = vmatpush1.msra.mxu0 %v10908_v60  ;;  %5152 = vmatpush1.msra.mxu1 %v11004_v27  ;;  %v10965_v33 = vld [vmem:[%s20209_s11 + $0x8d0] sm:$0xff]  ;;  %v10951_v60 = vld [vmem:[%s20209_s11 + $0x860] sm:$0xff] }
 0x366   : > { %10858 = vmatmul.mubr.msk.f32.gmra.mxu0 %vm4097_vm5, %v4271_v41  ;;  %10862 = vmatmul.mubr.msk.f32.gmra.mxu1 %vm4097_vm5, %v4271_v41  ;;  %v10963_v27 = vld [vmem:[%s20209_s11 + $0x8c0] sm:$0xff]  ;;  %v10950_v41 = vld [vmem:[%s20209_s11 + $0x858] sm:$0xff] }
 0x367   : > { %5076 = vmatprep.subr.mxu0 %v10906_v35  ;;  %5153 = vmatprep.subr.mxu1 %v11002_v19  ;;  %v10962_v35 = vld [vmem:[%s20209_s11 + $0x8b8] sm:$0xff]  ;;  %v10948_v19 = vld [vmem:[%s20209_s11 + $0x848] sm:$0xff] }
 0x368   : > { %5077 = vmatpush1.msra.mxu0 %v10905_v40  ;;  %5154 = vmatpush1.msra.mxu1 %v11001_v49  ;;  %v10960_v40 = vld [vmem:[%s20209_s11 + $0x8a8] sm:$0xff]  ;;  %v10947_v49 = vld [vmem:[%s20209_s11 + $0x840] sm:$0xff] }
 0x369   : > { %5078 = vmatprep.subr.mxu0 %v10903_v22  ;;  %5155 = vmatprep.subr.mxu1 %v10999_v43  ;;  %v10959_v22 = vld [vmem:[%s20209_s11 + $0x8a0] sm:$0xff]  ;;  %v10945_v43 = vld [vmem:[%s20209_s11 + $0x830] sm:$0xff] }
 0x36a   : > { %5079 = vmatpush1.msra.mxu0 %v10902_v39  ;;  %5156 = vmatpush1.msra.mxu1 %v10998_v42  ;;  %v11041_v39 = vld [vmem:[%s20209_s11 + $0xb30] sm:$0xff]  ;;  %v10944_v42 = vld [vmem:[%s20209_s11 + $0x828] sm:$0xff] }
 0x36b   : > { %5080 = vmatprep.subr.mxu0 %v10900_v21  ;;  %5157 = vmatprep.subr.mxu1 %v10996_v50  ;;  %v11040_v21 = vld [vmem:[%s20209_s11 + $0xb28] sm:$0xff]  ;;  %v10942_v50 = vld [vmem:[%s20209_s11 + $0x818] sm:$0xff] }
 0x36c   : > { %5081 = vmatpush1.msra.mxu0 %v10899_v10  ;;  %5158 = vmatpush1.msra.mxu1 %v10995_v46  ;;  %v11038_v10 = vld [vmem:[%s20209_s11 + $0xb18] sm:$0xff]  ;;  %v10941_v46 = vld [vmem:[%s20209_s11 + $0x810] sm:$0xff] }
 0x36d   : > { %5082 = vmatprep.subr.mxu0 %v10897_v13  ;;  %5159 = vmatprep.subr.mxu1 %v10993_v15  ;;  %v11037_v13 = vld [vmem:[%s20209_s11 + $0xb10] sm:$0xff]  ;;  %v10939_v15 = vld [vmem:[%s20209_s11 + $0x800] sm:$0xff] }
 0x36e   : > { %5083 = vmatpush1.msra.mxu0 %v10896_v52  ;;  %5160 = vmatpush1.msra.mxu1 %v10992_v25  ;;  %v11035_v52 = vld [vmem:[%s20209_s11 + $0xb00] sm:$0xff]  ;;  %v10938_v25 = vld [vmem:[%s20209_s11 + $0x7f8] sm:$0xff] }
 0x36f   : > { %5084 = vmatprep.subr.mxu0 %v10894_v16  ;;  %5161 = vmatprep.subr.mxu1 %v10990_v5  ;;  %v11034_v16 = vld [vmem:[%s20209_s11 + $0xaf8] sm:$0xff]  ;;  %v10936_v5 = vld [vmem:[%s20209_s11 + $0x7e8] sm:$0xff] }
 0x370   : > { %5085 = vmatpush1.msra.mxu0 %v10893_v54  ;;  %5162 = vmatpush1.msra.mxu1 %v10989_v3  ;;  %v11032_v54 = vld [vmem:[%s20209_s11 + $0xae8] sm:$0xff]  ;;  %v10935_v3 = vld [vmem:[%s20209_s11 + $0x7e0] sm:$0xff] }
 0x371   : > { %5086 = vmatprep.subr.mxu0 %v10891_v57  ;;  %5163 = vmatprep.subr.mxu1 %v10987_v62  ;;  %v11031_v57 = vld [vmem:[%s20209_s11 + $0xae0] sm:$0xff]  ;;  %v10933_v62 = vld [vmem:[%s20209_s11 + $0x7d0] sm:$0xff] }
 0x372   : > { %5087 = vmatpush1.msra.mxu0 %v10890_v48  ;;  %5164 = vmatpush1.msra.mxu1 %v10986_v18  ;;  %v11029_v48 = vld [vmem:[%s20209_s11 + $0xad0] sm:$0xff]  ;;  %v10932_v18 = vld [vmem:[%s20209_s11 + $0x7c8] sm:$0xff] }
 0x373   : > { %5088 = vmatprep.subr.mxu0 %v10888_v45  ;;  %5165 = vmatprep.subr.mxu1 %v10984_v51  ;;  %v11028_v45 = vld [vmem:[%s20209_s11 + $0xac8] sm:$0xff]  ;;  %v10930_v51 = vld [vmem:[%s20209_s11 + $0x7b8] sm:$0xff] }
 0x374   : > { %5089 = vmatpush1.msra.mxu0 %v10887_v32  ;;  %5166 = vmatpush1.msra.mxu1 %v10983_v0  ;;  %v11026_v32 = vld [vmem:[%s20209_s11 + $0xab8] sm:$0xff]  ;;  %v10929_v0 = vld [vmem:[%s20209_s11 + $0x7b0] sm:$0xff] }
 0x375   : > { %5090 = vmatprep.subr.mxu0 %v10885_v34  ;;  %5167 = vmatprep.subr.mxu1 %v10981_v4  ;;  %v11025_v34 = vld [vmem:[%s20209_s11 + $0xab0] sm:$0xff]  ;;  %v10927_v4 = vld [vmem:[%s20209_s11 + $0x7a0] sm:$0xff] }
 0x376   : > { %5091 = vmatpush1.msra.mxu0 %v10884_v55  ;;  %5168 = vmatpush1.msra.mxu1 %v10980_v36  ;;  %v11023_v55 = vld [vmem:[%s20209_s11 + $0xaa0] sm:$0xff]  ;;  %v10926_v36 = vld [vmem:[%s20209_s11 + $0x798] sm:$0xff] }
 0x377   : > { %5092 = vmatprep.subr.mxu0 %v10882_v58  ;;  %5169 = vmatprep.subr.mxu1 %v10978_v59  ;;  %v11022_v58 = vld [vmem:[%s20209_s11 + $0xa98] sm:$0xff]  ;;  %v10924_v59 = vld [vmem:[%s20209_s11 + $0x788] sm:$0xff] }
 0x378   : > { %5093 = vmatpush1.msra.mxu0 %v10881_v61  ;;  %5170 = vmatpush1.msra.mxu1 %v10977_v38  ;;  %v11020_v61 = vld [vmem:[%s20209_s11 + $0xa88] sm:$0xff]  ;;  %v10923_v38 = vld [vmem:[%s20209_s11 + $0x780] sm:$0xff] }
 0x379   : > { %5094 = vmatprep.subr.mxu0 %v10879_v56  ;;  %5171 = vmatprep.subr.mxu1 %v10975_v12  ;;  %v11019_v56 = vld [vmem:[%s20209_s11 + $0xa80] sm:$0xff]  ;;  %v10921_v12 = vld [vmem:[%s20209_s11 + $0x770] sm:$0xff] }
 0x37a   : > { %5095 = vmatpush1.msra.mxu0 %v10878_v47  ;;  %5172 = vmatpush1.msra.mxu1 %v10974_v2  ;;  %v11017_v47 = vld [vmem:[%s20209_s11 + $0xa70] sm:$0xff]  ;;  %v10920_v2 = vld [vmem:[%s20209_s11 + $0x768] sm:$0xff] }
 0x37b   : > { %5096 = vmatprep.subr.mxu0 %v10876_v24  ;;  %5173 = vmatprep.subr.mxu1 %v10972_v6  ;;  %v11016_v24 = vld [vmem:[%s20209_s11 + $0xa68] sm:$0xff]  ;;  %v10918_v6 = vld [vmem:[%s20209_s11 + $0x758] sm:$0xff] }
 0x37c   : > { %5097 = vmatpush1.msra.mxu0 %v10875_v23  ;;  %5174 = vmatpush1.msra.mxu1 %v10971_v9  ;;  %v11014_v23 = vld [vmem:[%s20209_s11 + $0xa58] sm:$0xff]  ;;  %v10917_v9 = vld [vmem:[%s20209_s11 + $0x750] sm:$0xff] }
 0x37d   : > { %5098 = vmatprep.subr.mxu0 %v10873_v30  ;;  %5175 = vmatprep.subr.mxu1 %v10969_v37  ;;  %v11013_v30 = vld [vmem:[%s20209_s11 + $0xa50] sm:$0xff]  ;;  %v10958_v37 = vld [vmem:[%s20209_s11 + $0x898] sm:$0xff] }
 0x37e   : > { %5099 = vmatpush1.msra.mxu0 %v10872_v7  ;;  %5176 = vmatpush1.msra.mxu1 %v10968_v8  ;;  %v10915_v7 = vld [vmem:[%s20209_s11 + $0x740] sm:$0xff] }
 0x37f   : > { %5100 = vmatprep.subr.mxu0 %v10870_v53  ;;  %5177 = vmatprep.subr.mxu1 %v10966_v1  ;;  %v11011_v53 = vld [vmem:[%s20209_s11 + $0xa40] sm:$0xff] }
 0x380   : > { %5101 = vmatpush1.msra.mxu0 %v10869_v28  ;;  %5178 = vmatpush1.msra.mxu1 %v10965_v33  ;;  %v10914_v28 = vld [vmem:[%s20209_s11 + $0x738] sm:$0xff] }
 0x381   : > { %5102 = vmatprep.subr.mxu0 %v10867_v11  ;;  %5179 = vmatprep.subr.mxu1 %v10963_v27  ;;  %v11010_v11 = vld [vmem:[%s20209_s11 + $0xa38] sm:$0xff] }
 0x382   : > { %5103 = vmatpush1.msra.mxu0 %v10866_v26  ;;  %5180 = vmatpush1.msra.mxu1 %v10962_v35  ;;  %v10912_v26 = vld [vmem:[%s20209_s11 + $0x728] sm:$0xff] }
 0x383   : > { %5104 = vmatprep.subr.mxu0 %v10864_v14  ;;  %5181 = vmatprep.subr.mxu1 %v10960_v40  ;;  %v11008_v14 = vld [vmem:[%s20209_s11 + $0xa28] sm:$0xff] }
 0x384   : > { %5105 = vmatpush1.msra.mxu0 %v10863_v31  ;;  %5182 = vmatpush1.msra.mxu1 %v10959_v22  ;;  %v10911_v31 = vld [vmem:[%s20209_s11 + $0x720] sm:$0xff] }
 0x385   : > { %5106 = vmatprep.subr.mxu0 %v10957_v17  ;;  %5191 = vmatprep.subr.mxu1 %v11041_v39  ;;  %v11007_v17 = vld [vmem:[%s20209_s11 + $0xa20] sm:$0xff] }
 0x386   : > { %5107 = vmatpush2.msra.mxu0 %v10956_v44  ;;  %5192 = vmatpush2.msra.mxu1 %v11040_v21  ;;  %v4442_v44 = vlaneseq }
 0x387   : > { %5108 = vmatprep.subr.mxu0 %v10954_v63  ;;  %5193 = vmatprep.subr.mxu1 %v11038_v10 }
 0x388   : > { %5109 = vmatpush2.msra.mxu0 %v10953_v29  ;;  %5194 = vmatpush2.msra.mxu1 %v11037_v13  ;;  %v16384_v33 = vshrl.u32 %v4442_v44, 7 }
 0x389   : > { %5110 = vmatprep.subr.mxu0 %v10951_v60  ;;  %5195 = vmatprep.subr.mxu1 %v11035_v52 }
 0x38a   : > { %5111 = vmatpush2.msra.mxu0 %v10950_v41  ;;  %5196 = vmatpush2.msra.mxu1 %v11034_v16  ;;  %v16387_v41 = vsub.s32 0, %v16384_v33  ;;  %v4452_v35 = vsub.s32 2, %v16384_v33  ;;  %v16394_v22 = vsub.s32 1, %v16384_v33 }
 0x38b   : > { %5112 = vmatprep.subr.mxu0 %v10948_v19  ;;  %5197 = vmatprep.subr.mxu1 %v11032_v54 }
 0x38c   : > { %5113 = vmatpush2.msra.mxu0 %v10947_v49  ;;  %5198 = vmatpush2.msra.mxu1 %v11031_v57  ;;  %v4440_v49 = vld [vmem:[%s20210_s3] sm:$0xf]  ;;  %s11658_s3 = sshll.u32 %s12361_s4, 4  ;;  %s12224_s4 = smov [#allocation12]  }
 0x38d   : > { %5114 = vmatprep.subr.mxu0 %v10945_v43  ;;  %5199 = vmatprep.subr.mxu1 %v11029_v48  ;;  %v4456_v43 = vsub.s32 3, %v16384_v33  ;;  %v4445_v39 = vrot.slane %v4440_v49, %v16387_v41  ;;  %v4449_v13 = vrot.slane %v4440_v49, %v16394_v22  ;;  %s20104_s25 = scalar_lea.hbm %s20161_s22, %s11658_s3  ;;  %s12152_s5 = sshll.u32 %s12224_s4, 4  ;;  %s12153_s5 = int_to_ptr.vmem [resolvable:$false] %s12152_s5 }
 0x38e   : > { %5115 = vmatpush2.msra.mxu0 %v10944_v42  ;;  %5200 = vmatpush2.msra.mxu1 %v11028_v45  ;;  %v4453_v42 = vrot.slane %v4440_v49, %v4452_v35  ;;  %s12154_s2 = scalar_lea.vmem %s12153_s5, 32  ;;  %p12155_p11 = scmp.lt.s32.totalorder %s9897_s30, %s12153_s5 }
 0x38f   : > { %5116 = vmatprep.subr.mxu0 %v10942_v50  ;;  %5201 = vmatprep.subr.mxu1 %v11026_v32 }
 0x390   : > { %5117 = vmatpush2.msra.mxu0 %v10941_v46  ;;  %5202 = vmatpush2.msra.mxu1 %v11025_v34 }
 0x391   : > { %5118 = vmatprep.subr.mxu0 %v10939_v15  ;;  %5203 = vmatprep.subr.mxu1 %v11023_v55  ;;  %v4457_v15 = vrot.slane %v4440_v49, %v4456_v43  ;;  %v10955_v43 = vld [vmem:[%s20209_s11 + $0x880] sm:$0xff] }
 0x392   : > { %5119 = vmatpush2.msra.mxu0 %v10938_v25  ;;  %5204 = vmatpush2.msra.mxu1 %v11022_v58 }
 0x393   : > { %5120 = vmatprep.subr.mxu0 %v10936_v5  ;;  %5205 = vmatprep.subr.mxu1 %v11020_v61 }
 0x394   : > { %5121 = vmatpush2.msra.mxu0 %v10935_v3  ;;  %5206 = vmatpush2.msra.mxu1 %v11019_v56 }
 0x395   : > { %5122 = vmatprep.subr.mxu0 %v10933_v62  ;;  %5207 = vmatprep.subr.mxu1 %v11017_v47 }
 0x396   : > { %5123 = vmatpush2.msra.mxu0 %v10932_v18  ;;  %5208 = vmatpush2.msra.mxu1 %v11016_v24 }
 0x397   : > { %5124 = vmatprep.subr.mxu0 %v10930_v51  ;;  %5209 = vmatprep.subr.mxu1 %v11014_v23 }
 0x398   : > { %5125 = vmatpush2.msra.mxu0 %v10929_v0  ;;  %5210 = vmatpush2.msra.mxu1 %v11013_v30 }
 0x399   : > { %5126 = vmatprep.subr.mxu0 %v10927_v4  ;;  %5211 = vmatprep.subr.mxu1 %v11011_v53 }
 0x39a   : > { %5127 = vmatpush2.msra.mxu0 %v10926_v36  ;;  %5212 = vmatpush2.msra.mxu1 %v11010_v11 }
 0x39b   : > { %5128 = vmatprep.subr.mxu0 %v10924_v59  ;;  %5213 = vmatprep.subr.mxu1 %v11008_v14 }
 0x39c   : > { %5129 = vmatpush2.msra.mxu0 %v10923_v38  ;;  %5214 = vmatpush2.msra.mxu1 %v11007_v17 }
 0x39d   : > { %5130 = vmatprep.subr.mxu0 %v10921_v12  ;;  %11662 = vmatprep.subr.mxu1 %v10958_v37 }
 0x39e   : > { %5131 = vmatpush2.msra.mxu0 %v10920_v2 }
 0x39f   : > { %5132 = vmatprep.subr.mxu0 %v10918_v6 }
 0x3a0   : > { %5133 = vmatpush2.msra.mxu0 %v10917_v9 }
 0x3a1   : > { %5134 = vmatprep.subr.mxu0 %v10915_v7 }
 0x3a2   : > { %5135 = vmatpush2.msra.mxu0 %v10914_v28 }
 0x3a3   : > { %5136 = vmatprep.subr.mxu0 %v10912_v26 }
 0x3a4   : > { %5137 = vmatpush2.msra.mxu0 %v10911_v31 }
 0x3a5   : > { %5303 = vmatprep.subr.mxu0 %v12222_v20 }
 0x416   : > { %v4182_v8 = vpop.f32.mrf.mxu0  ;;  %v4259_v63 = vpop.f32.mrf.mxu1 }
 0x418   : > { %v4184_v1 = vpop.f32.mrf.mxu0  ;;  %v4261_v29 = vpop.f32.mrf.mxu1 }
 0x41c   : > { %v4188_v60 = vpop.f32.mrf.mxu0  ;;  %v4265_v27 = vpop.f32.mrf.mxu1 }
 0x41e   : > { %v4190_v19 = vpop.f32.mrf.mxu0  ;;  %v4267_v40 = vpop.f32.mrf.mxu1 }
 0x422   : > { %v4344_v21 = vpop.f32.mrf.mxu0  ;;  %v4421_v50 = vpop.f32.mrf.mxu1 }
 0x423   : > { %v4432_v10 = vmax.f32 %v4182_v8, %v4344_v21  ;;  %v4434_v46 = vmax.f32 %v4259_v63, %v4421_v50  ;;  %v10952_v21 = vld [vmem:[%s20209_s11 + $0x868] sm:$0xff] }
 0x424   : > { %v4346_v52 = vpop.f32.mrf.mxu0  ;;  %v4423_v25 = vpop.f32.mrf.mxu1  ;;  %v10904_v50 = vld [vmem:[%s20209_s11 + $0x6e8] sm:$0xff] }
 0x425   : > { %v4462_v16 = vadd.f32 %v4445_v39, %v4432_v10  ;;  %v4464_v5 = vadd.f32 %v4453_v42, %v4434_v46  ;;  %v4433_v54 = vmax.f32 %v4184_v1, %v4346_v52  ;;  %v4435_v3 = vmax.f32 %v4261_v29, %v4423_v25  ;;  %v11000_v10 = vld [vmem:[%s20209_s11 + $0x9e8] sm:$0xff]  ;;  %v10949_v46 = vld [vmem:[%s20209_s11 + $0x850] sm:$0xff]  ;;  %v10946_v52 = vld [vmem:[%s20209_s11 + $0x838] sm:$0xff] }
 0x426   : > { %v4350_v57 = vpop.f32.mrf.mxu0  ;;  %v4427_v62 = vpop.f32.mrf.mxu1  ;;  %v10898_v25 = vld [vmem:[%s20209_s11 + $0x6b8] sm:$0xff] }
 0x427   : > { %v4470_v48 = vmax.f32 %v4462_v16, 0.0  ;;  %v4472_v18 = vmax.f32 %v4464_v5, 0.0  ;;  %v4463_v45 = vadd.f32 %v4449_v13, %v4433_v54  ;;  %v4465_v51 = vadd.f32 %v4457_v15, %v4435_v3  ;;  %v10994_v16 = vld [vmem:[%s20209_s11 + $0x9b8] sm:$0xff]  ;;  %v10943_v5 = vld [vmem:[%s20209_s11 + $0x820] sm:$0xff] }
 0x428   : > { %v4436_v32 = vmax.f32 %v4188_v60, %v4350_v57  ;;  %v4438_v0 = vmax.f32 %v4265_v27, %v4427_v62  ;;  %v4352_v34 = vpop.f32.mrf.mxu0  ;;  %v4429_v4 = vpop.f32.mrf.mxu1  ;;  %v10895_v54 = vld [vmem:[%s20209_s11 + $0x6a0] sm:$0xff]  ;;  %v10940_v57 = vld [vmem:[%s20209_s11 + $0x808] sm:$0xff] }
 0x429   : > { %4478 = vst [vmem:[#allocation4] sm:$0xff] %v4470_v48  ;;  %4480 = vst [vmem:[#allocation4 + $0x10] sm:$0xff] %v4472_v18  ;;  %v4471_v55 = vmax.f32 %v4463_v45, 0.0  ;;  %v4473_v36 = vmax.f32 %v4465_v51, 0.0  ;;  %v4437_v58 = vmax.f32 %v4190_v19, %v4352_v34  ;;  %v4439_v59 = vmax.f32 %v4267_v40, %v4429_v4  ;;  %v10910_v19 = vld [vmem:[%s20209_s11 + $0x718] sm:$0xff]  ;;  %v10991_v3 = vld [vmem:[%s20209_s11 + $0x9a0] sm:$0xff] }
 0x42a   : > { %v4466_v61 = vadd.f32 %v4445_v39, %v4436_v32  ;;  %v4468_v38 = vadd.f32 %v4453_v42, %v4438_v0  ;;  %v11006_v40 = vld [vmem:[%s20209_s11 + $0xa18] sm:$0xff]  ;;  %v10907_v39 = vld [vmem:[%s20209_s11 + $0x700] sm:$0xff]  ;;  %v10892_v62 = vld [vmem:[%s20209_s11 + $0x688] sm:$0xff] }
 0x42b   : > { %4479 = vst [vmem:[#allocation4 + $0x8] sm:$0xff] %v4471_v55  ;;  %4481 = vst.msk [vmem:[#allocation4 + $0x18] sm:$0xff] %vm1283_vm1, %v4473_v36  ;;  %v4467_v56 = vadd.f32 %v4449_v13, %v4437_v58  ;;  %v4469_v12 = vadd.f32 %v4457_v15, %v4439_v59  ;;  %v11003_v42 = vld [vmem:[%s20209_s11 + $0xa00] sm:$0xff]  ;;  %v10901_v13 = vld [vmem:[%s20209_s11 + $0x6d0] sm:$0xff] }
 0x42c   : > { %v4474_v47 = vmax.f32 %v4466_v61, 0.0  ;;  %v4476_v2 = vmax.f32 %v4468_v38, 0.0  ;;  %v10997_v15 = vld [vmem:[%s20209_s11 + $0x9d0] sm:$0xff]  ;;  %v10988_v48 = vld [vmem:[%s20209_s11 + $0x988] sm:$0xff]  ;;  %v10934_v32 = vld [vmem:[%s20209_s11 + $0x7d8] sm:$0xff] }
 0x42d   : > { %v4475_v24 = vmax.f32 %v4467_v56, 0.0  ;;  %v4477_v6 = vmax.f32 %v4469_v12, 0.0  ;;  %v10937_v18 = vld [vmem:[%s20209_s11 + $0x7f0] sm:$0xff]  ;;  %v10886_v0 = vld [vmem:[%s20209_s11 + $0x658] sm:$0xff]  ;;  %v10931_v4 = vld [vmem:[%s20209_s11 + $0x7c0] sm:$0xff] }
 0x42e   : > { %4482 = vst [vmem:[#allocation4 + $0x20] sm:$0x7f] %v4474_v47  ;;  %4484 = vst [vmem:[#allocation4 + $0x30] sm:$0x7f] %v4476_v2  ;;  %v10889_v45 = vld [vmem:[%s20209_s11 + $0x670] sm:$0xff]  ;;  %v10982_v34 = vld [vmem:[%s20209_s11 + $0x958] sm:$0xff] }
 0x42f   : > { %4483 = vst [vmem:[#allocation4 + $0x28] sm:$0x7f] %v4475_v24  ;;  %4486 = vst.msk [vmem:[#allocation4 + $0x38] sm:$0x7f] %vm4485_vm6, %v4477_v6  ;;  %v10985_v51 = vld [vmem:[%s20209_s11 + $0x970] sm:$0xff]  ;;  %v10883_v55 = vld [vmem:[%s20209_s11 + $0x640] sm:$0xff] }
 0x430   : > { %v4857_v23 = vld [vmem:[#allocation4 + $0x10] sm:$0xfe]  ;;  %v4855_v7 = vld [vmem:[#allocation4] sm:$0xfe]  ;;  %v10928_v58 = vld [vmem:[%s20209_s11 + $0x7a8] sm:$0xff] }
 0x431   : > { %v5058_v53 = vrot.slane %v4857_v23, 1  ;;  %v5052_v1 = vrot.slane %v4855_v7, 1  ;;  %v10979_v36 = vld [vmem:[%s20209_s11 + $0x940] sm:$0xff]  ;;  %v10880_v59 = vld [vmem:[%s20209_s11 + $0x628] sm:$0xff]  ;;  %v10925_v38 = vld [vmem:[%s20209_s11 + $0x790] sm:$0xff] }
 0x432   : > { %v4858_v9 = vld [vmem:[#allocation4 + $0x18] sm:$0xfe]  ;;  %v4856_v30 = vld [vmem:[#allocation4 + $0x8] sm:$0xfe]  ;;  %v10877_v56 = vld [vmem:[%s20209_s11 + $0x610] sm:$0xff] }
 0x433   : > { %v5061_v28 = vrot.slane %v4858_v9, 1  ;;  %v5055_v44 = vrot.slane %v4856_v30, 1  ;;  %v10976_v61 = vld [vmem:[%s20209_s11 + $0x928] sm:$0xff]  ;;  %v10973_v12 = vld [vmem:[%s20209_s11 + $0x910] sm:$0xff]  ;;  %v10922_v47 = vld [vmem:[%s20209_s11 + $0x778] sm:$0xff] }
 0x434   : > { %v10874_v2 = vld [vmem:[%s20209_s11 + $0x5f8] sm:$0xff]  ;;  %v10919_v6 = vld [vmem:[%s20209_s11 + $0x760] sm:$0xff]  ;;  %v10916_v30 = vld [vmem:[%s20209_s11 + $0x748] sm:$0xff] }
 0x435   : > { %v4859_v11 = vld [vmem:[#allocation4 + $0x20] sm:$0x3f]  ;;  %v4861_v26 = vld [vmem:[#allocation4 + $0x30] sm:$0x3f]  ;;  %v10970_v24 = vld [vmem:[%s20209_s11 + $0x8f8] sm:$0xff] }
 0x436   : > { %v4860_v14 = vld [vmem:[#allocation4 + $0x28] sm:$0x3f]  ;;  %v4862_v31 = vld [vmem:[#allocation4 + $0x38] sm:$0x3f]  ;;  %v16402_v17 = vrot.slane %v4859_v11, 1  ;;  %v16404_v37 = vrot.slane %v4861_v26, 1 }
 0x437   : > { %v16406_v8 = vrot.slane %v4860_v14, 1  ;;  %v16408_v63 = vrot.slane %v4862_v31, 1  ;;  %v10871_v23 = vld [vmem:[%s20209_s11 + $0x5e0] sm:$0xff]  ;;  %v10868_v7 = vld [vmem:[%s20209_s11 + $0x5c8] sm:$0xff]  ;;  %v10865_v11 = vld [vmem:[%s20209_s11 + $0x5b0] sm:$0xff] }
 0x438   : > { %v16412_v29 = vsel %vm2094_vm2, %v5058_v53, %v16404_v37  ;;  %v16433_v49 = vsel %vm2094_vm2, %v5052_v1, %v16402_v17  ;;  %v10967_v9 = vld [vmem:[%s20209_s11 + $0x8e0] sm:$0xff]  ;;  %v10964_v53 = vld [vmem:[%s20209_s11 + $0x8c8] sm:$0xff]  ;;  %v10961_v26 = vld [vmem:[%s20209_s11 + $0x8b0] sm:$0xff] }
 0x439   : > { %v16416_v60 = vsel %vm2094_vm2, %v5055_v44, %v16406_v8  ;;  %v16420_v27 = vsel %vm2094_vm2, %v5061_v28, %v16408_v63  ;;  %v10913_v28 = vld [vmem:[%s20209_s11 + $0x730] sm:$0xff]  ;;  %v11042_v31 = vld [vmem:[%s20209_s11 + $0xb38] sm:$0xff]  ;;  %v11092_v44 = vld [vmem:[%s20211_s7 + $0x708] sm:$0xff] }
 0x43a   : > { %5138 = vmatprep.mubr.f32.mxu0 %v16416_v60  ;;  %11043 = vmatprep.mubr.msk.f32.mxu1 %vm1283_vm1, %v16420_v27  ;;  %v11093_v14 = vld [vmem:[%s20211_s7 + $0x710] sm:$0xff]  ;;  %v11090_v1 = vld [vmem:[%s20211_s7 + $0x6f8] sm:$0xff] }
 0x43b   : > { %5139 = vmatmul.mubr.f32.vlgmr.msra.gmra.mxu0 %v16433_v49  ;;  %5216 = vmatmul.mubr.f32.vlgmr.msra.gmra.mxu1 %v16412_v29 }
 0x43c   : > { %11663 = vmatpush3.msra.mxu1 %v10910_v19  ;;  %5304 = vmatpush1.msra.mxu0 %v11006_v40  ;;  %v11039_v19 = vld [vmem:[%s20209_s11 + $0xb20] sm:$0xff]  ;;  %v11089_v40 = vld [vmem:[%s20211_s7 + $0x6f0] sm:$0xff] }
 0x43d   : > { %5144 = vmatprep.mubr.f32.mxu0 %v16406_v8  ;;  %11664 = vmatprep.subr.mxu1 %v10955_v43  ;;  %v11087_v43 = vld [vmem:[%s20211_s7 + $0x6e0] sm:$0xff] }
 0x43e   : > { %5305 = vmatprep.subr.mxu0 %v12222_v20  ;;  %11665 = vmatpush3.msra.mxu1 %v10907_v39  ;;  %v11036_v39 = vld [vmem:[%s20209_s11 + $0xb08] sm:$0xff] }
 0x43f   : > { %5306 = vmatpush1.msra.mxu0 %v11003_v42  ;;  %11044 = vmatprep.mubr.msk.f32.mxu1 %vm1283_vm1, %v16408_v63  ;;  %v11086_v42 = vld [vmem:[%s20211_s7 + $0x6d8] sm:$0xff] }
 0x440   : > { %11666 = vmatprep.subr.mxu1 %v10952_v21  ;;  %5307 = vmatprep.subr.mxu0 %v12222_v20  ;;  %v11084_v21 = vld [vmem:[%s20211_s7 + $0x6c8] sm:$0xff] }
 0x441   : > { %5145 = vmatmul.mubr.f32.gmra.mxu0 %v16402_v17  ;;  %5222 = vmatmul.mubr.f32.gmra.mxu1 %v16404_v37 }
 0x442   : > { %11667 = vmatpush3.msra.mxu1 %v10904_v50  ;;  %5308 = vmatpush1.msra.mxu0 %v11000_v10  ;;  %v11033_v50 = vld [vmem:[%s20209_s11 + $0xaf0] sm:$0xff]  ;;  %v11083_v10 = vld [vmem:[%s20211_s7 + $0x6c0] sm:$0xff] }
 0x443   : > { %11668 = vmatprep.subr.mxu1 %v10949_v46  ;;  %5292 = vmatprep.mubr.f32.mxu1 %v16416_v60  ;;  %v11081_v46 = vld [vmem:[%s20211_s7 + $0x6b0] sm:$0xff] }
 0x444   : > { %5309 = vmatprep.subr.mxu0 %v12222_v20  ;;  %11669 = vmatpush3.msra.mxu1 %v10901_v13  ;;  %v11030_v13 = vld [vmem:[%s20209_s11 + $0xad8] sm:$0xff] }
 0x445   : > { %5310 = vmatpush1.msra.mxu0 %v10997_v15  ;;  %11670 = vmatprep.subr.mxu1 %v10946_v52  ;;  %v11080_v15 = vld [vmem:[%s20211_s7 + $0x6a8] sm:$0xff]  ;;  %v11078_v52 = vld [vmem:[%s20211_s7 + $0x698] sm:$0xff] }
 0x446   : > { %5311 = vmatprep.subr.mxu0 %v12222_v20  ;;  %11671 = vmatpush3.msra.mxu1 %v10898_v25  ;;  %v11027_v25 = vld [vmem:[%s20209_s11 + $0xac0] sm:$0xff] }
 0x447   : > { %5312 = vmatpush1.msra.mxu0 %v10994_v16  ;;  %11672 = vmatprep.subr.mxu1 %v10943_v5  ;;  %v11077_v16 = vld [vmem:[%s20211_s7 + $0x690] sm:$0xff]  ;;  %v11075_v5 = vld [vmem:[%s20211_s7 + $0x680] sm:$0xff] }
 0x448   : > { %5313 = vmatprep.subr.mxu0 %v12222_v20  ;;  %11673 = vmatpush3.msra.mxu1 %v10895_v54  ;;  %v11024_v54 = vld [vmem:[%s20209_s11 + $0xaa8] sm:$0xff] }
 0x449   : > { %5314 = vmatpush1.msra.mxu0 %v10991_v3  ;;  %11674 = vmatprep.subr.mxu1 %v10940_v57  ;;  %v11074_v3 = vld [vmem:[%s20211_s7 + $0x678] sm:$0xff]  ;;  %v11072_v57 = vld [vmem:[%s20211_s7 + $0x668] sm:$0xff] }
 0x44a   : > { %5315 = vmatprep.subr.mxu0 %v12222_v20  ;;  %11675 = vmatpush3.msra.mxu1 %v10892_v62  ;;  %v11021_v62 = vld [vmem:[%s20209_s11 + $0xa90] sm:$0xff] }
 0x44b   : > { %5316 = vmatpush1.msra.mxu0 %v10988_v48  ;;  %11676 = vmatprep.subr.mxu1 %v10937_v18  ;;  %v11071_v48 = vld [vmem:[%s20211_s7 + $0x660] sm:$0xff]  ;;  %v11069_v18 = vld [vmem:[%s20211_s7 + $0x650] sm:$0xff] }
 0x44c   : > { %5317 = vmatprep.subr.mxu0 %v12222_v20  ;;  %11677 = vmatpush3.msra.mxu1 %v10889_v45  ;;  %v11018_v45 = vld [vmem:[%s20209_s11 + $0xa78] sm:$0xff] }
 0x44d   : > { %5318 = vmatpush1.msra.mxu0 %v10985_v51  ;;  %11678 = vmatprep.subr.mxu1 %v10934_v32  ;;  %v11068_v51 = vld [vmem:[%s20211_s7 + $0x648] sm:$0xff]  ;;  %v11066_v32 = vld [vmem:[%s20211_s7 + $0x638] sm:$0xff] }
 0x44e   : > { %5319 = vmatprep.subr.mxu0 %v12222_v20  ;;  %11679 = vmatpush3.msra.mxu1 %v10886_v0  ;;  %v11015_v0 = vld [vmem:[%s20209_s11 + $0xa60] sm:$0xff] }
 0x44f   : > { %5320 = vmatpush1.msra.mxu0 %v10982_v34  ;;  %11680 = vmatprep.subr.mxu1 %v10931_v4  ;;  %v11065_v34 = vld [vmem:[%s20211_s7 + $0x630] sm:$0xff]  ;;  %v11063_v4 = vld [vmem:[%s20211_s7 + $0x620] sm:$0xff] }
 0x450   : > { %5321 = vmatprep.subr.mxu0 %v12222_v20  ;;  %11681 = vmatpush3.msra.mxu1 %v10883_v55  ;;  %v11012_v55 = vld [vmem:[%s20209_s11 + $0xa48] sm:$0xff] }
 0x451   : > { %5322 = vmatpush1.msra.mxu0 %v10979_v36  ;;  %11682 = vmatprep.subr.mxu1 %v10928_v58  ;;  %v11062_v36 = vld [vmem:[%s20211_s7 + $0x618] sm:$0xff]  ;;  %v11060_v58 = vld [vmem:[%s20211_s7 + $0x608] sm:$0xff] }
 0x452   : > { %5323 = vmatprep.subr.mxu0 %v12222_v20  ;;  %11683 = vmatpush3.msra.mxu1 %v10880_v59  ;;  %v11009_v59 = vld [vmem:[%s20209_s11 + $0xa30] sm:$0xff] }
 0x453   : > { %5324 = vmatpush1.msra.mxu0 %v10976_v61  ;;  %11684 = vmatprep.subr.mxu1 %v10925_v38  ;;  %v11059_v61 = vld [vmem:[%s20211_s7 + $0x600] sm:$0xff]  ;;  %v11057_v38 = vld [vmem:[%s20211_s7 + $0x5f0] sm:$0xff] }
 0x454   : > { %5325 = vmatprep.subr.mxu0 %v12222_v20  ;;  %11685 = vmatpush3.msra.mxu1 %v10877_v56  ;;  %v11189_v56 = vld [vmem:[%s20211_s7 + $0xa10] sm:$0xff] }
 0x455   : > { %5326 = vmatpush1.msra.mxu0 %v10973_v12  ;;  %11045 = vmatprep.mubr.msk.f32.mxu0 %vm1283_vm1, %v16420_v27  ;;  %v11056_v12 = vld [vmem:[%s20211_s7 + $0x5e8] sm:$0xff] }
 0x456   : > { %11686 = vmatprep.subr.mxu1 %v10922_v47  ;;  %5327 = vmatprep.subr.mxu0 %v12222_v20  ;;  %v11188_v47 = vld [vmem:[%s20211_s7 + $0xa08] sm:$0xff] }
 0x457   : > { %11687 = vmatpush3.msra.mxu1 %v10874_v2  ;;  %5328 = vmatpush1.msra.mxu0 %v10970_v24  ;;  %v11054_v2 = vld [vmem:[%s20211_s7 + $0x5d8] sm:$0xff] }
 0x458   : > { %11688 = vmatprep.subr.mxu1 %v10919_v6  ;;  %5329 = vmatprep.subr.mxu0 %v12222_v20  ;;  %v11186_v24 = vld [vmem:[%s20211_s7 + $0x9f8] sm:$0xff]  ;;  %v11053_v6 = vld [vmem:[%s20211_s7 + $0x5d0] sm:$0xff] }
 0x459   : > { %11689 = vmatpush3.msra.mxu1 %v10871_v23  ;;  %5330 = vmatpush1.msra.mxu0 %v10967_v9  ;;  %v11185_v23 = vld [vmem:[%s20211_s7 + $0x9f0] sm:$0xff]  ;;  %v11051_v9 = vld [vmem:[%s20211_s7 + $0x5c0] sm:$0xff] }
 0x45a   : > { %11690 = vmatprep.subr.mxu1 %v10916_v30  ;;  %5331 = vmatprep.subr.mxu0 %v12222_v20  ;;  %v11183_v30 = vld [vmem:[%s20211_s7 + $0x9e0] sm:$0xff] }
 0x45b   : > { %11691 = vmatpush3.msra.mxu1 %v10868_v7  ;;  %5332 = vmatpush1.msra.mxu0 %v10964_v53  ;;  %v11050_v7 = vld [vmem:[%s20211_s7 + $0x5b8] sm:$0xff] }
 0x45c   : > { %11692 = vmatprep.subr.mxu1 %v10913_v28  ;;  %5333 = vmatprep.subr.mxu0 %v12222_v20  ;;  %v11182_v53 = vld [vmem:[%s20211_s7 + $0x9d8] sm:$0xff]  ;;  %v11048_v28 = vld [vmem:[%s20211_s7 + $0x5a8] sm:$0xff] }
 0x45d   : > { %11693 = vmatpush3.msra.mxu1 %v10865_v11  ;;  %5334 = vmatpush1.msra.mxu0 %v10961_v26  ;;  %v11180_v11 = vld [vmem:[%s20211_s7 + $0x9c8] sm:$0xff]  ;;  %v11047_v26 = vld [vmem:[%s20211_s7 + $0x5a0] sm:$0xff] }
 0x45e   : > { %5293 = vmatmul.mubr.f32.vlgmr.msra.gmra.mxu1 %v16433_v49  ;;  %5343 = vmatprep.subr.mxu0 %v12222_v20 }
 0x45f   : > { %5559 = vmatprep.subr.mxu1 %v11093_v14  ;;  %5297 = vmatprep.mubr.f32.mxu1 %v16406_v8  ;;  %v11179_v14 = vld [vmem:[%s20211_s7 + $0x9c0] sm:$0xff] }
 0x460   : > { %5344 = vmatpush2.msra.mxu0 %v11042_v31  ;;  %5560 = vmatpush1.msra.mxu1 %v11092_v44  ;;  %v11141_v31 = vld [vmem:[%s20211_s7 + $0x890] sm:$0xff] }
 0x461   : > { %5345 = vmatprep.subr.mxu0 %v12222_v20  ;;  %5561 = vmatprep.subr.mxu1 %v11090_v1  ;;  %v11177_v44 = vld [vmem:[%s20211_s7 + $0x9b0] sm:$0xff]  ;;  %v11140_v1 = vld [vmem:[%s20211_s7 + $0x888] sm:$0xff] }
 0x462   : > { %5346 = vmatpush2.msra.mxu0 %v11039_v19  ;;  %5562 = vmatpush1.msra.mxu1 %v11089_v40  ;;  %v11176_v19 = vld [vmem:[%s20211_s7 + $0x9a8] sm:$0xff]  ;;  %v11138_v40 = vld [vmem:[%s20211_s7 + $0x878] sm:$0xff] }
 0x463   : > { %5298 = vmatmul.mubr.f32.gmra.mxu1 %v16402_v17  ;;  %5347 = vmatprep.subr.mxu0 %v12222_v20 }
 0x464   : > { %5563 = vmatprep.subr.mxu1 %v11087_v43  ;;  %5348 = vmatpush2.msra.mxu0 %v11036_v39  ;;  %v11174_v43 = vld [vmem:[%s20211_s7 + $0x998] sm:$0xff]  ;;  %v11137_v39 = vld [vmem:[%s20211_s7 + $0x870] sm:$0xff] }
 0x465   : > { %5564 = vmatpush1.msra.mxu1 %v11086_v42  ;;  %5623 = vmatprep.mubr.f32.mxu1 %v16416_v60  ;;  %v11173_v42 = vld [vmem:[%s20211_s7 + $0x990] sm:$0xff] }
 0x466   : > { %5349 = vmatprep.subr.mxu0 %v12222_v20  ;;  %5565 = vmatprep.subr.mxu1 %v11084_v21  ;;  %v11135_v21 = vld [vmem:[%s20211_s7 + $0x860] sm:$0xff] }
 0x467   : > { %5350 = vmatpush2.msra.mxu0 %v11033_v50  ;;  %5566 = vmatpush1.msra.mxu1 %v11083_v10  ;;  %v11171_v50 = vld [vmem:[%s20211_s7 + $0x980] sm:$0xff]  ;;  %v11134_v10 = vld [vmem:[%s20211_s7 + $0x858] sm:$0xff] }
 0x468   : > { %5351 = vmatprep.subr.mxu0 %v12222_v20  ;;  %5567 = vmatprep.subr.mxu1 %v11081_v46  ;;  %v11170_v46 = vld [vmem:[%s20211_s7 + $0x978] sm:$0xff] }
 0x469   : > { %5352 = vmatpush2.msra.mxu0 %v11030_v13  ;;  %5568 = vmatpush1.msra.mxu1 %v11080_v15  ;;  %v11132_v13 = vld [vmem:[%s20211_s7 + $0x848] sm:$0xff] }
 0x46a   : > { %5353 = vmatprep.subr.mxu0 %v12222_v20  ;;  %5569 = vmatprep.subr.mxu1 %v11078_v52  ;;  %v11168_v15 = vld [vmem:[%s20211_s7 + $0x968] sm:$0xff]  ;;  %v11131_v52 = vld [vmem:[%s20211_s7 + $0x840] sm:$0xff] }
 0x46b   : > { %5354 = vmatpush2.msra.mxu0 %v11027_v25  ;;  %5570 = vmatpush1.msra.mxu1 %v11077_v16  ;;  %v11167_v25 = vld [vmem:[%s20211_s7 + $0x960] sm:$0xff]  ;;  %v11129_v16 = vld [vmem:[%s20211_s7 + $0x830] sm:$0xff] }
 0x46c   : > { %5355 = vmatprep.subr.mxu0 %v12222_v20  ;;  %5571 = vmatprep.subr.mxu1 %v11075_v5  ;;  %v11165_v5 = vld [vmem:[%s20211_s7 + $0x950] sm:$0xff] }
 0x46d   : > { %5356 = vmatpush2.msra.mxu0 %v11024_v54  ;;  %5572 = vmatpush1.msra.mxu1 %v11074_v3  ;;  %v11128_v54 = vld [vmem:[%s20211_s7 + $0x828] sm:$0xff] }
 0x46e   : > { %5357 = vmatprep.subr.mxu0 %v12222_v20  ;;  %5573 = vmatprep.subr.mxu1 %v11072_v57  ;;  %v11164_v3 = vld [vmem:[%s20211_s7 + $0x948] sm:$0xff]  ;;  %v11126_v57 = vld [vmem:[%s20211_s7 + $0x818] sm:$0xff] }
 0x46f   : > { %5358 = vmatpush2.msra.mxu0 %v11021_v62  ;;  %5574 = vmatpush1.msra.mxu1 %v11071_v48  ;;  %v11162_v62 = vld [vmem:[%s20211_s7 + $0x938] sm:$0xff]  ;;  %v11125_v48 = vld [vmem:[%s20211_s7 + $0x810] sm:$0xff] }
 0x470   : > { %5359 = vmatprep.subr.mxu0 %v12222_v20  ;;  %5575 = vmatprep.subr.mxu1 %v11069_v18  ;;  %v11161_v18 = vld [vmem:[%s20211_s7 + $0x930] sm:$0xff] }
 0x471   : > { %5360 = vmatpush2.msra.mxu0 %v11018_v45  ;;  %5576 = vmatpush1.msra.mxu1 %v11068_v51  ;;  %v11123_v45 = vld [vmem:[%s20211_s7 + $0x800] sm:$0xff] }
 0x472   : > { %5361 = vmatprep.subr.mxu0 %v12222_v20  ;;  %5577 = vmatprep.subr.mxu1 %v11066_v32  ;;  %v11159_v51 = vld [vmem:[%s20211_s7 + $0x920] sm:$0xff]  ;;  %v11122_v32 = vld [vmem:[%s20211_s7 + $0x7f8] sm:$0xff] }
 0x473   : > { %5362 = vmatpush2.msra.mxu0 %v11015_v0  ;;  %5578 = vmatpush1.msra.mxu1 %v11065_v34  ;;  %v11158_v0 = vld [vmem:[%s20211_s7 + $0x918] sm:$0xff]  ;;  %v11120_v34 = vld [vmem:[%s20211_s7 + $0x7e8] sm:$0xff] }
 0x474   : > { %5363 = vmatprep.subr.mxu0 %v12222_v20  ;;  %5579 = vmatprep.subr.mxu1 %v11063_v4  ;;  %v11156_v4 = vld [vmem:[%s20211_s7 + $0x908] sm:$0xff] }
 0x475   : > { %5364 = vmatpush2.msra.mxu0 %v11012_v55  ;;  %5580 = vmatpush1.msra.mxu1 %v11062_v36  ;;  %v11119_v55 = vld [vmem:[%s20211_s7 + $0x7e0] sm:$0xff] }
 0x476   : > { %5365 = vmatprep.subr.mxu0 %v12222_v20  ;;  %5581 = vmatprep.subr.mxu1 %v11060_v58  ;;  %v11155_v36 = vld [vmem:[%s20211_s7 + $0x900] sm:$0xff]  ;;  %v11117_v58 = vld [vmem:[%s20211_s7 + $0x7d0] sm:$0xff] }
 0x477   : > { %5366 = vmatpush2.msra.mxu0 %v11009_v59  ;;  %5582 = vmatpush1.msra.mxu1 %v11059_v61  ;;  %v11153_v59 = vld [vmem:[%s20211_s7 + $0x8f0] sm:$0xff]  ;;  %v11116_v61 = vld [vmem:[%s20211_s7 + $0x7c8] sm:$0xff] }
 0x478   : > { %5368 = vmatmul.mubr.f32.vlgmr.msra.gmra.mxu0 %v16412_v29  ;;  %5583 = vmatprep.subr.mxu1 %v11057_v38  ;;  %v11152_v38 = vld [vmem:[%s20211_s7 + $0x8e8] sm:$0xff] }
 0x479   : > { %5636 = vmatprep.subr.mxu0 %v11189_v56  ;;  %11046 = vmatprep.mubr.msk.f32.mxu0 %vm1283_vm1, %v16408_v63  ;;  %v11114_v56 = vld [vmem:[%s20211_s7 + $0x7b8] sm:$0xff] }
 0x47a   : > { %5584 = vmatpush1.msra.mxu1 %v11056_v12  ;;  %5637 = vmatpush1.msra.mxu0 %v11188_v47  ;;  %v11150_v12 = vld [vmem:[%s20211_s7 + $0x8d8] sm:$0xff]  ;;  %v11113_v47 = vld [vmem:[%s20211_s7 + $0x7b0] sm:$0xff] }
 0x47b   : > { %5585 = vmatprep.subr.mxu1 %v11054_v2  ;;  %5638 = vmatprep.subr.mxu0 %v11186_v24  ;;  %v11149_v2 = vld [vmem:[%s20211_s7 + $0x8d0] sm:$0xff]  ;;  %v11111_v24 = vld [vmem:[%s20211_s7 + $0x7a0] sm:$0xff] }
 0x47c   : > { %5586 = vmatpush1.msra.mxu1 %v11053_v6  ;;  %5639 = vmatpush1.msra.mxu0 %v11185_v23  ;;  %v11147_v6 = vld [vmem:[%s20211_s7 + $0x8c0] sm:$0xff]  ;;  %v11110_v23 = vld [vmem:[%s20211_s7 + $0x798] sm:$0xff] }
 0x47d   : > { %5373 = vmatmul.mubr.f32.gmra.mxu0 %v16404_v37  ;;  %5587 = vmatprep.subr.mxu1 %v11051_v9  ;;  %v11146_v9 = vld [vmem:[%s20211_s7 + $0x8b8] sm:$0xff] }
 0x47e   : > { %5640 = vmatprep.subr.mxu0 %v11183_v30  ;;  %5588 = vmatpush1.msra.mxu1 %v11050_v7  ;;  %v11108_v30 = vld [vmem:[%s20211_s7 + $0x788] sm:$0xff] }
 0x47f   : > { %5641 = vmatpush1.msra.mxu0 %v11182_v53  ;;  %11227 = vmatprep.mubr.msk.f32.mxu0 %vm1283_vm1, %v16420_v27  ;;  %v11144_v7 = vld [vmem:[%s20211_s7 + $0x8a8] sm:$0xff]  ;;  %v11107_v53 = vld [vmem:[%s20211_s7 + $0x780] sm:$0xff] }
 0x480   : > { %5589 = vmatprep.subr.mxu1 %v11048_v28  ;;  %5642 = vmatprep.subr.mxu0 %v11180_v11  ;;  %v11143_v28 = vld [vmem:[%s20211_s7 + $0x8a0] sm:$0xff]  ;;  %v11105_v11 = vld [vmem:[%s20211_s7 + $0x770] sm:$0xff] }
 0x481   : > { %5590 = vmatpush1.msra.mxu1 %v11047_v26  ;;  %5643 = vmatpush1.msra.mxu0 %v11179_v14  ;;  %v11225_v26 = vld [vmem:[%s20211_s7 + $0xb30] sm:$0xff]  ;;  %v11104_v14 = vld [vmem:[%s20211_s7 + $0x768] sm:$0xff] }
 0x482   : > { %5591 = vmatprep.subr.mxu1 %v11141_v31  ;;  %5644 = vmatprep.subr.mxu0 %v11177_v44  ;;  %v11224_v31 = vld [vmem:[%s20211_s7 + $0xb28] sm:$0xff]  ;;  %v11102_v44 = vld [vmem:[%s20211_s7 + $0x758] sm:$0xff] }
 0x483   : > { %5592 = vmatpush2.msra.mxu1 %v11140_v1  ;;  %5645 = vmatpush1.msra.mxu0 %v11176_v19  ;;  %v11222_v1 = vld [vmem:[%s20211_s7 + $0xb18] sm:$0xff]  ;;  %v11101_v19 = vld [vmem:[%s20211_s7 + $0x750] sm:$0xff] }
 0x484   : > { %5593 = vmatprep.subr.mxu1 %v11138_v40  ;;  %5646 = vmatprep.subr.mxu0 %v11174_v43  ;;  %v11221_v40 = vld [vmem:[%s20211_s7 + $0xb10] sm:$0xff]  ;;  %v11099_v43 = vld [vmem:[%s20211_s7 + $0x740] sm:$0xff] }
 0x485   : > { %5594 = vmatpush2.msra.mxu1 %v11137_v39  ;;  %5647 = vmatpush1.msra.mxu0 %v11173_v42  ;;  %v11219_v39 = vld [vmem:[%s20211_s7 + $0xb00] sm:$0xff]  ;;  %v11098_v42 = vld [vmem:[%s20211_s7 + $0x738] sm:$0xff] }
 0x486   : > { %5595 = vmatprep.subr.mxu1 %v11135_v21  ;;  %5648 = vmatprep.subr.mxu0 %v11171_v50  ;;  %v11218_v21 = vld [vmem:[%s20211_s7 + $0xaf8] sm:$0xff]  ;;  %v11096_v50 = vld [vmem:[%s20211_s7 + $0x728] sm:$0xff] }
 0x487   : > { %5596 = vmatpush2.msra.mxu1 %v11134_v10  ;;  %5649 = vmatpush1.msra.mxu0 %v11170_v46  ;;  %v11216_v10 = vld [vmem:[%s20211_s7 + $0xae8] sm:$0xff]  ;;  %v11095_v46 = vld [vmem:[%s20211_s7 + $0x720] sm:$0xff] }
 0x488   : > { %5597 = vmatprep.subr.mxu1 %v11132_v13  ;;  %5650 = vmatprep.subr.mxu0 %v11168_v15  ;;  %v11215_v13 = vld [vmem:[%s20211_s7 + $0xae0] sm:$0xff]  ;;  %v11213_v15 = vld [vmem:[%s20211_s7 + $0xad0] sm:$0xff] }
 0x489   : > { %5598 = vmatpush2.msra.mxu1 %v11131_v52  ;;  %5651 = vmatpush1.msra.mxu0 %v11167_v25  ;;  %v11142_v52 = vld [vmem:[%s20211_s7 + $0x898] sm:$0xff]  ;;  %v11212_v25 = vld [vmem:[%s20211_s7 + $0xac8] sm:$0xff] }
 0x48a   : > { %5599 = vmatprep.subr.mxu1 %v11129_v16  ;;  %5652 = vmatprep.subr.mxu0 %v11165_v5  ;;  %v11094_v16 = vld [vmem:[%s20211_s7 + $0x718] sm:$0xff] }
 0x48b   : > { %5600 = vmatpush2.msra.mxu1 %v11128_v54  ;;  %5653 = vmatpush1.msra.mxu0 %v11164_v3  ;;  %v11210_v5 = vld [vmem:[%s20211_s7 + $0xab8] sm:$0xff]  ;;  %v11139_v54 = vld [vmem:[%s20211_s7 + $0x880] sm:$0xff]  ;;  %v11209_v3 = vld [vmem:[%s20211_s7 + $0xab0] sm:$0xff] }
 0x48c   : > { %5601 = vmatprep.subr.mxu1 %v11126_v57  ;;  %5654 = vmatprep.subr.mxu0 %v11162_v62  ;;  %v11091_v57 = vld [vmem:[%s20211_s7 + $0x700] sm:$0xff] }
 0x48d   : > { %5602 = vmatpush2.msra.mxu1 %v11125_v48  ;;  %5655 = vmatpush1.msra.mxu0 %v11161_v18  ;;  %v11207_v62 = vld [vmem:[%s20211_s7 + $0xaa0] sm:$0xff]  ;;  %v11136_v48 = vld [vmem:[%s20211_s7 + $0x868] sm:$0xff]  ;;  %v11206_v18 = vld [vmem:[%s20211_s7 + $0xa98] sm:$0xff] }
 0x48e   : > { %5603 = vmatprep.subr.mxu1 %v11123_v45  ;;  %5656 = vmatprep.subr.mxu0 %v11159_v51  ;;  %v11088_v45 = vld [vmem:[%s20211_s7 + $0x6e8] sm:$0xff] }
 0x48f   : > { %5604 = vmatpush2.msra.mxu1 %v11122_v32  ;;  %5657 = vmatpush1.msra.mxu0 %v11158_v0  ;;  %v11204_v51 = vld [vmem:[%s20211_s7 + $0xa88] sm:$0xff]  ;;  %v11133_v32 = vld [vmem:[%s20211_s7 + $0x850] sm:$0xff]  ;;  %v11203_v0 = vld [vmem:[%s20211_s7 + $0xa80] sm:$0xff] }
 0x490   : > { %5605 = vmatprep.subr.mxu1 %v11120_v34  ;;  %5658 = vmatprep.subr.mxu0 %v11156_v4  ;;  %v11085_v34 = vld [vmem:[%s20211_s7 + $0x6d0] sm:$0xff] }
 0x491   : > { %5606 = vmatpush2.msra.mxu1 %v11119_v55  ;;  %5659 = vmatpush1.msra.mxu0 %v11155_v36  ;;  %v11201_v4 = vld [vmem:[%s20211_s7 + $0xa70] sm:$0xff]  ;;  %v11130_v55 = vld [vmem:[%s20211_s7 + $0x838] sm:$0xff]  ;;  %v11200_v36 = vld [vmem:[%s20211_s7 + $0xa68] sm:$0xff] }
 0x492   : > { %5607 = vmatprep.subr.mxu1 %v11117_v58  ;;  %5660 = vmatprep.subr.mxu0 %v11153_v59  ;;  %v11082_v58 = vld [vmem:[%s20211_s7 + $0x6b8] sm:$0xff]  ;;  %v11127_v59 = vld [vmem:[%s20211_s7 + $0x820] sm:$0xff] }
 0x493   : > { %5608 = vmatpush2.msra.mxu1 %v11116_v61  ;;  %5661 = vmatpush1.msra.mxu0 %v11152_v38  ;;  %v11197_v61 = vld [vmem:[%s20211_s7 + $0xa50] sm:$0xff]  ;;  %v11079_v38 = vld [vmem:[%s20211_s7 + $0x6a0] sm:$0xff] }
 0x494   : > { %5609 = vmatprep.subr.mxu1 %v11114_v56  ;;  %5662 = vmatprep.subr.mxu0 %v11150_v12  ;;  %v11195_v56 = vld [vmem:[%s20211_s7 + $0xa40] sm:$0xff]  ;;  %v11124_v12 = vld [vmem:[%s20211_s7 + $0x808] sm:$0xff] }
 0x495   : > { %5610 = vmatpush2.msra.mxu1 %v11113_v47  ;;  %5663 = vmatpush1.msra.mxu0 %v11149_v2  ;;  %v11194_v47 = vld [vmem:[%s20211_s7 + $0xa38] sm:$0xff]  ;;  %v11076_v2 = vld [vmem:[%s20211_s7 + $0x688] sm:$0xff] }
 0x496   : > { %5611 = vmatprep.subr.mxu1 %v11111_v24  ;;  %5664 = vmatprep.subr.mxu0 %v11147_v6  ;;  %v11192_v24 = vld [vmem:[%s20211_s7 + $0xa28] sm:$0xff]  ;;  %v11121_v6 = vld [vmem:[%s20211_s7 + $0x7f0] sm:$0xff] }
 0x497   : > { %5612 = vmatpush2.msra.mxu1 %v11110_v23  ;;  %5665 = vmatpush1.msra.mxu0 %v11146_v9  ;;  %v11191_v23 = vld [vmem:[%s20211_s7 + $0xa20] sm:$0xff]  ;;  %v11073_v9 = vld [vmem:[%s20211_s7 + $0x670] sm:$0xff] }
 0x498   : > { %5613 = vmatprep.subr.mxu1 %v11108_v30  ;;  %5666 = vmatprep.subr.mxu0 %v11144_v7  ;;  %v11118_v30 = vld [vmem:[%s20211_s7 + $0x7d8] sm:$0xff] }
 0x499   : > { %5614 = vmatpush2.msra.mxu1 %v11107_v53  ;;  %5667 = vmatpush1.msra.mxu0 %v11143_v28  ;;  %v11070_v7 = vld [vmem:[%s20211_s7 + $0x658] sm:$0xff]  ;;  %v11115_v28 = vld [vmem:[%s20211_s7 + $0x7c0] sm:$0xff] }
 0x49a   : > { %5615 = vmatprep.subr.mxu1 %v11105_v11  ;;  %5676 = vmatprep.subr.mxu0 %v11225_v26  ;;  %v11190_v53 = vld [vmem:[%s20211_s7 + $0xa18] sm:$0xff]  ;;  %v11067_v11 = vld [vmem:[%s20211_s7 + $0x640] sm:$0xff] }
 0x49b   : > { %5616 = vmatpush2.msra.mxu1 %v11104_v14  ;;  %5677 = vmatpush2.msra.mxu0 %v11224_v31  ;;  %v11187_v26 = vld [vmem:[%s20211_s7 + $0xa00] sm:$0xff]  ;;  %v11112_v14 = vld [vmem:[%s20211_s7 + $0x7a8] sm:$0xff] }
 0x49c   : > { %5617 = vmatprep.subr.mxu1 %v11102_v44  ;;  %5678 = vmatprep.subr.mxu0 %v11222_v1  ;;  %v11064_v31 = vld [vmem:[%s20211_s7 + $0x628] sm:$0xff]  ;;  %v11109_v1 = vld [vmem:[%s20211_s7 + $0x790] sm:$0xff] }
 0x49d   : > { %5618 = vmatpush2.msra.mxu1 %v11101_v19  ;;  %5679 = vmatpush2.msra.mxu0 %v11221_v40  ;;  %v11184_v44 = vld [vmem:[%s20211_s7 + $0x9e8] sm:$0xff]  ;;  %v11061_v19 = vld [vmem:[%s20211_s7 + $0x610] sm:$0xff] }
 0x49e   : > { %5619 = vmatprep.subr.mxu1 %v11099_v43  ;;  %5680 = vmatprep.subr.mxu0 %v11219_v39  ;;  %v11181_v40 = vld [vmem:[%s20211_s7 + $0x9d0] sm:$0xff]  ;;  %v11106_v43 = vld [vmem:[%s20211_s7 + $0x778] sm:$0xff] }
 0x49f   : > { %5620 = vmatpush2.msra.mxu1 %v11098_v42  ;;  %5681 = vmatpush2.msra.mxu0 %v11218_v21  ;;  %v11058_v39 = vld [vmem:[%s20211_s7 + $0x5f8] sm:$0xff]  ;;  %v11055_v21 = vld [vmem:[%s20211_s7 + $0x5e0] sm:$0xff] }
 0x4a0   : > { %5621 = vmatprep.subr.mxu1 %v11096_v50  ;;  %5682 = vmatprep.subr.mxu0 %v11216_v10  ;;  %v11178_v42 = vld [vmem:[%s20211_s7 + $0x9b8] sm:$0xff]  ;;  %v11175_v50 = vld [vmem:[%s20211_s7 + $0x9a0] sm:$0xff]  ;;  %v11100_v10 = vld [vmem:[%s20211_s7 + $0x748] sm:$0xff] }
 0x4a1   : > { %5622 = vmatpush2.msra.mxu1 %v11095_v46  ;;  %5683 = vmatpush2.msra.mxu0 %v11215_v13  ;;  %v11052_v46 = vld [vmem:[%s20211_s7 + $0x5c8] sm:$0xff] }
 0x4a2   : > { %5624 = vmatmul.mubr.f32.vlgmr.msra.gmra.mxu1 %v16433_v49  ;;  %5684 = vmatprep.subr.mxu0 %v11213_v15  ;;  %v11172_v13 = vld [vmem:[%s20211_s7 + $0x988] sm:$0xff]  ;;  %v11097_v15 = vld [vmem:[%s20211_s7 + $0x730] sm:$0xff] }
 0x4a3   : > { %11700 = vmatprep.subr.mxu1 %v11142_v52  ;;  %5629 = vmatprep.mubr.f32.mxu1 %v16406_v8  ;;  %v11049_v52 = vld [vmem:[%s20211_s7 + $0x5b0] sm:$0xff] }
 0x4a4   : > { %5685 = vmatpush2.msra.mxu0 %v11212_v25  ;;  %11701 = vmatpush3.msra.mxu1 %v11094_v16  ;;  %v11169_v25 = vld [vmem:[%s20211_s7 + $0x970] sm:$0xff] }
 0x4a5   : > { %5686 = vmatprep.subr.mxu0 %v11210_v5  ;;  %11702 = vmatprep.subr.mxu1 %v11139_v54  ;;  %v4541_v16 = vld [vmem:[%s20209_s11 + $0x170] sm:$0xff]  ;;  %v11166_v5 = vld [vmem:[%s20211_s7 + $0x958] sm:$0xff]  ;;  %v4540_v54 = vld [vmem:[%s20209_s11 + $0x168] sm:$0xff] }
 0x4a6   : > { %5687 = vmatpush2.msra.mxu0 %v11209_v3  ;;  %11703 = vmatpush3.msra.mxu1 %v11091_v57  ;;  %v4538_v3 = vld [vmem:[%s20209_s11 + $0x158] sm:$0xff]  ;;  %v11163_v57 = vld [vmem:[%s20211_s7 + $0x940] sm:$0xff] }
 0x4a7   : > { %5630 = vmatmul.mubr.f32.gmra.mxu1 %v16402_v17  ;;  %5688 = vmatprep.subr.mxu0 %v11207_v62  ;;  %v4537_v62 = vld [vmem:[%s20209_s11 + $0x150] sm:$0xff] }
 0x4a8   : > { %11704 = vmatprep.subr.mxu1 %v11136_v48  ;;  %5689 = vmatpush2.msra.mxu0 %v11206_v18  ;;  %v4534_v48 = vld [vmem:[%s20209_s11 + $0x138] sm:$0xff]  ;;  %v4532_v18 = vld [vmem:[%s20209_s11 + $0x128] sm:$0xff] }
 0x4a9   : > { %11705 = vmatpush3.msra.mxu1 %v11088_v45  ;;  %5777 = vmatprep.mubr.f32.mxu1 %v16416_v60  ;;  %v11198_v60 = vld [vmem:[%s20211_s7 + $0xa58] sm:$0xff]  ;;  %v17187_v45 = vld [vmem:[#allocation4 + $0x8] sm:$0xff] }
 0x4aa   : > { %5690 = vmatprep.subr.mxu0 %v11204_v51  ;;  %11706 = vmatprep.subr.mxu1 %v11133_v32  ;;  %v11157_v51 = vld [vmem:[%s20211_s7 + $0x910] sm:$0xff]  ;;  %v4531_v32 = vld [vmem:[%s20209_s11 + $0x120] sm:$0xff] }
 0x4ab   : > { %5691 = vmatpush2.msra.mxu0 %v11203_v0  ;;  %11707 = vmatpush3.msra.mxu1 %v11085_v34  ;;  %v11154_v0 = vld [vmem:[%s20211_s7 + $0x8f8] sm:$0xff]  ;;  %v4528_v34 = vld [vmem:[%s20209_s11 + $0x108] sm:$0xff] }
 0x4ac   : > { %5692 = vmatprep.subr.mxu0 %v11201_v4  ;;  %11708 = vmatprep.subr.mxu1 %v11130_v55  ;;  %v4526_v4 = vld [vmem:[%s20209_s11 + $0xf8] sm:$0xff]  ;;  %v11151_v55 = vld [vmem:[%s20211_s7 + $0x8e0] sm:$0xff] }
 0x4ad   : > { %5693 = vmatpush2.msra.mxu0 %v11200_v36  ;;  %11709 = vmatpush3.msra.mxu1 %v11082_v58  ;;  %v4525_v36 = vld [vmem:[%s20209_s11 + $0xf0] sm:$0xff]  ;;  %v4523_v58 = vld [vmem:[%s20209_s11 + $0xe0] sm:$0xff] }
 0x4ae   : > { %5694 = vmatprep.subr.mxu0 %v11198_v60  ;;  %11710 = vmatprep.subr.mxu1 %v11127_v59  ;;  %v11148_v60 = vld [vmem:[%s20211_s7 + $0x8c8] sm:$0xff]  ;;  %v4522_v59 = vld [vmem:[%s20209_s11 + $0xd8] sm:$0xff] }
 0x4af   : > { %5695 = vmatpush2.msra.mxu0 %v11197_v61  ;;  %11711 = vmatpush3.msra.mxu1 %v11079_v38  ;;  %v4520_v61 = vld [vmem:[%s20209_s11 + $0xc8] sm:$0xff]  ;;  %v11145_v38 = vld [vmem:[%s20211_s7 + $0x8b0] sm:$0xff] }
 0x4b0   : > { %5696 = vmatprep.subr.mxu0 %v11195_v56  ;;  %11712 = vmatprep.subr.mxu1 %v11124_v12  ;;  %v4519_v56 = vld [vmem:[%s20209_s11 + $0xc0] sm:$0xff]  ;;  %v4517_v12 = vld [vmem:[%s20209_s11 + $0xb0] sm:$0xff] }
 0x4b1   : > { %5697 = vmatpush2.msra.mxu0 %v11194_v47  ;;  %11713 = vmatpush3.msra.mxu1 %v11076_v2  ;;  %v11226_v47 = vld [vmem:[%s20211_s7 + $0xb38] sm:$0xff]  ;;  %v4516_v2 = vld [vmem:[%s20209_s11 + $0xa8] sm:$0xff] }
 0x4b2   : > { %5698 = vmatprep.subr.mxu0 %v11192_v24  ;;  %11714 = vmatprep.subr.mxu1 %v11121_v6  ;;  %v4514_v24 = vld [vmem:[%s20209_s11 + $0x98] sm:$0xff]  ;;  %v11223_v6 = vld [vmem:[%s20211_s7 + $0xb20] sm:$0xff] }
 0x4b3   : > { %5699 = vmatpush2.msra.mxu0 %v11191_v23  ;;  %11715 = vmatpush3.msra.mxu1 %v11073_v9  ;;  %v4513_v23 = vld [vmem:[%s20209_s11 + $0x90] sm:$0xff]  ;;  %v4511_v9 = vld [vmem:[%s20209_s11 + $0x80] sm:$0xff] }
 0x4b4   : > { %5701 = vmatmul.mubr.f32.vlgmr.msra.gmra.mxu0 %v16412_v29  ;;  %11716 = vmatprep.subr.mxu1 %v11118_v30  ;;  %v11220_v30 = vld [vmem:[%s20211_s7 + $0xb08] sm:$0xff] }
 0x4b5   : > { %5788 = vmatprep.subr.mxu0 %v12222_v20  ;;  %11228 = vmatprep.mubr.msk.f32.mxu0 %vm1283_vm1, %v16408_v63 }
 0x4b6   : > { %11717 = vmatpush3.msra.mxu1 %v11070_v7  ;;  %5789 = vmatpush1.msra.mxu0 %v11190_v53  ;;  %v4510_v7 = vld [vmem:[%s20209_s11 + $0x78] sm:$0xff]  ;;  %v4508_v53 = vld [vmem:[%s20209_s11 + $0x68] sm:$0xff] }
 0x4b7   : > { %11718 = vmatprep.subr.mxu1 %v11115_v28  ;;  %5790 = vmatprep.subr.mxu0 %v12222_v20  ;;  %v11217_v28 = vld [vmem:[%s20211_s7 + $0xaf0] sm:$0xff] }
 0x4b8   : > { %11719 = vmatpush3.msra.mxu1 %v11067_v11  ;;  %5791 = vmatpush1.msra.mxu0 %v11187_v26  ;;  %v4507_v11 = vld [vmem:[%s20209_s11 + $0x60] sm:$0xff]  ;;  %v4505_v26 = vld [vmem:[%s20209_s11 + $0x50] sm:$0xff] }
 0x4b9   : > { %5707 = vmatmul.mubr.f32.gmra.mxu0 %v16404_v37  ;;  %11720 = vmatprep.subr.mxu1 %v11112_v14  ;;  %v11214_v14 = vld [vmem:[%s20211_s7 + $0xad8] sm:$0xff] }
 0x4ba   : > { %5792 = vmatprep.subr.mxu0 %v12222_v20  ;;  %11721 = vmatpush3.msra.mxu1 %v11064_v31  ;;  %v4504_v31 = vld [vmem:[%s20209_s11 + $0x48] sm:$0xff] }
 0x4bb   : > { %5793 = vmatpush1.msra.mxu0 %v11184_v44  ;;  %11229 = vmatprep.mubr.msk.f32.mxu0 %vm1283_vm1, %v16420_v27  ;;  %v11103_v27 = vld [vmem:[%s20211_s7 + $0x760] sm:$0xff]  ;;  %v4502_v44 = vld [vmem:[%s20209_s11 + $0x38] sm:$0xff] }
 0x4bc   : > { %11722 = vmatprep.subr.mxu1 %v11109_v1  ;;  %5794 = vmatprep.subr.mxu0 %v12222_v20  ;;  %v11211_v1 = vld [vmem:[%s20211_s7 + $0xac0] sm:$0xff] }
 0x4bd   : > { %11723 = vmatpush3.msra.mxu1 %v11061_v19  ;;  %5795 = vmatpush1.msra.mxu0 %v11181_v40  ;;  %v4501_v19 = vld [vmem:[%s20209_s11 + $0x30] sm:$0xff]  ;;  %v4499_v40 = vld [vmem:[%s20209_s11 + $0x20] sm:$0xff] }
 0x4be   : > { %11724 = vmatprep.subr.mxu1 %v11106_v43  ;;  %5796 = vmatprep.subr.mxu0 %v12222_v20  ;;  %v11208_v43 = vld [vmem:[%s20211_s7 + $0xaa8] sm:$0xff] }
 0x4bf   : > { %11725 = vmatpush3.msra.mxu1 %v11058_v39  ;;  %5797 = vmatpush1.msra.mxu0 %v11178_v42  ;;  %v4498_v39 = vld [vmem:[%s20209_s11 + $0x18] sm:$0xff]  ;;  %v4496_v42 = vld [vmem:[%s20209_s11 + $0x8] sm:$0xff] }
 0x4c0   : > { %11726 = vmatprep.subr.mxu1 %v11103_v27  ;;  %5798 = vmatprep.subr.mxu0 %v12222_v20  ;;  %v11205_v27 = vld [vmem:[%s20211_s7 + $0xa90] sm:$0xff] }
 0x4c1   : > { %11727 = vmatpush3.msra.mxu1 %v11055_v21  ;;  %5799 = vmatpush1.msra.mxu0 %v11175_v50  ;;  %v4495_v21 = vld [vmem:[%s20209_s11] sm:$0xff]  ;;  %v4589_v50 = vld [vmem:[%s20209_s11 + $0x2f0] sm:$0xff] }
 0x4c2   : > { %11728 = vmatprep.subr.mxu1 %v11100_v10  ;;  %5800 = vmatprep.subr.mxu0 %v12222_v20  ;;  %v11202_v10 = vld [vmem:[%s20211_s7 + $0xa78] sm:$0xff] }
 0x4c3   : > { %11729 = vmatpush3.msra.mxu1 %v11052_v46  ;;  %5801 = vmatpush1.msra.mxu0 %v11172_v13  ;;  %v4588_v46 = vld [vmem:[%s20209_s11 + $0x2e8] sm:$0xff]  ;;  %v4586_v13 = vld [vmem:[%s20209_s11 + $0x2d8] sm:$0xff] }
 0x4c4   : > { %11730 = vmatprep.subr.mxu1 %v11097_v15  ;;  %5802 = vmatprep.subr.mxu0 %v12222_v20  ;;  %v11199_v15 = vld [vmem:[%s20211_s7 + $0xa60] sm:$0xff] }
 0x4c5   : > { %11731 = vmatpush3.msra.mxu1 %v11049_v52  ;;  %5803 = vmatpush1.msra.mxu0 %v11169_v25  ;;  %v4585_v52 = vld [vmem:[%s20209_s11 + $0x2d0] sm:$0xff]  ;;  %v4583_v25 = vld [vmem:[%s20209_s11 + $0x2c0] sm:$0xff] }
 0x4c6   : > { %5778 = vmatmul.mubr.f32.vlgmr.msra.gmra.mxu1 %v16433_v49  ;;  %5804 = vmatprep.subr.mxu0 %v12222_v20  ;;  %v4535_v49 = vld [vmem:[%s20209_s11 + $0x140] sm:$0xff] }
 0x4c7   : > { %5869 = vmatprep.subr.mxu1 %v4541_v16  ;;  %5782 = vmatprep.mubr.f32.mxu1 %v16406_v8  ;;  %v11160_v8 = vld [vmem:[%s20211_s7 + $0x928] sm:$0xff] }
 0x4c8   : > { %5805 = vmatpush1.msra.mxu0 %v11166_v5  ;;  %5870 = vmatpush1.msra.mxu1 %v4540_v54  ;;  %v11196_v16 = vld [vmem:[%s20211_s7 + $0xa48] sm:$0xff]  ;;  %v4582_v5 = vld [vmem:[%s20209_s11 + $0x2b8] sm:$0xff] }
 0x4c9   : > { %5806 = vmatprep.subr.mxu0 %v12222_v20  ;;  %5871 = vmatprep.subr.mxu1 %v4538_v3  ;;  %v4580_v54 = vld [vmem:[%s20209_s11 + $0x2a8] sm:$0xff]  ;;  %v11193_v3 = vld [vmem:[%s20211_s7 + $0xa30] sm:$0xff] }
 0x4ca   : > { %5807 = vmatpush1.msra.mxu0 %v11163_v57  ;;  %5872 = vmatpush1.msra.mxu1 %v4537_v62  ;;  %v4579_v57 = vld [vmem:[%s20209_s11 + $0x2a0] sm:$0xff]  ;;  %v4577_v62 = vld [vmem:[%s20209_s11 + $0x290] sm:$0xff] }
 0x4cb   : > { %5783 = vmatmul.mubr.f32.gmra.mxu1 %v16402_v17  ;;  %5808 = vmatprep.subr.mxu0 %v12222_v20  ;;  %v4529_v17 = vld [vmem:[%s20209_s11 + $0x110] sm:$0xff] }
 0x4cc   : > { %5873 = vmatprep.subr.mxu1 %v4535_v49  ;;  %5809 = vmatpush1.msra.mxu0 %v11160_v8  ;;  %v4637_v49 = vld [vmem:[%s20209_s11 + $0x470] sm:$0xff]  ;;  %v4576_v8 = vld [vmem:[%s20209_s11 + $0x288] sm:$0xff] }
 0x4cd   : > { %5874 = vmatpush1.msra.mxu1 %v4534_v48  ;;  %5933 = vmatprep.mubr.f32.mxu1 %v17187_v45  ;;  %v4636_v48 = vld [vmem:[%s20209_s11 + $0x468] sm:$0xff] }
 0x4ce   : > { %5810 = vmatprep.subr.mxu0 %v12222_v20  ;;  %5875 = vmatprep.subr.mxu1 %v4532_v18  ;;  %v4574_v18 = vld [vmem:[%s20209_s11 + $0x278] sm:$0xff] }
 0x4cf   : > { %5811 = vmatpush1.msra.mxu0 %v11157_v51  ;;  %5876 = vmatpush1.msra.mxu1 %v4531_v32  ;;  %v4634_v51 = vld [vmem:[%s20209_s11 + $0x458] sm:$0xff]  ;;  %v4573_v32 = vld [vmem:[%s20209_s11 + $0x270] sm:$0xff] }
 0x4d0   : > { %5812 = vmatprep.subr.mxu0 %v12222_v20  ;;  %5877 = vmatprep.subr.mxu1 %v4529_v17  ;;  %v4571_v17 = vld [vmem:[%s20209_s11 + $0x260] sm:$0xff] }
 0x4d1   : > { %5813 = vmatpush1.msra.mxu0 %v11154_v0  ;;  %5878 = vmatpush1.msra.mxu1 %v4528_v34  ;;  %v4570_v0 = vld [vmem:[%s20209_s11 + $0x258] sm:$0xff] }
 0x4d2   : > { %5814 = vmatprep.subr.mxu0 %v12222_v20  ;;  %5879 = vmatprep.subr.mxu1 %v4526_v4  ;;  %v4630_v34 = vld [vmem:[%s20209_s11 + $0x438] sm:$0xff]  ;;  %v4568_v4 = vld [vmem:[%s20209_s11 + $0x248] sm:$0xff] }
 0x4d3   : > { %5815 = vmatpush1.msra.mxu0 %v11151_v55  ;;  %5880 = vmatpush1.msra.mxu1 %v4525_v36  ;;  %v4628_v55 = vld [vmem:[%s20209_s11 + $0x428] sm:$0xff]  ;;  %v17403_v36 = vld [vmem:[#allocation4 + $0x18] sm:$0xff] }
 0x4d4   : > { %5816 = vmatprep.subr.mxu0 %v12222_v20  ;;  %5881 = vmatprep.subr.mxu1 %v4523_v58  ;;  %v4567_v58 = vld [vmem:[%s20209_s11 + $0x240] sm:$0xff] }
 0x4d5   : > { %5817 = vmatpush1.msra.mxu0 %v11148_v60  ;;  %5882 = vmatpush1.msra.mxu1 %v4522_v59  ;;  %v4565_v60 = vld [vmem:[%s20209_s11 + $0x230] sm:$0xff] }
 0x4d6   : > { %5818 = vmatprep.subr.mxu0 %v12222_v20  ;;  %5883 = vmatprep.subr.mxu1 %v4520_v61  ;;  %v4625_v59 = vld [vmem:[%s20209_s11 + $0x410] sm:$0xff]  ;;  %v4564_v61 = vld [vmem:[%s20209_s11 + $0x228] sm:$0xff] }
 0x4d7   : > { %5819 = vmatpush1.msra.mxu0 %v11145_v38  ;;  %5884 = vmatpush1.msra.mxu1 %v4519_v56  ;;  %v4624_v38 = vld [vmem:[%s20209_s11 + $0x408] sm:$0xff]  ;;  %v4562_v56 = vld [vmem:[%s20209_s11 + $0x218] sm:$0xff] }
 0x4d8   : > { %5828 = vmatprep.subr.mxu0 %v12222_v20  ;;  %5885 = vmatprep.subr.mxu1 %v4517_v12  ;;  %v4622_v12 = vld [vmem:[%s20209_s11 + $0x3f8] sm:$0xff] }
 0x4d9   : > { %5829 = vmatpush2.msra.mxu0 %v11226_v47  ;;  %5886 = vmatpush1.msra.mxu1 %v4516_v2  ;;  %v4561_v47 = vld [vmem:[%s20209_s11 + $0x210] sm:$0xff] }
 0x4da   : > { %5830 = vmatprep.subr.mxu0 %v12222_v20  ;;  %5887 = vmatprep.subr.mxu1 %v4514_v24  ;;  %v4621_v2 = vld [vmem:[%s20209_s11 + $0x3f0] sm:$0xff]  ;;  %v4559_v24 = vld [vmem:[%s20209_s11 + $0x200] sm:$0xff] }
 0x4db   : > { %5831 = vmatpush2.msra.mxu0 %v11223_v6  ;;  %5888 = vmatpush1.msra.mxu1 %v4513_v23  ;;  %v4619_v6 = vld [vmem:[%s20209_s11 + $0x3e0] sm:$0xff] }
 0x4dc   : > { %5832 = vmatprep.subr.mxu0 %v12222_v20  ;;  %5889 = vmatprep.subr.mxu1 %v4511_v9 }
 0x4dd   : > { %5833 = vmatpush2.msra.mxu0 %v11220_v30  ;;  %5890 = vmatpush1.msra.mxu1 %v4510_v7  ;;  %v4558_v30 = vld [vmem:[%s20209_s11 + $0x1f8] sm:$0xff] }
 0x4de   : > { %5834 = vmatprep.subr.mxu0 %v12222_v20  ;;  %5891 = vmatprep.subr.mxu1 %v4508_v53  ;;  %v4618_v7 = vld [vmem:[%s20209_s11 + $0x3d8] sm:$0xff] }
 0x4df   : > { %5835 = vmatpush2.msra.mxu0 %v11217_v28  ;;  %5892 = vmatpush1.msra.mxu1 %v4507_v11  ;;  %v4556_v28 = vld [vmem:[%s20209_s11 + $0x1e8] sm:$0xff] }
 0x4e0   : > { %5836 = vmatprep.subr.mxu0 %v12222_v20  ;;  %5893 = vmatprep.subr.mxu1 %v4505_v26  ;;  %v4616_v11 = vld [vmem:[%s20209_s11 + $0x3c8] sm:$0xff] }
 0x4e1   : > { %5837 = vmatpush2.msra.mxu0 %v11214_v14  ;;  %5894 = vmatpush1.msra.mxu1 %v4504_v31  ;;  %v4555_v31 = vld [vmem:[%s20209_s11 + $0x1e0] sm:$0xff] }
 0x4e2   : > { %5838 = vmatprep.subr.mxu0 %v12222_v20  ;;  %5895 = vmatprep.subr.mxu1 %v4502_v44  ;;  %v4615_v44 = vld [vmem:[%s20209_s11 + $0x3c0] sm:$0xff] }
 0x4e3   : > { %5839 = vmatpush2.msra.mxu0 %v11211_v1  ;;  %5896 = vmatpush1.msra.mxu1 %v4501_v19  ;;  %v4553_v19 = vld [vmem:[%s20209_s11 + $0x1d0] sm:$0xff] }
 0x4e4   : > { %5840 = vmatprep.subr.mxu0 %v12222_v20  ;;  %5897 = vmatprep.subr.mxu1 %v4499_v40  ;;  %v4613_v40 = vld [vmem:[%s20209_s11 + $0x3b0] sm:$0xff] }
 0x4e5   : > { %5841 = vmatpush2.msra.mxu0 %v11208_v43  ;;  %5898 = vmatpush1.msra.mxu1 %v4498_v39  ;;  %v4552_v43 = vld [vmem:[%s20209_s11 + $0x1c8] sm:$0xff] }
 0x4e6   : > { %5842 = vmatprep.subr.mxu0 %v12222_v20  ;;  %5899 = vmatprep.subr.mxu1 %v4496_v42  ;;  %v4612_v39 = vld [vmem:[%s20209_s11 + $0x3a8] sm:$0xff]  ;;  %v4550_v42 = vld [vmem:[%s20209_s11 + $0x1b8] sm:$0xff] }
 0x4e7   : > { %5843 = vmatpush2.msra.mxu0 %v11205_v27  ;;  %5900 = vmatpush1.msra.mxu1 %v4495_v21  ;;  %v4610_v27 = vld [vmem:[%s20209_s11 + $0x398] sm:$0xff] }
 0x4e8   : > { %5844 = vmatprep.subr.mxu0 %v12222_v20  ;;  %5901 = vmatprep.subr.mxu1 %v4589_v50 }
 0x4e9   : > { %5845 = vmatpush2.msra.mxu0 %v11202_v10  ;;  %5902 = vmatpush2.msra.mxu1 %v4588_v46  ;;  %v4549_v10 = vld [vmem:[%s20209_s11 + $0x1b0] sm:$0xff] }
 0x4ea   : > { %5846 = vmatprep.subr.mxu0 %v12222_v20  ;;  %5903 = vmatprep.subr.mxu1 %v4586_v13  ;;  %v4609_v46 = vld [vmem:[%s20209_s11 + $0x390] sm:$0xff] }
 0x4eb   : > { %5847 = vmatpush2.msra.mxu0 %v11199_v15  ;;  %5904 = vmatpush2.msra.mxu1 %v4585_v52  ;;  %v4547_v15 = vld [vmem:[%s20209_s11 + $0x1a0] sm:$0xff] }
 0x4ec   : > { %5848 = vmatprep.subr.mxu0 %v12222_v20  ;;  %5905 = vmatprep.subr.mxu1 %v4583_v25  ;;  %v4607_v52 = vld [vmem:[%s20209_s11 + $0x380] sm:$0xff] }
 0x4ed   : > { %5849 = vmatpush2.msra.mxu0 %v11196_v16  ;;  %5906 = vmatpush2.msra.mxu1 %v4582_v5  ;;  %v4546_v5 = vld [vmem:[%s20209_s11 + $0x198] sm:$0xff] }
 0x4ee   : > { %5850 = vmatprep.subr.mxu0 %v12222_v20  ;;  %5907 = vmatprep.subr.mxu1 %v4580_v54  ;;  %v4606_v54 = vld [vmem:[%s20209_s11 + $0x378] sm:$0xff] }
 0x4ef   : > { %5851 = vmatpush2.msra.mxu0 %v11193_v3  ;;  %5908 = vmatpush2.msra.mxu1 %v4579_v57  ;;  %v4544_v57 = vld [vmem:[%s20209_s11 + $0x188] sm:$0xff] }
 0x4f0   : > { %5853 = vmatmul.mubr.f32.vlgmr.msra.gmra.mxu0 %v16412_v29  ;;  %5909 = vmatprep.subr.mxu1 %v4577_v62  ;;  %v4633_v29 = vld [vmem:[%s20209_s11 + $0x450] sm:$0xff]  ;;  %v4604_v62 = vld [vmem:[%s20209_s11 + $0x368] sm:$0xff] }
 0x4f1   : > { %5946 = vmatprep.subr.mxu0 %v4637_v49  ;;  %11230 = vmatprep.mubr.msk.f32.mxu0 %vm1283_vm1, %v16408_v63  ;;  %v4631_v63 = vld [vmem:[%s20209_s11 + $0x440] sm:$0xff] }
 0x4f2   : > { %5910 = vmatpush2.msra.mxu1 %v4576_v8  ;;  %5947 = vmatpush1.msra.mxu0 %v4636_v48  ;;  %v4543_v49 = vld [vmem:[%s20209_s11 + $0x180] sm:$0xff]  ;;  %v4601_v48 = vld [vmem:[%s20209_s11 + $0x350] sm:$0xff] }
 0x4f3   : > { %5911 = vmatprep.subr.mxu1 %v4574_v18  ;;  %5948 = vmatprep.subr.mxu0 %v4634_v51  ;;  %v4603_v8 = vld [vmem:[%s20209_s11 + $0x360] sm:$0xff]  ;;  %v4590_v18 = vld [vmem:[%s20209_s11 + $0x2f8] sm:$0xff] }
 0x4f4   : > { %5912 = vmatpush2.msra.mxu1 %v4573_v32  ;;  %5949 = vmatpush1.msra.mxu0 %v4633_v29  ;;  %v17523_v51 = vld [vmem:[#allocation4] sm:$0xff]  ;;  %v4600_v32 = vld [vmem:[%s20209_s11 + $0x348] sm:$0xff]  ;;  %v4542_v29 = vld [vmem:[%s20209_s11 + $0x178] sm:$0xff] }
 0x4f5   : > { %5858 = vmatmul.mubr.f32.gmra.mxu0 %v16404_v37  ;;  %5913 = vmatprep.subr.mxu1 %v4571_v17  ;;  %v4627_v37 = vld [vmem:[%s20209_s11 + $0x420] sm:$0xff]  ;;  %v17532_v17 = vld [vmem:[#allocation4 + $0x28] sm:$0x1f] }
 0x4f6   : > { %5950 = vmatprep.subr.mxu0 %v4631_v63  ;;  %5914 = vmatpush2.msra.mxu1 %v4570_v0  ;;  %v4598_v63 = vld [vmem:[%s20209_s11 + $0x338] sm:$0xff]  ;;  %v4587_v0 = vld [vmem:[%s20209_s11 + $0x2e0] sm:$0xff] }
 0x4f7   : > { %5951 = vmatpush1.msra.mxu0 %v4630_v34  ;;  %11231 = vmatprep.mubr.msk.f32.mxu0 %vm1283_vm1, %v17403_v36  ;;  %v4597_v34 = vld [vmem:[%s20209_s11 + $0x330] sm:$0xff] }
 0x4f8   : > { %5915 = vmatprep.subr.mxu1 %v4568_v4  ;;  %5952 = vmatprep.subr.mxu0 %v4628_v55  ;;  %v4539_v4 = vld [vmem:[%s20209_s11 + $0x160] sm:$0xff] }
 0x4f9   : > { %5916 = vmatpush2.msra.mxu1 %v4567_v58  ;;  %5953 = vmatpush1.msra.mxu0 %v4627_v37  ;;  %v4595_v55 = vld [vmem:[%s20209_s11 + $0x320] sm:$0xff]  ;;  %v4584_v58 = vld [vmem:[%s20209_s11 + $0x2c8] sm:$0xff]  ;;  %v4594_v37 = vld [vmem:[%s20209_s11 + $0x318] sm:$0xff] }
 0x4fa   : > { %5917 = vmatprep.subr.mxu1 %v4565_v60  ;;  %5954 = vmatprep.subr.mxu0 %v4625_v59  ;;  %v17556_v60 = vld [vmem:[#allocation4 + $0x20] sm:$0x1f]  ;;  %v4536_v59 = vld [vmem:[%s20209_s11 + $0x148] sm:$0xff] }
 0x4fb   : > { %5918 = vmatpush2.msra.mxu1 %v4564_v61  ;;  %5955 = vmatpush1.msra.mxu0 %v4624_v38  ;;  %v5140_v23 = vpop.f32.mrf.mxu0  ;;  %v5217_v9 = vpop.f32.mrf.mxu1  ;;  %v4592_v61 = vld [vmem:[%s20209_s11 + $0x308] sm:$0xff]  ;;  %v4581_v38 = vld [vmem:[%s20209_s11 + $0x2b0] sm:$0xff] }
 0x4fc   : > { %5919 = vmatprep.subr.mxu1 %v4562_v56  ;;  %5956 = vmatprep.subr.mxu0 %v4622_v12  ;;  %v17449_v53 = vadd.f32 %v5217_v9, %v5140_v23  ;;  %v4591_v56 = vld [vmem:[%s20209_s11 + $0x300] sm:$0xff]  ;;  %v4533_v12 = vld [vmem:[%s20209_s11 + $0x130] sm:$0xff]  ;;  %v4670_v23 = vld [vmem:[%s20209_s11 + $0x578] sm:$0xff] }
 0x4fd   : > { %5920 = vmatpush2.msra.mxu1 %v4561_v47  ;;  %5957 = vmatpush1.msra.mxu0 %v4621_v2  ;;  %v5142_v26 = vpop.f32.mrf.mxu0  ;;  %v5219_v14 = vpop.f32.mrf.mxu1  ;;  %v4673_v47 = vld [vmem:[%s20209_s11 + $0x590] sm:$0xff]  ;;  %v4578_v2 = vld [vmem:[%s20209_s11 + $0x298] sm:$0xff]  ;;  %v4575_v9 = vld [vmem:[%s20209_s11 + $0x280] sm:$0xff] }
 0x4fe   : > { %5921 = vmatprep.subr.mxu1 %v4559_v24  ;;  %5958 = vmatprep.subr.mxu0 %v4619_v6  ;;  %v17463_v1 = vadd.f32 %v5219_v14, %v5142_v26  ;;  %v4672_v24 = vld [vmem:[%s20209_s11 + $0x588] sm:$0xff]  ;;  %v4530_v6 = vld [vmem:[%s20209_s11 + $0x118] sm:$0xff] }
 0x4ff   : > { %5922 = vmatpush2.msra.mxu1 %v4558_v30  ;;  %5959 = vmatpush1.msra.mxu0 %v4618_v7  ;;  %v4669_v30 = vld [vmem:[%s20209_s11 + $0x570] sm:$0xff]  ;;  %v4527_v7 = vld [vmem:[%s20209_s11 + $0x100] sm:$0xff]  ;;  %v4666_v26 = vld [vmem:[%s20209_s11 + $0x558] sm:$0xff] }
 0x500   : > { %5923 = vmatprep.subr.mxu1 %v4556_v28  ;;  %5960 = vmatprep.subr.mxu0 %v4616_v11  ;;  %v4667_v28 = vld [vmem:[%s20209_s11 + $0x560] sm:$0xff]  ;;  %v4572_v11 = vld [vmem:[%s20209_s11 + $0x268] sm:$0xff] }
 0x501   : > { %5924 = vmatpush2.msra.mxu1 %v4555_v31  ;;  %5961 = vmatpush1.msra.mxu0 %v4615_v44  ;;  %v5146_v21 = vpop.f32.mrf.mxu0  ;;  %v5223_v50 = vpop.f32.mrf.mxu1  ;;  %v4524_v14 = vld [vmem:[%s20209_s11 + $0xe8] sm:$0xff]  ;;  %v4569_v44 = vld [vmem:[%s20209_s11 + $0x250] sm:$0xff] }
 0x502   : > { %5925 = vmatprep.subr.mxu1 %v4553_v19  ;;  %5962 = vmatprep.subr.mxu0 %v4613_v40  ;;  %v17489_v13 = vadd.f32 %v5223_v50, %v5146_v21  ;;  %v4664_v31 = vld [vmem:[%s20209_s11 + $0x548] sm:$0xff]  ;;  %v4663_v19 = vld [vmem:[%s20209_s11 + $0x540] sm:$0xff]  ;;  %v4521_v40 = vld [vmem:[%s20209_s11 + $0xd0] sm:$0xff] }
 0x503   : > { %5926 = vmatpush2.msra.mxu1 %v4552_v43  ;;  %5963 = vmatpush1.msra.mxu0 %v4612_v39  ;;  %v5148_v25 = vpop.f32.mrf.mxu0  ;;  %v5225_v16 = vpop.f32.mrf.mxu1  ;;  %v4661_v43 = vld [vmem:[%s20209_s11 + $0x530] sm:$0xff]  ;;  %v4566_v39 = vld [vmem:[%s20209_s11 + $0x238] sm:$0xff]  ;;  %v4563_v50 = vld [vmem:[%s20209_s11 + $0x220] sm:$0xff] }
 0x504   : > { %5927 = vmatprep.subr.mxu1 %v4550_v42  ;;  %5964 = vmatprep.subr.mxu0 %v4610_v27  ;;  %v17503_v3 = vadd.f32 %v5225_v16, %v5148_v25  ;;  %v4660_v42 = vld [vmem:[%s20209_s11 + $0x528] sm:$0xff]  ;;  %v4518_v27 = vld [vmem:[%s20209_s11 + $0xb8] sm:$0xff] }
 0x505   : > { %5928 = vmatpush2.msra.mxu1 %v4549_v10  ;;  %5965 = vmatpush1.msra.mxu0 %v4609_v46  ;;  %v4658_v21 = vld [vmem:[%s20209_s11 + $0x518] sm:$0xff]  ;;  %v4657_v10 = vld [vmem:[%s20209_s11 + $0x510] sm:$0xff]  ;;  %v4515_v46 = vld [vmem:[%s20209_s11 + $0xa0] sm:$0xff] }
 0x506   : > { %5929 = vmatprep.subr.mxu1 %v4547_v15  ;;  %5966 = vmatprep.subr.mxu0 %v4607_v52  ;;  %v4655_v15 = vld [vmem:[%s20209_s11 + $0x500] sm:$0xff]  ;;  %v4560_v52 = vld [vmem:[%s20209_s11 + $0x208] sm:$0xff]  ;;  %v4654_v25 = vld [vmem:[%s20209_s11 + $0x4f8] sm:$0xff] }
 0x507   : > { %5930 = vmatpush2.msra.mxu1 %v4546_v5  ;;  %5967 = vmatpush1.msra.mxu0 %v4606_v54  ;;  %v4512_v16 = vld [vmem:[%s20209_s11 + $0x88] sm:$0xff] }
 0x508   : > { %5931 = vmatprep.subr.mxu1 %v4544_v57  ;;  %5968 = vmatprep.subr.mxu0 %v4604_v62  ;;  %v4652_v54 = vld [vmem:[%s20209_s11 + $0x4e8] sm:$0xff]  ;;  %v4557_v57 = vld [vmem:[%s20209_s11 + $0x1f0] sm:$0xff]  ;;  %v4651_v62 = vld [vmem:[%s20209_s11 + $0x4e0] sm:$0xff] }
 0x509   : > { %5932 = vmatpush2.msra.mxu1 %v4543_v49  ;;  %5969 = vmatpush1.msra.mxu0 %v4603_v8  ;;  %v4509_v49 = vld [vmem:[%s20209_s11 + $0x70] sm:$0xff] }
 0x50a   : > { %5934 = vmatmul.mubr.f32.vlgmr.msra.gmra.mxu1 %v17523_v51  ;;  %5970 = vmatprep.subr.mxu0 %v4601_v48  ;;  %v4649_v48 = vld [vmem:[%s20209_s11 + $0x4d0] sm:$0xff] }
 0x50b   : > { %11738 = vmatprep.subr.mxu1 %v4590_v18  ;;  %5939 = vmatprep.mubr.f32.mxu1 %v17532_v17  ;;  %v4554_v18 = vld [vmem:[%s20209_s11 + $0x1d8] sm:$0xff] }
 0x50c   : > { %5971 = vmatpush1.msra.mxu0 %v4600_v32  ;;  %11739 = vmatpush3.msra.mxu1 %v4542_v29  ;;  %v4648_v29 = vld [vmem:[%s20209_s11 + $0x4c8] sm:$0xff] }
 0x50d   : > { %5972 = vmatprep.subr.mxu0 %v4598_v63  ;;  %11740 = vmatprep.subr.mxu1 %v4587_v0  ;;  %v4506_v63 = vld [vmem:[%s20209_s11 + $0x58] sm:$0xff] }
 0x50e   : > { %5973 = vmatpush1.msra.mxu0 %v4597_v34  ;;  %11741 = vmatpush3.msra.mxu1 %v4539_v4  ;;  %v4646_v0 = vld [vmem:[%s20209_s11 + $0x4b8] sm:$0xff]  ;;  %v4551_v34 = vld [vmem:[%s20209_s11 + $0x1c0] sm:$0xff] }
 0x50f   : > { %5940 = vmatmul.mubr.f32.gmra.mxu1 %v17556_v60  ;;  %5974 = vmatprep.subr.mxu0 %v4595_v55  ;;  %v4645_v55 = vld [vmem:[%s20209_s11 + $0x4b0] sm:$0xff] }
 0x510   : > { %11742 = vmatprep.subr.mxu1 %v4584_v58  ;;  %5975 = vmatpush1.msra.mxu0 %v4594_v37  ;;  %v4503_v58 = vld [vmem:[%s20209_s11 + $0x40] sm:$0xff] }
 0x511   : > { %11743 = vmatpush3.msra.mxu1 %v4536_v59  ;;  %6087 = vmatprep.mubr.f32.mxu1 %v17187_v45  ;;  %v4643_v37 = vld [vmem:[%s20209_s11 + $0x4a0] sm:$0xff]  ;;  %v4548_v59 = vld [vmem:[%s20209_s11 + $0x1a8] sm:$0xff] }
 0x512   : > { %5976 = vmatprep.subr.mxu0 %v4592_v61  ;;  %11744 = vmatprep.subr.mxu1 %v4581_v38  ;;  %v4642_v38 = vld [vmem:[%s20209_s11 + $0x498] sm:$0xff] }
 0x513   : > { %5977 = vmatpush1.msra.mxu0 %v4591_v56  ;;  %11745 = vmatpush3.msra.mxu1 %v4533_v12  ;;  %v4500_v56 = vld [vmem:[%s20209_s11 + $0x28] sm:$0xff] }
 0x514   : > { %5986 = vmatprep.subr.mxu0 %v4673_v47  ;;  %11746 = vmatprep.subr.mxu1 %v4578_v2  ;;  %v4640_v47 = vld [vmem:[%s20209_s11 + $0x488] sm:$0xff]  ;;  %v4545_v2 = vld [vmem:[%s20209_s11 + $0x190] sm:$0xff] }
 0x515   : > { %5987 = vmatpush2.msra.mxu0 %v4672_v24  ;;  %11747 = vmatpush3.msra.mxu1 %v4530_v6  ;;  %v4639_v24 = vld [vmem:[%s20209_s11 + $0x480] sm:$0xff]  ;;  %v4497_v6 = vld [vmem:[%s20209_s11 + $0x10] sm:$0xff] }
 0x516   : > { %5988 = vmatprep.subr.mxu0 %v4670_v23  ;;  %11748 = vmatprep.subr.mxu1 %v4575_v9  ;;  %v4721_v23 = vld [vmem:[%s20211_s7 + $0x170] sm:$0xff] }
 0x517   : > { %5989 = vmatpush2.msra.mxu0 %v4669_v30  ;;  %11749 = vmatpush3.msra.mxu1 %v4527_v7  ;;  %v17726_v9 = vld [vmem:[#allocation4 + $0x10] sm:$0xff]  ;;  %v4638_v30 = vld [vmem:[%s20209_s11 + $0x478] sm:$0xff]  ;;  %v4720_v7 = vld [vmem:[%s20211_s7 + $0x168] sm:$0xff] }
 0x518   : > { %5990 = vmatprep.subr.mxu0 %v4667_v28  ;;  %11750 = vmatprep.subr.mxu1 %v4572_v11  ;;  %v17737_v28 = vld [vmem:[#allocation4 + $0x38] sm:$0x1f] }
 0x519   : > { %5991 = vmatpush2.msra.mxu0 %v4666_v26  ;;  %11751 = vmatpush3.msra.mxu1 %v4524_v14  ;;  %v4718_v11 = vld [vmem:[%s20211_s7 + $0x158] sm:$0xff]  ;;  %v4635_v26 = vld [vmem:[%s20209_s11 + $0x460] sm:$0xff]  ;;  %v4717_v14 = vld [vmem:[%s20211_s7 + $0x150] sm:$0xff] }
 0x51a   : > { %5992 = vmatprep.subr.mxu0 %v4664_v31  ;;  %11752 = vmatprep.subr.mxu1 %v4569_v44  ;;  %v4715_v31 = vld [vmem:[%s20211_s7 + $0x140] sm:$0xff]  ;;  %v17755_v44 = vld [vmem:[#allocation4 + $0x30] sm:$0x1f] }
 0x51b   : > { %5993 = vmatpush2.msra.mxu0 %v4663_v19  ;;  %11753 = vmatpush3.msra.mxu1 %v4521_v40  ;;  %v4632_v19 = vld [vmem:[%s20209_s11 + $0x448] sm:$0xff]  ;;  %v4714_v40 = vld [vmem:[%s20211_s7 + $0x138] sm:$0xff] }
 0x51c   : > { %5994 = vmatprep.subr.mxu0 %v4661_v43  ;;  %11754 = vmatprep.subr.mxu1 %v4566_v39  ;;  %v4712_v43 = vld [vmem:[%s20211_s7 + $0x128] sm:$0xff]  ;;  %v4629_v39 = vld [vmem:[%s20209_s11 + $0x430] sm:$0xff] }
 0x51d   : > { %5995 = vmatpush2.msra.mxu0 %v4660_v42  ;;  %11755 = vmatpush3.msra.mxu1 %v4518_v27  ;;  %v4711_v42 = vld [vmem:[%s20211_s7 + $0x120] sm:$0xff]  ;;  %v4709_v27 = vld [vmem:[%s20211_s7 + $0x110] sm:$0xff] }
 0x51e   : > { %5996 = vmatprep.subr.mxu0 %v4658_v21  ;;  %11756 = vmatprep.subr.mxu1 %v4563_v50  ;;  %v11694_v5 = vpop.f32.mrf.mxu1  ;;  %v4626_v21 = vld [vmem:[%s20209_s11 + $0x418] sm:$0xff]  ;;  %v4708_v50 = vld [vmem:[%s20211_s7 + $0x108] sm:$0xff] }
 0x51f   : > { %5997 = vmatpush2.msra.mxu0 %v4657_v10  ;;  %11757 = vmatpush3.msra.mxu1 %v4515_v46  ;;  %v4623_v10 = vld [vmem:[%s20209_s11 + $0x400] sm:$0xff]  ;;  %v4705_v46 = vld [vmem:[%s20211_s7 + $0xf0] sm:$0xff] }
 0x520   : > { %5998 = vmatprep.subr.mxu0 %v4655_v15  ;;  %11758 = vmatprep.subr.mxu1 %v4560_v52  ;;  %v11695_v8 = vpop.f32.mrf.mxu1  ;;  %v4703_v52 = vld [vmem:[%s20211_s7 + $0xe0] sm:$0xff] }
 0x521   : > { %5999 = vmatpush2.msra.mxu0 %v4654_v25  ;;  %11759 = vmatpush3.msra.mxu1 %v4512_v16  ;;  %v17677_v32 = vadd.f32 %v11695_v8, %v11694_v5  ;;  %v4620_v16 = vld [vmem:[%s20209_s11 + $0x3e8] sm:$0xff]  ;;  %v4702_v5 = vld [vmem:[%s20211_s7 + $0xd8] sm:$0xff]  ;;  %v4697_v8 = vld [vmem:[%s20211_s7 + $0xb0] sm:$0xff] }
 0x522   : > { %6000 = vmatprep.subr.mxu0 %v4652_v54  ;;  %11760 = vmatprep.subr.mxu1 %v4557_v57  ;;  %v4700_v57 = vld [vmem:[%s20211_s7 + $0xc8] sm:$0xff] }
 0x523   : > { %6001 = vmatpush2.msra.mxu0 %v4651_v62  ;;  %11761 = vmatpush3.msra.mxu1 %v4509_v49  ;;  %v11697_v4 = vpop.f32.mrf.mxu1  ;;  %v4617_v62 = vld [vmem:[%s20209_s11 + $0x3d0] sm:$0xff]  ;;  %v4699_v49 = vld [vmem:[%s20211_s7 + $0xc0] sm:$0xff] }
 0x524   : > { %6002 = vmatprep.subr.mxu0 %v4649_v48  ;;  %11762 = vmatprep.subr.mxu1 %v4554_v18  ;;  %v4614_v18 = vld [vmem:[%s20209_s11 + $0x3b8] sm:$0xff] }
 0x525   : > { %6003 = vmatpush2.msra.mxu0 %v4648_v29  ;;  %11763 = vmatpush3.msra.mxu1 %v4506_v63  ;;  %v11698_v61 = vpop.f32.mrf.mxu1  ;;  %v4694_v63 = vld [vmem:[%s20211_s7 + $0x98] sm:$0xff] }
 0x526   : > { %6004 = vmatprep.subr.mxu0 %v4646_v0  ;;  %11764 = vmatprep.subr.mxu1 %v4551_v34  ;;  %v17709_v12 = vadd.f32 %v11698_v61, %v11697_v4  ;;  %v4611_v34 = vld [vmem:[%s20209_s11 + $0x3a0] sm:$0xff]  ;;  %v4693_v4 = vld [vmem:[%s20211_s7 + $0x90] sm:$0xff] }
 0x527   : > { %6005 = vmatpush2.msra.mxu0 %v4645_v55  ;;  %11765 = vmatpush3.msra.mxu1 %v4503_v58  ;;  %v4691_v55 = vld [vmem:[%s20211_s7 + $0x80] sm:$0xff]  ;;  %v4608_v58 = vld [vmem:[%s20209_s11 + $0x388] sm:$0xff]  ;;  %v4605_v61 = vld [vmem:[%s20209_s11 + $0x370] sm:$0xff] }
 0x528   : > { %6006 = vmatprep.subr.mxu0 %v4643_v37  ;;  %11766 = vmatprep.subr.mxu1 %v4548_v59  ;;  %v4690_v37 = vld [vmem:[%s20211_s7 + $0x78] sm:$0xff]  ;;  %v4688_v59 = vld [vmem:[%s20211_s7 + $0x68] sm:$0xff] }
 0x529   : > { %6007 = vmatpush2.msra.mxu0 %v4642_v38  ;;  %11767 = vmatpush3.msra.mxu1 %v4500_v56  ;;  %v4687_v38 = vld [vmem:[%s20211_s7 + $0x60] sm:$0xff]  ;;  %v4685_v56 = vld [vmem:[%s20211_s7 + $0x50] sm:$0xff] }
 0x52a   : > { %6008 = vmatprep.subr.mxu0 %v4640_v47  ;;  %11768 = vmatprep.subr.mxu1 %v4545_v2  ;;  %v4684_v47 = vld [vmem:[%s20211_s7 + $0x48] sm:$0xff]  ;;  %v4682_v2 = vld [vmem:[%s20211_s7 + $0x38] sm:$0xff] }
 0x52b   : > { %6009 = vmatpush2.msra.mxu0 %v4639_v24  ;;  %11769 = vmatpush3.msra.mxu1 %v4497_v6  ;;  %v4599_v24 = vld [vmem:[%s20209_s11 + $0x340] sm:$0xff]  ;;  %v4681_v6 = vld [vmem:[%s20211_s7 + $0x30] sm:$0xff] }
 0x52c   : > { %6011 = vmatmul.mubr.f32.vlgmr.msra.gmra.mxu0 %v17726_v9  ;;  %6088 = vmatmul.mubr.f32.vlgmr.msra.gmra.mxu1 %v17523_v51 }
 0x52d   : > { %6098 = vmatprep.subr.mxu1 %v12222_v20  ;;  %6173 = vmatprep.subr.mxu0 %v4721_v23  ;;  %v4679_v23 = vld [vmem:[%s20211_s7 + $0x20] sm:$0xff] }
 0x52e   : > { %11232 = vmatprep.mubr.msk.f32.mxu0 %vm1283_vm1, %v17737_v28  ;;  %6092 = vmatprep.mubr.f32.mxu1 %v17532_v17 }
 0x52f   : > { %6099 = vmatpush1.msra.mxu1 %v4638_v30  ;;  %6174 = vmatpush1.msra.mxu0 %v4720_v7  ;;  %v4596_v30 = vld [vmem:[%s20209_s11 + $0x328] sm:$0xff]  ;;  %v4678_v7 = vld [vmem:[%s20211_s7 + $0x18] sm:$0xff] }
 0x530   : > { %6100 = vmatprep.subr.mxu1 %v12222_v20  ;;  %6175 = vmatprep.subr.mxu0 %v4718_v11  ;;  %v4676_v11 = vld [vmem:[%s20211_s7 + $0x8] sm:$0xff] }
 0x531   : > { %6101 = vmatpush1.msra.mxu1 %v4635_v26  ;;  %6176 = vmatpush1.msra.mxu0 %v4717_v14  ;;  %v4593_v26 = vld [vmem:[%s20209_s11 + $0x310] sm:$0xff]  ;;  %v4675_v14 = vld [vmem:[%s20211_s7] sm:$0xff] }
 0x532   : > { %6017 = vmatmul.mubr.f32.gmra.mxu0 %v17755_v44  ;;  %6093 = vmatmul.mubr.f32.gmra.mxu1 %v17556_v60 }
 0x533   : > { %6102 = vmatprep.subr.mxu1 %v12222_v20  ;;  %6177 = vmatprep.subr.mxu0 %v4715_v31  ;;  %v4769_v31 = vld [vmem:[%s20211_s7 + $0x2f0] sm:$0xff] }
 0x534   : > { %6103 = vmatpush1.msra.mxu1 %v4632_v19  ;;  %11233 = vmatprep.mubr.msk.f32.mxu1 %vm1283_vm1, %v17403_v36  ;;  %v4674_v19 = vld [vmem:[%s20209_s11 + $0x598] sm:$0xff] }
 0x535   : > { %6178 = vmatpush1.msra.mxu0 %v4714_v40  ;;  %6237 = vmatprep.mubr.f32.mxu0 %v17187_v45  ;;  %v4706_v45 = vld [vmem:[%s20211_s7 + $0xf8] sm:$0xff]  ;;  %v4768_v40 = vld [vmem:[%s20211_s7 + $0x2e8] sm:$0xff] }
 0x536   : > { %6104 = vmatprep.subr.mxu1 %v12222_v20  ;;  %6179 = vmatprep.subr.mxu0 %v4712_v43  ;;  %v4766_v43 = vld [vmem:[%s20211_s7 + $0x2d8] sm:$0xff] }
 0x537   : > { %6105 = vmatpush1.msra.mxu1 %v4629_v39  ;;  %6180 = vmatpush1.msra.mxu0 %v4711_v42  ;;  %v4671_v39 = vld [vmem:[%s20209_s11 + $0x580] sm:$0xff]  ;;  %v4765_v42 = vld [vmem:[%s20211_s7 + $0x2d0] sm:$0xff] }
 0x538   : > { %6106 = vmatprep.subr.mxu1 %v12222_v20  ;;  %6181 = vmatprep.subr.mxu0 %v4709_v27  ;;  %v5369_v15 = vpop.f32.mrf.mxu0  ;;  %v4763_v27 = vld [vmem:[%s20211_s7 + $0x2c0] sm:$0xff] }
 0x539   : > { %6107 = vmatpush1.msra.mxu1 %v4626_v21  ;;  %6182 = vmatpush1.msra.mxu0 %v4708_v50  ;;  %v17802_v25 = vadd.f32 %v17677_v32, %v5369_v15  ;;  %v4696_v32 = vld [vmem:[%s20211_s7 + $0xa8] sm:$0xff]  ;;  %v4762_v50 = vld [vmem:[%s20211_s7 + $0x2b8] sm:$0xff]  ;;  %v4757_v15 = vld [vmem:[%s20211_s7 + $0x290] sm:$0xff] }
 0x53a   : > { %6108 = vmatprep.subr.mxu1 %v12222_v20  ;;  %6183 = vmatprep.subr.mxu0 %v4706_v45  ;;  %v5371_v54 = vpop.f32.mrf.mxu0  ;;  %v4668_v21 = vld [vmem:[%s20209_s11 + $0x568] sm:$0xff] }
 0x53b   : > { %6109 = vmatpush1.msra.mxu1 %v4623_v10  ;;  %6184 = vmatpush1.msra.mxu0 %v4705_v46  ;;  %v4760_v45 = vld [vmem:[%s20211_s7 + $0x2a8] sm:$0xff]  ;;  %v4665_v10 = vld [vmem:[%s20209_s11 + $0x550] sm:$0xff]  ;;  %v4759_v46 = vld [vmem:[%s20211_s7 + $0x2a0] sm:$0xff] }
 0x53c   : > { %6110 = vmatprep.subr.mxu1 %v12222_v20  ;;  %6185 = vmatprep.subr.mxu0 %v4703_v52  ;;  %v4662_v52 = vld [vmem:[%s20209_s11 + $0x538] sm:$0xff]  ;;  %v4659_v54 = vld [vmem:[%s20209_s11 + $0x520] sm:$0xff] }
 0x53d   : > { %6111 = vmatpush1.msra.mxu1 %v4620_v16  ;;  %6186 = vmatpush1.msra.mxu0 %v4702_v5  ;;  %v5374_v48 = vpop.f32.mrf.mxu0  ;;  %v4756_v16 = vld [vmem:[%s20211_s7 + $0x288] sm:$0xff]  ;;  %v4754_v5 = vld [vmem:[%s20211_s7 + $0x278] sm:$0xff] }
 0x53e   : > { %6112 = vmatprep.subr.mxu1 %v12222_v20  ;;  %6187 = vmatprep.subr.mxu0 %v4700_v57  ;;  %v17832_v29 = vadd.f32 %v17709_v12, %v5374_v48  ;;  %v4602_v12 = vld [vmem:[%s20209_s11 + $0x358] sm:$0xff]  ;;  %v4753_v57 = vld [vmem:[%s20211_s7 + $0x270] sm:$0xff]  ;;  %v4748_v48 = vld [vmem:[%s20211_s7 + $0x248] sm:$0xff] }
 0x53f   : > { %6113 = vmatpush1.msra.mxu1 %v4617_v62  ;;  %6188 = vmatpush1.msra.mxu0 %v4699_v49  ;;  %v5376_v0 = vpop.f32.mrf.mxu0  ;;  %v4751_v62 = vld [vmem:[%s20211_s7 + $0x260] sm:$0xff]  ;;  %v4656_v49 = vld [vmem:[%s20209_s11 + $0x508] sm:$0xff] }
 0x540   : > { %6114 = vmatprep.subr.mxu1 %v12222_v20  ;;  %6189 = vmatprep.subr.mxu0 %v4697_v8  ;;  %v4750_v8 = vld [vmem:[%s20211_s7 + $0x258] sm:$0xff] }
 0x541   : > { %6115 = vmatpush1.msra.mxu1 %v4614_v18  ;;  %6190 = vmatpush1.msra.mxu0 %v4696_v32  ;;  %v4653_v18 = vld [vmem:[%s20209_s11 + $0x4f0] sm:$0xff]  ;;  %v4747_v32 = vld [vmem:[%s20211_s7 + $0x240] sm:$0xff]  ;;  %v4650_v0 = vld [vmem:[%s20209_s11 + $0x4d8] sm:$0xff] }
 0x542   : > { %6116 = vmatprep.subr.mxu1 %v12222_v20  ;;  %6191 = vmatprep.subr.mxu0 %v4694_v63  ;;  %v4745_v63 = vld [vmem:[%s20211_s7 + $0x230] sm:$0xff] }
 0x543   : > { %6117 = vmatpush1.msra.mxu1 %v4611_v34  ;;  %6192 = vmatpush1.msra.mxu0 %v4693_v4  ;;  %v4744_v34 = vld [vmem:[%s20211_s7 + $0x228] sm:$0xff]  ;;  %v4742_v4 = vld [vmem:[%s20211_s7 + $0x218] sm:$0xff] }
 0x544   : > { %6118 = vmatprep.subr.mxu1 %v12222_v20  ;;  %6193 = vmatprep.subr.mxu0 %v4691_v55  ;;  %v4647_v55 = vld [vmem:[%s20209_s11 + $0x4c0] sm:$0xff] }
 0x545   : > { %6119 = vmatpush1.msra.mxu1 %v4608_v58  ;;  %6194 = vmatpush1.msra.mxu0 %v4690_v37  ;;  %v4741_v58 = vld [vmem:[%s20211_s7 + $0x210] sm:$0xff]  ;;  %v4739_v37 = vld [vmem:[%s20211_s7 + $0x200] sm:$0xff] }
 0x546   : > { %6120 = vmatprep.subr.mxu1 %v12222_v20  ;;  %6195 = vmatprep.subr.mxu0 %v4688_v59  ;;  %v4644_v59 = vld [vmem:[%s20209_s11 + $0x4a8] sm:$0xff] }
 0x547   : > { %6121 = vmatpush1.msra.mxu1 %v4605_v61  ;;  %6196 = vmatpush1.msra.mxu0 %v4687_v38  ;;  %v4738_v61 = vld [vmem:[%s20211_s7 + $0x1f8] sm:$0xff]  ;;  %v4736_v38 = vld [vmem:[%s20211_s7 + $0x1e8] sm:$0xff] }
 0x548   : > { %6122 = vmatprep.subr.mxu1 %v12222_v20  ;;  %6197 = vmatprep.subr.mxu0 %v4685_v56  ;;  %v4641_v56 = vld [vmem:[%s20209_s11 + $0x490] sm:$0xff] }
 0x549   : > { %6123 = vmatpush1.msra.mxu1 %v4602_v12  ;;  %6198 = vmatpush1.msra.mxu0 %v4684_v47  ;;  %v4735_v12 = vld [vmem:[%s20211_s7 + $0x1e0] sm:$0xff]  ;;  %v4733_v47 = vld [vmem:[%s20211_s7 + $0x1d0] sm:$0xff] }
 0x54a   : > { %6124 = vmatprep.subr.mxu1 %v12222_v20  ;;  %6199 = vmatprep.subr.mxu0 %v4682_v2  ;;  %v4817_v2 = vld [vmem:[%s20211_s7 + $0x470] sm:$0xff] }
 0x54b   : > { %6125 = vmatpush1.msra.mxu1 %v4599_v24  ;;  %6200 = vmatpush1.msra.mxu0 %v4681_v6  ;;  %v4732_v24 = vld [vmem:[%s20211_s7 + $0x1c8] sm:$0xff] }
 0x54c   : > { %6126 = vmatprep.subr.mxu1 %v12222_v20  ;;  %6201 = vmatprep.subr.mxu0 %v4679_v23  ;;  %v4816_v6 = vld [vmem:[%s20211_s7 + $0x468] sm:$0xff]  ;;  %v4730_v23 = vld [vmem:[%s20211_s7 + $0x1b8] sm:$0xff] }
 0x54d   : > { %6127 = vmatpush1.msra.mxu1 %v4596_v30  ;;  %6202 = vmatpush1.msra.mxu0 %v4678_v7  ;;  %v4814_v30 = vld [vmem:[%s20211_s7 + $0x458] sm:$0xff]  ;;  %v4729_v7 = vld [vmem:[%s20211_s7 + $0x1b0] sm:$0xff] }
 0x54e   : > { %6128 = vmatprep.subr.mxu1 %v12222_v20  ;;  %6203 = vmatprep.subr.mxu0 %v4676_v11  ;;  %v4813_v11 = vld [vmem:[%s20211_s7 + $0x450] sm:$0xff] }
 0x54f   : > { %6129 = vmatpush1.msra.mxu1 %v4593_v26  ;;  %6204 = vmatpush1.msra.mxu0 %v4675_v14  ;;  %v4727_v26 = vld [vmem:[%s20211_s7 + $0x1a0] sm:$0xff] }
 0x550   : > { %6138 = vmatprep.subr.mxu1 %v12222_v20  ;;  %6205 = vmatprep.subr.mxu0 %v4769_v31  ;;  %v4811_v14 = vld [vmem:[%s20211_s7 + $0x440] sm:$0xff]  ;;  %v4726_v31 = vld [vmem:[%s20211_s7 + $0x198] sm:$0xff] }
 0x551   : > { %6139 = vmatpush2.msra.mxu1 %v4674_v19  ;;  %6206 = vmatpush2.msra.mxu0 %v4768_v40  ;;  %v4810_v19 = vld [vmem:[%s20211_s7 + $0x438] sm:$0xff]  ;;  %v4724_v40 = vld [vmem:[%s20211_s7 + $0x188] sm:$0xff] }
 0x552   : > { %6140 = vmatprep.subr.mxu1 %v12222_v20  ;;  %6207 = vmatprep.subr.mxu0 %v4766_v43  ;;  %v4808_v43 = vld [vmem:[%s20211_s7 + $0x428] sm:$0xff] }
 0x553   : > { %6141 = vmatpush2.msra.mxu1 %v4671_v39  ;;  %6208 = vmatpush2.msra.mxu0 %v4765_v42  ;;  %v4723_v39 = vld [vmem:[%s20211_s7 + $0x180] sm:$0xff] }
 0x554   : > { %6142 = vmatprep.subr.mxu1 %v12222_v20  ;;  %6209 = vmatprep.subr.mxu0 %v4763_v27  ;;  %v4807_v42 = vld [vmem:[%s20211_s7 + $0x420] sm:$0xff] }
 0x555   : > { %6143 = vmatpush2.msra.mxu1 %v4668_v21  ;;  %6210 = vmatpush2.msra.mxu0 %v4762_v50  ;;  %v4805_v21 = vld [vmem:[%s20211_s7 + $0x410] sm:$0xff]  ;;  %v4770_v50 = vld [vmem:[%s20211_s7 + $0x2f8] sm:$0xff] }
 0x556   : > { %6144 = vmatprep.subr.mxu1 %v12222_v20  ;;  %6211 = vmatprep.subr.mxu0 %v4760_v45  ;;  %v4804_v45 = vld [vmem:[%s20211_s7 + $0x408] sm:$0xff] }
 0x557   : > { %6145 = vmatpush2.msra.mxu1 %v4665_v10  ;;  %6212 = vmatpush2.msra.mxu0 %v4759_v46  ;;  %v4802_v10 = vld [vmem:[%s20211_s7 + $0x3f8] sm:$0xff]  ;;  %v4767_v46 = vld [vmem:[%s20211_s7 + $0x2e0] sm:$0xff] }
 0x558   : > { %6146 = vmatprep.subr.mxu1 %v12222_v20  ;;  %6213 = vmatprep.subr.mxu0 %v4757_v15 }
 0x559   : > { %6147 = vmatpush2.msra.mxu1 %v4662_v52  ;;  %6214 = vmatpush2.msra.mxu0 %v4756_v16  ;;  %v4801_v52 = vld [vmem:[%s20211_s7 + $0x3f0] sm:$0xff]  ;;  %v4799_v16 = vld [vmem:[%s20211_s7 + $0x3e0] sm:$0xff] }
 0x55a   : > { %6148 = vmatprep.subr.mxu1 %v12222_v20  ;;  %6215 = vmatprep.subr.mxu0 %v4754_v5 }
 0x55b   : > { %6149 = vmatpush2.msra.mxu1 %v4659_v54  ;;  %6216 = vmatpush2.msra.mxu0 %v4753_v57  ;;  %v4798_v54 = vld [vmem:[%s20211_s7 + $0x3d8] sm:$0xff] }
 0x55c   : > { %6150 = vmatprep.subr.mxu1 %v12222_v20  ;;  %6217 = vmatprep.subr.mxu0 %v4751_v62  ;;  %v4716_v62 = vld [vmem:[%s20211_s7 + $0x148] sm:$0xff] }
 0x55d   : > { %6151 = vmatpush2.msra.mxu1 %v4656_v49  ;;  %6218 = vmatpush2.msra.mxu0 %v4750_v8 }
 0x55e   : > { %6152 = vmatprep.subr.mxu1 %v12222_v20  ;;  %6219 = vmatprep.subr.mxu0 %v4748_v48  ;;  %v4796_v48 = vld [vmem:[%s20211_s7 + $0x3c8] sm:$0xff] }
 0x55f   : > { %6153 = vmatpush2.msra.mxu1 %v4653_v18  ;;  %6220 = vmatpush2.msra.mxu0 %v4747_v32  ;;  %v4761_v18 = vld [vmem:[%s20211_s7 + $0x2b0] sm:$0xff] }
 0x560   : > { %6154 = vmatprep.subr.mxu1 %v12222_v20  ;;  %6221 = vmatprep.subr.mxu0 %v4745_v63  ;;  %v4795_v63 = vld [vmem:[%s20211_s7 + $0x3c0] sm:$0xff] }
 0x561   : > { %6155 = vmatpush2.msra.mxu1 %v4650_v0  ;;  %6222 = vmatpush2.msra.mxu0 %v4744_v34  ;;  %v12088_v0 = vld [vmem:[#allocation4 + $0x8] sm:$0xff]  ;;  %v4793_v34 = vld [vmem:[%s20211_s7 + $0x3b0] sm:$0xff] }
 0x562   : > { %6156 = vmatprep.subr.mxu1 %v12222_v20  ;;  %6223 = vmatprep.subr.mxu0 %v4742_v4  ;;  %v5625_v27 = vpop.f32.mrf.mxu1  ;;  %v4758_v4 = vld [vmem:[%s20211_s7 + $0x298] sm:$0xff] }
 0x563   : > { %6157 = vmatpush2.msra.mxu1 %v4647_v55  ;;  %6224 = vmatpush2.msra.mxu0 %v4741_v58  ;;  %v4792_v58 = vld [vmem:[%s20211_s7 + $0x3a8] sm:$0xff] }
 0x564   : > { %6158 = vmatprep.subr.mxu1 %v12222_v20  ;;  %6225 = vmatprep.subr.mxu0 %v4739_v37  ;;  %v5627_v15 = vpop.f32.mrf.mxu1  ;;  %v4710_v37 = vld [vmem:[%s20211_s7 + $0x118] sm:$0xff] }
 0x565   : > { %6159 = vmatpush2.msra.mxu1 %v4644_v59  ;;  %6226 = vmatpush2.msra.mxu0 %v4738_v61 }
 0x566   : > { %6160 = vmatprep.subr.mxu1 %v12222_v20  ;;  %6227 = vmatprep.subr.mxu0 %v4736_v38  ;;  %v4790_v38 = vld [vmem:[%s20211_s7 + $0x398] sm:$0xff] }
 0x567   : > { %6161 = vmatpush2.msra.mxu1 %v4641_v56  ;;  %6228 = vmatpush2.msra.mxu0 %v4735_v12  ;;  %v5631_v8 = vpop.f32.mrf.mxu1  ;;  %v4755_v56 = vld [vmem:[%s20211_s7 + $0x280] sm:$0xff] }
 0x568   : > { %6163 = vmatmul.mubr.f32.vlgmr.msra.gmra.mxu1 %v17726_v9  ;;  %6229 = vmatprep.subr.mxu0 %v4733_v47  ;;  %v4789_v47 = vld [vmem:[%s20211_s7 + $0x390] sm:$0xff] }
 0x569   : > { %6250 = vmatprep.subr.mxu1 %v4817_v2  ;;  %11234 = vmatprep.mubr.msk.f32.mxu1 %vm1283_vm1, %v17737_v28  ;;  %v5633_v61 = vpop.f32.mrf.mxu1  ;;  %v4707_v2 = vld [vmem:[%s20211_s7 + $0x100] sm:$0xff] }
 0x56a   : > { %6230 = vmatpush2.msra.mxu0 %v4732_v24  ;;  %6251 = vmatpush1.msra.mxu1 %v4816_v6  ;;  %v4787_v6 = vld [vmem:[%s20211_s7 + $0x380] sm:$0xff] }
 0x56b   : > { %6231 = vmatprep.subr.mxu0 %v4730_v23  ;;  %6252 = vmatprep.subr.mxu1 %v4814_v30  ;;  %v4752_v23 = vld [vmem:[%s20211_s7 + $0x268] sm:$0xff]  ;;  %v4786_v30 = vld [vmem:[%s20211_s7 + $0x378] sm:$0xff] }
 0x56c   : > { %6232 = vmatpush2.msra.mxu0 %v4729_v7  ;;  %6253 = vmatpush1.msra.mxu1 %v4813_v11  ;;  %v4704_v7 = vld [vmem:[%s20211_s7 + $0xe8] sm:$0xff] }
 0x56d   : > { %6168 = vmatmul.mubr.f32.gmra.mxu1 %v17755_v44  ;;  %6233 = vmatprep.subr.mxu0 %v4727_v26  ;;  %v4784_v11 = vld [vmem:[%s20211_s7 + $0x368] sm:$0xff]  ;;  %v4749_v26 = vld [vmem:[%s20211_s7 + $0x250] sm:$0xff] }
 0x56e   : > { %6254 = vmatprep.subr.mxu1 %v4811_v14  ;;  %6234 = vmatpush2.msra.mxu0 %v4726_v31  ;;  %v4783_v14 = vld [vmem:[%s20211_s7 + $0x360] sm:$0xff]  ;;  %v4701_v31 = vld [vmem:[%s20211_s7 + $0xd0] sm:$0xff] }
 0x56f   : > { %6255 = vmatpush1.msra.mxu1 %v4810_v19  ;;  %11235 = vmatprep.mubr.msk.f32.mxu1 %vm1283_vm1, %v17403_v36  ;;  %v4722_v36 = vld [vmem:[%s20211_s7 + $0x178] sm:$0xff]  ;;  %v4781_v19 = vld [vmem:[%s20211_s7 + $0x350] sm:$0xff] }
 0x570   : > { %6235 = vmatprep.subr.mxu0 %v4724_v40  ;;  %6256 = vmatprep.subr.mxu1 %v4808_v43  ;;  %v4746_v40 = vld [vmem:[%s20211_s7 + $0x238] sm:$0xff]  ;;  %v4780_v43 = vld [vmem:[%s20211_s7 + $0x348] sm:$0xff] }
 0x571   : > { %6236 = vmatpush2.msra.mxu0 %v4723_v39  ;;  %6257 = vmatpush1.msra.mxu1 %v4807_v42  ;;  %v4698_v39 = vld [vmem:[%s20211_s7 + $0xb8] sm:$0xff] }
 0x572   : > { %6238 = vmatmul.mubr.f32.vlgmr.msra.gmra.mxu0 %v17523_v51  ;;  %6258 = vmatprep.subr.mxu1 %v4805_v21  ;;  %v4719_v51 = vld [vmem:[%s20211_s7 + $0x160] sm:$0xff]  ;;  %v4778_v42 = vld [vmem:[%s20211_s7 + $0x338] sm:$0xff]  ;;  %v4777_v21 = vld [vmem:[%s20211_s7 + $0x330] sm:$0xff] }
 0x573   : > { %11776 = vmatprep.subr.mxu0 %v4770_v50  ;;  %6243 = vmatprep.mubr.f32.mxu0 %v17532_v17  ;;  %v4764_v17 = vld [vmem:[%s20211_s7 + $0x2c8] sm:$0xff]  ;;  %v4695_v50 = vld [vmem:[%s20211_s7 + $0xa0] sm:$0xff] }
 0x574   : > { %6259 = vmatpush1.msra.mxu1 %v4804_v45  ;;  %11777 = vmatpush3.msra.mxu0 %v4722_v36  ;;  %v5702_v5 = vpop.f32.mrf.mxu0  ;;  %v4775_v45 = vld [vmem:[%s20211_s7 + $0x320] sm:$0xff]  ;;  %v4740_v36 = vld [vmem:[%s20211_s7 + $0x208] sm:$0xff] }
 0x575   : > { %6260 = vmatprep.subr.mxu1 %v4802_v10  ;;  %11778 = vmatprep.subr.mxu0 %v4767_v46  ;;  %v18114_v57 = vadd.f32 %v5702_v5, %v5625_v27  ;;  %v4743_v27 = vld [vmem:[%s20211_s7 + $0x220] sm:$0xff]  ;;  %v4774_v10 = vld [vmem:[%s20211_s7 + $0x318] sm:$0xff]  ;;  %v4692_v46 = vld [vmem:[%s20211_s7 + $0x88] sm:$0xff] }
 0x576   : > { %6261 = vmatpush1.msra.mxu1 %v4801_v52  ;;  %11779 = vmatpush3.msra.mxu0 %v4719_v51  ;;  %v5704_v49 = vpop.f32.mrf.mxu0  ;;  %v4772_v52 = vld [vmem:[%s20211_s7 + $0x308] sm:$0xff]  ;;  %v4737_v51 = vld [vmem:[%s20211_s7 + $0x1f0] sm:$0xff] }
 0x577   : > { %6244 = vmatmul.mubr.f32.gmra.mxu0 %v17556_v60  ;;  %6262 = vmatprep.subr.mxu1 %v4799_v16  ;;  %v18126_v32 = vadd.f32 %v5704_v49, %v5627_v15  ;;  %v4713_v60 = vld [vmem:[%s20211_s7 + $0x130] sm:$0xff]  ;;  %v4771_v16 = vld [vmem:[%s20211_s7 + $0x300] sm:$0xff] }
 0x578   : > { %11780 = vmatprep.subr.mxu0 %v4764_v17  ;;  %6263 = vmatpush1.msra.mxu1 %v4798_v54  ;;  %v4689_v5 = vld [vmem:[%s20211_s7 + $0x70] sm:$0xff] }
 0x579   : > { %11781 = vmatpush3.msra.mxu0 %v4716_v62  ;;  %6391 = vmatprep.mubr.f32.mxu0 %v12088_v0  ;;  %v5708_v55 = vpop.f32.mrf.mxu0  ;;  %v4853_v54 = vld [vmem:[%s20211_s7 + $0x590] sm:$0xff]  ;;  %v4734_v62 = vld [vmem:[%s20211_s7 + $0x1d8] sm:$0xff] }
 0x57a   : > { %6264 = vmatprep.subr.mxu1 %v4796_v48  ;;  %11782 = vmatprep.subr.mxu0 %v4761_v18  ;;  %v18146_v59 = vadd.f32 %v5708_v55, %v5631_v8  ;;  %v4852_v8 = vld [vmem:[%s20211_s7 + $0x588] sm:$0xff]  ;;  %v4686_v48 = vld [vmem:[%s20211_s7 + $0x58] sm:$0xff]  ;;  %v4849_v0 = vld [vmem:[%s20211_s7 + $0x570] sm:$0xff] }
 0x57b   : > { %6265 = vmatpush1.msra.mxu1 %v4795_v63  ;;  %11783 = vmatpush3.msra.mxu0 %v4713_v60  ;;  %v5710_v12 = vpop.f32.mrf.mxu0  ;;  %v4850_v18 = vld [vmem:[%s20211_s7 + $0x578] sm:$0xff]  ;;  %v4731_v63 = vld [vmem:[%s20211_s7 + $0x1c0] sm:$0xff]  ;;  %v4728_v55 = vld [vmem:[%s20211_s7 + $0x1a8] sm:$0xff] }
 0x57c   : > { %6266 = vmatprep.subr.mxu1 %v4793_v34  ;;  %11784 = vmatprep.subr.mxu0 %v4758_v4  ;;  %v18160_v24 = vadd.f32 %v5710_v12, %v5633_v61  ;;  %v4683_v34 = vld [vmem:[%s20211_s7 + $0x40] sm:$0xff]  ;;  %v4680_v61 = vld [vmem:[%s20211_s7 + $0x28] sm:$0xff]  ;;  %v4725_v12 = vld [vmem:[%s20211_s7 + $0x190] sm:$0xff] }
 0x57d   : > { %6267 = vmatpush1.msra.mxu1 %v4792_v58  ;;  %11785 = vmatpush3.msra.mxu0 %v4710_v37  ;;  %v4847_v4 = vld [vmem:[%s20211_s7 + $0x560] sm:$0xff]  ;;  %v4846_v37 = vld [vmem:[%s20211_s7 + $0x558] sm:$0xff] }
 0x57e   : > { %6268 = vmatprep.subr.mxu1 %v4790_v38  ;;  %11786 = vmatprep.subr.mxu0 %v4755_v56  ;;  %v4844_v56 = vld [vmem:[%s20211_s7 + $0x548] sm:$0xff] }
 0x57f   : > { %6269 = vmatpush1.msra.mxu1 %v4789_v47  ;;  %11787 = vmatpush3.msra.mxu0 %v4707_v2  ;;  %v4843_v47 = vld [vmem:[%s20211_s7 + $0x540] sm:$0xff]  ;;  %v4677_v2 = vld [vmem:[%s20211_s7 + $0x10] sm:$0xff] }
 0x580   : > { %6270 = vmatprep.subr.mxu1 %v4787_v6  ;;  %11788 = vmatprep.subr.mxu0 %v4752_v23  ;;  %v4841_v6 = vld [vmem:[%s20211_s7 + $0x530] sm:$0xff]  ;;  %v4840_v23 = vld [vmem:[%s20211_s7 + $0x528] sm:$0xff] }
 0x581   : > { %6271 = vmatpush1.msra.mxu1 %v4786_v30  ;;  %11789 = vmatpush3.msra.mxu0 %v4704_v7  ;;  %v4818_v30 = vld [vmem:[%s20211_s7 + $0x478] sm:$0xff]  ;;  %v12089_v7 = vld [vmem:[#allocation4] sm:$0xff] }
 0x582   : > { %6272 = vmatprep.subr.mxu1 %v4784_v11  ;;  %11790 = vmatprep.subr.mxu0 %v4749_v26  ;;  %v4838_v11 = vld [vmem:[%s20211_s7 + $0x518] sm:$0xff]  ;;  %v4837_v26 = vld [vmem:[%s20211_s7 + $0x510] sm:$0xff] }
 0x583   : > { %6273 = vmatpush1.msra.mxu1 %v4783_v14  ;;  %11791 = vmatpush3.msra.mxu0 %v4701_v31  ;;  %v4815_v14 = vld [vmem:[%s20211_s7 + $0x460] sm:$0xff]  ;;  %v12090_v31 = vld [vmem:[#allocation4 + $0x28] sm:$0x1f] }
 0x584   : > { %6274 = vmatprep.subr.mxu1 %v4781_v19  ;;  %11792 = vmatprep.subr.mxu0 %v4746_v40  ;;  %v4835_v19 = vld [vmem:[%s20211_s7 + $0x500] sm:$0xff]  ;;  %v4834_v40 = vld [vmem:[%s20211_s7 + $0x4f8] sm:$0xff] }
 0x585   : > { %6275 = vmatpush1.msra.mxu1 %v4780_v43  ;;  %11793 = vmatpush3.msra.mxu0 %v4698_v39  ;;  %v4812_v43 = vld [vmem:[%s20211_s7 + $0x448] sm:$0xff]  ;;  %v12091_v39 = vld [vmem:[#allocation4 + $0x20] sm:$0x1f] }
 0x586   : > { %6276 = vmatprep.subr.mxu1 %v4778_v42  ;;  %11794 = vmatprep.subr.mxu0 %v4743_v27  ;;  %v11732_v15 = vpop.f32.mrf.mxu1  ;;  %v4832_v42 = vld [vmem:[%s20211_s7 + $0x4e8] sm:$0xff]  ;;  %v4831_v27 = vld [vmem:[%s20211_s7 + $0x4e0] sm:$0xff] }
 0x587   : > { %6277 = vmatpush1.msra.mxu1 %v4777_v21  ;;  %11795 = vmatpush3.msra.mxu0 %v4695_v50  ;;  %v4809_v21 = vld [vmem:[%s20211_s7 + $0x430] sm:$0xff]  ;;  %v12092_v50 = vld [vmem:[#allocation4 + $0x18] sm:$0xff] }
 0x588   : > { %6278 = vmatprep.subr.mxu1 %v4775_v45  ;;  %11796 = vmatprep.subr.mxu0 %v4740_v36  ;;  %v11733_v17 = vpop.f32.mrf.mxu1  ;;  %v4829_v45 = vld [vmem:[%s20211_s7 + $0x4d0] sm:$0xff]  ;;  %v4828_v36 = vld [vmem:[%s20211_s7 + $0x4c8] sm:$0xff] }
 0x589   : > { %6279 = vmatpush1.msra.mxu1 %v4774_v10  ;;  %11797 = vmatpush3.msra.mxu0 %v4692_v46  ;;  %v18240_v49 = vadd.f32 %v11733_v17, %v11732_v15  ;;  %v4806_v10 = vld [vmem:[%s20211_s7 + $0x418] sm:$0xff]  ;;  %v4825_v15 = vld [vmem:[%s20211_s7 + $0x4b0] sm:$0xff]  ;;  %v4820_v17 = vld [vmem:[%s20211_s7 + $0x488] sm:$0xff] }
 0x58a   : > { %6280 = vmatprep.subr.mxu1 %v4772_v52  ;;  %11798 = vmatprep.subr.mxu0 %v4737_v51  ;;  %v4826_v46 = vld [vmem:[%s20211_s7 + $0x4b8] sm:$0xff]  ;;  %v4803_v52 = vld [vmem:[%s20211_s7 + $0x400] sm:$0xff] }
 0x58b   : > { %6281 = vmatpush1.msra.mxu1 %v4771_v16  ;;  %11799 = vmatpush3.msra.mxu0 %v4689_v5  ;;  %v11735_v60 = vpop.f32.mrf.mxu1  ;;  %v4823_v51 = vld [vmem:[%s20211_s7 + $0x4a0] sm:$0xff]  ;;  %v4822_v16 = vld [vmem:[%s20211_s7 + $0x498] sm:$0xff]  ;;  %v4800_v5 = vld [vmem:[%s20211_s7 + $0x3e8] sm:$0xff] }
 0x58c   : > { %6290 = vmatprep.subr.mxu1 %v4853_v54  ;;  %11800 = vmatprep.subr.mxu0 %v4734_v62  ;;  %v4819_v54 = vld [vmem:[%s20211_s7 + $0x480] sm:$0xff]  ;;  %v4797_v62 = vld [vmem:[%s20211_s7 + $0x3d0] sm:$0xff] }
 0x58d   : > { %6291 = vmatpush2.msra.mxu1 %v4852_v8  ;;  %11801 = vmatpush3.msra.mxu0 %v4686_v48  ;;  %v11736_v58 = vpop.f32.mrf.mxu1  ;;  %v11285_v8 = vld [vmem:[%s20209_s11 + $0xcb0] sm:$0xff]  ;;  %v4794_v48 = vld [vmem:[%s20211_s7 + $0x3b8] sm:$0xff] }
 0x58e   : > { %6292 = vmatprep.subr.mxu1 %v4850_v18  ;;  %11802 = vmatprep.subr.mxu0 %v4731_v63  ;;  %v18272_v38 = vadd.f32 %v11736_v58, %v11735_v60  ;;  %v11284_v18 = vld [vmem:[%s20209_s11 + $0xca8] sm:$0xff]  ;;  %v11282_v60 = vld [vmem:[%s20209_s11 + $0xc98] sm:$0xff] }
 0x58f   : > { %6293 = vmatpush2.msra.mxu1 %v4849_v0  ;;  %11803 = vmatpush3.msra.mxu0 %v4683_v34  ;;  %v6482_v63 = vld [vmem:[#allocation4 + $0x28] sm:$0x7f]  ;;  %v4791_v0 = vld [vmem:[%s20211_s7 + $0x3a0] sm:$0xff]  ;;  %v11281_v34 = vld [vmem:[%s20209_s11 + $0xc90] sm:$0xff] }
 0x590   : > { %6294 = vmatprep.subr.mxu1 %v4847_v4  ;;  %11804 = vmatprep.subr.mxu0 %v4728_v55  ;;  %v6478_v4 = vld [vmem:[#allocation4 + $0x8] sm:$0xfc]  ;;  %v11278_v58 = vld [vmem:[%s20209_s11 + $0xc78] sm:$0xff] }
 0x591   : > { %6295 = vmatpush2.msra.mxu1 %v4846_v37  ;;  %11805 = vmatpush3.msra.mxu0 %v4680_v61  ;;  %v4788_v55 = vld [vmem:[%s20211_s7 + $0x388] sm:$0xff]  ;;  %v6677_v37 = vrot.slane %v6478_v4, 2 }
 0x592   : > { %6296 = vmatprep.subr.mxu1 %v4844_v56  ;;  %11806 = vmatprep.subr.mxu0 %v4725_v12  ;;  %v11276_v61 = vld [vmem:[%s20209_s11 + $0xc68] sm:$0xff]  ;;  %v4785_v12 = vld [vmem:[%s20211_s7 + $0x370] sm:$0xff] }
 0x593   : > { %6297 = vmatpush2.msra.mxu1 %v4843_v47  ;;  %11807 = vmatpush3.msra.mxu0 %v4677_v2  ;;  %v11273_v47 = vld [vmem:[%s20209_s11 + $0xc50] sm:$0xff]  ;;  %v4782_v2 = vld [vmem:[%s20211_s7 + $0x358] sm:$0xff]  ;;  %v11240_v4 = vld [vmem:[%s20209_s11 + $0xb48] sm:$0xff] }
 0x594   : > { %6298 = vmatprep.subr.mxu1 %v4841_v6  ;;  %6392 = vmatmul.mubr.f32.vlgmr.msra.gmra.mxu0 %v12089_v7  ;;  %v11272_v6 = vld [vmem:[%s20209_s11 + $0xc48] sm:$0xff]  ;;  %v11269_v7 = vld [vmem:[%s20209_s11 + $0xc30] sm:$0xff] }
 0x595   : > { %6402 = vmatprep.subr.mxu0 %v12222_v20  ;;  %6299 = vmatpush2.msra.mxu1 %v4840_v23  ;;  %v11270_v23 = vld [vmem:[%s20209_s11 + $0xc38] sm:$0xff] }
 0x596   : > { %6396 = vmatprep.mubr.f32.mxu0 %v12090_v31  ;;  %6403 = vmatpush1.msra.mxu0 %v4818_v30  ;;  %v4779_v30 = vld [vmem:[%s20211_s7 + $0x340] sm:$0xff]  ;;  %v4776_v31 = vld [vmem:[%s20211_s7 + $0x328] sm:$0xff] }
 0x597   : > { %6300 = vmatprep.subr.mxu1 %v4838_v11  ;;  %6404 = vmatprep.subr.mxu0 %v12222_v20 }
 0x598   : > { %6301 = vmatpush2.msra.mxu1 %v4837_v26  ;;  %6405 = vmatpush1.msra.mxu0 %v4815_v14  ;;  %v11267_v26 = vld [vmem:[%s20209_s11 + $0xc20] sm:$0xff] }
 0x599   : > { %6302 = vmatprep.subr.mxu1 %v4835_v19  ;;  %6397 = vmatmul.mubr.f32.gmra.mxu0 %v12091_v39  ;;  %v11266_v19 = vld [vmem:[%s20209_s11 + $0xc18] sm:$0xff]  ;;  %v11263_v39 = vld [vmem:[%s20209_s11 + $0xc00] sm:$0xff] }
 0x59a   : > { %6406 = vmatprep.subr.mxu0 %v12222_v20  ;;  %6303 = vmatpush2.msra.mxu1 %v4834_v40 }
 0x59b   : > { %6407 = vmatpush1.msra.mxu0 %v4812_v43  ;;  %11237 = vmatprep.mubr.msk.f32.mxu0 %vm1283_vm1, %v12092_v50  ;;  %v11264_v43 = vld [vmem:[%s20209_s11 + $0xc08] sm:$0xff] }
 0x59c   : > { %6304 = vmatprep.subr.mxu1 %v4832_v42  ;;  %6408 = vmatprep.subr.mxu0 %v12222_v20  ;;  %v11261_v42 = vld [vmem:[%s20209_s11 + $0xbf0] sm:$0xff]  ;;  %v11260_v50 = vld [vmem:[%s20209_s11 + $0xbe8] sm:$0xff] }
 0x59d   : > { %6305 = vmatpush2.msra.mxu1 %v4831_v27  ;;  %6409 = vmatpush1.msra.mxu0 %v4809_v21  ;;  %v4854_v21 = vld [vmem:[%s20211_s7 + $0x598] sm:$0xff] }
 0x59e   : > { %6306 = vmatprep.subr.mxu1 %v4829_v45  ;;  %6410 = vmatprep.subr.mxu0 %v12222_v20 }
 0x59f   : > { %6307 = vmatpush2.msra.mxu1 %v4828_v36  ;;  %6411 = vmatpush1.msra.mxu0 %v4806_v10  ;;  %v11258_v36 = vld [vmem:[%s20209_s11 + $0xbd8] sm:$0xff] }
 0x5a0   : > { %6308 = vmatprep.subr.mxu1 %v4826_v46  ;;  %6412 = vmatprep.subr.mxu0 %v12222_v20  ;;  %v4851_v46 = vld [vmem:[%s20211_s7 + $0x580] sm:$0xff] }
 0x5a1   : > { %6309 = vmatpush2.msra.mxu1 %v4825_v15  ;;  %6413 = vmatpush1.msra.mxu0 %v4803_v52  ;;  %v11257_v15 = vld [vmem:[%s20209_s11 + $0xbd0] sm:$0xff]  ;;  %v4848_v52 = vld [vmem:[%s20211_s7 + $0x568] sm:$0xff] }
 0x5a2   : > { %6310 = vmatprep.subr.mxu1 %v4823_v51  ;;  %6414 = vmatprep.subr.mxu0 %v12222_v20  ;;  %v11254_v51 = vld [vmem:[%s20209_s11 + $0xbb8] sm:$0xff] }
 0x5a3   : > { %6311 = vmatpush2.msra.mxu1 %v4822_v16  ;;  %6415 = vmatpush1.msra.mxu0 %v4800_v5  ;;  %v11252_v16 = vld [vmem:[%s20209_s11 + $0xba8] sm:$0xff]  ;;  %v4845_v5 = vld [vmem:[%s20211_s7 + $0x550] sm:$0xff] }
 0x5a4   : > { %6312 = vmatprep.subr.mxu1 %v4820_v17  ;;  %6416 = vmatprep.subr.mxu0 %v12222_v20  ;;  %v11251_v17 = vld [vmem:[%s20209_s11 + $0xba0] sm:$0xff] }
 0x5a5   : > { %6313 = vmatpush2.msra.mxu1 %v4819_v54  ;;  %6417 = vmatpush1.msra.mxu0 %v4797_v62  ;;  %v11249_v54 = vld [vmem:[%s20209_s11 + $0xb90] sm:$0xff]  ;;  %v4842_v62 = vld [vmem:[%s20211_s7 + $0x538] sm:$0xff] }
 0x5a6   : > { %6315 = vmatmul.mubr.f32.vlgmr.msra.gmra.mxu1 %v17726_v9  ;;  %6418 = vmatprep.subr.mxu0 %v12222_v20  ;;  %v18389_v9 = vrot.slane %v6482_v63, 2  ;;  %v11245_v63 = vld [vmem:[%s20209_s11 + $0xb70] sm:$0xff] }
 0x5a7   : > { %6696 = vmatprep.subr.mxu1 %v11285_v8  ;;  %11236 = vmatprep.mubr.msk.f32.mxu1 %vm1283_vm1, %v17737_v28  ;;  %v11279_v28 = vld [vmem:[%s20209_s11 + $0xc80] sm:$0xff]  ;;  %v11248_v8 = vld [vmem:[%s20209_s11 + $0xb88] sm:$0xff] }
 0x5a8   : > { %6419 = vmatpush1.msra.mxu0 %v4794_v48  ;;  %6697 = vmatpush1.msra.mxu1 %v11284_v18  ;;  %v18408_v56 = vsel %vm3471_vm4, %v6677_v37, %v18389_v9  ;;  %v11246_v48 = vld [vmem:[%s20209_s11 + $0xb78] sm:$0xff]  ;;  %v4839_v18 = vld [vmem:[%s20211_s7 + $0x520] sm:$0xff] }
 0x5a9   : > { %6420 = vmatprep.subr.mxu0 %v12222_v20  ;;  %6698 = vmatprep.subr.mxu1 %v11282_v60  ;;  %v11243_v60 = vld [vmem:[%s20209_s11 + $0xb60] sm:$0xff]  ;;  %v4830_v37 = vld [vmem:[%s20211_s7 + $0x4d8] sm:$0xff] }
 0x5aa   : > { %6421 = vmatpush1.msra.mxu0 %v4791_v0  ;;  %6699 = vmatpush1.msra.mxu1 %v11281_v34  ;;  %v4836_v0 = vld [vmem:[%s20211_s7 + $0x508] sm:$0xff]  ;;  %v11242_v34 = vld [vmem:[%s20209_s11 + $0xb58] sm:$0xff] }
 0x5ab   : > { %6321 = vmatmul.mubr.f32.gmra.mxu1 %v17755_v44  ;;  %6422 = vmatprep.subr.mxu0 %v12222_v20  ;;  %v11275_v44 = vld [vmem:[%s20209_s11 + $0xc60] sm:$0xff] }
 0x5ac   : > { %6700 = vmatprep.subr.mxu1 %v11279_v28  ;;  %6423 = vmatpush1.msra.mxu0 %v4788_v55  ;;  %v4833_v28 = vld [vmem:[%s20211_s7 + $0x4f0] sm:$0xff]  ;;  %v11239_v55 = vld [vmem:[%s20209_s11 + $0xb40] sm:$0xff] }
 0x5ad   : > { %6701 = vmatpush1.msra.mxu1 %v11278_v58  ;;  %6760 = vmatprep.mubr.f32.mxu1 %v18408_v56  ;;  %v11333_v58 = vld [vmem:[%s20209_s11 + $0xe30] sm:$0xff] }
 0x5ae   : > { %6424 = vmatprep.subr.mxu0 %v12222_v20  ;;  %6702 = vmatprep.subr.mxu1 %v11276_v61  ;;  %v11332_v61 = vld [vmem:[%s20209_s11 + $0xe28] sm:$0xff] }
 0x5af   : > { %6425 = vmatpush1.msra.mxu0 %v4785_v12  ;;  %6703 = vmatpush1.msra.mxu1 %v11275_v44  ;;  %v11330_v12 = vld [vmem:[%s20209_s11 + $0xe18] sm:$0xff]  ;;  %v4827_v44 = vld [vmem:[%s20211_s7 + $0x4c0] sm:$0xff] }
 0x5b0   : > { %6426 = vmatprep.subr.mxu0 %v12222_v20  ;;  %6704 = vmatprep.subr.mxu1 %v11273_v47  ;;  %v5854_v11 = vpop.f32.mrf.mxu0  ;;  %v11329_v47 = vld [vmem:[%s20209_s11 + $0xe10] sm:$0xff] }
 0x5b1   : > { %6427 = vmatpush1.msra.mxu0 %v4782_v2  ;;  %6705 = vmatpush1.msra.mxu1 %v11272_v6  ;;  %v18441_v14 = vadd.f32 %v18240_v49, %v5854_v11  ;;  %v4773_v49 = vld [vmem:[%s20211_s7 + $0x310] sm:$0xff]  ;;  %v11327_v2 = vld [vmem:[%s20209_s11 + $0xe00] sm:$0xff]  ;;  %v4824_v6 = vld [vmem:[%s20211_s7 + $0x4a8] sm:$0xff] }
 0x5b2   : > { %6428 = vmatprep.subr.mxu0 %v12222_v20  ;;  %6706 = vmatprep.subr.mxu1 %v11270_v23  ;;  %v5856_v40 = vpop.f32.mrf.mxu0  ;;  %v11326_v23 = vld [vmem:[%s20209_s11 + $0xdf8] sm:$0xff] }
 0x5b3   : > { %6429 = vmatpush1.msra.mxu0 %v4779_v30  ;;  %6707 = vmatpush1.msra.mxu1 %v11269_v7  ;;  %v11324_v7 = vld [vmem:[%s20209_s11 + $0xde8] sm:$0xff]  ;;  %v11321_v40 = vld [vmem:[%s20209_s11 + $0xdd0] sm:$0xff] }
 0x5b4   : > { %6430 = vmatprep.subr.mxu0 %v12222_v20  ;;  %6708 = vmatprep.subr.mxu1 %v11267_v26  ;;  %v4821_v26 = vld [vmem:[%s20211_s7 + $0x490] sm:$0xff] }
 0x5b5   : > { %6431 = vmatpush1.msra.mxu0 %v4776_v31  ;;  %6709 = vmatpush1.msra.mxu1 %v11266_v19  ;;  %v5859_v27 = vpop.f32.mrf.mxu0  ;;  %v11323_v31 = vld [vmem:[%s20209_s11 + $0xde0] sm:$0xff] }
 0x5b6   : > { %6432 = vmatprep.subr.mxu0 %v12222_v20  ;;  %6710 = vmatprep.subr.mxu1 %v11264_v43  ;;  %v18471_v45 = vadd.f32 %v18272_v38, %v5859_v27  ;;  %v11255_v38 = vld [vmem:[%s20209_s11 + $0xbc0] sm:$0xff]  ;;  %v11381_v43 = vld [vmem:[%s20209_s11 + $0xfb0] sm:$0xff] }
 0x5b7   : > { %6433 = vmatpush1.msra.mxu0 %v4773_v49  ;;  %6711 = vmatpush1.msra.mxu1 %v11263_v39  ;;  %v5861_v10 = vpop.f32.mrf.mxu0  ;;  %v6480_v49 = vld [vmem:[#allocation4 + $0x18] sm:$0xfc]  ;;  %v11320_v39 = vld [vmem:[%s20209_s11 + $0xdc8] sm:$0xff] }
 0x5b8   : > { %6442 = vmatprep.subr.mxu0 %v12222_v20  ;;  %6712 = vmatprep.subr.mxu1 %v11261_v42  ;;  %v11380_v42 = vld [vmem:[%s20209_s11 + $0xfa8] sm:$0xff] }
 0x5b9   : > { %6443 = vmatpush2.msra.mxu0 %v4854_v21  ;;  %6713 = vmatpush1.msra.mxu1 %v11260_v50  ;;  %v12093_v21 = vld [vmem:[#allocation4 + $0x10] sm:$0xff]  ;;  %v11318_v50 = vld [vmem:[%s20209_s11 + $0xdb8] sm:$0xff] }
 0x5ba   : > { %6444 = vmatprep.subr.mxu0 %v12222_v20  ;;  %6714 = vmatprep.subr.mxu1 %v11258_v36  ;;  %v11378_v36 = vld [vmem:[%s20209_s11 + $0xf98] sm:$0xff] }
 0x5bb   : > { %6445 = vmatpush2.msra.mxu0 %v4851_v46  ;;  %6715 = vmatpush1.msra.mxu1 %v11257_v15  ;;  %v12094_v46 = vld [vmem:[#allocation4 + $0x38] sm:$0x1f]  ;;  %v11317_v15 = vld [vmem:[%s20209_s11 + $0xdb0] sm:$0xff] }
 0x5bc   : > { %6446 = vmatprep.subr.mxu0 %v12222_v20  ;;  %6716 = vmatprep.subr.mxu1 %v11255_v38  ;;  %v11377_v38 = vld [vmem:[%s20209_s11 + $0xf90] sm:$0xff] }
 0x5bd   : > { %6447 = vmatpush2.msra.mxu0 %v4848_v52  ;;  %6717 = vmatpush1.msra.mxu1 %v11254_v51  ;;  %v6683_v51 = vrot.slane %v6480_v49, 2  ;;  %v11354_v49 = vld [vmem:[%s20209_s11 + $0xed8] sm:$0xff] }
 0x5be   : > { %6448 = vmatprep.subr.mxu0 %v12222_v20  ;;  %6718 = vmatprep.subr.mxu1 %v11252_v16 }
 0x5bf   : > { %6449 = vmatpush2.msra.mxu0 %v4845_v5  ;;  %6719 = vmatpush1.msra.mxu1 %v11251_v17  ;;  %v11375_v17 = vld [vmem:[%s20209_s11 + $0xf80] sm:$0xff] }
 0x5c0   : > { %6450 = vmatprep.subr.mxu0 %v12222_v20  ;;  %6720 = vmatprep.subr.mxu1 %v11249_v54  ;;  %v11314_v54 = vld [vmem:[%s20209_s11 + $0xd98] sm:$0xff] }
 0x5c1   : > { %6451 = vmatpush2.msra.mxu0 %v4842_v62  ;;  %6721 = vmatpush1.msra.mxu1 %v11248_v8  ;;  %v11374_v62 = vld [vmem:[%s20209_s11 + $0xf78] sm:$0xff]  ;;  %v12095_v8 = vld [vmem:[#allocation4 + $0x30] sm:$0x1f] }
 0x5c2   : > { %6452 = vmatprep.subr.mxu0 %v12222_v20  ;;  %6722 = vmatprep.subr.mxu1 %v11246_v48  ;;  %v11372_v48 = vld [vmem:[%s20209_s11 + $0xf68] sm:$0xff] }
 0x5c3   : > { %6453 = vmatpush2.msra.mxu0 %v4839_v18  ;;  %6723 = vmatpush1.msra.mxu1 %v11245_v63  ;;  %v11311_v63 = vld [vmem:[%s20209_s11 + $0xd80] sm:$0xff] }
 0x5c4   : > { %6454 = vmatprep.subr.mxu0 %v12222_v20  ;;  %6724 = vmatprep.subr.mxu1 %v11243_v60  ;;  %v11371_v60 = vld [vmem:[%s20209_s11 + $0xf60] sm:$0xff] }
 0x5c5   : > { %6455 = vmatpush2.msra.mxu0 %v4836_v0  ;;  %6725 = vmatpush1.msra.mxu1 %v11242_v34  ;;  %v11309_v0 = vld [vmem:[%s20209_s11 + $0xd70] sm:$0xff] }
 0x5c6   : > { %6456 = vmatprep.subr.mxu0 %v12222_v20  ;;  %6726 = vmatprep.subr.mxu1 %v11240_v4  ;;  %v11369_v34 = vld [vmem:[%s20209_s11 + $0xf50] sm:$0xff]  ;;  %v11308_v4 = vld [vmem:[%s20209_s11 + $0xd68] sm:$0xff] }
 0x5c7   : > { %6457 = vmatpush2.msra.mxu0 %v4833_v28  ;;  %6727 = vmatpush1.msra.mxu1 %v11239_v55  ;;  %v11368_v28 = vld [vmem:[%s20209_s11 + $0xf48] sm:$0xff]  ;;  %v11306_v55 = vld [vmem:[%s20209_s11 + $0xd58] sm:$0xff] }
 0x5c8   : > { %6458 = vmatprep.subr.mxu0 %v12222_v20  ;;  %6728 = vmatprep.subr.mxu1 %v11333_v58  ;;  %v11366_v58 = vld [vmem:[%s20209_s11 + $0xf38] sm:$0xff] }
 0x5c9   : > { %6459 = vmatpush2.msra.mxu0 %v4830_v37  ;;  %6729 = vmatpush2.msra.mxu1 %v11332_v61  ;;  %v11305_v37 = vld [vmem:[%s20209_s11 + $0xd50] sm:$0xff] }
 0x5ca   : > { %6460 = vmatprep.subr.mxu0 %v12222_v20  ;;  %6730 = vmatprep.subr.mxu1 %v11330_v12  ;;  %v5935_v30 = vpop.f32.mrf.mxu1  ;;  %v11365_v61 = vld [vmem:[%s20209_s11 + $0xf30] sm:$0xff]  ;;  %v11303_v12 = vld [vmem:[%s20209_s11 + $0xd40] sm:$0xff] }
 0x5cb   : > { %6461 = vmatpush2.msra.mxu0 %v4827_v44  ;;  %6731 = vmatpush2.msra.mxu1 %v11329_v47  ;;  %v18577_v11 = vadd.f32 %v5935_v30, %v17449_v53  ;;  %v11363_v44 = vld [vmem:[%s20209_s11 + $0xf20] sm:$0xff]  ;;  %v11302_v47 = vld [vmem:[%s20209_s11 + $0xd38] sm:$0xff] }
 0x5cc   : > { %6462 = vmatprep.subr.mxu0 %v12222_v20  ;;  %6732 = vmatprep.subr.mxu1 %v11327_v2  ;;  %v5937_v19 = vpop.f32.mrf.mxu1  ;;  %v11362_v2 = vld [vmem:[%s20209_s11 + $0xf18] sm:$0xff]  ;;  %v11299_v30 = vld [vmem:[%s20209_s11 + $0xd20] sm:$0xff] }
 0x5cd   : > { %6463 = vmatpush2.msra.mxu0 %v4824_v6  ;;  %6733 = vmatpush2.msra.mxu1 %v11326_v23  ;;  %v18590_v53 = vadd.f32 %v5937_v19, %v17463_v1  ;;  %v6484_v1 = vld [vmem:[#allocation4 + $0x38] sm:$0x7f]  ;;  %v11300_v6 = vld [vmem:[%s20209_s11 + $0xd28] sm:$0xff] }
 0x5ce   : > { %6464 = vmatprep.subr.mxu0 %v12222_v20  ;;  %6734 = vmatprep.subr.mxu1 %v11324_v7  ;;  %v18621_v16 = vrot.slane %v6484_v1, 2  ;;  %v11360_v23 = vld [vmem:[%s20209_s11 + $0xf08] sm:$0xff]  ;;  %v11359_v7 = vld [vmem:[%s20209_s11 + $0xf00] sm:$0xff] }
 0x5cf   : > { %6465 = vmatpush2.msra.mxu0 %v4821_v26  ;;  %6735 = vmatpush2.msra.mxu1 %v11323_v31  ;;  %v5941_v27 = vpop.f32.mrf.mxu1  ;;  %v11297_v26 = vld [vmem:[%s20209_s11 + $0xd10] sm:$0xff]  ;;  %v11296_v19 = vld [vmem:[%s20209_s11 + $0xd08] sm:$0xff]  ;;  %v6481_v1 = vld [vmem:[#allocation4 + $0x20] sm:$0x7f] }
 0x5d0   : > { %6467 = vmatmul.mubr.f32.vlgmr.msra.gmra.mxu0 %v12093_v21  ;;  %6736 = vmatprep.subr.mxu1 %v11321_v40  ;;  %v18609_v10 = vadd.f32 %v5941_v27, %v17489_v13  ;;  %v11315_v13 = vld [vmem:[%s20209_s11 + $0xda0] sm:$0xff]  ;;  %v18643_v18 = vsel %vm3471_vm4, %v6683_v51, %v18621_v16  ;;  %v11357_v31 = vld [vmem:[%s20209_s11 + $0xef0] sm:$0xff]  ;;  %v11356_v40 = vld [vmem:[%s20209_s11 + $0xee8] sm:$0xff] }
 0x5d1   : > { %6773 = vmatprep.subr.mxu0 %v11381_v43  ;;  %11238 = vmatprep.mubr.msk.f32.mxu0 %vm1283_vm1, %v12094_v46  ;;  %v5943_v52 = vpop.f32.mrf.mxu1  ;;  %v11294_v43 = vld [vmem:[%s20209_s11 + $0xcf8] sm:$0xff]  ;;  %v11291_v27 = vld [vmem:[%s20209_s11 + $0xce0] sm:$0xff] }
 0x5d2   : > { %6737 = vmatpush2.msra.mxu1 %v11320_v39  ;;  %6774 = vmatpush1.msra.mxu0 %v11380_v42  ;;  %v18624_v5 = vadd.f32 %v5943_v52, %v17503_v3  ;;  %v11312_v3 = vld [vmem:[%s20209_s11 + $0xd88] sm:$0xff]  ;;  %v11293_v39 = vld [vmem:[%s20209_s11 + $0xcf0] sm:$0xff]  ;;  %v11351_v21 = vld [vmem:[%s20209_s11 + $0xec0] sm:$0xff]  ;;  %v18743_v52 = vrot.slane %v6481_v1, 2 }
 0x5d3   : > { %6738 = vmatprep.subr.mxu1 %v11318_v50  ;;  %6775 = vmatprep.subr.mxu0 %v11378_v36  ;;  %v11353_v42 = vld [vmem:[%s20209_s11 + $0xed0] sm:$0xff]  ;;  %v11290_v50 = vld [vmem:[%s20209_s11 + $0xcd8] sm:$0xff]  ;;  %v6477_v46 = vld [vmem:[#allocation4] sm:$0xfc] }
 0x5d4   : > { %6739 = vmatpush2.msra.mxu1 %v11317_v15  ;;  %6776 = vmatpush1.msra.mxu0 %v11377_v38  ;;  %v11350_v36 = vld [vmem:[%s20209_s11 + $0xeb8] sm:$0xff]  ;;  %v11288_v15 = vld [vmem:[%s20209_s11 + $0xcc8] sm:$0xff]  ;;  %v11347_v51 = vld [vmem:[%s20209_s11 + $0xea0] sm:$0xff] }
 0x5d5   : > { %6472 = vmatmul.mubr.f32.gmra.mxu0 %v12095_v8  ;;  %6740 = vmatprep.subr.mxu1 %v11315_v13  ;;  %v11348_v38 = vld [vmem:[%s20209_s11 + $0xea8] sm:$0xff]  ;;  %v11287_v13 = vld [vmem:[%s20209_s11 + $0xcc0] sm:$0xff]  ;;  %v11413_v1 = vld [vmem:[%s20209_s11 + $0x10b0] sm:$0xff] }
 0x5d6   : > { %6777 = vmatprep.subr.mxu0 %v11375_v17  ;;  %6741 = vmatpush2.msra.mxu1 %v11314_v54  ;;  %v6674_v17 = vrot.slane %v6477_v46, 2  ;;  %v11345_v54 = vld [vmem:[%s20209_s11 + $0xe90] sm:$0xff] }
 0x5d7   : > { %6778 = vmatpush1.msra.mxu0 %v11374_v62  ;;  %11419 = vmatprep.mubr.msk.f32.mxu0 %vm1283_vm1, %v18643_v18  ;;  %v11334_v62 = vld [vmem:[%s20209_s11 + $0xe38] sm:$0xff] }
 0x5d8   : > { %6742 = vmatprep.subr.mxu1 %v11312_v3  ;;  %6779 = vmatprep.subr.mxu0 %v11372_v48  ;;  %v18759_v8 = vsel %vm3471_vm4, %v6674_v17, %v18743_v52  ;;  %v11344_v3 = vld [vmem:[%s20209_s11 + $0xe88] sm:$0xff]  ;;  %v11286_v48 = vld [vmem:[%s20209_s11 + $0xcb8] sm:$0xff] }
 0x5d9   : > { %6743 = vmatpush2.msra.mxu1 %v11311_v63  ;;  %6780 = vmatpush1.msra.mxu0 %v11371_v60  ;;  %v11342_v63 = vld [vmem:[%s20209_s11 + $0xe78] sm:$0xff]  ;;  %v11331_v60 = vld [vmem:[%s20209_s11 + $0xe20] sm:$0xff] }
 0x5da   : > { %6744 = vmatprep.subr.mxu1 %v11309_v0  ;;  %6781 = vmatprep.subr.mxu0 %v11369_v34  ;;  %v11341_v0 = vld [vmem:[%s20209_s11 + $0xe70] sm:$0xff]  ;;  %v11283_v34 = vld [vmem:[%s20209_s11 + $0xca0] sm:$0xff] }
 0x5db   : > { %6745 = vmatpush2.msra.mxu1 %v11308_v4  ;;  %6782 = vmatpush1.msra.mxu0 %v11368_v28  ;;  %v11339_v4 = vld [vmem:[%s20209_s11 + $0xe60] sm:$0xff] }
 0x5dc   : > { %6746 = vmatprep.subr.mxu1 %v11306_v55  ;;  %6783 = vmatprep.subr.mxu0 %v11366_v58  ;;  %v11328_v58 = vld [vmem:[%s20209_s11 + $0xe08] sm:$0xff] }
 0x5dd   : > { %6747 = vmatpush2.msra.mxu1 %v11305_v37  ;;  %6784 = vmatpush1.msra.mxu0 %v11365_v61  ;;  %v11338_v37 = vld [vmem:[%s20209_s11 + $0xe58] sm:$0xff] }
 0x5de   : > { %6748 = vmatprep.subr.mxu1 %v11303_v12  ;;  %6785 = vmatprep.subr.mxu0 %v11363_v44  ;;  %v11280_v12 = vld [vmem:[%s20209_s11 + $0xc88] sm:$0xff] }
 0x5df   : > { %6749 = vmatpush2.msra.mxu1 %v11302_v47  ;;  %6786 = vmatpush1.msra.mxu0 %v11362_v2  ;;  %v11336_v2 = vld [vmem:[%s20209_s11 + $0xe48] sm:$0xff] }
 0x5e0   : > { %6750 = vmatprep.subr.mxu1 %v11300_v6  ;;  %6787 = vmatprep.subr.mxu0 %v11360_v23 }
 0x5e1   : > { %6751 = vmatpush2.msra.mxu1 %v11299_v30  ;;  %6788 = vmatpush1.msra.mxu0 %v11359_v7  ;;  %v11335_v30 = vld [vmem:[%s20209_s11 + $0xe40] sm:$0xff]  ;;  %v11277_v7 = vld [vmem:[%s20209_s11 + $0xc70] sm:$0xff] }
 0x5e2   : > { %6752 = vmatprep.subr.mxu1 %v11297_v26  ;;  %6789 = vmatprep.subr.mxu0 %v11357_v31  ;;  %v11417_v26 = vld [vmem:[%s20209_s11 + $0x10d0] sm:$0xff] }
 0x5e3   : > { %6753 = vmatpush2.msra.mxu1 %v11296_v19  ;;  %6790 = vmatpush1.msra.mxu0 %v11356_v40  ;;  %v11416_v19 = vld [vmem:[%s20209_s11 + $0x10c8] sm:$0xff]  ;;  %v11274_v40 = vld [vmem:[%s20209_s11 + $0xc58] sm:$0xff] }
 0x5e4   : > { %6754 = vmatprep.subr.mxu1 %v11294_v43  ;;  %6791 = vmatprep.subr.mxu0 %v11354_v49 }
 0x5e5   : > { %6755 = vmatpush2.msra.mxu1 %v11293_v39  ;;  %6792 = vmatpush1.msra.mxu0 %v11353_v42  ;;  %v11414_v39 = vld [vmem:[%s20209_s11 + $0x10b8] sm:$0xff] }
 0x5e6   : > { %6756 = vmatprep.subr.mxu1 %v11291_v27  ;;  %6793 = vmatprep.subr.mxu0 %v11351_v21  ;;  %v11271_v27 = vld [vmem:[%s20209_s11 + $0xc40] sm:$0xff] }
 0x5e7   : > { %6757 = vmatpush2.msra.mxu1 %v11290_v50  ;;  %6794 = vmatpush1.msra.mxu0 %v11350_v36  ;;  %v11411_v36 = vld [vmem:[%s20209_s11 + $0x10a0] sm:$0xff] }
 0x5e8   : > { %6758 = vmatprep.subr.mxu1 %v11288_v15  ;;  %6795 = vmatprep.subr.mxu0 %v11348_v38  ;;  %v11410_v38 = vld [vmem:[%s20209_s11 + $0x1098] sm:$0xff] }
 0x5e9   : > { %6759 = vmatpush2.msra.mxu1 %v11287_v13  ;;  %6796 = vmatpush1.msra.mxu0 %v11347_v51  ;;  %v11268_v13 = vld [vmem:[%s20209_s11 + $0xc28] sm:$0xff] }
 0x5ea   : > { %6761 = vmatmul.mubr.f32.vlgmr.msra.gmra.mxu1 %v18759_v8  ;;  %6797 = vmatprep.subr.mxu0 %v11345_v54  ;;  %v11408_v51 = vld [vmem:[%s20209_s11 + $0x1088] sm:$0xff]  ;;  %v11407_v54 = vld [vmem:[%s20209_s11 + $0x1080] sm:$0xff] }
 0x5eb   : > { %11814 = vmatprep.subr.mxu1 %v11334_v62  ;;  %6766 = vmatprep.mubr.f32.mxu1 %v18389_v9  ;;  %v11265_v62 = vld [vmem:[%s20209_s11 + $0xc10] sm:$0xff] }
 0x5ec   : > { %6798 = vmatpush1.msra.mxu0 %v11344_v3  ;;  %11815 = vmatpush3.msra.mxu1 %v11286_v48  ;;  %v6012_v28 = vpop.f32.mrf.mxu0  ;;  %v11770_v55 = vpop.f32.mrf.mxu1  ;;  %v11405_v3 = vld [vmem:[%s20209_s11 + $0x1070] sm:$0xff]  ;;  %v11404_v48 = vld [vmem:[%s20209_s11 + $0x1068] sm:$0xff] }
 0x5ed   : > { %6799 = vmatprep.subr.mxu0 %v11342_v63  ;;  %11816 = vmatprep.subr.mxu1 %v11331_v60  ;;  %v18791_v61 = vadd.f32 %v6012_v28, %v18577_v11  ;;  %v11325_v11 = vld [vmem:[%s20209_s11 + $0xdf0] sm:$0xff]  ;;  %v11262_v63 = vld [vmem:[%s20209_s11 + $0xbf8] sm:$0xff]  ;;  %v11399_v28 = vld [vmem:[%s20209_s11 + $0x1040] sm:$0xff] }
 0x5ee   : > { %6800 = vmatpush1.msra.mxu0 %v11341_v0  ;;  %11817 = vmatpush3.msra.mxu1 %v11283_v34  ;;  %v6014_v44 = vpop.f32.mrf.mxu0  ;;  %v11771_v47 = vpop.f32.mrf.mxu1  ;;  %v11402_v60 = vld [vmem:[%s20209_s11 + $0x1058] sm:$0xff]  ;;  %v11307_v0 = vld [vmem:[%s20209_s11 + $0xd60] sm:$0xff]  ;;  %v11401_v34 = vld [vmem:[%s20209_s11 + $0x1050] sm:$0xff] }
 0x5ef   : > { %6767 = vmatmul.mubr.f32.gmra.mxu1 %v18743_v52  ;;  %6801 = vmatprep.subr.mxu0 %v11339_v4  ;;  %v18804_v6 = vadd.f32 %v6014_v44, %v18590_v53  ;;  %v11772_v23 = vadd.f32 %v11771_v47, %v11770_v55  ;;  %v11322_v53 = vld [vmem:[%s20209_s11 + $0xdd8] sm:$0xff]  ;;  %v11259_v4 = vld [vmem:[%s20209_s11 + $0xbe0] sm:$0xff]  ;;  %v11304_v55 = vld [vmem:[%s20209_s11 + $0xd48] sm:$0xff] }
 0x5f0   : > { %11818 = vmatprep.subr.mxu1 %v11328_v58  ;;  %6802 = vmatpush1.msra.mxu0 %v11338_v37  ;;  %v11398_v58 = vld [vmem:[%s20209_s11 + $0x1038] sm:$0xff]  ;;  %v11256_v37 = vld [vmem:[%s20209_s11 + $0xbc8] sm:$0xff]  ;;  %v11301_v44 = vld [vmem:[%s20209_s11 + $0xd30] sm:$0xff] }
 0x5f1   : > { %11819 = vmatpush3.msra.mxu1 %v11280_v12  ;;  %6914 = vmatprep.mubr.f32.mxu1 %v18408_v56  ;;  %v18820_v31 = vadd.f32 %v11772_v23, %v17802_v25  ;;  %v11319_v25 = vld [vmem:[%s20209_s11 + $0xdc0] sm:$0xff]  ;;  %v11396_v12 = vld [vmem:[%s20209_s11 + $0x1028] sm:$0xff]  ;;  %v11298_v23 = vld [vmem:[%s20209_s11 + $0xd18] sm:$0xff] }
 0x5f2   : > { %6803 = vmatprep.subr.mxu0 %v11336_v2  ;;  %11820 = vmatprep.subr.mxu1 %v11325_v11  ;;  %v6018_v43 = vpop.f32.mrf.mxu0  ;;  %v11773_v49 = vpop.f32.mrf.mxu1  ;;  %v11395_v47 = vld [vmem:[%s20209_s11 + $0x1020] sm:$0xff]  ;;  %v11253_v2 = vld [vmem:[%s20209_s11 + $0xbb0] sm:$0xff] }
 0x5f3   : > { %6804 = vmatpush1.msra.mxu0 %v11335_v30  ;;  %11821 = vmatpush3.msra.mxu1 %v11277_v7  ;;  %v18835_v42 = vadd.f32 %v6018_v43, %v18609_v10  ;;  %v11316_v10 = vld [vmem:[%s20209_s11 + $0xda8] sm:$0xff]  ;;  %v11393_v11 = vld [vmem:[%s20209_s11 + $0x1010] sm:$0xff]  ;;  %v11250_v7 = vld [vmem:[%s20209_s11 + $0xb98] sm:$0xff] }
 0x5f4   : > { %6813 = vmatprep.subr.mxu0 %v11417_v26  ;;  %11822 = vmatprep.subr.mxu1 %v11322_v53  ;;  %v6020_v21 = vpop.f32.mrf.mxu0  ;;  %v11774_v50 = vpop.f32.mrf.mxu1  ;;  %v11392_v30 = vld [vmem:[%s20209_s11 + $0x1008] sm:$0xff]  ;;  %v11390_v26 = vld [vmem:[%s20209_s11 + $0xff8] sm:$0xff]  ;;  %v11295_v53 = vld [vmem:[%s20209_s11 + $0xd00] sm:$0xff] }
 0x5f5   : > { %6814 = vmatpush2.msra.mxu0 %v11416_v19  ;;  %11823 = vmatpush3.msra.mxu1 %v11274_v40  ;;  %v18850_v46 = vadd.f32 %v6020_v21, %v18624_v5  ;;  %v11775_v15 = vadd.f32 %v11774_v50, %v11773_v49  ;;  %v11313_v5 = vld [vmem:[%s20209_s11 + $0xd90] sm:$0xff]  ;;  %v11247_v43 = vld [vmem:[%s20209_s11 + $0xb80] sm:$0xff]  ;;  %v11384_v21 = vld [vmem:[%s20209_s11 + $0xfc8] sm:$0xff] }
 0x5f6   : > { %6815 = vmatprep.subr.mxu0 %v11414_v39  ;;  %11824 = vmatprep.subr.mxu1 %v11319_v25  ;;  %v6479_v19 = vld [vmem:[#allocation4 + $0x10] sm:$0xfc]  ;;  %v11387_v39 = vld [vmem:[%s20209_s11 + $0xfe0] sm:$0xff]  ;;  %v11292_v25 = vld [vmem:[%s20209_s11 + $0xce8] sm:$0xff] }
 0x5f7   : > { %6816 = vmatpush2.msra.mxu0 %v11413_v1  ;;  %11825 = vmatpush3.msra.mxu1 %v11271_v27  ;;  %v18865_v17 = vadd.f32 %v11775_v15, %v17832_v29  ;;  %v11310_v29 = vld [vmem:[%s20209_s11 + $0xd78] sm:$0xff]  ;;  %v11389_v40 = vld [vmem:[%s20209_s11 + $0xff0] sm:$0xff]  ;;  %v11244_v27 = vld [vmem:[%s20209_s11 + $0xb68] sm:$0xff] }
 0x5f8   : > { %6817 = vmatprep.subr.mxu0 %v11411_v36  ;;  %11826 = vmatprep.subr.mxu1 %v11316_v10  ;;  %v6483_v49 = vld [vmem:[#allocation4 + $0x30] sm:$0x7f]  ;;  %v11386_v1 = vld [vmem:[%s20209_s11 + $0xfd8] sm:$0xff]  ;;  %v6680_v36 = vrot.slane %v6479_v19, 2  ;;  %v11383_v15 = vld [vmem:[%s20209_s11 + $0xfc0] sm:$0xff] }
 0x5f9   : > { %6818 = vmatpush2.msra.mxu0 %v11410_v38  ;;  %11827 = vmatpush3.msra.mxu1 %v11268_v13  ;;  %v11289_v50 = vld [vmem:[%s20209_s11 + $0xcd0] sm:$0xff]  ;;  %v18963_v10 = vrot.slane %v6483_v49, 2  ;;  %v11444_v19 = vld [vmem:[%s20211_s7 + $0xbe8] sm:$0xff] }
 0x5fa   : > { %6819 = vmatprep.subr.mxu0 %v11408_v51  ;;  %11828 = vmatprep.subr.mxu1 %v11313_v5  ;;  %v11241_v38 = vld [vmem:[%s20209_s11 + $0xb50] sm:$0xff]  ;;  %v11382_v5 = vld [vmem:[%s20209_s11 + $0xfb8] sm:$0xff] }
 0x5fb   : > { %6820 = vmatpush2.msra.mxu0 %v11407_v54  ;;  %11829 = vmatpush3.msra.mxu1 %v11265_v62  ;;  %v11469_v13 = vld [vmem:[%s20211_s7 + $0xcb0] sm:$0xff]  ;;  %v18976_v51 = vsel %vm3471_vm4, %v6680_v36, %v18963_v10  ;;  %v11468_v54 = vld [vmem:[%s20211_s7 + $0xca8] sm:$0xff]  ;;  %v11466_v62 = vld [vmem:[%s20211_s7 + $0xc98] sm:$0xff] }
 0x5fc   : > { %6821 = vmatprep.subr.mxu0 %v11405_v3  ;;  %11830 = vmatprep.subr.mxu1 %v11310_v29  ;;  %v11379_v3 = vld [vmem:[%s20209_s11 + $0xfa0] sm:$0xff]  ;;  %v11465_v29 = vld [vmem:[%s20211_s7 + $0xc90] sm:$0xff] }
 0x5fd   : > { %6822 = vmatpush2.msra.mxu0 %v11404_v48  ;;  %11831 = vmatpush3.msra.mxu1 %v11262_v63  ;;  %v11463_v48 = vld [vmem:[%s20211_s7 + $0xc80] sm:$0xff]  ;;  %v11376_v63 = vld [vmem:[%s20209_s11 + $0xf88] sm:$0xff]  ;;  %v11441_v49 = vld [vmem:[%s20211_s7 + $0xbd0] sm:$0xff] }
 0x5fe   : > { %6823 = vmatprep.subr.mxu0 %v11402_v60  ;;  %11832 = vmatprep.subr.mxu1 %v11307_v0  ;;  %v11462_v60 = vld [vmem:[%s20211_s7 + $0xc78] sm:$0xff]  ;;  %v11460_v0 = vld [vmem:[%s20211_s7 + $0xc68] sm:$0xff]  ;;  %v11433_v36 = vld [vmem:[%s20211_s7 + $0xb90] sm:$0xff] }
 0x5ff   : > { %6824 = vmatpush2.msra.mxu0 %v11401_v34  ;;  %11833 = vmatpush3.msra.mxu1 %v11259_v4  ;;  %v11373_v34 = vld [vmem:[%s20209_s11 + $0xf70] sm:$0xff]  ;;  %v11459_v4 = vld [vmem:[%s20211_s7 + $0xc60] sm:$0xff] }
 0x600   : > { %6825 = vmatprep.subr.mxu0 %v11399_v28  ;;  %11834 = vmatprep.subr.mxu1 %v11304_v55  ;;  %v11457_v28 = vld [vmem:[%s20211_s7 + $0xc50] sm:$0xff]  ;;  %v11370_v55 = vld [vmem:[%s20209_s11 + $0xf58] sm:$0xff] }
 0x601   : > { %6826 = vmatpush2.msra.mxu0 %v11398_v58  ;;  %11835 = vmatpush3.msra.mxu1 %v11256_v37  ;;  %v11456_v58 = vld [vmem:[%s20211_s7 + $0xc48] sm:$0xff]  ;;  %v11454_v37 = vld [vmem:[%s20211_s7 + $0xc38] sm:$0xff] }
 0x602   : > { %6827 = vmatprep.subr.mxu0 %v11396_v12  ;;  %11836 = vmatprep.subr.mxu1 %v11301_v44  ;;  %v11367_v12 = vld [vmem:[%s20209_s11 + $0xf40] sm:$0xff]  ;;  %v11453_v44 = vld [vmem:[%s20211_s7 + $0xc30] sm:$0xff] }
 0x603   : > { %6828 = vmatpush2.msra.mxu0 %v11395_v47  ;;  %11837 = vmatpush3.msra.mxu1 %v11253_v2  ;;  %v11451_v47 = vld [vmem:[%s20211_s7 + $0xc20] sm:$0xff]  ;;  %v11364_v2 = vld [vmem:[%s20209_s11 + $0xf28] sm:$0xff] }
 0x604   : > { %6829 = vmatprep.subr.mxu0 %v11393_v11  ;;  %11838 = vmatprep.subr.mxu1 %v11298_v23  ;;  %v11450_v11 = vld [vmem:[%s20211_s7 + $0xc18] sm:$0xff]  ;;  %v11448_v23 = vld [vmem:[%s20211_s7 + $0xc08] sm:$0xff] }
 0x605   : > { %6830 = vmatpush2.msra.mxu0 %v11392_v30  ;;  %11839 = vmatpush3.msra.mxu1 %v11250_v7  ;;  %v11361_v30 = vld [vmem:[%s20209_s11 + $0xf10] sm:$0xff]  ;;  %v11447_v7 = vld [vmem:[%s20211_s7 + $0xc00] sm:$0xff] }
 0x606   : > { %6831 = vmatprep.subr.mxu0 %v11390_v26  ;;  %11840 = vmatprep.subr.mxu1 %v11295_v53  ;;  %v11445_v26 = vld [vmem:[%s20211_s7 + $0xbf0] sm:$0xff]  ;;  %v11358_v53 = vld [vmem:[%s20209_s11 + $0xef8] sm:$0xff] }
 0x607   : > { %6832 = vmatpush2.msra.mxu0 %v11389_v40  ;;  %11841 = vmatpush3.msra.mxu1 %v11247_v43  ;;  %v11442_v40 = vld [vmem:[%s20211_s7 + $0xbd8] sm:$0xff]  ;;  %v11355_v43 = vld [vmem:[%s20209_s11 + $0xee0] sm:$0xff] }
 0x608   : > { %6833 = vmatprep.subr.mxu0 %v11387_v39  ;;  %11842 = vmatprep.subr.mxu1 %v11292_v25  ;;  %v11439_v39 = vld [vmem:[%s20211_s7 + $0xbc0] sm:$0xff]  ;;  %v11352_v25 = vld [vmem:[%s20209_s11 + $0xec8] sm:$0xff] }
 0x609   : > { %6834 = vmatpush2.msra.mxu0 %v11386_v1  ;;  %11843 = vmatpush3.msra.mxu1 %v11244_v27  ;;  %v11438_v1 = vld [vmem:[%s20211_s7 + $0xbb8] sm:$0xff]  ;;  %v11436_v27 = vld [vmem:[%s20211_s7 + $0xba8] sm:$0xff] }
 0x60a   : > { %6835 = vmatprep.subr.mxu0 %v11384_v21  ;;  %11844 = vmatprep.subr.mxu1 %v11289_v50  ;;  %v11349_v21 = vld [vmem:[%s20209_s11 + $0xeb0] sm:$0xff]  ;;  %v11435_v50 = vld [vmem:[%s20211_s7 + $0xba0] sm:$0xff] }
 0x60b   : > { %6836 = vmatpush2.msra.mxu0 %v11383_v15  ;;  %11845 = vmatpush3.msra.mxu1 %v11241_v38  ;;  %v11346_v15 = vld [vmem:[%s20209_s11 + $0xe98] sm:$0xff]  ;;  %v11432_v38 = vld [vmem:[%s20211_s7 + $0xb88] sm:$0xff] }
 0x60c   : > { %6838 = vmatmul.mubr.f32.vlgmr.msra.gmra.mxu0 %v18976_v51  ;;  %6915 = vmatmul.mubr.f32.vlgmr.msra.gmra.mxu1 %v18759_v8 }
 0x60d   : > { %6925 = vmatprep.subr.mxu1 %v12222_v20  ;;  %7181 = vmatprep.subr.mxu0 %v11469_v13  ;;  %v11430_v13 = vld [vmem:[%s20211_s7 + $0xb78] sm:$0xff] }
 0x60e   : > { %11420 = vmatprep.mubr.msk.f32.mxu0 %vm1283_vm1, %v18621_v16  ;;  %6919 = vmatprep.mubr.f32.mxu1 %v18389_v9 }
 0x60f   : > { %6926 = vmatpush1.msra.mxu1 %v11382_v5  ;;  %7182 = vmatpush1.msra.mxu0 %v11468_v54  ;;  %v11343_v5 = vld [vmem:[%s20209_s11 + $0xe80] sm:$0xff]  ;;  %v11429_v54 = vld [vmem:[%s20211_s7 + $0xb70] sm:$0xff] }
 0x610   : > { %6927 = vmatprep.subr.mxu1 %v12222_v20  ;;  %7183 = vmatprep.subr.mxu0 %v11466_v62 }
 0x611   : > { %6928 = vmatpush1.msra.mxu1 %v11379_v3  ;;  %7184 = vmatpush1.msra.mxu0 %v11465_v29  ;;  %v11427_v3 = vld [vmem:[%s20211_s7 + $0xb60] sm:$0xff] }
 0x612   : > { %6844 = vmatmul.mubr.f32.gmra.mxu0 %v18963_v10  ;;  %6920 = vmatmul.mubr.f32.gmra.mxu1 %v18743_v52 }
 0x613   : > { %6929 = vmatprep.subr.mxu1 %v12222_v20  ;;  %7185 = vmatprep.subr.mxu0 %v11463_v48  ;;  %v11340_v48 = vld [vmem:[%s20209_s11 + $0xe68] sm:$0xff] }
 0x614   : > { %6930 = vmatpush1.msra.mxu1 %v11376_v63  ;;  %11421 = vmatprep.mubr.msk.f32.mxu1 %vm1283_vm1, %v18643_v18  ;;  %v11426_v63 = vld [vmem:[%s20211_s7 + $0xb58] sm:$0xff] }
 0x615   : > { %7186 = vmatpush1.msra.mxu0 %v11462_v60  ;;  %7245 = vmatprep.mubr.f32.mxu0 %v18408_v56 }
 0x616   : > { %6931 = vmatprep.subr.mxu1 %v12222_v20  ;;  %7187 = vmatprep.subr.mxu0 %v11460_v0  ;;  %v11424_v0 = vld [vmem:[%s20211_s7 + $0xb48] sm:$0xff] }
 0x617   : > { %6932 = vmatpush1.msra.mxu1 %v11373_v34  ;;  %7188 = vmatpush1.msra.mxu0 %v11459_v4  ;;  %v11423_v34 = vld [vmem:[%s20211_s7 + $0xb40] sm:$0xff]  ;;  %v11517_v4 = vld [vmem:[%s20211_s7 + $0xe30] sm:$0xff] }
 0x618   : > { %6933 = vmatprep.subr.mxu1 %v12222_v20  ;;  %7189 = vmatprep.subr.mxu0 %v11457_v28 }
 0x619   : > { %6934 = vmatpush1.msra.mxu1 %v11370_v55  ;;  %7190 = vmatpush1.msra.mxu0 %v11456_v58  ;;  %v11418_v55 = vld [vmem:[%s20209_s11 + $0x10d8] sm:$0xff]  ;;  %v11516_v58 = vld [vmem:[%s20211_s7 + $0xe28] sm:$0xff] }
 0x61a   : > { %6935 = vmatprep.subr.mxu1 %v12222_v20  ;;  %7191 = vmatprep.subr.mxu0 %v11454_v37 }
 0x61b   : > { %6936 = vmatpush1.msra.mxu1 %v11367_v12  ;;  %7192 = vmatpush1.msra.mxu0 %v11453_v44  ;;  %v11514_v12 = vld [vmem:[%s20211_s7 + $0xe18] sm:$0xff] }
 0x61c   : > { %6937 = vmatprep.subr.mxu1 %v12222_v20  ;;  %7193 = vmatprep.subr.mxu0 %v11451_v47  ;;  %v11415_v47 = vld [vmem:[%s20209_s11 + $0x10c0] sm:$0xff] }
 0x61d   : > { %6938 = vmatpush1.msra.mxu1 %v11364_v2  ;;  %7194 = vmatpush1.msra.mxu0 %v11450_v11  ;;  %v11513_v2 = vld [vmem:[%s20211_s7 + $0xe10] sm:$0xff]  ;;  %v11412_v11 = vld [vmem:[%s20209_s11 + $0x10a8] sm:$0xff] }
 0x61e   : > { %6939 = vmatprep.subr.mxu1 %v12222_v20  ;;  %7195 = vmatprep.subr.mxu0 %v11448_v23  ;;  %v11510_v23 = vld [vmem:[%s20211_s7 + $0xdf8] sm:$0xff] }
 0x61f   : > { %6940 = vmatpush1.msra.mxu1 %v11361_v30  ;;  %7196 = vmatpush1.msra.mxu0 %v11447_v7  ;;  %v11508_v7 = vld [vmem:[%s20211_s7 + $0xde8] sm:$0xff] }
 0x620   : > { %6941 = vmatprep.subr.mxu1 %v12222_v20  ;;  %7197 = vmatprep.subr.mxu0 %v11445_v26 }
 0x621   : > { %6942 = vmatpush1.msra.mxu1 %v11358_v53  ;;  %7198 = vmatpush1.msra.mxu0 %v11444_v19  ;;  %v11409_v53 = vld [vmem:[%s20209_s11 + $0x1090] sm:$0xff]  ;;  %v11507_v19 = vld [vmem:[%s20211_s7 + $0xde0] sm:$0xff] }
 0x622   : > { %6943 = vmatprep.subr.mxu1 %v12222_v20  ;;  %7199 = vmatprep.subr.mxu0 %v11442_v40 }
 0x623   : > { %6944 = vmatpush1.msra.mxu1 %v11355_v43  ;;  %7200 = vmatpush1.msra.mxu0 %v11441_v49  ;;  %v11505_v43 = vld [vmem:[%s20211_s7 + $0xdd0] sm:$0xff]  ;;  %v11406_v49 = vld [vmem:[%s20209_s11 + $0x1078] sm:$0xff] }
 0x624   : > { %6945 = vmatprep.subr.mxu1 %v12222_v20  ;;  %7201 = vmatprep.subr.mxu0 %v11439_v39  ;;  %v11504_v39 = vld [vmem:[%s20211_s7 + $0xdc8] sm:$0xff] }
 0x625   : > { %6946 = vmatpush1.msra.mxu1 %v11352_v25  ;;  %7202 = vmatpush1.msra.mxu0 %v11438_v1  ;;  %v11502_v25 = vld [vmem:[%s20211_s7 + $0xdb8] sm:$0xff] }
 0x626   : > { %6947 = vmatprep.subr.mxu1 %v12222_v20  ;;  %7203 = vmatprep.subr.mxu0 %v11436_v27  ;;  %v11501_v27 = vld [vmem:[%s20211_s7 + $0xdb0] sm:$0xff] }
 0x627   : > { %6948 = vmatpush1.msra.mxu1 %v11349_v21  ;;  %7204 = vmatpush1.msra.mxu0 %v11435_v50  ;;  %v11499_v50 = vld [vmem:[%s20211_s7 + $0xda0] sm:$0xff] }
 0x628   : > { %6949 = vmatprep.subr.mxu1 %v12222_v20  ;;  %7205 = vmatprep.subr.mxu0 %v11433_v36  ;;  %v6164_v62 = vpop.f32.mrf.mxu1 }
 0x629   : > { %6950 = vmatpush1.msra.mxu1 %v11346_v15  ;;  %7206 = vmatpush1.msra.mxu0 %v11432_v38  ;;  %v19128_v29 = vadd.f32 %v6164_v62, %v18820_v31  ;;  %v11337_v31 = vld [vmem:[%s20209_s11 + $0xe50] sm:$0xff]  ;;  %v11400_v15 = vld [vmem:[%s20209_s11 + $0x1048] sm:$0xff]  ;;  %v11498_v38 = vld [vmem:[%s20211_s7 + $0xd98] sm:$0xff] }
 0x62a   : > { %6951 = vmatprep.subr.mxu1 %v12222_v20  ;;  %7207 = vmatprep.subr.mxu0 %v11430_v13  ;;  %v6166_v60 = vpop.f32.mrf.mxu1  ;;  %v11496_v13 = vld [vmem:[%s20211_s7 + $0xd88] sm:$0xff]  ;;  %v11394_v62 = vld [vmem:[%s20209_s11 + $0x1018] sm:$0xff] }
 0x62b   : > { %6952 = vmatpush1.msra.mxu1 %v11343_v5  ;;  %7208 = vmatpush1.msra.mxu0 %v11429_v54  ;;  %v11397_v5 = vld [vmem:[%s20209_s11 + $0x1030] sm:$0xff]  ;;  %v11495_v54 = vld [vmem:[%s20211_s7 + $0xd80] sm:$0xff] }
 0x62c   : > { %6953 = vmatprep.subr.mxu1 %v12222_v20  ;;  %7209 = vmatprep.subr.mxu0 %v11427_v3  ;;  %v11492_v3 = vld [vmem:[%s20211_s7 + $0xd68] sm:$0xff]  ;;  %v11489_v60 = vld [vmem:[%s20211_s7 + $0xd50] sm:$0xff] }
 0x62d   : > { %6954 = vmatpush1.msra.mxu1 %v11340_v48  ;;  %7210 = vmatpush1.msra.mxu0 %v11426_v63  ;;  %v6169_v28 = vpop.f32.mrf.mxu1  ;;  %v11490_v48 = vld [vmem:[%s20211_s7 + $0xd58] sm:$0xff]  ;;  %v11391_v63 = vld [vmem:[%s20209_s11 + $0x1000] sm:$0xff] }
 0x62e   : > { %6955 = vmatprep.subr.mxu1 %v12222_v20  ;;  %7211 = vmatprep.subr.mxu0 %v11424_v0  ;;  %v19158_v37 = vadd.f32 %v6169_v28, %v18865_v17  ;;  %v11511_v17 = vld [vmem:[%s20211_s7 + $0xe00] sm:$0xff]  ;;  %v11385_v28 = vld [vmem:[%s20209_s11 + $0xfd0] sm:$0xff] }
 0x62f   : > { %6956 = vmatpush1.msra.mxu1 %v11337_v31  ;;  %7212 = vmatpush1.msra.mxu0 %v11423_v34  ;;  %v6171_v44 = vpop.f32.mrf.mxu1  ;;  %v11487_v0 = vld [vmem:[%s20211_s7 + $0xd40] sm:$0xff]  ;;  %v11388_v31 = vld [vmem:[%s20209_s11 + $0xfe8] sm:$0xff]  ;;  %v11486_v34 = vld [vmem:[%s20211_s7 + $0xd38] sm:$0xff] }
 0x630   : > { %6965 = vmatprep.subr.mxu1 %v12222_v20  ;;  %7213 = vmatprep.subr.mxu0 %v11517_v4  ;;  %v11484_v4 = vld [vmem:[%s20211_s7 + $0xd28] sm:$0xff] }
 0x631   : > { %6966 = vmatpush2.msra.mxu1 %v11418_v55  ;;  %7214 = vmatpush2.msra.mxu0 %v11516_v58  ;;  %v11483_v55 = vld [vmem:[%s20211_s7 + $0xd20] sm:$0xff]  ;;  %v11481_v58 = vld [vmem:[%s20211_s7 + $0xd10] sm:$0xff]  ;;  %v11480_v44 = vld [vmem:[%s20211_s7 + $0xd08] sm:$0xff] }
 0x632   : > { %6967 = vmatprep.subr.mxu1 %v12222_v20  ;;  %7215 = vmatprep.subr.mxu0 %v11514_v12  ;;  %v6239_v30 = vpop.f32.mrf.mxu0  ;;  %v11565_v12 = vld [vmem:[%s20211_s7 + $0xfb0] sm:$0xff] }
 0x633   : > { %6968 = vmatpush2.msra.mxu1 %v11415_v47  ;;  %7216 = vmatpush2.msra.mxu0 %v11513_v2  ;;  %v19184_v26 = vadd.f32 %v6239_v30, %v18114_v57  ;;  %v11564_v47 = vld [vmem:[%s20211_s7 + $0xfa8] sm:$0xff]  ;;  %v11478_v2 = vld [vmem:[%s20211_s7 + $0xcf8] sm:$0xff]  ;;  %v11475_v30 = vld [vmem:[%s20211_s7 + $0xce0] sm:$0xff] }
 0x634   : > { %6969 = vmatprep.subr.mxu1 %v12222_v20  ;;  %7217 = vmatprep.subr.mxu0 %v11511_v17  ;;  %v6241_v40 = vpop.f32.mrf.mxu0  ;;  %v11562_v17 = vld [vmem:[%s20211_s7 + $0xf98] sm:$0xff] }
 0x635   : > { %6970 = vmatpush2.msra.mxu1 %v11412_v11  ;;  %7218 = vmatpush2.msra.mxu0 %v11510_v23  ;;  %v19197_v57 = vadd.f32 %v6241_v40, %v18126_v32  ;;  %v11403_v32 = vld [vmem:[%s20209_s11 + $0x1060] sm:$0xff]  ;;  %v11477_v11 = vld [vmem:[%s20211_s7 + $0xcf0] sm:$0xff]  ;;  %v11472_v40 = vld [vmem:[%s20211_s7 + $0xcc8] sm:$0xff] }
 0x636   : > { %6971 = vmatprep.subr.mxu1 %v12222_v20  ;;  %7219 = vmatprep.subr.mxu0 %v11508_v7  ;;  %v11561_v23 = vld [vmem:[%s20211_s7 + $0xf90] sm:$0xff]  ;;  %v11559_v7 = vld [vmem:[%s20211_s7 + $0xf80] sm:$0xff] }
 0x637   : > { %6972 = vmatpush2.msra.mxu1 %v11409_v53  ;;  %7220 = vmatpush2.msra.mxu0 %v11507_v19  ;;  %v6245_v1 = vpop.f32.mrf.mxu0  ;;  %v11474_v53 = vld [vmem:[%s20211_s7 + $0xcd8] sm:$0xff] }
 0x638   : > { %6973 = vmatprep.subr.mxu1 %v12222_v20  ;;  %7221 = vmatprep.subr.mxu0 %v11505_v43  ;;  %v19217_v21 = vadd.f32 %v6245_v1, %v18146_v59  ;;  %v11558_v19 = vld [vmem:[%s20211_s7 + $0xf78] sm:$0xff]  ;;  %v11556_v43 = vld [vmem:[%s20211_s7 + $0xf68] sm:$0xff] }
 0x639   : > { %6974 = vmatpush2.msra.mxu1 %v11406_v49  ;;  %7222 = vmatpush2.msra.mxu0 %v11504_v39  ;;  %v6247_v36 = vpop.f32.mrf.mxu0  ;;  %v11471_v49 = vld [vmem:[%s20211_s7 + $0xcc0] sm:$0xff]  ;;  %v11518_v1 = vld [vmem:[%s20211_s7 + $0xe38] sm:$0xff] }
 0x63a   : > { %6975 = vmatprep.subr.mxu1 %v12222_v20  ;;  %7223 = vmatprep.subr.mxu0 %v11502_v25  ;;  %v19230_v59 = vadd.f32 %v6247_v36, %v18160_v24  ;;  %v11493_v24 = vld [vmem:[%s20211_s7 + $0xd70] sm:$0xff]  ;;  %v11555_v39 = vld [vmem:[%s20211_s7 + $0xf60] sm:$0xff] }
 0x63b   : > { %6976 = vmatpush2.msra.mxu1 %v11403_v32  ;;  %7224 = vmatpush2.msra.mxu0 %v11501_v27  ;;  %v11553_v25 = vld [vmem:[%s20211_s7 + $0xf50] sm:$0xff]  ;;  %v11552_v32 = vld [vmem:[%s20211_s7 + $0xf48] sm:$0xff]  ;;  %v11470_v27 = vld [vmem:[%s20211_s7 + $0xcb8] sm:$0xff] }
 0x63c   : > { %6977 = vmatprep.subr.mxu1 %v12222_v20  ;;  %7225 = vmatprep.subr.mxu0 %v11499_v50  ;;  %v11550_v50 = vld [vmem:[%s20211_s7 + $0xf38] sm:$0xff]  ;;  %v11515_v36 = vld [vmem:[%s20211_s7 + $0xe20] sm:$0xff] }
 0x63d   : > { %6978 = vmatpush2.msra.mxu1 %v11400_v15  ;;  %7226 = vmatpush2.msra.mxu0 %v11498_v38  ;;  %v11549_v15 = vld [vmem:[%s20211_s7 + $0xf30] sm:$0xff]  ;;  %v11467_v38 = vld [vmem:[%s20211_s7 + $0xca0] sm:$0xff] }
 0x63e   : > { %6979 = vmatprep.subr.mxu1 %v12222_v20  ;;  %7227 = vmatprep.subr.mxu0 %v11496_v13  ;;  %v11547_v13 = vld [vmem:[%s20211_s7 + $0xf20] sm:$0xff] }
 0x63f   : > { %6980 = vmatpush2.msra.mxu1 %v11397_v5  ;;  %7228 = vmatpush2.msra.mxu0 %v11495_v54  ;;  %v11512_v54 = vld [vmem:[%s20211_s7 + $0xe08] sm:$0xff] }
 0x640   : > { %6981 = vmatprep.subr.mxu1 %v12222_v20  ;;  %7229 = vmatprep.subr.mxu0 %v11493_v24  ;;  %v11546_v24 = vld [vmem:[%s20211_s7 + $0xf18] sm:$0xff] }
 0x641   : > { %6982 = vmatpush2.msra.mxu1 %v11394_v62  ;;  %7230 = vmatpush2.msra.mxu0 %v11492_v3  ;;  %v11464_v62 = vld [vmem:[%s20211_s7 + $0xc88] sm:$0xff] }
 0x642   : > { %6983 = vmatprep.subr.mxu1 %v12222_v20  ;;  %7231 = vmatprep.subr.mxu0 %v11490_v48  ;;  %v11544_v48 = vld [vmem:[%s20211_s7 + $0xf08] sm:$0xff] }
 0x643   : > { %6984 = vmatpush2.msra.mxu1 %v11391_v63  ;;  %7232 = vmatpush2.msra.mxu0 %v11489_v60  ;;  %v11509_v63 = vld [vmem:[%s20211_s7 + $0xdf0] sm:$0xff] }
 0x644   : > { %6985 = vmatprep.subr.mxu1 %v12222_v20  ;;  %7233 = vmatprep.subr.mxu0 %v11487_v0  ;;  %v11543_v0 = vld [vmem:[%s20211_s7 + $0xf00] sm:$0xff] }
 0x645   : > { %6986 = vmatpush2.msra.mxu1 %v11388_v31  ;;  %7234 = vmatpush2.msra.mxu0 %v11486_v34  ;;  %v11461_v31 = vld [vmem:[%s20211_s7 + $0xc70] sm:$0xff] }
 0x646   : > { %6987 = vmatprep.subr.mxu1 %v12222_v20  ;;  %7235 = vmatprep.subr.mxu0 %v11484_v4  ;;  %v11541_v34 = vld [vmem:[%s20211_s7 + $0xef0] sm:$0xff]  ;;  %v11506_v4 = vld [vmem:[%s20211_s7 + $0xdd8] sm:$0xff] }
 0x647   : > { %6988 = vmatpush2.msra.mxu1 %v11385_v28  ;;  %7236 = vmatpush2.msra.mxu0 %v11483_v55 }
 0x648   : > { %6990 = vmatmul.mubr.f32.vlgmr.msra.gmra.mxu1 %v18976_v51  ;;  %7237 = vmatprep.subr.mxu0 %v11481_v58  ;;  %v11540_v58 = vld [vmem:[%s20211_s7 + $0xee8] sm:$0xff] }
 0x649   : > { %7258 = vmatprep.subr.mxu1 %v11565_v12  ;;  %11422 = vmatprep.mubr.msk.f32.mxu1 %vm1283_vm1, %v18621_v16  ;;  %v11538_v12 = vld [vmem:[%s20211_s7 + $0xed8] sm:$0xff] }
 0x64a   : > { %7238 = vmatpush2.msra.mxu0 %v11480_v44  ;;  %7259 = vmatpush1.msra.mxu1 %v11564_v47  ;;  %v11537_v47 = vld [vmem:[%s20211_s7 + $0xed0] sm:$0xff] }
 0x64b   : > { %7239 = vmatprep.subr.mxu0 %v11478_v2  ;;  %7260 = vmatprep.subr.mxu1 %v11562_v17  ;;  %v11455_v2 = vld [vmem:[%s20211_s7 + $0xc40] sm:$0xff] }
 0x64c   : > { %7240 = vmatpush2.msra.mxu0 %v11477_v11  ;;  %7261 = vmatpush1.msra.mxu1 %v11561_v23  ;;  %v11535_v11 = vld [vmem:[%s20211_s7 + $0xec0] sm:$0xff]  ;;  %v11500_v23 = vld [vmem:[%s20211_s7 + $0xda8] sm:$0xff] }
 0x64d   : > { %6995 = vmatmul.mubr.f32.gmra.mxu1 %v18963_v10  ;;  %7241 = vmatprep.subr.mxu0 %v11475_v30  ;;  %v11534_v30 = vld [vmem:[%s20211_s7 + $0xeb8] sm:$0xff] }
 0x64e   : > { %7262 = vmatprep.subr.mxu1 %v11559_v7  ;;  %7242 = vmatpush2.msra.mxu0 %v11474_v53  ;;  %v11452_v7 = vld [vmem:[%s20211_s7 + $0xc28] sm:$0xff] }
 0x64f   : > { %7263 = vmatpush1.msra.mxu1 %v11558_v19  ;;  %11603 = vmatprep.mubr.msk.f32.mxu1 %vm1283_vm1, %v18643_v18  ;;  %v11532_v19 = vld [vmem:[%s20211_s7 + $0xea8] sm:$0xff] }
 0x650   : > { %7243 = vmatprep.subr.mxu0 %v11472_v40  ;;  %7264 = vmatprep.subr.mxu1 %v11556_v43  ;;  %v11497_v40 = vld [vmem:[%s20211_s7 + $0xd90] sm:$0xff]  ;;  %v11531_v43 = vld [vmem:[%s20211_s7 + $0xea0] sm:$0xff] }
 0x651   : > { %7244 = vmatpush2.msra.mxu0 %v11471_v49  ;;  %7265 = vmatpush1.msra.mxu1 %v11555_v39  ;;  %v11529_v49 = vld [vmem:[%s20211_s7 + $0xe90] sm:$0xff]  ;;  %v11494_v39 = vld [vmem:[%s20211_s7 + $0xd78] sm:$0xff] }
 0x652   : > { %7246 = vmatmul.mubr.f32.vlgmr.msra.gmra.mxu0 %v18759_v8  ;;  %7266 = vmatprep.subr.mxu1 %v11553_v25  ;;  %v11528_v25 = vld [vmem:[%s20211_s7 + $0xe88] sm:$0xff] }
 0x653   : > { %11852 = vmatprep.subr.mxu0 %v11518_v1  ;;  %7251 = vmatprep.mubr.f32.mxu0 %v18389_v9  ;;  %v11446_v1 = vld [vmem:[%s20211_s7 + $0xbf8] sm:$0xff] }
 0x654   : > { %7267 = vmatpush1.msra.mxu1 %v11552_v32  ;;  %11853 = vmatpush3.msra.mxu0 %v11470_v27  ;;  %v11808_v5 = vpop.f32.mrf.mxu0  ;;  %v11526_v32 = vld [vmem:[%s20211_s7 + $0xe78] sm:$0xff]  ;;  %v11491_v27 = vld [vmem:[%s20211_s7 + $0xd60] sm:$0xff] }
 0x655   : > { %7268 = vmatprep.subr.mxu1 %v11550_v50  ;;  %11854 = vmatprep.subr.mxu0 %v11515_v36  ;;  %v11525_v50 = vld [vmem:[%s20211_s7 + $0xe70] sm:$0xff]  ;;  %v11443_v36 = vld [vmem:[%s20211_s7 + $0xbe0] sm:$0xff] }
 0x656   : > { %7269 = vmatpush1.msra.mxu1 %v11549_v15  ;;  %11855 = vmatpush3.msra.mxu0 %v11467_v38  ;;  %v11809_v3 = vpop.f32.mrf.mxu0  ;;  %v11523_v15 = vld [vmem:[%s20211_s7 + $0xe60] sm:$0xff]  ;;  %v11488_v38 = vld [vmem:[%s20211_s7 + $0xd48] sm:$0xff] }
 0x657   : > { %7252 = vmatmul.mubr.f32.gmra.mxu0 %v18743_v52  ;;  %7270 = vmatprep.subr.mxu1 %v11547_v13  ;;  %v11810_v60 = vadd.f32 %v11809_v3, %v11808_v5  ;;  %v11522_v13 = vld [vmem:[%s20211_s7 + $0xe58] sm:$0xff]  ;;  %v11440_v5 = vld [vmem:[%s20211_s7 + $0xbc8] sm:$0xff] }
 0x658   : > { %11856 = vmatprep.subr.mxu0 %v11512_v54  ;;  %7271 = vmatpush1.msra.mxu1 %v11546_v24  ;;  %v11520_v24 = vld [vmem:[%s20211_s7 + $0xe48] sm:$0xff] }
 0x659   : > { %11857 = vmatpush3.msra.mxu0 %v11464_v62  ;;  %7399 = vmatprep.mubr.f32.mxu0 %v18408_v56  ;;  %v11811_v28 = vpop.f32.mrf.mxu0  ;;  %v19396_v55 = vadd.f32 %v11810_v60, %v18441_v14  ;;  %v11458_v56 = vld [vmem:[%s20211_s7 + $0xc58] sm:$0xff]  ;;  %v11503_v14 = vld [vmem:[%s20211_s7 + $0xdc0] sm:$0xff]  ;;  %v11485_v62 = vld [vmem:[%s20211_s7 + $0xd30] sm:$0xff] }
 0x65a   : > { %7272 = vmatprep.subr.mxu1 %v11544_v48  ;;  %11858 = vmatprep.subr.mxu0 %v11509_v63  ;;  %v11519_v48 = vld [vmem:[%s20211_s7 + $0xe40] sm:$0xff]  ;;  %v11437_v63 = vld [vmem:[%s20211_s7 + $0xbb0] sm:$0xff] }
 0x65b   : > { %7273 = vmatpush1.msra.mxu1 %v11543_v0  ;;  %11859 = vmatpush3.msra.mxu0 %v11461_v31  ;;  %v11812_v44 = vpop.f32.mrf.mxu0  ;;  %v11601_v0 = vld [vmem:[%s20211_s7 + $0x10d0] sm:$0xff] }
 0x65c   : > { %7274 = vmatprep.subr.mxu1 %v11541_v34  ;;  %11860 = vmatprep.subr.mxu0 %v11506_v4  ;;  %v11813_v17 = vadd.f32 %v11812_v44, %v11811_v28  ;;  %v11600_v34 = vld [vmem:[%s20211_s7 + $0x10c8] sm:$0xff]  ;;  %v11434_v4 = vld [vmem:[%s20211_s7 + $0xb98] sm:$0xff]  ;;  %v11595_v44 = vld [vmem:[%s20211_s7 + $0x10a0] sm:$0xff] }
 0x65d   : > { %7275 = vmatpush1.msra.mxu1 %v11540_v58  ;;  %11861 = vmatpush3.msra.mxu0 %v11458_v56  ;;  %v11598_v28 = vld [vmem:[%s20211_s7 + $0x10b8] sm:$0xff]  ;;  %v11597_v56 = vld [vmem:[%s20211_s7 + $0x10b0] sm:$0xff] }
 0x65e   : > { %7276 = vmatprep.subr.mxu1 %v11538_v12  ;;  %11862 = vmatprep.subr.mxu0 %v11503_v14  ;;  %v19429_v53 = vadd.f32 %v11813_v17, %v18471_v45  ;;  %v11449_v45 = vld [vmem:[%s20211_s7 + $0xc10] sm:$0xff]  ;;  %v11431_v12 = vld [vmem:[%s20211_s7 + $0xb80] sm:$0xff]  ;;  %v11594_v17 = vld [vmem:[%s20211_s7 + $0x1098] sm:$0xff] }
 0x65f   : > { %7277 = vmatpush1.msra.mxu1 %v11537_v47  ;;  %11863 = vmatpush3.msra.mxu0 %v11455_v2  ;;  %v11476_v47 = vld [vmem:[%s20211_s7 + $0xce8] sm:$0xff] }
 0x660   : > { %7278 = vmatprep.subr.mxu1 %v11535_v11  ;;  %11864 = vmatprep.subr.mxu0 %v11500_v23  ;;  %v11592_v23 = vld [vmem:[%s20211_s7 + $0x1088] sm:$0xff] }
 0x661   : > { %7279 = vmatpush1.msra.mxu1 %v11534_v30  ;;  %11865 = vmatpush3.msra.mxu0 %v11452_v7  ;;  %v11473_v30 = vld [vmem:[%s20211_s7 + $0xcd0] sm:$0xff]  ;;  %v11591_v7 = vld [vmem:[%s20211_s7 + $0x1080] sm:$0xff] }
 0x662   : > { %7280 = vmatprep.subr.mxu1 %v11532_v19  ;;  %11866 = vmatprep.subr.mxu0 %v11497_v40  ;;  %v11589_v19 = vld [vmem:[%s20211_s7 + $0x1070] sm:$0xff]  ;;  %v11588_v40 = vld [vmem:[%s20211_s7 + $0x1068] sm:$0xff] }
 0x663   : > { %7281 = vmatpush1.msra.mxu1 %v11531_v43  ;;  %11867 = vmatpush3.msra.mxu0 %v11449_v45  ;;  %v11566_v43 = vld [vmem:[%s20211_s7 + $0xfb8] sm:$0xff] }
 0x664   : > { %7282 = vmatprep.subr.mxu1 %v11529_v49  ;;  %11868 = vmatprep.subr.mxu0 %v11494_v39  ;;  %v11586_v45 = vld [vmem:[%s20211_s7 + $0x1058] sm:$0xff]  ;;  %v11585_v49 = vld [vmem:[%s20211_s7 + $0x1050] sm:$0xff]  ;;  %v11563_v39 = vld [vmem:[%s20211_s7 + $0xfa0] sm:$0xff] }
 0x665   : > { %7283 = vmatpush1.msra.mxu1 %v11528_v25  ;;  %11869 = vmatpush3.msra.mxu0 %v11446_v1  ;;  %v11582_v25 = vld [vmem:[%s20211_s7 + $0x1038] sm:$0xff]  ;;  %v11560_v1 = vld [vmem:[%s20211_s7 + $0xf88] sm:$0xff] }
 0x666   : > { %7284 = vmatprep.subr.mxu1 %v11526_v32  ;;  %11870 = vmatprep.subr.mxu0 %v11491_v27  ;;  %v6316_v54 = vpop.f32.mrf.mxu1  ;;  %v11579_v32 = vld [vmem:[%s20211_s7 + $0x1020] sm:$0xff]  ;;  %v11557_v27 = vld [vmem:[%s20211_s7 + $0xf70] sm:$0xff] }
 0x667   : > { %7285 = vmatpush1.msra.mxu1 %v11525_v50  ;;  %11871 = vmatpush3.msra.mxu0 %v11443_v36  ;;  %v19486_v3 = vadd.f32 %v6316_v54, %v19184_v26  ;;  %v11482_v26 = vld [vmem:[%s20211_s7 + $0xd18] sm:$0xff]  ;;  %v11576_v50 = vld [vmem:[%s20211_s7 + $0x1008] sm:$0xff] }
 0x668   : > { %7286 = vmatprep.subr.mxu1 %v11523_v15  ;;  %11872 = vmatprep.subr.mxu0 %v11488_v38  ;;  %v6318_v60 = vpop.f32.mrf.mxu1  ;;  %v11554_v36 = vld [vmem:[%s20211_s7 + $0xf58] sm:$0xff]  ;;  %v11573_v15 = vld [vmem:[%s20211_s7 + $0xff0] sm:$0xff]  ;;  %v11551_v38 = vld [vmem:[%s20211_s7 + $0xf40] sm:$0xff] }
 0x669   : > { %7287 = vmatpush1.msra.mxu1 %v11522_v13  ;;  %11873 = vmatpush3.msra.mxu0 %v11440_v5  ;;  %v19501_v31 = vadd.f32 %v6318_v60, %v19197_v57  ;;  %v11479_v57 = vld [vmem:[%s20211_s7 + $0xd00] sm:$0xff]  ;;  %v11570_v5 = vld [vmem:[%s20211_s7 + $0xfd8] sm:$0xff]  ;;  %v11548_v54 = vld [vmem:[%s20211_s7 + $0xf28] sm:$0xff] }
 0x66a   : > { %7288 = vmatprep.subr.mxu1 %v11520_v24  ;;  %11874 = vmatprep.subr.mxu0 %v11485_v62  ;;  %v11571_v13 = vld [vmem:[%s20211_s7 + $0xfe0] sm:$0xff]  ;;  %v11568_v24 = vld [vmem:[%s20211_s7 + $0xfc8] sm:$0xff] }
 0x66b   : > { %7289 = vmatpush1.msra.mxu1 %v11519_v48  ;;  %11875 = vmatpush3.msra.mxu0 %v11437_v63  ;;  %v6322_v58 = vpop.f32.mrf.mxu1  ;;  %v11567_v62 = vld [vmem:[%s20211_s7 + $0xfc0] sm:$0xff]  ;;  %v11545_v48 = vld [vmem:[%s20211_s7 + $0xf10] sm:$0xff]  ;;  %v11542_v63 = vld [vmem:[%s20211_s7 + $0xef8] sm:$0xff] }
 0x66c   : > { %7298 = vmatprep.subr.mxu1 %v11601_v0  ;;  %11876 = vmatprep.subr.mxu0 %v11482_v26  ;;  %v19522_v14 = vadd.f32 %v6322_v58, %v19217_v21  ;;  %v11428_v21 = vld [vmem:[%s20211_s7 + $0xb68] sm:$0xff]  ;;  %v11539_v60 = vld [vmem:[%s20211_s7 + $0xee0] sm:$0xff]  ;;  %v11533_v26 = vld [vmem:[%s20211_s7 + $0xeb0] sm:$0xff] }
 0x66d   : > { %7299 = vmatpush2.msra.mxu1 %v11600_v34  ;;  %11877 = vmatpush3.msra.mxu0 %v11434_v4  ;;  %v6324_v2 = vpop.f32.mrf.mxu1  ;;  %v11536_v0 = vld [vmem:[%s20211_s7 + $0xec8] sm:$0xff]  ;;  %v11530_v34 = vld [vmem:[%s20211_s7 + $0xe98] sm:$0xff]  ;;  %v11527_v4 = vld [vmem:[%s20211_s7 + $0xe80] sm:$0xff] }
 0x66e   : > { %7300 = vmatprep.subr.mxu1 %v11598_v28  ;;  %11878 = vmatprep.subr.mxu0 %v11479_v57  ;;  %v19537_v11 = vadd.f32 %v6324_v2, %v19230_v59  ;;  %v11425_v59 = vld [vmem:[%s20211_s7 + $0xb50] sm:$0xff]  ;;  %v11524_v28 = vld [vmem:[%s20211_s7 + $0xe68] sm:$0xff] }
 0x66f   : > { %7301 = vmatpush2.msra.mxu1 %v11597_v56  ;;  %11879 = vmatpush3.msra.mxu0 %v11431_v12  ;;  %v11521_v56 = vld [vmem:[%s20211_s7 + $0xe50] sm:$0xff] }
 0x670   : > { %7302 = vmatprep.subr.mxu1 %v11595_v44  ;;  %11880 = vmatprep.subr.mxu0 %v11476_v47  ;;  %v11602_v44 = vld [vmem:[%s20211_s7 + $0x10d8] sm:$0xff] }
 0x671   : > { %7303 = vmatpush2.msra.mxu1 %v11594_v17  ;;  %11881 = vmatpush3.msra.mxu0 %v11428_v21  ;;  %v11596_v21 = vld [vmem:[%s20211_s7 + $0x10a8] sm:$0xff] }
 0x672   : > { %7304 = vmatprep.subr.mxu1 %v11592_v23  ;;  %11882 = vmatprep.subr.mxu0 %v11473_v30  ;;  %v11593_v23 = vld [vmem:[%s20211_s7 + $0x1090] sm:$0xff]  ;;  %v11587_v30 = vld [vmem:[%s20211_s7 + $0x1060] sm:$0xff] }
 0x673   : > { %7305 = vmatpush2.msra.mxu1 %v11591_v7  ;;  %11883 = vmatpush3.msra.mxu0 %v11425_v59  ;;  %v11584_v7 = vld [vmem:[%s20211_s7 + $0x1048] sm:$0xff]  ;;  %v11581_v59 = vld [vmem:[%s20211_s7 + $0x1030] sm:$0xff] }
 0x674   : > { %7306 = vmatprep.subr.mxu1 %v11589_v19  ;;  %7400 = vmatmul.mubr.f32.vlgmr.msra.gmra.mxu0 %v18759_v8  ;;  %v11583_v8 = vld [vmem:[%s20211_s7 + $0x1040] sm:$0xff]  ;;  %v11578_v19 = vld [vmem:[%s20211_s7 + $0x1018] sm:$0xff] }
 0x675   : > { %7410 = vmatprep.subr.mxu0 %v12222_v20  ;;  %7307 = vmatpush2.msra.mxu1 %v11588_v40  ;;  %v11575_v40 = vld [vmem:[%s20211_s7 + $0x1000] sm:$0xff] }
 0x676   : > { %7404 = vmatprep.mubr.f32.mxu0 %v18389_v9  ;;  %7411 = vmatpush1.msra.mxu0 %v11566_v43  ;;  %v11580_v9 = vld [vmem:[%s20211_s7 + $0x1028] sm:$0xff] }
 0x677   : > { %7308 = vmatprep.subr.mxu1 %v11586_v45  ;;  %7412 = vmatprep.subr.mxu0 %v12222_v20  ;;  %v11572_v43 = vld [vmem:[%s20211_s7 + $0xfe8] sm:$0xff]  ;;  %v11569_v45 = vld [vmem:[%s20211_s7 + $0xfd0] sm:$0xff] }
 0x678   : > { %7309 = vmatpush2.msra.mxu1 %v11585_v49  ;;  %7413 = vmatpush1.msra.mxu0 %v11563_v39 }
 0x679   : > { %7310 = vmatprep.subr.mxu1 %v11583_v8  ;;  %7405 = vmatmul.mubr.f32.gmra.mxu0 %v18743_v52  ;;  %v11577_v52 = vld [vmem:[%s20211_s7 + $0x1010] sm:$0xff] }
 0x67a   : > { %7414 = vmatprep.subr.mxu0 %v12222_v20  ;;  %7311 = vmatpush2.msra.mxu1 %v11582_v25 }
 0x67b   : > { %7415 = vmatpush1.msra.mxu0 %v11560_v1  ;;  %11605 = vmatprep.mubr.msk.f32.mxu0 %vm1283_vm1, %v18643_v18  ;;  %v11574_v18 = vld [vmem:[%s20211_s7 + $0xff8] sm:$0xff] }
 0x67c   : > { %7312 = vmatprep.subr.mxu1 %v11580_v9  ;;  %7416 = vmatprep.subr.mxu0 %v12222_v20 }
 0x67d   : > { %7313 = vmatpush2.msra.mxu1 %v11579_v32  ;;  %7417 = vmatpush1.msra.mxu0 %v11557_v27 }
 0x67e   : > { %7314 = vmatprep.subr.mxu1 %v11577_v52  ;;  %7418 = vmatprep.subr.mxu0 %v12222_v20 }
 0x67f   : > { %7315 = vmatpush2.msra.mxu1 %v11576_v50  ;;  %7419 = vmatpush1.msra.mxu0 %v11554_v36 }
 0x680   : > { %7316 = vmatprep.subr.mxu1 %v11574_v18  ;;  %7420 = vmatprep.subr.mxu0 %v12222_v20 }
 0x681   : > { %7317 = vmatpush2.msra.mxu1 %v11573_v15  ;;  %7421 = vmatpush1.msra.mxu0 %v11551_v38 }
 0x682   : > { %7318 = vmatprep.subr.mxu1 %v11571_v13  ;;  %7422 = vmatprep.subr.mxu0 %v12222_v20 }
 0x683   : > { %7319 = vmatpush2.msra.mxu1 %v11570_v5  ;;  %7423 = vmatpush1.msra.mxu0 %v11548_v54 }
 0x684   : > { %7320 = vmatprep.subr.mxu1 %v11568_v24  ;;  %7424 = vmatprep.subr.mxu0 %v12222_v20 }
 0x685   : > { %7321 = vmatpush2.msra.mxu1 %v11567_v62  ;;  %7425 = vmatpush1.msra.mxu0 %v11545_v48 }
 0x686   : > { %7323 = vmatmul.mubr.f32.vlgmr.msra.gmra.mxu1 %v18976_v51  ;;  %7426 = vmatprep.subr.mxu0 %v12222_v20 }
 0x687   : > { %11604 = vmatprep.mubr.msk.f32.mxu1 %vm1283_vm1, %v18621_v16  ;;  %7427 = vmatpush1.msra.mxu0 %v11542_v63 }
 0x688   : > { %7428 = vmatprep.subr.mxu0 %v12222_v20 }
 0x689   : > { %7429 = vmatpush1.msra.mxu0 %v11539_v60 }
 0x68a   : > { %7329 = vmatmul.mubr.f32.gmra.mxu1 %v18963_v10  ;;  %7430 = vmatprep.subr.mxu0 %v12222_v20 }
 0x68b   : > { %7431 = vmatpush1.msra.mxu0 %v11536_v0  ;;  %7582 = vmatprep.mubr.f32.mxu1 %v12222_v20 }
 0x68c   : > { %7432 = vmatprep.subr.mxu0 %v12222_v20 }
 0x68d   : > { %7433 = vmatpush1.msra.mxu0 %v11533_v26 }
 0x68e   : > { %7434 = vmatprep.subr.mxu0 %v12222_v20 }
 0x68f   : > { %7435 = vmatpush1.msra.mxu0 %v11530_v34 }
 0x690   : > { %7436 = vmatprep.subr.mxu0 %v12222_v20  ;;  %v6468_v57 = vpop.f32.mrf.mxu0 }
 0x691   : > { %7437 = vmatpush1.msra.mxu0 %v11527_v4  ;;  %v19669_v58 = vadd.f32 %v6468_v57, %v19396_v55  ;;  %v11599_v55 = vld [vmem:[%s20211_s7 + $0x10c0] sm:$0xff]  ;;  %v8127_v4 = vld [vmem:[#allocation7 + $0x5f8] sm:$0xff] }
 0x692   : > { %7438 = vmatprep.subr.mxu0 %v12222_v20  ;;  %v6470_v12 = vpop.f32.mrf.mxu0  ;;  %v8125_v57 = vld [vmem:[#allocation7 + $0x5e8] sm:$0xff] }
 0x693   : > { %7439 = vmatpush1.msra.mxu0 %v11524_v28  ;;  %v8126_v28 = vld [vmem:[#allocation7 + $0x5f0] sm:$0xff] }
 0x694   : > { %7440 = vmatprep.subr.mxu0 %v12222_v20 }
 0x695   : > { %7441 = vmatpush1.msra.mxu0 %v11521_v56  ;;  %v6473_v47 = vpop.f32.mrf.mxu0 }
 0x696   : > { %7450 = vmatprep.subr.mxu0 %v12222_v20  ;;  %v19684_v2 = vadd.f32 %v6473_v47, %v19429_v53  ;;  %v11590_v53 = vld [vmem:[%s20211_s7 + $0x1078] sm:$0xff]  ;;  %s12148_s7 = scalar_lea.vmem %s9897_s30, 16 }
 0x697   : > { %7451 = vmatpush2.msra.mxu0 %v11602_v44  ;;  %v6475_v17 = vpop.f32.mrf.mxu0  ;;  %p12149_p10 = scmp.ne.s32.totalorder %s9897_s30, %s12148_s7  ;;  %p12156_p0 = scmp.lt.s32.totalorder %s12154_s2, %s12148_s7 }
 0x698   : > { %7452 = vmatprep.subr.mxu0 %v12222_v20 }
 0x699   : > { %7453 = vmatpush2.msra.mxu0 %v11599_v55  ;;  %p12150_p12 = pnand %p12149_p10, %p12378_p5  ;;  %p12157_p1 = por %p12156_p0, %p12155_p11 }
 0x69a   : > { %7454 = vmatprep.subr.mxu0 %v12222_v20 }
 0x69b   : > { %7455 = vmatpush2.msra.mxu0 %v11596_v21  ;;  %p12151_p8 = pneg %p12150_p12 }
 0x69c   : > { %7456 = vmatprep.subr.mxu0 %v12222_v20 }
 0x69d   : > { %7457 = vmatpush2.msra.mxu0 %v11593_v23  ;;  %p12158_p3 = pnand %p12157_p1, %p12151_p8 }
 0x69e   : > { %7458 = vmatprep.subr.mxu0 %v12222_v20 }
 0x69f   : > { %7459 = vmatpush2.msra.mxu0 %v11590_v53 }
 0x6a0   : > { %7460 = vmatprep.subr.mxu0 %v12222_v20 }
 0x6a1   : > { %7461 = vmatpush2.msra.mxu0 %v11587_v30 }
 0x6a2   : > { %7462 = vmatprep.subr.mxu0 %v12222_v20 }
 0x6a3   : > { %7463 = vmatpush2.msra.mxu0 %v11584_v7 }
 0x6a4   : > { %7464 = vmatprep.subr.mxu0 %v12222_v20 }
 0x6a5   : > { %7465 = vmatpush2.msra.mxu0 %v11581_v59 }
 0x6a6   : > { %7466 = vmatprep.subr.mxu0 %v12222_v20 }
 0x6a7   : > { %7467 = vmatpush2.msra.mxu0 %v11578_v19 }
 0x6a8   : > { %7468 = vmatprep.subr.mxu0 %v12222_v20 }
 0x6a9   : > { %7469 = vmatpush2.msra.mxu0 %v11575_v40 }
 0x6aa   : > { %7470 = vmatprep.subr.mxu0 %v12222_v20  ;;  %v6762_v49 = vpop.f32.mrf.mxu1 }
 0x6ab   : > { %7471 = vmatpush2.msra.mxu0 %v11572_v43 }
 0x6ac   : > { %7472 = vmatprep.subr.mxu0 %v12222_v20  ;;  %v6764_v39 = vpop.f32.mrf.mxu1 }
 0x6ad   : > { %7473 = vmatpush2.msra.mxu0 %v11569_v45 }
 0x6ae   : > { %7475 = vmatmul.mubr.f32.vlgmr.msra.gmra.mxu0 %v18976_v51  ;;  %8208 = vmatprep.subr.mxu0 %v8127_v4  ;;  %v8046_v4 = vld [vmem:[#allocation7 + $0x370] sm:$0xff] }
 0x6af   : > { %11606 = vmatprep.mubr.msk.f32.mxu0 %vm1283_vm1, %v18621_v16  ;;  %v6768_v8 = vpop.f32.mrf.mxu1  ;;  %8209 = vmatpush1.msra.mxu0 %v8126_v28  ;;  %v8045_v28 = vld [vmem:[#allocation7 + $0x368] sm:$0xff] }
 0x6b0   : > { %8210 = vmatprep.subr.mxu0 %v8125_v57  ;;  %v8044_v57 = vld [vmem:[#allocation7 + $0x360] sm:$0xff] }
 0x6b1   : > { %v6770_v25 = vpop.f32.mrf.mxu1 }
 0x6b2   : > { %7480 = vmatmul.mubr.f32.gmra.mxu0 %v18963_v10 }
 0x6b3   : > { %8272 = vmatprep.mubr.f32.mxu0 %v12222_v20 }
 0x6cc   : > { %v6839_v1 = vpop.f32.mrf.mxu0  ;;  %v11846_v9 = vpop.f32.mrf.mxu1 }
 0x6cd   : > { %v6840_v32 = vadd.f32 %v6839_v1, %v6762_v49 }
 0x6ce   : > { %v6841_v27 = vpop.f32.mrf.mxu0  ;;  %v11847_v52 = vpop.f32.mrf.mxu1 }
 0x6cf   : > { %v7485_v50 = vadd.f32 %v6840_v32, %v18791_v61  ;;  %v6842_v36 = vadd.f32 %v6841_v27, %v6764_v39  ;;  %v11848_v51 = vadd.f32 %v11847_v52, %v11846_v9 }
 0x6d1   : > { %v7486_v18 = vadd.f32 %v6842_v36, %v18804_v6 }
 0x6d2   : > { %v6845_v16 = vpop.f32.mrf.mxu0  ;;  %v11849_v15 = vpop.f32.mrf.mxu1 }
 0x6d3   : > { %v6846_v10 = vadd.f32 %v6845_v16, %v6768_v8 }
 0x6d4   : > { %v6847_v38 = vpop.f32.mrf.mxu0  ;;  %v11850_v13 = vpop.f32.mrf.mxu1 }
 0x6d5   : > { %v7488_v5 = vadd.f32 %v6846_v10, %v18835_v42  ;;  %v6848_v54 = vadd.f32 %v6847_v38, %v6770_v25  ;;  %v11851_v24 = vadd.f32 %v11850_v13, %v11849_v15  ;;  %v8124_v42 = vld [vmem:[#allocation7 + $0x5e0] sm:$0xff]  ;;  %v8062_v15 = vld [vmem:[#allocation7 + $0x3f0] sm:$0xff]  ;;  %v8061_v10 = vld [vmem:[#allocation7 + $0x3e8] sm:$0xff] }
 0x6d6   : > { %8211 = vmatpush1.msra.mxu0 %v8124_v42  ;;  %v8060_v38 = vld [vmem:[#allocation7 + $0x3e0] sm:$0xff]  ;;  %v8059_v13 = vld [vmem:[#allocation7 + $0x3d8] sm:$0xff] }
 0x6d7   : > { %v7489_v62 = vadd.f32 %v6848_v54, %v18850_v46  ;;  %v8057_v54 = vld [vmem:[#allocation7 + $0x3c8] sm:$0xff]  ;;  %v8043_v42 = vld [vmem:[#allocation7 + $0x358] sm:$0xff] }
 0x708   : > { %v6991_v48 = vpop.f32.mrf.mxu1 }
 0x709   : > { %v6992_v63 = vadd.f32 %v11848_v51, %v6991_v48  ;;  %v8054_v48 = vld [vmem:[#allocation7 + $0x3b0] sm:$0xff] }
 0x70a   : > { %v6993_v60 = vpop.f32.mrf.mxu1 }
 0x70b   : > { %v7487_v61 = vadd.f32 %v6992_v63, %v19128_v29  ;;  %v8053_v63 = vld [vmem:[#allocation7 + $0x3a8] sm:$0xff]  ;;  %v8052_v60 = vld [vmem:[#allocation7 + $0x3a0] sm:$0xff] }
 0x70d   : > { %v6996_v0 = vpop.f32.mrf.mxu1 }
 0x70e   : > { %v6997_v26 = vadd.f32 %v11851_v24, %v6996_v0  ;;  %v8056_v24 = vld [vmem:[#allocation7 + $0x3c0] sm:$0xff]  ;;  %v8050_v0 = vld [vmem:[#allocation7 + $0x390] sm:$0xff] }
 0x70f   : > { %v6998_v34 = vpop.f32.mrf.mxu1 }
 0x710   : > { %v7490_v6 = vadd.f32 %v6997_v26, %v19158_v37  ;;  %v8049_v26 = vld [vmem:[#allocation7 + $0x388] sm:$0xff]  ;;  %v8048_v34 = vld [vmem:[#allocation7 + $0x380] sm:$0xff] }
 0x712   : > { %v7247_v56 = vpop.f32.mrf.mxu0 }
 0x714   : > { %v7249_v46 = vpop.f32.mrf.mxu0 }
 0x717   : > { %v7253_v47 = vpop.f32.mrf.mxu0 }
 0x719   : > { %v7255_v30 = vpop.f32.mrf.mxu0 }
 0x746   : > { %v7324_v12 = vpop.f32.mrf.mxu1 }
 0x747   : > { %v7325_v44 = vadd.f32 %v7324_v12, %v7247_v56  ;;  %v8042_v56 = vld [vmem:[#allocation7 + $0x350] sm:$0xff]  ;;  %v8123_v12 = vld [vmem:[#allocation7 + $0x5d8] sm:$0xff] }
 0x748   : > { %v7326_v55 = vpop.f32.mrf.mxu1  ;;  %8212 = vmatprep.subr.mxu0 %v8123_v12  ;;  %v8101_v12 = vld [vmem:[#allocation7 + $0x528] sm:$0xff] }
 0x749   : > { %v7491_v29 = vadd.f32 %v7325_v44, %v19486_v3  ;;  %v7327_v17 = vadd.f32 %v7326_v55, %v7249_v46  ;;  %v7503_v3 = vld [vmem:[%s20148_s9] sm:$0x3f]  ;;  %v8039_v55 = vld [vmem:[#allocation7 + $0x338] sm:$0xff] }
 0x74a   : > { %v7330_v21 = vpop.f32.mrf.mxu1  ;;  %v8041_v46 = vld [vmem:[#allocation7 + $0x348] sm:$0xff]  ;;  %v8040_v44 = vld [vmem:[#allocation7 + $0x340] sm:$0xff] }
 0x74b   : > { %v7497_v23 = vmax.f32 %v7485_v50, %v7491_v29  ;;  %v7492_v37 = vadd.f32 %v7327_v17, %v19501_v31  ;;  %v7331_v53 = vadd.f32 %v7330_v21, %v7253_v47  ;;  %v11884_v31 = vpop.f32.mrf.mxu0  ;;  %v8122_v47 = vld [vmem:[#allocation7 + $0x5d0] sm:$0xff]  ;;  %v8121_v29 = vld [vmem:[#allocation7 + $0x5c8] sm:$0xff]  ;;  %v8120_v21 = vld [vmem:[#allocation7 + $0x5c0] sm:$0xff] }
 0x74c   : > { %v7332_v7 = vpop.f32.mrf.mxu1  ;;  %8213 = vmatpush1.msra.mxu0 %v8122_v47  ;;  %v8038_v17 = vld [vmem:[#allocation7 + $0x330] sm:$0xff]  ;;  %v8100_v47 = vld [vmem:[#allocation7 + $0x520] sm:$0xff] }
 0x74d   : > { %v7494_v59 = vadd.f32 %v7331_v53, %v19522_v14  ;;  %v7333_v19 = vadd.f32 %v7332_v7, %v7255_v30  ;;  %v7498_v40 = vmax.f32 %v7486_v18, %v7492_v37  ;;  %v11885_v14 = vpop.f32.mrf.mxu0  ;;  %8214 = vmatprep.subr.mxu0 %v8121_v29  ;;  %v8036_v37 = vld [vmem:[#allocation7 + $0x320] sm:$0xff]  ;;  %v8035_v53 = vld [vmem:[#allocation7 + $0x318] sm:$0xff]  ;;  %v8034_v30 = vld [vmem:[#allocation7 + $0x310] sm:$0xff] }
 0x74e   : > { %v11886_v8 = vadd.f32 %v11885_v14, %v11884_v31  ;;  %8215 = vmatpush1.msra.mxu0 %v8120_v21  ;;  %v8033_v7 = vld [vmem:[#allocation7 + $0x308] sm:$0xff]  ;;  %v8088_v14 = vld [vmem:[#allocation7 + $0x4c0] sm:$0xff]  ;;  %v8099_v29 = vld [vmem:[#allocation7 + $0x518] sm:$0xff] }
 0x74f   : > { %v7500_v43 = vmax.f32 %v7488_v5, %v7494_v59  ;;  %v7495_v45 = vadd.f32 %v7333_v19, %v19537_v11  ;;  %v11887_v11 = vpop.f32.mrf.mxu0  ;;  %v8058_v5 = vld [vmem:[#allocation7 + $0x3d0] sm:$0xff]  ;;  %v8032_v59 = vld [vmem:[#allocation7 + $0x300] sm:$0xff]  ;;  %v8095_v19 = vld [vmem:[#allocation7 + $0x4f8] sm:$0xff] }
 0x750   : > { %v8089_v31 = vld [vmem:[#allocation7 + $0x4c8] sm:$0xff]  ;;  %v8098_v21 = vld [vmem:[#allocation7 + $0x510] sm:$0xff] }
 0x751   : > { %v7501_v49 = vmax.f32 %v7489_v62, %v7495_v45  ;;  %v11888_v39 = vpop.f32.mrf.mxu0  ;;  %v8055_v62 = vld [vmem:[#allocation7 + $0x3b8] sm:$0xff]  ;;  %v8092_v45 = vld [vmem:[#allocation7 + $0x4e0] sm:$0xff] }
 0x752   : > { %v11889_v32 = vadd.f32 %v11888_v39, %v11887_v11  ;;  %v8087_v11 = vld [vmem:[#allocation7 + $0x4b8] sm:$0xff]  ;;  %v8086_v39 = vld [vmem:[#allocation7 + $0x4b0] sm:$0xff] }
 0x753   : > { %11607 = vmatprep.subr.msk.mxu1 %vm7508_vm7, %v7501_v49 }
 0x754   : > { %11608 = vmatpush1.msk.msra.mxu1 %vm7508_vm7, %v7500_v43 }
 0x755   : > { %7548 = vmatprep.subr.mxu1 %v7498_v40 }
 0x756   : > { %7549 = vmatpush1.msra.mxu1 %v7497_v23 }
 0x757   : > { %11609 = vmatmul.mubr.msk.f32.vlgmr.msra.gmra.mxu1 %vm7504_vm8, %v7503_v3  ;;  %11980 = vmatprep.subr.mxu1 %v12222_v20 }
 0x758   : > { %11984 = vmatprep.mubr.msk.f32.mxu1 %vm12223_vm9, %v12222_v20 }
 0x76e   : > { %v7476_v25 = vpop.f32.mrf.mxu0 }
 0x76f   : > { %v7477_v1 = vadd.f32 %v11886_v8, %v7476_v25  ;;  %v8119_v8 = vld [vmem:[#allocation7 + $0x5b8] sm:$0xff]  ;;  %v8085_v25 = vld [vmem:[#allocation7 + $0x4a8] sm:$0xff] }
 0x770   : > { %v7478_v9 = vpop.f32.mrf.mxu0  ;;  %8216 = vmatprep.subr.mxu0 %v8119_v8 }
 0x771   : > { %v7493_v27 = vadd.f32 %v7477_v1, %v19669_v58  ;;  %v7659_v58 = vld [vmem:[%s20149_s10] sm:$0x3f]  ;;  %v8118_v1 = vld [vmem:[#allocation7 + $0x5b0] sm:$0xff] }
 0x772   : > { %v7481_v52 = vpop.f32.mrf.mxu0  ;;  %8217 = vmatpush1.msra.mxu0 %v8118_v1  ;;  %v8084_v9 = vld [vmem:[#allocation7 + $0x4a0] sm:$0xff] }
 0x773   : > { %v7499_v50 = vmax.f32 %v7487_v61, %v7493_v27  ;;  %v7482_v36 = vadd.f32 %v11889_v32, %v7481_v52  ;;  %v8051_v61 = vld [vmem:[#allocation7 + $0x398] sm:$0xff]  ;;  %v8117_v32 = vld [vmem:[#allocation7 + $0x5a8] sm:$0xff]  ;;  %v8116_v52 = vld [vmem:[#allocation7 + $0x5a0] sm:$0xff] }
 0x774   : > { %v7483_v51 = vpop.f32.mrf.mxu0  ;;  %8218 = vmatprep.subr.mxu0 %v8117_v32  ;;  %v8083_v27 = vld [vmem:[#allocation7 + $0x498] sm:$0xff] }
 0x775   : > { %v7496_v18 = vadd.f32 %v7482_v36, %v19684_v2  ;;  %v8063_v2 = vld [vmem:[#allocation7 + $0x3f8] sm:$0xff]  ;;  %8219 = vmatpush1.msra.mxu0 %v8116_v52  ;;  %v8081_v51 = vld [vmem:[#allocation7 + $0x488] sm:$0xff] }
 0x776   : > { %v8115_v36 = vld [vmem:[#allocation7 + $0x598] sm:$0xff] }
 0x777   : > { %v7502_v16 = vmax.f32 %v7490_v6, %v7496_v18  ;;  %v8047_v6 = vld [vmem:[#allocation7 + $0x378] sm:$0xff]  ;;  %8220 = vmatprep.subr.mxu0 %v8115_v36  ;;  %v8114_v18 = vld [vmem:[#allocation7 + $0x590] sm:$0xff] }
 0x778   : > { %8221 = vmatpush1.msra.mxu0 %v8114_v18 }
 0x779   : > { %11981 = vmatpush3.msk.msra.mxu1 %vm7508_vm7, %v7502_v16 }
 0x77a   : > { %11982 = vmatprep.subr.mxu1 %v12222_v20 }
 0x77b   : > { %11983 = vmatpush3.msra.mxu1 %v7499_v50 }
 0x77c   : > { %11985 = vmatmul.mubr.msk.f32.vlgmr.msra.gmra.mxu1 %vm7504_vm8, %v7503_v3  ;;  %11612 = vmatprep.subr.msk.mxu1 %vm7508_vm7, %v7501_v49  ;;  %v8091_v49 = vld [vmem:[#allocation7 + $0x4d8] sm:$0xff]  ;;  %v8090_v3 = vld [vmem:[#allocation7 + $0x4d0] sm:$0xff] }
 0x77d   : > { %11613 = vmatpush1.msk.msra.mxu1 %vm7508_vm7, %v7500_v43  ;;  %7727 = vmatprep.mubr.f32.mxu1 %v12222_v20  ;;  %v8093_v43 = vld [vmem:[#allocation7 + $0x4e8] sm:$0xff] }
 0x77e   : > { %7693 = vmatprep.subr.mxu1 %v7498_v40  ;;  %v8094_v40 = vld [vmem:[#allocation7 + $0x4f0] sm:$0xff] }
 0x77f   : > { %7694 = vmatpush1.msra.mxu1 %v7497_v23  ;;  %v8037_v23 = vld [vmem:[#allocation7 + $0x328] sm:$0xff] }
 0x780   : > { %11614 = vmatmul.mubr.msk.f32.vlgmr.msra.gmra.mxu1 %vm7504_vm8, %v7659_v58  ;;  %11987 = vmatprep.subr.mxu1 %v12222_v20 }
 0x781   : > { %11988 = vmatpush3.msk.msra.mxu1 %vm7508_vm7, %v7502_v16  ;;  %11991 = vmatprep.mubr.msk.f32.mxu1 %vm12223_vm9, %v12222_v20  ;;  %v8080_v16 = vld [vmem:[#allocation7 + $0x480] sm:$0xff] }
 0x782   : > { %11989 = vmatprep.subr.mxu1 %v12222_v20 }
 0x783   : > { %11990 = vmatpush3.msra.mxu1 %v7499_v50  ;;  %v8082_v50 = vld [vmem:[#allocation7 + $0x490] sm:$0xff] }
 0x784   : > { %11992 = vmatmul.mubr.msk.f32.vlgmr.msra.gmra.mxu1 %vm7504_vm8, %v7659_v58  ;;  %8137 = vmatprep.subr.mxu1 %v8063_v2  ;;  %v8113_v58 = vld [vmem:[#allocation7 + $0x588] sm:$0xff]  ;;  %v8079_v2 = vld [vmem:[#allocation7 + $0x478] sm:$0xff] }
 0x785   : > { %8138 = vmatpush1.msra.mxu1 %v8062_v15  ;;  %8222 = vmatprep.subr.mxu0 %v8113_v58  ;;  %v8112_v15 = vld [vmem:[#allocation7 + $0x580] sm:$0xff] }
 0x786   : > { %8139 = vmatprep.subr.mxu1 %v8061_v10  ;;  %8223 = vmatpush1.msra.mxu0 %v8112_v15  ;;  %v8078_v10 = vld [vmem:[#allocation7 + $0x470] sm:$0xff] }
 0x787   : > { %8140 = vmatpush1.msra.mxu1 %v8060_v38  ;;  %v8111_v38 = vld [vmem:[#allocation7 + $0x578] sm:$0xff]  ;;  %v8374_v15 = vld [vmem:[#allocation10 + $0x5f0] sm:$0xff] }
 0x788   : > { %8141 = vmatprep.subr.mxu1 %v8059_v13  ;;  %8224 = vmatprep.subr.mxu0 %v8111_v38  ;;  %v8077_v13 = vld [vmem:[#allocation7 + $0x468] sm:$0xff] }
 0x789   : > { %8142 = vmatpush1.msra.mxu1 %v8058_v5  ;;  %v8110_v5 = vld [vmem:[#allocation7 + $0x570] sm:$0xff]  ;;  %v8373_v38 = vld [vmem:[#allocation10 + $0x5e8] sm:$0xff] }
 0x78a   : > { %8143 = vmatprep.subr.mxu1 %v8057_v54  ;;  %8225 = vmatpush1.msra.mxu0 %v8110_v5  ;;  %v8076_v54 = vld [vmem:[#allocation7 + $0x460] sm:$0xff] }
 0x78b   : > { %8144 = vmatpush1.msra.mxu1 %v8056_v24  ;;  %v8109_v24 = vld [vmem:[#allocation7 + $0x568] sm:$0xff]  ;;  %v8372_v5 = vld [vmem:[#allocation10 + $0x5e0] sm:$0xff] }
 0x78c   : > { %8145 = vmatprep.subr.mxu1 %v8055_v62  ;;  %8226 = vmatprep.subr.mxu0 %v8109_v24  ;;  %v8075_v62 = vld [vmem:[#allocation7 + $0x458] sm:$0xff] }
 0x78d   : > { %8146 = vmatpush1.msra.mxu1 %v8054_v48  ;;  %v8108_v48 = vld [vmem:[#allocation7 + $0x560] sm:$0xff]  ;;  %v8371_v24 = vld [vmem:[#allocation10 + $0x5d8] sm:$0xff] }
 0x78e   : > { %8147 = vmatprep.subr.mxu1 %v8053_v63  ;;  %8227 = vmatpush1.msra.mxu0 %v8108_v48  ;;  %v8074_v63 = vld [vmem:[#allocation7 + $0x450] sm:$0xff] }
 0x78f   : > { %8148 = vmatpush1.msra.mxu1 %v8052_v60  ;;  %v8107_v60 = vld [vmem:[#allocation7 + $0x558] sm:$0xff]  ;;  %v8370_v48 = vld [vmem:[#allocation10 + $0x5d0] sm:$0xff] }
 0x790   : > { %8149 = vmatprep.subr.mxu1 %v8051_v61  ;;  %8228 = vmatprep.subr.mxu0 %v8107_v60  ;;  %v8073_v61 = vld [vmem:[#allocation7 + $0x448] sm:$0xff] }
 0x791   : > { %8150 = vmatpush1.msra.mxu1 %v8050_v0  ;;  %v8106_v0 = vld [vmem:[#allocation7 + $0x550] sm:$0xff]  ;;  %v8369_v60 = vld [vmem:[#allocation10 + $0x5c8] sm:$0xff] }
 0x792   : > { %8151 = vmatprep.subr.mxu1 %v8049_v26  ;;  %8229 = vmatpush1.msra.mxu0 %v8106_v0  ;;  %v8072_v26 = vld [vmem:[#allocation7 + $0x440] sm:$0xff] }
 0x793   : > { %8152 = vmatpush1.msra.mxu1 %v8048_v34  ;;  %v8105_v34 = vld [vmem:[#allocation7 + $0x548] sm:$0xff]  ;;  %v8368_v0 = vld [vmem:[#allocation10 + $0x5c0] sm:$0xff] }
 0x794   : > { %8153 = vmatprep.subr.mxu1 %v8047_v6  ;;  %8230 = vmatprep.subr.mxu0 %v8105_v34  ;;  %v8071_v6 = vld [vmem:[#allocation7 + $0x438] sm:$0xff] }
 0x795   : > { %8154 = vmatpush1.msra.mxu1 %v8046_v4  ;;  %v8104_v4 = vld [vmem:[#allocation7 + $0x540] sm:$0xff]  ;;  %v8367_v34 = vld [vmem:[#allocation10 + $0x5b8] sm:$0xff] }
 0x796   : > { %8155 = vmatprep.subr.mxu1 %v8045_v28  ;;  %8231 = vmatpush1.msra.mxu0 %v8104_v4  ;;  %v8070_v28 = vld [vmem:[#allocation7 + $0x430] sm:$0xff] }
 0x797   : > { %8156 = vmatpush1.msra.mxu1 %v8044_v57  ;;  %v8103_v57 = vld [vmem:[#allocation7 + $0x538] sm:$0xff]  ;;  %v8366_v4 = vld [vmem:[#allocation10 + $0x5b0] sm:$0xff] }
 0x798   : > { %8157 = vmatprep.subr.mxu1 %v8043_v42  ;;  %v8069_v42 = vld [vmem:[#allocation7 + $0x428] sm:$0xff]  ;;  %8232 = vmatprep.subr.mxu0 %v8103_v57 }
 0x799   : > { %8158 = vmatpush1.msra.mxu1 %v8042_v56  ;;  %v8102_v56 = vld [vmem:[#allocation7 + $0x530] sm:$0xff]  ;;  %v8365_v57 = vld [vmem:[#allocation10 + $0x5a8] sm:$0xff] }
 0x79a   : > { %8159 = vmatprep.subr.mxu1 %v8041_v46  ;;  %v8068_v46 = vld [vmem:[#allocation7 + $0x420] sm:$0xff]  ;;  %8233 = vmatpush1.msra.mxu0 %v8102_v56 }
 0x79b   : > { %8160 = vmatpush1.msra.mxu1 %v8040_v44  ;;  %v8067_v44 = vld [vmem:[#allocation7 + $0x418] sm:$0xff]  ;;  %8234 = vmatprep.subr.mxu0 %v8101_v12  ;;  %v8364_v56 = vld [vmem:[#allocation10 + $0x5a0] sm:$0xff] }
 0x79c   : > { %8161 = vmatprep.subr.mxu1 %v8039_v55  ;;  %v8066_v55 = vld [vmem:[#allocation7 + $0x410] sm:$0xff]  ;;  %8235 = vmatpush1.msra.mxu0 %v8100_v47  ;;  %v8363_v12 = vld [vmem:[#allocation10 + $0x598] sm:$0xff] }
 0x79d   : > { %8162 = vmatpush1.msra.mxu1 %v8038_v17  ;;  %v8065_v17 = vld [vmem:[#allocation7 + $0x408] sm:$0xff]  ;;  %8236 = vmatprep.subr.mxu0 %v8099_v29  ;;  %v8362_v47 = vld [vmem:[#allocation10 + $0x590] sm:$0xff] }
 0x79e   : > { %8163 = vmatprep.subr.mxu1 %v8037_v23  ;;  %v8064_v23 = vld [vmem:[#allocation7 + $0x400] sm:$0xff]  ;;  %8237 = vmatpush1.msra.mxu0 %v8098_v21  ;;  %v8361_v29 = vld [vmem:[#allocation10 + $0x588] sm:$0xff] }
 0x79f   : > { %8164 = vmatpush1.msra.mxu1 %v8036_v37  ;;  %v8097_v37 = vld [vmem:[#allocation7 + $0x508] sm:$0xff]  ;;  %v8360_v21 = vld [vmem:[#allocation10 + $0x580] sm:$0xff] }
 0x7a0   : > { %8165 = vmatprep.subr.mxu1 %v8035_v53  ;;  %8238 = vmatprep.subr.mxu0 %v8097_v37  ;;  %v8096_v53 = vld [vmem:[#allocation7 + $0x500] sm:$0xff]  ;;  %v8359_v37 = vld [vmem:[#allocation10 + $0x578] sm:$0xff] }
 0x7a1   : > { %8166 = vmatpush1.msra.mxu1 %v8034_v30  ;;  %v8375_v30 = vld [vmem:[#allocation10 + $0x5f8] sm:$0xff]  ;;  %8239 = vmatpush1.msra.mxu0 %v8096_v53 }
 0x7a2   : > { %8167 = vmatprep.subr.mxu1 %v8033_v7  ;;  %v8311_v7 = vld [vmem:[#allocation10 + $0x3f8] sm:$0xff] }
 0x7a3   : > { %8168 = vmatpush1.msra.mxu1 %v8032_v59  ;;  %8376 = vmatprep.subr.mxu0 %v8311_v7  ;;  %v8295_v53 = vld [vmem:[#allocation10 + $0x378] sm:$0xff]  ;;  %v8294_v7 = vld [vmem:[#allocation10 + $0x370] sm:$0xff] }
 0x7a4   : > { %8169 = vmatprep.subr.mxu1 %v8095_v19 }
 0x7a5   : > { %8170 = vmatpush2.msra.mxu1 %v8094_v40 }
 0x7a6   : > { %8171 = vmatprep.subr.mxu1 %v8093_v43  ;;  %v7807_v43 = vld [vmem:[%s20212_s8] sm:$0x7] }
 0x7a7   : > { %8172 = vmatpush2.msra.mxu1 %v8092_v45 }
 0x7a8   : > { %8173 = vmatprep.subr.mxu1 %v8091_v49  ;;  %v7812_v49 = vrot.slane %v7807_v43, %v16387_v41 }
 0x7a9   : > { %8174 = vmatpush2.msra.mxu1 %v8090_v3 }
 0x7aa   : > { %8175 = vmatprep.subr.mxu1 %v8089_v31 }
 0x7ab   : > { %8176 = vmatpush2.msra.mxu1 %v8088_v14  ;;  %v7816_v14 = vrot.slane %v7807_v43, %v16394_v22 }
 0x7ac   : > { %8177 = vmatprep.subr.mxu1 %v8087_v11 }
 0x7ad   : > { %8178 = vmatpush2.msra.mxu1 %v8086_v39 }
 0x7ae   : > { %8179 = vmatprep.subr.mxu1 %v8085_v25  ;;  %v7820_v25 = vrot.slane %v7807_v43, %v4452_v35  ;;  %v8292_v43 = vld [vmem:[#allocation10 + $0x360] sm:$0xff] }
 0x7af   : > { %8180 = vmatpush2.msra.mxu1 %v8084_v9 }
 0x7b0   : > { %8181 = vmatprep.subr.mxu1 %v8083_v27 }
 0x7b1   : > { %8182 = vmatpush2.msra.mxu1 %v8082_v50 }
 0x7b2   : > { %8183 = vmatprep.subr.mxu1 %v8081_v51 }
 0x7b3   : > { %8184 = vmatpush2.msra.mxu1 %v8080_v16 }
 0x7b4   : > { %8185 = vmatprep.subr.mxu1 %v8079_v2 }
 0x7b5   : > { %8186 = vmatpush2.msra.mxu1 %v8078_v10  ;;  %v8310_v10 = vld [vmem:[#allocation10 + $0x3f0] sm:$0xff] }
 0x7b6   : > { %8187 = vmatprep.subr.mxu1 %v8077_v13  ;;  %v8309_v13 = vld [vmem:[#allocation10 + $0x3e8] sm:$0xff] }
 0x7b7   : > { %8188 = vmatpush2.msra.mxu1 %v8076_v54  ;;  %v8308_v54 = vld [vmem:[#allocation10 + $0x3e0] sm:$0xff] }
 0x7b8   : > { %8189 = vmatprep.subr.mxu1 %v8075_v62  ;;  %v8307_v62 = vld [vmem:[#allocation10 + $0x3d8] sm:$0xff] }
 0x7b9   : > { %8190 = vmatpush2.msra.mxu1 %v8074_v63  ;;  %v8306_v63 = vld [vmem:[#allocation10 + $0x3d0] sm:$0xff] }
 0x7ba   : > { %8191 = vmatprep.subr.mxu1 %v8073_v61  ;;  %v8305_v61 = vld [vmem:[#allocation10 + $0x3c8] sm:$0xff] }
 0x7bb   : > { %8192 = vmatpush2.msra.mxu1 %v8072_v26  ;;  %v8304_v26 = vld [vmem:[#allocation10 + $0x3c0] sm:$0xff] }
 0x7bc   : > { %8193 = vmatprep.subr.mxu1 %v8071_v6  ;;  %v8303_v6 = vld [vmem:[#allocation10 + $0x3b8] sm:$0xff] }
 0x7bd   : > { %8194 = vmatpush2.msra.mxu1 %v8070_v28  ;;  %v8302_v28 = vld [vmem:[#allocation10 + $0x3b0] sm:$0xff] }
 0x7be   : > { %8195 = vmatprep.subr.mxu1 %v8069_v42  ;;  %v8301_v42 = vld [vmem:[#allocation10 + $0x3a8] sm:$0xff] }
 0x7bf   : > { %8196 = vmatpush2.msra.mxu1 %v8068_v46  ;;  %v8300_v46 = vld [vmem:[#allocation10 + $0x3a0] sm:$0xff] }
 0x7c0   : > { %8197 = vmatprep.subr.mxu1 %v8067_v44  ;;  %v8299_v44 = vld [vmem:[#allocation10 + $0x398] sm:$0xff] }
 0x7c1   : > { %8198 = vmatpush2.msra.mxu1 %v8066_v55  ;;  %v8298_v55 = vld [vmem:[#allocation10 + $0x390] sm:$0xff] }
 0x7c2   : > { %8199 = vmatprep.subr.mxu1 %v8065_v17  ;;  %v8297_v17 = vld [vmem:[#allocation10 + $0x388] sm:$0xff] }
 0x7c3   : > { %8200 = vmatpush2.msra.mxu1 %v8064_v23  ;;  %v8296_v23 = vld [vmem:[#allocation10 + $0x380] sm:$0xff] }
 0x7c4   : > { %8447 = vmatprep.subr.mxu1 %v8375_v30  ;;  %v8358_v30 = vld [vmem:[#allocation10 + $0x570] sm:$0xff] }
 0x817   : > { %v7584_v59 = vpop.f32.mrf.mxu1 }
 0x819   : > { %v7586_v19 = vpop.f32.mrf.mxu1 }
 0x83c   : > { %v7655_v40 = vpop.f32.mrf.mxu1 }
 0x83e   : > { %v11986_v45 = vpop.f32.mrf.mxu1 }
 0x83f   : > { %v8355_v45 = vld [vmem:[#allocation10 + $0x558] sm:$0xff] }
 0x840   : > { %v7729_v3 = vpop.f32.mrf.mxu1 }
 0x841   : > { %v7804_v31 = vmax.f32 %v7584_v59, %v7729_v3  ;;  %v8357_v59 = vld [vmem:[#allocation10 + $0x568] sm:$0xff]  ;;  %v8354_v3 = vld [vmem:[#allocation10 + $0x550] sm:$0xff] }
 0x842   : > { %v7731_v11 = vpop.f32.mrf.mxu1 }
 0x843   : > { %v7824_v39 = vadd.f32 %v7812_v49, %v7804_v31  ;;  %v7805_v8 = vmax.f32 %v7586_v19, %v7731_v11  ;;  %v8293_v19 = vld [vmem:[#allocation10 + $0x368] sm:$0xff]  ;;  %v8291_v49 = vld [vmem:[#allocation10 + $0x358] sm:$0xff]  ;;  %v8290_v31 = vld [vmem:[#allocation10 + $0x350] sm:$0xff] }
 0x844   : > { %v7800_v1 = vpop.f32.mrf.mxu1  ;;  %v8289_v11 = vld [vmem:[#allocation10 + $0x348] sm:$0xff] }
 0x845   : > { %v7827_v9 = vmax.f32 %v7824_v39, 0.0  ;;  %v7825_v32 = vadd.f32 %v7816_v14, %v7805_v8  ;;  %v7806_v27 = vmax.f32 %v7655_v40, %v7800_v1  ;;  %v8356_v40 = vld [vmem:[#allocation10 + $0x560] sm:$0xff]  ;;  %v8353_v14 = vld [vmem:[#allocation10 + $0x548] sm:$0xff]  ;;  %v8287_v1 = vld [vmem:[#allocation10 + $0x338] sm:$0xff] }
 0x846   : > { %v11993_v52 = vpop.f32.mrf.mxu1  ;;  %v8352_v39 = vld [vmem:[#allocation10 + $0x540] sm:$0xff] }
 0x847   : > { %7830 = vst [vmem:[#allocation5 + $0x10] sm:$0x3f] %v7827_v9  ;;  %v7828_v50 = vmax.f32 %v7825_v32, 0.0  ;;  %v7826_v36 = vadd.f32 %v7820_v25, %v7806_v27  ;;  %v8288_v8 = vld [vmem:[#allocation10 + $0x340] sm:$0xff]  ;;  %v8351_v25 = vld [vmem:[#allocation10 + $0x538] sm:$0xff]  ;;  %v8350_v9 = vld [vmem:[#allocation10 + $0x530] sm:$0xff] }
 0x848   : > { %v8286_v32 = vld [vmem:[#allocation10 + $0x330] sm:$0xff]  ;;  %v8349_v27 = vld [vmem:[#allocation10 + $0x528] sm:$0xff] }
 0x849   : > { %7831 = vst [vmem:[#allocation5] sm:$0x3f] %v7828_v50  ;;  %v7829_v51 = vmax.f32 %v7826_v36, 0.0  ;;  %v8285_v52 = vld [vmem:[#allocation10 + $0x328] sm:$0xff]  ;;  %v8348_v50 = vld [vmem:[#allocation10 + $0x520] sm:$0xff] }
 0x84a   : > { %v8284_v36 = vld [vmem:[#allocation10 + $0x320] sm:$0xff] }
 0x84b   : > { %7832 = vst [vmem:[#allocation5 + $0x8] sm:$0x3f] %v7829_v51  ;;  %v8347_v51 = vld [vmem:[#allocation10 + $0x518] sm:$0xff] }
 0x84e   : > { %v19776_v18 = vld [vmem:[#allocation5 + $0x10] sm:$0x1e] }
 0x84f   : > { %v8131_v2 = vrot.slane %v19776_v18, 1  ;;  %v7891_v18 = vld [vmem:[#allocation7 + $0x1b8] sm:$0xff] }
 0x850   : > { %v8029_v16 = vld [vmem:[#allocation5] sm:$0x1e] }
 0x851   : > { %v8132_v58 = vrot.slane %v8029_v16, 1  ;;  %v8283_v16 = vld [vmem:[#allocation10 + $0x318] sm:$0xff] }
 0x852   : > { %v19779_v33 = vld [vmem:[#allocation5 + $0x8] sm:$0x1e] }
 0x853   : > { %8201 = vmatprep.mubr.f32.mxu1 %v8132_v58  ;;  %v8133_v35 = vrot.slane %v19779_v33, 1  ;;  %v8338_v33 = vld [vmem:[#allocation10 + $0x4d0] sm:$0xff] }
 0x854   : > { %8202 = vmatmul.mubr.f32.vlgmr.msra.gmra.mxu1 %v8131_v2 }
 0x855   : > { %8448 = vmatpush1.msra.mxu1 %v8374_v15  ;;  %8273 = vmatmul.mubr.f32.vlgmr.msra.gmra.mxu0 %v8133_v35  ;;  %v8282_v15 = vld [vmem:[#allocation10 + $0x310] sm:$0xff] }
 0x856   : > { %8377 = vmatpush1.msra.mxu0 %v8310_v10  ;;  %8449 = vmatprep.subr.mxu1 %v8373_v38  ;;  %v8345_v10 = vld [vmem:[#allocation10 + $0x508] sm:$0xff] }
 0x857   : > { %8378 = vmatprep.subr.mxu0 %v8309_v13  ;;  %8440 = vmatprep.mubr.f32.mxu0 %v8132_v58  ;;  %v8346_v58 = vld [vmem:[#allocation10 + $0x510] sm:$0xff]  ;;  %v8281_v38 = vld [vmem:[#allocation10 + $0x308] sm:$0xff]  ;;  %v8344_v13 = vld [vmem:[#allocation10 + $0x500] sm:$0xff] }
 0x858   : > { %8450 = vmatpush1.msra.mxu1 %v8372_v5  ;;  %8379 = vmatpush1.msra.mxu0 %v8308_v54  ;;  %v8280_v5 = vld [vmem:[#allocation10 + $0x300] sm:$0xff]  ;;  %v7867_v54 = vld [vmem:[#allocation7 + $0xf8] sm:$0xff] }
 0x859   : > { %8451 = vmatprep.subr.mxu1 %v8371_v24  ;;  %8380 = vmatprep.subr.mxu0 %v8307_v62  ;;  %v8343_v24 = vld [vmem:[#allocation10 + $0x4f8] sm:$0xff]  ;;  %v7866_v62 = vld [vmem:[#allocation7 + $0xf0] sm:$0xff] }
 0x85a   : > { %8452 = vmatpush1.msra.mxu1 %v8370_v48  ;;  %8381 = vmatpush1.msra.mxu0 %v8306_v63  ;;  %v8342_v48 = vld [vmem:[#allocation10 + $0x4f0] sm:$0xff]  ;;  %v7865_v63 = vld [vmem:[#allocation7 + $0xe8] sm:$0xff] }
 0x85b   : > { %8453 = vmatprep.subr.mxu1 %v8369_v60  ;;  %8382 = vmatprep.subr.mxu0 %v8305_v61  ;;  %v19789_v60 = vld [vmem:[#allocation5] sm:$0xf]  ;;  %v8341_v61 = vld [vmem:[#allocation10 + $0x4e8] sm:$0xff] }
 0x85c   : > { %8454 = vmatpush1.msra.mxu1 %v8368_v0  ;;  %8383 = vmatpush1.msra.mxu0 %v8304_v26  ;;  %v7864_v0 = vld [vmem:[#allocation7 + $0xe0] sm:$0xff] }
 0x85d   : > { %8455 = vmatprep.subr.mxu1 %v8367_v34  ;;  %8384 = vmatprep.subr.mxu0 %v8303_v6  ;;  %v8340_v26 = vld [vmem:[#allocation10 + $0x4e0] sm:$0xff]  ;;  %v7863_v34 = vld [vmem:[#allocation7 + $0xd8] sm:$0xff] }
 0x85e   : > { %8456 = vmatpush1.msra.mxu1 %v8366_v4  ;;  %8385 = vmatpush1.msra.mxu0 %v8302_v28  ;;  %v8339_v6 = vld [vmem:[#allocation10 + $0x4d8] sm:$0xff]  ;;  %v7862_v4 = vld [vmem:[#allocation7 + $0xd0] sm:$0xff]  ;;  %v8337_v28 = vld [vmem:[#allocation10 + $0x4c8] sm:$0xff] }
 0x85f   : > { %8457 = vmatprep.subr.mxu1 %v8365_v57  ;;  %8386 = vmatprep.subr.mxu0 %v8301_v42  ;;  %v7860_v57 = vld [vmem:[#allocation7 + $0xc0] sm:$0xff] }
 0x860   : > { %8458 = vmatpush1.msra.mxu1 %v8364_v56  ;;  %8387 = vmatpush1.msra.mxu0 %v8300_v46  ;;  %v8336_v42 = vld [vmem:[#allocation10 + $0x4c0] sm:$0xff]  ;;  %v7859_v56 = vld [vmem:[#allocation7 + $0xb8] sm:$0xff] }
 0x861   : > { %8459 = vmatprep.subr.mxu1 %v8363_v12  ;;  %8388 = vmatprep.subr.mxu0 %v8299_v44  ;;  %v8335_v46 = vld [vmem:[#allocation10 + $0x4b8] sm:$0xff]  ;;  %v7858_v12 = vld [vmem:[#allocation7 + $0xb0] sm:$0xff] }
 0x862   : > { %8460 = vmatpush1.msra.mxu1 %v8362_v47  ;;  %8389 = vmatpush1.msra.mxu0 %v8298_v55  ;;  %v8334_v44 = vld [vmem:[#allocation10 + $0x4b0] sm:$0xff]  ;;  %v7857_v47 = vld [vmem:[#allocation7 + $0xa8] sm:$0xff] }
 0x863   : > { %8461 = vmatprep.subr.mxu1 %v8361_v29  ;;  %8390 = vmatprep.subr.mxu0 %v8297_v17  ;;  %v8333_v55 = vld [vmem:[#allocation10 + $0x4a8] sm:$0xff]  ;;  %v7856_v29 = vld [vmem:[#allocation7 + $0xa0] sm:$0xff] }
 0x864   : > { %8462 = vmatpush1.msra.mxu1 %v8360_v21  ;;  %8391 = vmatpush1.msra.mxu0 %v8296_v23  ;;  %v8332_v17 = vld [vmem:[#allocation10 + $0x4a0] sm:$0xff]  ;;  %v7855_v21 = vld [vmem:[#allocation7 + $0x98] sm:$0xff] }
 0x865   : > { %8463 = vmatprep.subr.mxu1 %v8359_v37  ;;  %8392 = vmatprep.subr.mxu0 %v8295_v53  ;;  %v8331_v23 = vld [vmem:[#allocation10 + $0x498] sm:$0xff]  ;;  %v7854_v37 = vld [vmem:[#allocation7 + $0x90] sm:$0xff] }
 0x866   : > { %8464 = vmatpush1.msra.mxu1 %v8358_v30  ;;  %8393 = vmatpush1.msra.mxu0 %v8294_v7  ;;  %v8330_v53 = vld [vmem:[#allocation10 + $0x490] sm:$0xff]  ;;  %v7853_v30 = vld [vmem:[#allocation7 + $0x88] sm:$0xff] }
 0x867   : > { %8465 = vmatprep.subr.mxu1 %v8357_v59  ;;  %8394 = vmatprep.subr.mxu0 %v8293_v19  ;;  %v8329_v7 = vld [vmem:[#allocation10 + $0x488] sm:$0xff]  ;;  %v7852_v59 = vld [vmem:[#allocation7 + $0x80] sm:$0xff] }
 0x868   : > { %8466 = vmatpush1.msra.mxu1 %v8356_v40  ;;  %8395 = vmatpush1.msra.mxu0 %v8292_v43  ;;  %v8328_v19 = vld [vmem:[#allocation10 + $0x480] sm:$0xff]  ;;  %v7851_v40 = vld [vmem:[#allocation7 + $0x78] sm:$0xff] }
 0x869   : > { %8467 = vmatprep.subr.mxu1 %v8355_v45  ;;  %8396 = vmatprep.subr.mxu0 %v8291_v49  ;;  %v8327_v43 = vld [vmem:[#allocation10 + $0x478] sm:$0xff]  ;;  %v7850_v45 = vld [vmem:[#allocation7 + $0x70] sm:$0xff] }
 0x86a   : > { %8468 = vmatpush1.msra.mxu1 %v8354_v3  ;;  %8397 = vmatpush1.msra.mxu0 %v8290_v31  ;;  %v8326_v49 = vld [vmem:[#allocation10 + $0x470] sm:$0xff]  ;;  %v7849_v3 = vld [vmem:[#allocation7 + $0x68] sm:$0xff] }
 0x86b   : > { %8469 = vmatprep.subr.mxu1 %v8353_v14  ;;  %8398 = vmatprep.subr.mxu0 %v8289_v11  ;;  %v8325_v31 = vld [vmem:[#allocation10 + $0x468] sm:$0xff]  ;;  %v7848_v14 = vld [vmem:[#allocation7 + $0x60] sm:$0xff] }
 0x86c   : > { %8470 = vmatpush1.msra.mxu1 %v8352_v39  ;;  %8399 = vmatpush1.msra.mxu0 %v8288_v8  ;;  %v8324_v11 = vld [vmem:[#allocation10 + $0x460] sm:$0xff]  ;;  %v7847_v39 = vld [vmem:[#allocation7 + $0x58] sm:$0xff] }
 0x86d   : > { %8471 = vmatprep.subr.mxu1 %v8351_v25  ;;  %8400 = vmatprep.subr.mxu0 %v8287_v1  ;;  %v8323_v8 = vld [vmem:[#allocation10 + $0x458] sm:$0xff]  ;;  %v7846_v25 = vld [vmem:[#allocation7 + $0x50] sm:$0xff] }
 0x86e   : > { %8472 = vmatpush1.msra.mxu1 %v8350_v9  ;;  %8401 = vmatpush1.msra.mxu0 %v8286_v32  ;;  %v8322_v1 = vld [vmem:[#allocation10 + $0x450] sm:$0xff]  ;;  %v7845_v9 = vld [vmem:[#allocation7 + $0x48] sm:$0xff] }
 0x86f   : > { %8473 = vmatprep.subr.mxu1 %v8349_v27  ;;  %8402 = vmatprep.subr.mxu0 %v8285_v52  ;;  %v8321_v32 = vld [vmem:[#allocation10 + $0x448] sm:$0xff]  ;;  %v7844_v27 = vld [vmem:[#allocation7 + $0x40] sm:$0xff] }
 0x870   : > { %8474 = vmatpush1.msra.mxu1 %v8348_v50  ;;  %8403 = vmatpush1.msra.mxu0 %v8284_v36  ;;  %v8320_v52 = vld [vmem:[#allocation10 + $0x440] sm:$0xff]  ;;  %v7843_v50 = vld [vmem:[#allocation7 + $0x38] sm:$0xff] }
 0x871   : > { %8475 = vmatprep.subr.mxu1 %v8347_v51  ;;  %8404 = vmatprep.subr.mxu0 %v8283_v16  ;;  %v8319_v36 = vld [vmem:[#allocation10 + $0x438] sm:$0xff]  ;;  %v7842_v51 = vld [vmem:[#allocation7 + $0x30] sm:$0xff] }
 0x872   : > { %8476 = vmatpush1.msra.mxu1 %v8346_v58  ;;  %8405 = vmatpush1.msra.mxu0 %v8282_v15  ;;  %v8318_v16 = vld [vmem:[#allocation10 + $0x430] sm:$0xff]  ;;  %v7841_v58 = vld [vmem:[#allocation7 + $0x28] sm:$0xff] }
 0x873   : > { %8477 = vmatprep.subr.mxu1 %v8345_v10  ;;  %8406 = vmatprep.subr.mxu0 %v8281_v38  ;;  %v8317_v15 = vld [vmem:[#allocation10 + $0x428] sm:$0xff]  ;;  %v7840_v10 = vld [vmem:[#allocation7 + $0x20] sm:$0xff] }
 0x874   : > { %8478 = vmatpush1.msra.mxu1 %v8344_v13  ;;  %8511 = vmatprep.mubr.f32.mxu1 %v12222_v20  ;;  %v8316_v38 = vld [vmem:[#allocation10 + $0x420] sm:$0xff]  ;;  %v7839_v13 = vld [vmem:[#allocation7 + $0x18] sm:$0xff] }
 0x875   : > { %8407 = vmatpush1.msra.mxu0 %v8280_v5  ;;  %8512 = vmatmul.mubr.f32.vlgmr.msra.gmra.mxu1 %v8133_v35  ;;  %v7861_v35 = vld [vmem:[#allocation7 + $0xc8] sm:$0xff]  ;;  %v8315_v5 = vld [vmem:[#allocation10 + $0x418] sm:$0xff] }
 0x876   : > { %8518 = vmatprep.subr.mxu1 %v7867_v54  ;;  %8408 = vmatprep.subr.mxu0 %v8343_v24  ;;  %v7838_v54 = vld [vmem:[#allocation7 + $0x10] sm:$0xff] }
 0x877   : > { %8519 = vmatpush1.msra.mxu1 %v7866_v62  ;;  %8582 = vmatprep.mubr.f32.mxu1 %v19789_v60  ;;  %v8314_v24 = vld [vmem:[#allocation10 + $0x410] sm:$0xff]  ;;  %v7837_v62 = vld [vmem:[#allocation7 + $0x8] sm:$0xff] }
 0x878   : > { %8409 = vmatpush2.msra.mxu0 %v8342_v48  ;;  %8520 = vmatprep.subr.mxu1 %v7865_v63  ;;  %v8313_v48 = vld [vmem:[#allocation10 + $0x408] sm:$0xff]  ;;  %v7836_v63 = vld [vmem:[#allocation7] sm:$0xff] }
 0x879   : > { %8410 = vmatprep.subr.mxu0 %v8341_v61  ;;  %8521 = vmatpush1.msra.mxu1 %v7864_v0  ;;  %v8312_v61 = vld [vmem:[#allocation10 + $0x400] sm:$0xff]  ;;  %v7899_v0 = vld [vmem:[#allocation7 + $0x1f8] sm:$0xff] }
 0x87a   : > { %8411 = vmatpush2.msra.mxu0 %v8340_v26  ;;  %8522 = vmatprep.subr.mxu1 %v7863_v34  ;;  %v7898_v26 = vld [vmem:[#allocation7 + $0x1f0] sm:$0xff]  ;;  %v7931_v34 = vld [vmem:[#allocation7 + $0x2f8] sm:$0xff] }
 0x87b   : > { %8412 = vmatprep.subr.mxu0 %v8339_v6  ;;  %8523 = vmatpush1.msra.mxu1 %v7862_v4  ;;  %v7897_v6 = vld [vmem:[#allocation7 + $0x1e8] sm:$0xff]  ;;  %v7930_v4 = vld [vmem:[#allocation7 + $0x2f0] sm:$0xff] }
 0x87c   : > { %8413 = vmatpush2.msra.mxu0 %v8338_v33  ;;  %8524 = vmatprep.subr.mxu1 %v7861_v35  ;;  %v7896_v33 = vld [vmem:[#allocation7 + $0x1e0] sm:$0xff]  ;;  %v7929_v35 = vld [vmem:[#allocation7 + $0x2e8] sm:$0xff] }
 0x87d   : > { %8414 = vmatprep.subr.mxu0 %v8337_v28  ;;  %8525 = vmatpush1.msra.mxu1 %v7860_v57  ;;  %v7895_v28 = vld [vmem:[#allocation7 + $0x1d8] sm:$0xff]  ;;  %v7928_v57 = vld [vmem:[#allocation7 + $0x2e0] sm:$0xff] }
 0x87e   : > { %8415 = vmatpush2.msra.mxu0 %v8336_v42  ;;  %8526 = vmatprep.subr.mxu1 %v7859_v56  ;;  %v7894_v42 = vld [vmem:[#allocation7 + $0x1d0] sm:$0xff]  ;;  %v7927_v56 = vld [vmem:[#allocation7 + $0x2d8] sm:$0xff] }
 0x87f   : > { %8416 = vmatprep.subr.mxu0 %v8335_v46  ;;  %8527 = vmatpush1.msra.mxu1 %v7858_v12  ;;  %v7893_v46 = vld [vmem:[#allocation7 + $0x1c8] sm:$0xff]  ;;  %v7926_v12 = vld [vmem:[#allocation7 + $0x2d0] sm:$0xff] }
 0x880   : > { %8417 = vmatpush2.msra.mxu0 %v8334_v44  ;;  %8528 = vmatprep.subr.mxu1 %v7857_v47  ;;  %v7892_v44 = vld [vmem:[#allocation7 + $0x1c0] sm:$0xff]  ;;  %v7925_v47 = vld [vmem:[#allocation7 + $0x2c8] sm:$0xff] }
 0x881   : > { %8418 = vmatprep.subr.mxu0 %v8333_v55  ;;  %8529 = vmatpush1.msra.mxu1 %v7856_v29  ;;  %v7890_v55 = vld [vmem:[#allocation7 + $0x1b0] sm:$0xff]  ;;  %v7923_v29 = vld [vmem:[#allocation7 + $0x2b8] sm:$0xff] }
 0x882   : > { %8419 = vmatpush2.msra.mxu0 %v8332_v17  ;;  %8530 = vmatprep.subr.mxu1 %v7855_v21  ;;  %v7889_v17 = vld [vmem:[#allocation7 + $0x1a8] sm:$0xff]  ;;  %v7922_v21 = vld [vmem:[#allocation7 + $0x2b0] sm:$0xff] }
 0x883   : > { %8420 = vmatprep.subr.mxu0 %v8331_v23  ;;  %8531 = vmatpush1.msra.mxu1 %v7854_v37  ;;  %v7888_v23 = vld [vmem:[#allocation7 + $0x1a0] sm:$0xff]  ;;  %v7921_v37 = vld [vmem:[#allocation7 + $0x2a8] sm:$0xff] }
 0x884   : > { %8421 = vmatpush2.msra.mxu0 %v8330_v53  ;;  %8532 = vmatprep.subr.mxu1 %v7853_v30  ;;  %v7887_v53 = vld [vmem:[#allocation7 + $0x198] sm:$0xff]  ;;  %v7920_v30 = vld [vmem:[#allocation7 + $0x2a0] sm:$0xff] }
 0x885   : > { %8422 = vmatprep.subr.mxu0 %v8329_v7  ;;  %8533 = vmatpush1.msra.mxu1 %v7852_v59  ;;  %v7886_v7 = vld [vmem:[#allocation7 + $0x190] sm:$0xff]  ;;  %v7919_v59 = vld [vmem:[#allocation7 + $0x298] sm:$0xff] }
 0x886   : > { %8423 = vmatpush2.msra.mxu0 %v8328_v19  ;;  %8534 = vmatprep.subr.mxu1 %v7851_v40  ;;  %v7885_v19 = vld [vmem:[#allocation7 + $0x188] sm:$0xff]  ;;  %v7918_v40 = vld [vmem:[#allocation7 + $0x290] sm:$0xff] }
 0x887   : > { %8424 = vmatprep.subr.mxu0 %v8327_v43  ;;  %8535 = vmatpush1.msra.mxu1 %v7850_v45  ;;  %v7884_v43 = vld [vmem:[#allocation7 + $0x180] sm:$0xff]  ;;  %v7917_v45 = vld [vmem:[#allocation7 + $0x288] sm:$0xff] }
 0x888   : > { %8425 = vmatpush2.msra.mxu0 %v8326_v49  ;;  %8536 = vmatprep.subr.mxu1 %v7849_v3  ;;  %v7883_v49 = vld [vmem:[#allocation7 + $0x178] sm:$0xff]  ;;  %v7916_v3 = vld [vmem:[#allocation7 + $0x280] sm:$0xff] }
 0x889   : > { %8426 = vmatprep.subr.mxu0 %v8325_v31  ;;  %8537 = vmatpush1.msra.mxu1 %v7848_v14  ;;  %v7882_v31 = vld [vmem:[#allocation7 + $0x170] sm:$0xff]  ;;  %v7915_v14 = vld [vmem:[#allocation7 + $0x278] sm:$0xff] }
 0x88a   : > { %8427 = vmatpush2.msra.mxu0 %v8324_v11  ;;  %8538 = vmatprep.subr.mxu1 %v7847_v39  ;;  %v7881_v11 = vld [vmem:[#allocation7 + $0x168] sm:$0xff]  ;;  %v7914_v39 = vld [vmem:[#allocation7 + $0x270] sm:$0xff] }
 0x88b   : > { %8428 = vmatprep.subr.mxu0 %v8323_v8  ;;  %8539 = vmatpush1.msra.mxu1 %v7846_v25  ;;  %v7880_v8 = vld [vmem:[#allocation7 + $0x160] sm:$0xff]  ;;  %v7913_v25 = vld [vmem:[#allocation7 + $0x268] sm:$0xff] }
 0x88c   : > { %8429 = vmatpush2.msra.mxu0 %v8322_v1  ;;  %8540 = vmatprep.subr.mxu1 %v7845_v9  ;;  %v7879_v1 = vld [vmem:[#allocation7 + $0x158] sm:$0xff]  ;;  %v7912_v9 = vld [vmem:[#allocation7 + $0x260] sm:$0xff] }
 0x88d   : > { %8430 = vmatprep.subr.mxu0 %v8321_v32  ;;  %8541 = vmatpush1.msra.mxu1 %v7844_v27  ;;  %v7878_v32 = vld [vmem:[#allocation7 + $0x150] sm:$0xff]  ;;  %v7911_v27 = vld [vmem:[#allocation7 + $0x258] sm:$0xff] }
 0x88e   : > { %8431 = vmatpush2.msra.mxu0 %v8320_v52  ;;  %8542 = vmatprep.subr.mxu1 %v7843_v50  ;;  %v7877_v52 = vld [vmem:[#allocation7 + $0x148] sm:$0xff]  ;;  %v7910_v50 = vld [vmem:[#allocation7 + $0x250] sm:$0xff] }
 0x88f   : > { %8432 = vmatprep.subr.mxu0 %v8319_v36  ;;  %8543 = vmatpush1.msra.mxu1 %v7842_v51  ;;  %v7876_v36 = vld [vmem:[#allocation7 + $0x140] sm:$0xff]  ;;  %v7909_v51 = vld [vmem:[#allocation7 + $0x248] sm:$0xff] }
 0x890   : > { %8433 = vmatpush2.msra.mxu0 %v8318_v16  ;;  %8544 = vmatprep.subr.mxu1 %v7841_v58  ;;  %v7875_v16 = vld [vmem:[#allocation7 + $0x138] sm:$0xff]  ;;  %v7908_v58 = vld [vmem:[#allocation7 + $0x240] sm:$0xff] }
 0x891   : > { %8434 = vmatprep.subr.mxu0 %v8317_v15  ;;  %8545 = vmatpush1.msra.mxu1 %v7840_v10  ;;  %v7874_v15 = vld [vmem:[#allocation7 + $0x130] sm:$0xff]  ;;  %v7907_v10 = vld [vmem:[#allocation7 + $0x238] sm:$0xff] }
 0x892   : > { %8435 = vmatpush2.msra.mxu0 %v8316_v38  ;;  %8546 = vmatprep.subr.mxu1 %v7839_v13  ;;  %v7873_v38 = vld [vmem:[#allocation7 + $0x128] sm:$0xff]  ;;  %v7906_v13 = vld [vmem:[#allocation7 + $0x230] sm:$0xff] }
 0x893   : > { %8436 = vmatprep.subr.mxu0 %v8315_v5  ;;  %8547 = vmatpush1.msra.mxu1 %v7838_v54  ;;  %v7872_v5 = vld [vmem:[#allocation7 + $0x120] sm:$0xff]  ;;  %v7905_v54 = vld [vmem:[#allocation7 + $0x228] sm:$0xff] }
 0x894   : > { %8437 = vmatpush2.msra.mxu0 %v8314_v24  ;;  %8548 = vmatprep.subr.mxu1 %v7837_v62  ;;  %v7871_v24 = vld [vmem:[#allocation7 + $0x118] sm:$0xff]  ;;  %v7904_v62 = vld [vmem:[#allocation7 + $0x220] sm:$0xff] }
 0x895   : > { %8438 = vmatprep.subr.mxu0 %v8313_v48  ;;  %8549 = vmatpush1.msra.mxu1 %v7836_v63  ;;  %v7870_v48 = vld [vmem:[#allocation7 + $0x110] sm:$0xff]  ;;  %v7903_v63 = vld [vmem:[#allocation7 + $0x218] sm:$0xff] }
 0x896   : > { %8439 = vmatpush2.msra.mxu0 %v8312_v61  ;;  %8550 = vmatprep.subr.mxu1 %v7899_v0  ;;  %v7869_v61 = vld [vmem:[#allocation7 + $0x108] sm:$0xff]  ;;  %v7902_v0 = vld [vmem:[#allocation7 + $0x210] sm:$0xff] }
 0x897   : > { %8441 = vmatmul.mubr.f32.vlgmr.msra.gmra.mxu0 %v8131_v2  ;;  %8551 = vmatpush2.msra.mxu1 %v7898_v26  ;;  %v7924_v2 = vld [vmem:[#allocation7 + $0x2c0] sm:$0xff] }
 0x898   : > { %8589 = vmatprep.subr.mxu0 %v7931_v34  ;;  %8552 = vmatprep.subr.mxu1 %v7897_v6  ;;  %v7868_v26 = vld [vmem:[#allocation7 + $0x100] sm:$0xff]  ;;  %v7901_v34 = vld [vmem:[#allocation7 + $0x208] sm:$0xff] }
 0x899   : > { %8590 = vmatpush1.msra.mxu0 %v7930_v4  ;;  %8553 = vmatpush2.msra.mxu1 %v7896_v33  ;;  %v7900_v6 = vld [vmem:[#allocation7 + $0x200] sm:$0xff]  ;;  %v19794_v4 = vld [vmem:[#allocation5 + $0x10] sm:$0xf]  ;;  %v8027_v33 = vld [vmem:[#allocation10 + $0x2f8] sm:$0xff] }
 0x89a   : > { %8591 = vmatprep.subr.mxu0 %v7929_v35  ;;  %8554 = vmatprep.subr.mxu1 %v7895_v28  ;;  %v7963_v35 = vld [vmem:[#allocation10 + $0xf8] sm:$0xff]  ;;  %v8026_v28 = vld [vmem:[#allocation10 + $0x2f0] sm:$0xff] }
 0x89b   : > { %8592 = vmatpush1.msra.mxu0 %v7928_v57  ;;  %8555 = vmatpush2.msra.mxu1 %v7894_v42  ;;  %v19798_v57 = vld [vmem:[#allocation5 + $0x8] sm:$0xf]  ;;  %v7962_v42 = vld [vmem:[#allocation10 + $0xf0] sm:$0xff] }
 0x89c   : > { %8593 = vmatprep.subr.mxu0 %v7927_v56  ;;  %8556 = vmatprep.subr.mxu1 %v7893_v46  ;;  %v8025_v56 = vld [vmem:[#allocation10 + $0x2e8] sm:$0xff] }
 0x89d   : > { %8594 = vmatpush1.msra.mxu0 %v7926_v12  ;;  %8557 = vmatpush2.msra.mxu1 %v7892_v44  ;;  %v7961_v46 = vld [vmem:[#allocation10 + $0xe8] sm:$0xff]  ;;  %v8024_v12 = vld [vmem:[#allocation10 + $0x2e0] sm:$0xff] }
 0x89e   : > { %8595 = vmatprep.subr.mxu0 %v7925_v47  ;;  %8558 = vmatprep.subr.mxu1 %v7891_v18  ;;  %v7960_v44 = vld [vmem:[#allocation10 + $0xe0] sm:$0xff]  ;;  %v8023_v47 = vld [vmem:[#allocation10 + $0x2d8] sm:$0xff] }
 0x89f   : > { %8596 = vmatpush1.msra.mxu0 %v7924_v2  ;;  %8559 = vmatpush2.msra.mxu1 %v7890_v55  ;;  %v7959_v18 = vld [vmem:[#allocation10 + $0xd8] sm:$0xff]  ;;  %v8022_v2 = vld [vmem:[#allocation10 + $0x2d0] sm:$0xff] }
 0x8a0   : > { %8597 = vmatprep.subr.mxu0 %v7923_v29  ;;  %8560 = vmatprep.subr.mxu1 %v7889_v17  ;;  %v7958_v55 = vld [vmem:[#allocation10 + $0xd0] sm:$0xff]  ;;  %v8021_v29 = vld [vmem:[#allocation10 + $0x2c8] sm:$0xff] }
 0x8a1   : > { %8598 = vmatpush1.msra.mxu0 %v7922_v21  ;;  %8561 = vmatpush2.msra.mxu1 %v7888_v23  ;;  %v7957_v17 = vld [vmem:[#allocation10 + $0xc8] sm:$0xff]  ;;  %v8020_v21 = vld [vmem:[#allocation10 + $0x2c0] sm:$0xff] }
 0x8a2   : > { %8599 = vmatprep.subr.mxu0 %v7921_v37  ;;  %8562 = vmatprep.subr.mxu1 %v7887_v53  ;;  %v7956_v23 = vld [vmem:[#allocation10 + $0xc0] sm:$0xff]  ;;  %v8019_v37 = vld [vmem:[#allocation10 + $0x2b8] sm:$0xff] }
 0x8a3   : > { %8600 = vmatpush1.msra.mxu0 %v7920_v30  ;;  %8563 = vmatpush2.msra.mxu1 %v7886_v7  ;;  %v7955_v53 = vld [vmem:[#allocation10 + $0xb8] sm:$0xff]  ;;  %v7954_v30 = vld [vmem:[#allocation10 + $0xb0] sm:$0xff]  ;;  %v8017_v7 = vld [vmem:[#allocation10 + $0x2a8] sm:$0xff] }
 0x8a4   : > { %8601 = vmatprep.subr.mxu0 %v7919_v59  ;;  %8564 = vmatprep.subr.mxu1 %v7885_v19  ;;  %v7953_v59 = vld [vmem:[#allocation10 + $0xa8] sm:$0xff]  ;;  %v8016_v19 = vld [vmem:[#allocation10 + $0x2a0] sm:$0xff] }
 0x8a5   : > { %8602 = vmatpush1.msra.mxu0 %v7918_v40  ;;  %8565 = vmatpush2.msra.mxu1 %v7884_v43  ;;  %v7952_v40 = vld [vmem:[#allocation10 + $0xa0] sm:$0xff]  ;;  %v8015_v43 = vld [vmem:[#allocation10 + $0x298] sm:$0xff] }
 0x8a6   : > { %8603 = vmatprep.subr.mxu0 %v7917_v45  ;;  %8566 = vmatprep.subr.mxu1 %v7883_v49  ;;  %v7951_v45 = vld [vmem:[#allocation10 + $0x98] sm:$0xff]  ;;  %v8014_v49 = vld [vmem:[#allocation10 + $0x290] sm:$0xff] }
 0x8a7   : > { %8604 = vmatpush1.msra.mxu0 %v7916_v3  ;;  %8567 = vmatpush2.msra.mxu1 %v7882_v31  ;;  %v7950_v3 = vld [vmem:[#allocation10 + $0x90] sm:$0xff]  ;;  %v8013_v31 = vld [vmem:[#allocation10 + $0x288] sm:$0xff] }
 0x8a8   : > { %8605 = vmatprep.subr.mxu0 %v7915_v14  ;;  %8568 = vmatprep.subr.mxu1 %v7881_v11  ;;  %v7949_v14 = vld [vmem:[#allocation10 + $0x88] sm:$0xff]  ;;  %v8012_v11 = vld [vmem:[#allocation10 + $0x280] sm:$0xff] }
 0x8a9   : > { %8606 = vmatpush1.msra.mxu0 %v7914_v39  ;;  %8569 = vmatpush2.msra.mxu1 %v7880_v8  ;;  %v7948_v39 = vld [vmem:[#allocation10 + $0x80] sm:$0xff]  ;;  %v8011_v8 = vld [vmem:[#allocation10 + $0x278] sm:$0xff] }
 0x8aa   : > { %8607 = vmatprep.subr.mxu0 %v7913_v25  ;;  %8570 = vmatprep.subr.mxu1 %v7879_v1  ;;  %v7947_v25 = vld [vmem:[#allocation10 + $0x78] sm:$0xff]  ;;  %v8010_v1 = vld [vmem:[#allocation10 + $0x270] sm:$0xff] }
 0x8ab   : > { %8608 = vmatpush1.msra.mxu0 %v7912_v9  ;;  %8571 = vmatpush2.msra.mxu1 %v7878_v32  ;;  %v7946_v9 = vld [vmem:[#allocation10 + $0x70] sm:$0xff]  ;;  %v8009_v32 = vld [vmem:[#allocation10 + $0x268] sm:$0xff] }
 0x8ac   : > { %8609 = vmatprep.subr.mxu0 %v7911_v27  ;;  %8572 = vmatprep.subr.mxu1 %v7877_v52  ;;  %v7945_v27 = vld [vmem:[#allocation10 + $0x68] sm:$0xff]  ;;  %v8008_v52 = vld [vmem:[#allocation10 + $0x260] sm:$0xff] }
 0x8ad   : > { %8610 = vmatpush1.msra.mxu0 %v7910_v50  ;;  %8573 = vmatpush2.msra.mxu1 %v7876_v36  ;;  %v7944_v50 = vld [vmem:[#allocation10 + $0x60] sm:$0xff]  ;;  %v8007_v36 = vld [vmem:[#allocation10 + $0x258] sm:$0xff] }
 0x8ae   : > { %8611 = vmatprep.subr.mxu0 %v7909_v51  ;;  %8574 = vmatprep.subr.mxu1 %v7875_v16  ;;  %v7943_v51 = vld [vmem:[#allocation10 + $0x58] sm:$0xff]  ;;  %v8006_v16 = vld [vmem:[#allocation10 + $0x250] sm:$0xff] }
 0x8af   : > { %8612 = vmatpush1.msra.mxu0 %v7908_v58  ;;  %8575 = vmatpush2.msra.mxu1 %v7874_v15  ;;  %v7942_v58 = vld [vmem:[#allocation10 + $0x50] sm:$0xff]  ;;  %v8005_v15 = vld [vmem:[#allocation10 + $0x248] sm:$0xff] }
 0x8b0   : > { %8613 = vmatprep.subr.mxu0 %v7907_v10  ;;  %8576 = vmatprep.subr.mxu1 %v7873_v38  ;;  %v7941_v10 = vld [vmem:[#allocation10 + $0x48] sm:$0xff]  ;;  %v8004_v38 = vld [vmem:[#allocation10 + $0x240] sm:$0xff] }
 0x8b1   : > { %8614 = vmatpush1.msra.mxu0 %v7906_v13  ;;  %8577 = vmatpush2.msra.mxu1 %v7872_v5  ;;  %v7940_v13 = vld [vmem:[#allocation10 + $0x40] sm:$0xff]  ;;  %v8003_v5 = vld [vmem:[#allocation10 + $0x238] sm:$0xff] }
 0x8b2   : > { %8615 = vmatprep.subr.mxu0 %v7905_v54  ;;  %8578 = vmatprep.subr.mxu1 %v7871_v24  ;;  %v7939_v54 = vld [vmem:[#allocation10 + $0x38] sm:$0xff]  ;;  %v8002_v24 = vld [vmem:[#allocation10 + $0x230] sm:$0xff] }
 0x8b3   : > { %8616 = vmatpush1.msra.mxu0 %v7904_v62  ;;  %8579 = vmatpush2.msra.mxu1 %v7870_v48  ;;  %v7938_v62 = vld [vmem:[#allocation10 + $0x30] sm:$0xff]  ;;  %v8001_v48 = vld [vmem:[#allocation10 + $0x228] sm:$0xff] }
 0x8b4   : > { %8617 = vmatprep.subr.mxu0 %v7903_v63  ;;  %8580 = vmatprep.subr.mxu1 %v7869_v61  ;;  %v7937_v63 = vld [vmem:[#allocation10 + $0x28] sm:$0xff]  ;;  %v8000_v61 = vld [vmem:[#allocation10 + $0x220] sm:$0xff] }
 0x8b5   : > { %8618 = vmatpush1.msra.mxu0 %v7902_v0  ;;  %8581 = vmatpush2.msra.mxu1 %v7868_v26  ;;  %v7936_v0 = vld [vmem:[#allocation10 + $0x20] sm:$0xff]  ;;  %v7999_v26 = vld [vmem:[#allocation10 + $0x218] sm:$0xff] }
 0x8b6   : > { %8619 = vmatprep.subr.mxu0 %v7901_v34  ;;  %8583 = vmatmul.mubr.f32.vlgmr.msra.gmra.mxu1 %v19794_v4  ;;  %v7935_v34 = vld [vmem:[#allocation10 + $0x18] sm:$0xff] }
 0x8b7   : > { %8620 = vmatpush1.msra.mxu0 %v7900_v6  ;;  %8653 = vmatprep.mubr.f32.mxu0 %v12222_v20  ;;  %v7998_v6 = vld [vmem:[#allocation10 + $0x210] sm:$0xff] }
 0x8b8   : > { %8731 = vmatprep.subr.mxu1 %v8027_v33  ;;  %8654 = vmatmul.mubr.f32.vlgmr.msra.gmra.mxu0 %v19798_v57  ;;  %v7934_v33 = vld [vmem:[#allocation10 + $0x10] sm:$0xff] }
 0x8b9   : > { %8660 = vmatprep.subr.mxu0 %v7963_v35  ;;  %8732 = vmatpush1.msra.mxu1 %v8026_v28  ;;  %v7997_v35 = vld [vmem:[#allocation10 + $0x208] sm:$0xff] }
 0x8ba   : > { %8661 = vmatpush1.msra.mxu0 %v7962_v42  ;;  %8724 = vmatprep.mubr.f32.mxu0 %v19789_v60  ;;  %v8018_v60 = vld [vmem:[#allocation10 + $0x2b0] sm:$0xff]  ;;  %v7933_v28 = vld [vmem:[#allocation10 + $0x8] sm:$0xff]  ;;  %v7996_v42 = vld [vmem:[#allocation10 + $0x200] sm:$0xff] }
 0x8bb   : > { %8733 = vmatprep.subr.mxu1 %v8025_v56  ;;  %8662 = vmatprep.subr.mxu0 %v7961_v46  ;;  %v7932_v56 = vld [vmem:[#allocation10] sm:$0xff] }
 0x8bc   : > { %8734 = vmatpush1.msra.mxu1 %v8024_v12  ;;  %8663 = vmatpush1.msra.mxu0 %v7960_v44  ;;  %v19802_v46 = vld [vmem:[#allocation5] sm:$0x3c]  ;;  %v8837_v12 = vld [vmem:[#allocation7 + $0x6f8] sm:$0xff] }
 0x8bd   : > { %8735 = vmatprep.subr.mxu1 %v8023_v47  ;;  %8664 = vmatprep.subr.mxu0 %v7959_v18  ;;  %v7995_v44 = vld [vmem:[#allocation10 + $0x1f8] sm:$0xff]  ;;  %v8836_v47 = vld [vmem:[#allocation7 + $0x6f0] sm:$0xff]  ;;  %v8906_v18 = vrot.slane %v19802_v46, 2 }
 0x8be   : > { %8736 = vmatpush1.msra.mxu1 %v8022_v2  ;;  %8665 = vmatpush1.msra.mxu0 %v7958_v55  ;;  %v7994_v2 = vld [vmem:[#allocation10 + $0x1f0] sm:$0xff]  ;;  %v8835_v55 = vld [vmem:[#allocation7 + $0x6e8] sm:$0xff] }
 0x8bf   : > { %8737 = vmatprep.subr.mxu1 %v8021_v29  ;;  %8666 = vmatprep.subr.mxu0 %v7957_v17  ;;  %v7993_v29 = vld [vmem:[#allocation10 + $0x1e8] sm:$0xff]  ;;  %v8834_v17 = vld [vmem:[#allocation7 + $0x6e0] sm:$0xff]  ;;  %v9140_v46 = vld [vmem:[#allocation10 + $0x8b0] sm:$0xff] }
 0x8c0   : > { %8738 = vmatpush1.msra.mxu1 %v8020_v21  ;;  %8667 = vmatpush1.msra.mxu0 %v7956_v23  ;;  %v7992_v21 = vld [vmem:[#allocation10 + $0x1e0] sm:$0xff]  ;;  %v8833_v23 = vld [vmem:[#allocation7 + $0x6d8] sm:$0xff] }
 0x8c1   : > { %8739 = vmatprep.subr.mxu1 %v8019_v37  ;;  %8668 = vmatprep.subr.mxu0 %v7955_v53  ;;  %v7991_v37 = vld [vmem:[#allocation10 + $0x1d8] sm:$0xff]  ;;  %v8832_v53 = vld [vmem:[#allocation7 + $0x6d0] sm:$0xff] }
 0x8c2   : > { %8740 = vmatpush1.msra.mxu1 %v8018_v60  ;;  %8669 = vmatpush1.msra.mxu0 %v7954_v30  ;;  %v8831_v60 = vld [vmem:[#allocation7 + $0x6c8] sm:$0xff] }
 0x8c3   : > { %8741 = vmatprep.subr.mxu1 %v8017_v7  ;;  %8670 = vmatprep.subr.mxu0 %v7953_v59  ;;  %v7989_v30 = vld [vmem:[#allocation10 + $0x1c8] sm:$0xff]  ;;  %v8830_v7 = vld [vmem:[#allocation7 + $0x6c0] sm:$0xff] }
 0x8c4   : > { %8742 = vmatpush1.msra.mxu1 %v8016_v19  ;;  %8671 = vmatpush1.msra.mxu0 %v7952_v40  ;;  %v7988_v59 = vld [vmem:[#allocation10 + $0x1c0] sm:$0xff]  ;;  %v8829_v19 = vld [vmem:[#allocation7 + $0x6b8] sm:$0xff] }
 0x8c5   : > { %8743 = vmatprep.subr.mxu1 %v8015_v43  ;;  %8672 = vmatprep.subr.mxu0 %v7951_v45  ;;  %v7987_v40 = vld [vmem:[#allocation10 + $0x1b8] sm:$0xff]  ;;  %v8828_v43 = vld [vmem:[#allocation7 + $0x6b0] sm:$0xff] }
 0x8c6   : > { %8744 = vmatpush1.msra.mxu1 %v8014_v49  ;;  %8673 = vmatpush1.msra.mxu0 %v7950_v3  ;;  %v7986_v45 = vld [vmem:[#allocation10 + $0x1b0] sm:$0xff]  ;;  %v8827_v49 = vld [vmem:[#allocation7 + $0x6a8] sm:$0xff] }
 0x8c7   : > { %8745 = vmatprep.subr.mxu1 %v8013_v31  ;;  %8674 = vmatprep.subr.mxu0 %v7949_v14  ;;  %v7985_v3 = vld [vmem:[#allocation10 + $0x1a8] sm:$0xff]  ;;  %v8826_v31 = vld [vmem:[#allocation7 + $0x6a0] sm:$0xff] }
 0x8c8   : > { %8746 = vmatpush1.msra.mxu1 %v8012_v11  ;;  %8675 = vmatpush1.msra.mxu0 %v7948_v39  ;;  %v7984_v14 = vld [vmem:[#allocation10 + $0x1a0] sm:$0xff]  ;;  %v8825_v11 = vld [vmem:[#allocation7 + $0x698] sm:$0xff] }
 0x8c9   : > { %8747 = vmatprep.subr.mxu1 %v8011_v8  ;;  %8676 = vmatprep.subr.mxu0 %v7947_v25  ;;  %v7983_v39 = vld [vmem:[#allocation10 + $0x198] sm:$0xff]  ;;  %v8824_v8 = vld [vmem:[#allocation7 + $0x690] sm:$0xff] }
 0x8ca   : > { %8748 = vmatpush1.msra.mxu1 %v8010_v1  ;;  %8677 = vmatpush1.msra.mxu0 %v7946_v9  ;;  %v7982_v25 = vld [vmem:[#allocation10 + $0x190] sm:$0xff]  ;;  %v8823_v1 = vld [vmem:[#allocation7 + $0x688] sm:$0xff] }
 0x8cb   : > { %8749 = vmatprep.subr.mxu1 %v8009_v32  ;;  %8678 = vmatprep.subr.mxu0 %v7945_v27  ;;  %v7981_v9 = vld [vmem:[#allocation10 + $0x188] sm:$0xff]  ;;  %v8822_v32 = vld [vmem:[#allocation7 + $0x680] sm:$0xff] }
 0x8cc   : > { %8750 = vmatpush1.msra.mxu1 %v8008_v52  ;;  %8679 = vmatpush1.msra.mxu0 %v7944_v50  ;;  %v7980_v27 = vld [vmem:[#allocation10 + $0x180] sm:$0xff]  ;;  %v8821_v52 = vld [vmem:[#allocation7 + $0x678] sm:$0xff] }
 0x8cd   : > { %8751 = vmatprep.subr.mxu1 %v8007_v36  ;;  %8680 = vmatprep.subr.mxu0 %v7943_v51  ;;  %v7979_v50 = vld [vmem:[#allocation10 + $0x178] sm:$0xff]  ;;  %v8820_v36 = vld [vmem:[#allocation7 + $0x670] sm:$0xff] }
 0x8ce   : > { %8752 = vmatpush1.msra.mxu1 %v8006_v16  ;;  %8681 = vmatpush1.msra.mxu0 %v7942_v58  ;;  %v7978_v51 = vld [vmem:[#allocation10 + $0x170] sm:$0xff]  ;;  %v8819_v16 = vld [vmem:[#allocation7 + $0x668] sm:$0xff] }
 0x8cf   : > { %8753 = vmatprep.subr.mxu1 %v8005_v15  ;;  %8682 = vmatprep.subr.mxu0 %v7941_v10  ;;  %v7977_v58 = vld [vmem:[#allocation10 + $0x168] sm:$0xff]  ;;  %v8818_v15 = vld [vmem:[#allocation7 + $0x660] sm:$0xff] }
 0x8d0   : > { %8754 = vmatpush1.msra.mxu1 %v8004_v38  ;;  %8683 = vmatpush1.msra.mxu0 %v7940_v13  ;;  %v7976_v10 = vld [vmem:[#allocation10 + $0x160] sm:$0xff]  ;;  %v8817_v38 = vld [vmem:[#allocation7 + $0x658] sm:$0xff] }
 0x8d1   : > { %8755 = vmatprep.subr.mxu1 %v8003_v5  ;;  %8684 = vmatprep.subr.mxu0 %v7939_v54  ;;  %v7975_v13 = vld [vmem:[#allocation10 + $0x158] sm:$0xff]  ;;  %v8816_v5 = vld [vmem:[#allocation7 + $0x650] sm:$0xff] }
 0x8d2   : > { %8756 = vmatpush1.msra.mxu1 %v8002_v24  ;;  %8685 = vmatpush1.msra.mxu0 %v7938_v62  ;;  %v7974_v54 = vld [vmem:[#allocation10 + $0x150] sm:$0xff]  ;;  %v8815_v24 = vld [vmem:[#allocation7 + $0x648] sm:$0xff] }
 0x8d3   : > { %8757 = vmatprep.subr.mxu1 %v8001_v48  ;;  %8686 = vmatprep.subr.mxu0 %v7937_v63  ;;  %v7973_v62 = vld [vmem:[#allocation10 + $0x148] sm:$0xff]  ;;  %v8814_v48 = vld [vmem:[#allocation7 + $0x640] sm:$0xff] }
 0x8d4   : > { %8758 = vmatpush1.msra.mxu1 %v8000_v61  ;;  %8687 = vmatpush1.msra.mxu0 %v7936_v0  ;;  %v7972_v63 = vld [vmem:[#allocation10 + $0x140] sm:$0xff]  ;;  %v8813_v61 = vld [vmem:[#allocation7 + $0x638] sm:$0xff] }
 0x8d5   : > { %8759 = vmatprep.subr.mxu1 %v7999_v26  ;;  %8688 = vmatprep.subr.mxu0 %v7935_v34  ;;  %v7971_v0 = vld [vmem:[#allocation10 + $0x138] sm:$0xff]  ;;  %v8812_v26 = vld [vmem:[#allocation7 + $0x630] sm:$0xff] }
 0x8d6   : > { %8760 = vmatpush1.msra.mxu1 %v7998_v6  ;;  %8689 = vmatpush1.msra.mxu0 %v7934_v33  ;;  %v7970_v34 = vld [vmem:[#allocation10 + $0x130] sm:$0xff]  ;;  %v8811_v6 = vld [vmem:[#allocation7 + $0x628] sm:$0xff] }
 0x8d7   : > { %8761 = vmatprep.subr.mxu1 %v7997_v35  ;;  %8690 = vmatprep.subr.mxu0 %v7933_v28  ;;  %v7969_v33 = vld [vmem:[#allocation10 + $0x128] sm:$0xff]  ;;  %v8810_v35 = vld [vmem:[#allocation7 + $0x620] sm:$0xff] }
 0x8d8   : > { %8762 = vmatpush1.msra.mxu1 %v7996_v42  ;;  %8795 = vmatprep.mubr.f32.mxu1 %v12222_v20  ;;  %v7968_v28 = vld [vmem:[#allocation10 + $0x120] sm:$0xff]  ;;  %v8809_v42 = vld [vmem:[#allocation7 + $0x618] sm:$0xff] }
 0x8d9   : > { %8691 = vmatpush1.msra.mxu0 %v7932_v56  ;;  %8796 = vmatmul.mubr.f32.vlgmr.msra.gmra.mxu1 %v19798_v57  ;;  %v7990_v57 = vld [vmem:[#allocation10 + $0x1d0] sm:$0xff]  ;;  %v7967_v56 = vld [vmem:[#allocation10 + $0x118] sm:$0xff] }
 0x8da   : > { %8911 = vmatprep.subr.mxu1 %v8837_v12  ;;  %8692 = vmatprep.subr.mxu0 %v7995_v44  ;;  %v8808_v12 = vld [vmem:[#allocation7 + $0x610] sm:$0xff] }
 0x8db   : > { %8912 = vmatpush1.msra.mxu1 %v8836_v47  ;;  %8975 = vmatprep.mubr.f32.mxu1 %v8906_v18  ;;  %v7966_v44 = vld [vmem:[#allocation10 + $0x110] sm:$0xff]  ;;  %v8807_v47 = vld [vmem:[#allocation7 + $0x608] sm:$0xff] }
 0x8dc   : > { %8693 = vmatpush2.msra.mxu0 %v7994_v2  ;;  %8913 = vmatprep.subr.mxu1 %v8835_v55  ;;  %v7965_v2 = vld [vmem:[#allocation10 + $0x108] sm:$0xff]  ;;  %v8806_v55 = vld [vmem:[#allocation7 + $0x600] sm:$0xff] }
 0x8dd   : > { %8694 = vmatprep.subr.mxu0 %v7993_v29  ;;  %8914 = vmatpush1.msra.mxu1 %v8834_v17  ;;  %v7964_v29 = vld [vmem:[#allocation10 + $0x100] sm:$0xff]  ;;  %v8869_v17 = vld [vmem:[#allocation7 + $0x7f8] sm:$0xff] }
 0x8de   : > { %8695 = vmatpush2.msra.mxu0 %v7992_v21  ;;  %8915 = vmatprep.subr.mxu1 %v8833_v23  ;;  %v8868_v21 = vld [vmem:[#allocation7 + $0x7f0] sm:$0xff]  ;;  %v8901_v23 = vld [vmem:[#allocation7 + $0x8f8] sm:$0xff] }
 0x8df   : > { %8696 = vmatprep.subr.mxu0 %v7991_v37  ;;  %8916 = vmatpush1.msra.mxu1 %v8832_v53  ;;  %v8867_v37 = vld [vmem:[#allocation7 + $0x7e8] sm:$0xff]  ;;  %v8900_v53 = vld [vmem:[#allocation7 + $0x8f0] sm:$0xff] }
 0x8e0   : > { %8697 = vmatpush2.msra.mxu0 %v7990_v57  ;;  %8917 = vmatprep.subr.mxu1 %v8831_v60  ;;  %v8866_v57 = vld [vmem:[#allocation7 + $0x7e0] sm:$0xff]  ;;  %v8899_v60 = vld [vmem:[#allocation7 + $0x8e8] sm:$0xff] }
 0x8e1   : > { %8698 = vmatprep.subr.mxu0 %v7989_v30  ;;  %8918 = vmatpush1.msra.mxu1 %v8830_v7  ;;  %v8865_v30 = vld [vmem:[#allocation7 + $0x7d8] sm:$0xff]  ;;  %v8898_v7 = vld [vmem:[#allocation7 + $0x8e0] sm:$0xff] }
 0x8e2   : > { %8699 = vmatpush2.msra.mxu0 %v7988_v59  ;;  %8919 = vmatprep.subr.mxu1 %v8829_v19  ;;  %v8864_v59 = vld [vmem:[#allocation7 + $0x7d0] sm:$0xff]  ;;  %v8897_v19 = vld [vmem:[#allocation7 + $0x8d8] sm:$0xff] }
 0x8e3   : > { %8700 = vmatprep.subr.mxu0 %v7987_v40  ;;  %8920 = vmatpush1.msra.mxu1 %v8828_v43  ;;  %v8863_v40 = vld [vmem:[#allocation7 + $0x7c8] sm:$0xff]  ;;  %v8896_v43 = vld [vmem:[#allocation7 + $0x8d0] sm:$0xff] }
 0x8e4   : > { %8701 = vmatpush2.msra.mxu0 %v7986_v45  ;;  %8921 = vmatprep.subr.mxu1 %v8827_v49  ;;  %v8862_v45 = vld [vmem:[#allocation7 + $0x7c0] sm:$0xff]  ;;  %v8895_v49 = vld [vmem:[#allocation7 + $0x8c8] sm:$0xff] }
 0x8e5   : > { %8702 = vmatprep.subr.mxu0 %v7985_v3  ;;  %8922 = vmatpush1.msra.mxu1 %v8826_v31  ;;  %v8861_v3 = vld [vmem:[#allocation7 + $0x7b8] sm:$0xff]  ;;  %v8860_v31 = vld [vmem:[#allocation7 + $0x7b0] sm:$0xff] }
 0x8e6   : > { %8703 = vmatpush2.msra.mxu0 %v7984_v14  ;;  %8923 = vmatprep.subr.mxu1 %v8825_v11  ;;  %v8893_v14 = vld [vmem:[#allocation7 + $0x8b8] sm:$0xff]  ;;  %v8859_v11 = vld [vmem:[#allocation7 + $0x7a8] sm:$0xff] }
 0x8e7   : > { %8704 = vmatprep.subr.mxu0 %v7983_v39  ;;  %8924 = vmatpush1.msra.mxu1 %v8824_v8  ;;  %v8892_v39 = vld [vmem:[#allocation7 + $0x8b0] sm:$0xff]  ;;  %v8858_v8 = vld [vmem:[#allocation7 + $0x7a0] sm:$0xff] }
 0x8e8   : > { %8705 = vmatpush2.msra.mxu0 %v7982_v25  ;;  %8925 = vmatprep.subr.mxu1 %v8823_v1  ;;  %v8891_v25 = vld [vmem:[#allocation7 + $0x8a8] sm:$0xff]  ;;  %v8857_v1 = vld [vmem:[#allocation7 + $0x798] sm:$0xff] }
 0x8e9   : > { %8706 = vmatprep.subr.mxu0 %v7981_v9  ;;  %8926 = vmatpush1.msra.mxu1 %v8822_v32  ;;  %v8890_v9 = vld [vmem:[#allocation7 + $0x8a0] sm:$0xff]  ;;  %v8856_v32 = vld [vmem:[#allocation7 + $0x790] sm:$0xff] }
 0x8ea   : > { %8707 = vmatpush2.msra.mxu0 %v7980_v27  ;;  %8927 = vmatprep.subr.mxu1 %v8821_v52  ;;  %v8889_v27 = vld [vmem:[#allocation7 + $0x898] sm:$0xff]  ;;  %v8855_v52 = vld [vmem:[#allocation7 + $0x788] sm:$0xff] }
 0x8eb   : > { %8708 = vmatprep.subr.mxu0 %v7979_v50  ;;  %8928 = vmatpush1.msra.mxu1 %v8820_v36  ;;  %v8888_v50 = vld [vmem:[#allocation7 + $0x890] sm:$0xff]  ;;  %v8854_v36 = vld [vmem:[#allocation7 + $0x780] sm:$0xff] }
 0x8ec   : > { %8709 = vmatpush2.msra.mxu0 %v7978_v51  ;;  %8929 = vmatprep.subr.mxu1 %v8819_v16  ;;  %v8887_v51 = vld [vmem:[#allocation7 + $0x888] sm:$0xff]  ;;  %v8853_v16 = vld [vmem:[#allocation7 + $0x778] sm:$0xff] }
 0x8ed   : > { %8710 = vmatprep.subr.mxu0 %v7977_v58  ;;  %8930 = vmatpush1.msra.mxu1 %v8818_v15  ;;  %v8886_v58 = vld [vmem:[#allocation7 + $0x880] sm:$0xff]  ;;  %v8852_v15 = vld [vmem:[#allocation7 + $0x770] sm:$0xff] }
 0x8ee   : > { %8711 = vmatpush2.msra.mxu0 %v7976_v10  ;;  %8931 = vmatprep.subr.mxu1 %v8817_v38  ;;  %v8885_v10 = vld [vmem:[#allocation7 + $0x878] sm:$0xff]  ;;  %v8851_v38 = vld [vmem:[#allocation7 + $0x768] sm:$0xff] }
 0x8ef   : > { %8712 = vmatprep.subr.mxu0 %v7975_v13  ;;  %8932 = vmatpush1.msra.mxu1 %v8816_v5  ;;  %v8884_v13 = vld [vmem:[#allocation7 + $0x870] sm:$0xff]  ;;  %v8850_v5 = vld [vmem:[#allocation7 + $0x760] sm:$0xff] }
 0x8f0   : > { %8713 = vmatpush2.msra.mxu0 %v7974_v54  ;;  %8933 = vmatprep.subr.mxu1 %v8815_v24  ;;  %v8883_v54 = vld [vmem:[#allocation7 + $0x868] sm:$0xff]  ;;  %v8849_v24 = vld [vmem:[#allocation7 + $0x758] sm:$0xff] }
 0x8f1   : > { %8714 = vmatprep.subr.mxu0 %v7973_v62  ;;  %8934 = vmatpush1.msra.mxu1 %v8814_v48  ;;  %v8882_v62 = vld [vmem:[#allocation7 + $0x860] sm:$0xff]  ;;  %v8848_v48 = vld [vmem:[#allocation7 + $0x750] sm:$0xff] }
 0x8f2   : > { %8715 = vmatpush2.msra.mxu0 %v7972_v63  ;;  %8935 = vmatprep.subr.mxu1 %v8813_v61  ;;  %v8881_v63 = vld [vmem:[#allocation7 + $0x858] sm:$0xff]  ;;  %v8847_v61 = vld [vmem:[#allocation7 + $0x748] sm:$0xff] }
 0x8f3   : > { %8716 = vmatprep.subr.mxu0 %v7971_v0  ;;  %8936 = vmatpush1.msra.mxu1 %v8812_v26  ;;  %v8880_v0 = vld [vmem:[#allocation7 + $0x850] sm:$0xff]  ;;  %v8846_v26 = vld [vmem:[#allocation7 + $0x740] sm:$0xff] }
 0x8f4   : > { %8717 = vmatpush2.msra.mxu0 %v7970_v34  ;;  %8937 = vmatprep.subr.mxu1 %v8811_v6  ;;  %v8879_v34 = vld [vmem:[#allocation7 + $0x848] sm:$0xff]  ;;  %v8845_v6 = vld [vmem:[#allocation7 + $0x738] sm:$0xff] }
 0x8f5   : > { %8718 = vmatprep.subr.mxu0 %v7969_v33  ;;  %8938 = vmatpush1.msra.mxu1 %v8810_v35  ;;  %v8878_v33 = vld [vmem:[#allocation7 + $0x840] sm:$0xff]  ;;  %v8844_v35 = vld [vmem:[#allocation7 + $0x730] sm:$0xff] }
 0x8f6   : > { %8719 = vmatpush2.msra.mxu0 %v7968_v28  ;;  %8939 = vmatprep.subr.mxu1 %v8809_v42  ;;  %v8877_v28 = vld [vmem:[#allocation7 + $0x838] sm:$0xff]  ;;  %v8843_v42 = vld [vmem:[#allocation7 + $0x728] sm:$0xff] }
 0x8f7   : > { %8720 = vmatprep.subr.mxu0 %v7967_v56  ;;  %8940 = vmatpush1.msra.mxu1 %v8808_v12  ;;  %v8876_v56 = vld [vmem:[#allocation7 + $0x830] sm:$0xff]  ;;  %v8842_v12 = vld [vmem:[#allocation7 + $0x720] sm:$0xff] }
 0x8f8   : > { %8721 = vmatpush2.msra.mxu0 %v7966_v44  ;;  %8941 = vmatprep.subr.mxu1 %v8807_v47  ;;  %v8875_v44 = vld [vmem:[#allocation7 + $0x828] sm:$0xff]  ;;  %v8841_v47 = vld [vmem:[#allocation7 + $0x718] sm:$0xff] }
 0x8f9   : > { %8722 = vmatprep.subr.mxu0 %v7965_v2  ;;  %8942 = vmatpush1.msra.mxu1 %v8806_v55  ;;  %v8874_v2 = vld [vmem:[#allocation7 + $0x820] sm:$0xff]  ;;  %v8840_v55 = vld [vmem:[#allocation7 + $0x710] sm:$0xff] }
 0x8fa   : > { %8723 = vmatpush2.msra.mxu0 %v7964_v29  ;;  %8943 = vmatprep.subr.mxu1 %v8869_v17  ;;  %v8873_v29 = vld [vmem:[#allocation7 + $0x818] sm:$0xff]  ;;  %v8839_v17 = vld [vmem:[#allocation7 + $0x708] sm:$0xff] }
 0x8fb   : > { %8725 = vmatmul.mubr.f32.vlgmr.msra.gmra.mxu0 %v19794_v4  ;;  %8944 = vmatpush2.msra.mxu1 %v8868_v21  ;;  %v8894_v4 = vld [vmem:[#allocation7 + $0x8c0] sm:$0xff]  ;;  %v19810_v21 = vld [vmem:[#allocation5 + $0x10] sm:$0x3c] }
 0x8fc   : > { %8982 = vmatprep.subr.mxu0 %v8901_v23  ;;  %8945 = vmatprep.subr.mxu1 %v8867_v37  ;;  %v8872_v23 = vld [vmem:[#allocation7 + $0x810] sm:$0xff]  ;;  %v8838_v37 = vld [vmem:[#allocation7 + $0x700] sm:$0xff] }
 0x8fd   : > { %8983 = vmatpush1.msra.mxu0 %v8900_v53  ;;  %8946 = vmatpush2.msra.mxu1 %v8866_v57  ;;  %v8871_v53 = vld [vmem:[#allocation7 + $0x808] sm:$0xff] }
 0x8fe   : > { %8984 = vmatprep.subr.mxu0 %v8899_v60  ;;  %8947 = vmatprep.subr.mxu1 %v8865_v30  ;;  %v19812_v57 = vld [vmem:[#allocation5 + $0x8] sm:$0x3c]  ;;  %v8905_v60 = vrot.slane %v19810_v21, 2  ;;  %v8870_v30 = vld [vmem:[#allocation7 + $0x800] sm:$0xff]  ;;  %v9501_v21 = vld [vmem:[%s20155_s16 + $0x70] sm:$0xff] }
 0x8ff   : > { %8985 = vmatpush1.msra.mxu0 %v8898_v7  ;;  %8948 = vmatpush2.msra.mxu1 %v8864_v59  ;;  %v9149_v7 = vld [vmem:[#allocation10 + $0x8f8] sm:$0xff]  ;;  %v8907_v59 = vrot.slane %v19812_v57, 2  ;;  %v9107_v57 = vld [vmem:[#allocation10 + $0x7a8] sm:$0xff] }
 0x900   : > { %8986 = vmatprep.subr.mxu0 %v8897_v19  ;;  %8949 = vmatprep.subr.mxu1 %v8863_v40  ;;  %v9085_v19 = vld [vmem:[#allocation10 + $0x6f8] sm:$0xff]  ;;  %v9148_v40 = vld [vmem:[#allocation10 + $0x8f0] sm:$0xff] }
 0x901   : > { %8987 = vmatpush1.msra.mxu0 %v8896_v43  ;;  %8950 = vmatpush2.msra.mxu1 %v8862_v45  ;;  %v9084_v43 = vld [vmem:[#allocation10 + $0x6f0] sm:$0xff]  ;;  %v9147_v45 = vld [vmem:[#allocation10 + $0x8e8] sm:$0xff] }
 0x902   : > { %8988 = vmatprep.subr.mxu0 %v8895_v49  ;;  %8951 = vmatprep.subr.mxu1 %v8861_v3  ;;  %v9083_v49 = vld [vmem:[#allocation10 + $0x6e8] sm:$0xff]  ;;  %v9146_v3 = vld [vmem:[#allocation10 + $0x8e0] sm:$0xff] }
 0x903   : > { %8989 = vmatpush1.msra.mxu0 %v8894_v4  ;;  %8952 = vmatpush2.msra.mxu1 %v8860_v31  ;;  %v9082_v4 = vld [vmem:[#allocation10 + $0x6e0] sm:$0xff]  ;;  %v9145_v31 = vld [vmem:[#allocation10 + $0x8d8] sm:$0xff] }
 0x904   : > { %8990 = vmatprep.subr.mxu0 %v8893_v14  ;;  %8953 = vmatprep.subr.mxu1 %v8859_v11  ;;  %v9081_v14 = vld [vmem:[#allocation10 + $0x6d8] sm:$0xff]  ;;  %v9144_v11 = vld [vmem:[#allocation10 + $0x8d0] sm:$0xff] }
 0x905   : > { %8991 = vmatpush1.msra.mxu0 %v8892_v39  ;;  %8954 = vmatpush2.msra.mxu1 %v8858_v8  ;;  %v9080_v39 = vld [vmem:[#allocation10 + $0x6d0] sm:$0xff]  ;;  %v9143_v8 = vld [vmem:[#allocation10 + $0x8c8] sm:$0xff] }
 0x906   : > { %8992 = vmatprep.subr.mxu0 %v8891_v25  ;;  %8955 = vmatprep.subr.mxu1 %v8857_v1  ;;  %v9079_v25 = vld [vmem:[#allocation10 + $0x6c8] sm:$0xff]  ;;  %v9142_v1 = vld [vmem:[#allocation10 + $0x8c0] sm:$0xff] }
 0x907   : > { %8993 = vmatpush1.msra.mxu0 %v8890_v9  ;;  %8956 = vmatpush2.msra.mxu1 %v8856_v32  ;;  %v9078_v9 = vld [vmem:[#allocation10 + $0x6c0] sm:$0xff]  ;;  %v9141_v32 = vld [vmem:[#allocation10 + $0x8b8] sm:$0xff] }
 0x908   : > { %8994 = vmatprep.subr.mxu0 %v8889_v27  ;;  %8957 = vmatprep.subr.mxu1 %v8855_v52  ;;  %v9077_v27 = vld [vmem:[#allocation10 + $0x6b8] sm:$0xff]  ;;  %v9139_v52 = vld [vmem:[#allocation10 + $0x8a8] sm:$0xff] }
 0x909   : > { %8995 = vmatpush1.msra.mxu0 %v8888_v50  ;;  %8958 = vmatpush2.msra.mxu1 %v8854_v36  ;;  %v9075_v50 = vld [vmem:[#allocation10 + $0x6a8] sm:$0xff]  ;;  %v9138_v36 = vld [vmem:[#allocation10 + $0x8a0] sm:$0xff] }
 0x90a   : > { %8996 = vmatprep.subr.mxu0 %v8887_v51  ;;  %8959 = vmatprep.subr.mxu1 %v8853_v16  ;;  %v9074_v51 = vld [vmem:[#allocation10 + $0x6a0] sm:$0xff]  ;;  %v9137_v16 = vld [vmem:[#allocation10 + $0x898] sm:$0xff] }
 0x90b   : > { %8997 = vmatpush1.msra.mxu0 %v8886_v58  ;;  %8960 = vmatpush2.msra.mxu1 %v8852_v15  ;;  %v9073_v58 = vld [vmem:[#allocation10 + $0x698] sm:$0xff]  ;;  %v9136_v15 = vld [vmem:[#allocation10 + $0x890] sm:$0xff] }
 0x90c   : > { %8998 = vmatprep.subr.mxu0 %v8885_v10  ;;  %8961 = vmatprep.subr.mxu1 %v8851_v38  ;;  %v9072_v10 = vld [vmem:[#allocation10 + $0x690] sm:$0xff]  ;;  %v9135_v38 = vld [vmem:[#allocation10 + $0x888] sm:$0xff] }
 0x90d   : > { %8999 = vmatpush1.msra.mxu0 %v8884_v13  ;;  %8962 = vmatpush2.msra.mxu1 %v8850_v5  ;;  %v9071_v13 = vld [vmem:[#allocation10 + $0x688] sm:$0xff]  ;;  %v9134_v5 = vld [vmem:[#allocation10 + $0x880] sm:$0xff] }
 0x90e   : > { %9000 = vmatprep.subr.mxu0 %v8883_v54  ;;  %8963 = vmatprep.subr.mxu1 %v8849_v24  ;;  %v9070_v54 = vld [vmem:[#allocation10 + $0x680] sm:$0xff]  ;;  %v9133_v24 = vld [vmem:[#allocation10 + $0x878] sm:$0xff] }
 0x90f   : > { %9001 = vmatpush1.msra.mxu0 %v8882_v62  ;;  %8964 = vmatpush2.msra.mxu1 %v8848_v48  ;;  %v9069_v62 = vld [vmem:[#allocation10 + $0x678] sm:$0xff]  ;;  %v9132_v48 = vld [vmem:[#allocation10 + $0x870] sm:$0xff] }
 0x910   : > { %9002 = vmatprep.subr.mxu0 %v8881_v63  ;;  %8965 = vmatprep.subr.mxu1 %v8847_v61  ;;  %v9068_v63 = vld [vmem:[#allocation10 + $0x670] sm:$0xff]  ;;  %v9131_v61 = vld [vmem:[#allocation10 + $0x868] sm:$0xff] }
 0x911   : > { %9003 = vmatpush1.msra.mxu0 %v8880_v0  ;;  %8966 = vmatpush2.msra.mxu1 %v8846_v26  ;;  %v9067_v0 = vld [vmem:[#allocation10 + $0x668] sm:$0xff]  ;;  %v9130_v26 = vld [vmem:[#allocation10 + $0x860] sm:$0xff] }
 0x912   : > { %9004 = vmatprep.subr.mxu0 %v8879_v34  ;;  %8967 = vmatprep.subr.mxu1 %v8845_v6  ;;  %v9066_v34 = vld [vmem:[#allocation10 + $0x660] sm:$0xff]  ;;  %v9129_v6 = vld [vmem:[#allocation10 + $0x858] sm:$0xff] }
 0x913   : > { %9005 = vmatpush1.msra.mxu0 %v8878_v33  ;;  %8968 = vmatpush2.msra.mxu1 %v8844_v35  ;;  %v9065_v33 = vld [vmem:[#allocation10 + $0x658] sm:$0xff]  ;;  %v9128_v35 = vld [vmem:[#allocation10 + $0x850] sm:$0xff] }
 0x914   : > { %9006 = vmatprep.subr.mxu0 %v8877_v28  ;;  %8969 = vmatprep.subr.mxu1 %v8843_v42  ;;  %v9064_v28 = vld [vmem:[#allocation10 + $0x650] sm:$0xff]  ;;  %v9127_v42 = vld [vmem:[#allocation10 + $0x848] sm:$0xff] }
 0x915   : > { %9007 = vmatpush1.msra.mxu0 %v8876_v56  ;;  %8970 = vmatpush2.msra.mxu1 %v8842_v12  ;;  %v9063_v56 = vld [vmem:[#allocation10 + $0x648] sm:$0xff]  ;;  %v9126_v12 = vld [vmem:[#allocation10 + $0x840] sm:$0xff] }
 0x916   : > { %9008 = vmatprep.subr.mxu0 %v8875_v44  ;;  %8971 = vmatprep.subr.mxu1 %v8841_v47  ;;  %v9062_v44 = vld [vmem:[#allocation10 + $0x640] sm:$0xff]  ;;  %v9125_v47 = vld [vmem:[#allocation10 + $0x838] sm:$0xff] }
 0x917   : > { %9009 = vmatpush1.msra.mxu0 %v8874_v2  ;;  %8972 = vmatpush2.msra.mxu1 %v8840_v55  ;;  %v9061_v2 = vld [vmem:[#allocation10 + $0x638] sm:$0xff]  ;;  %v9124_v55 = vld [vmem:[#allocation10 + $0x830] sm:$0xff] }
 0x918   : > { %9010 = vmatprep.subr.mxu0 %v8873_v29  ;;  %8973 = vmatprep.subr.mxu1 %v8839_v17  ;;  %v9060_v29 = vld [vmem:[#allocation10 + $0x630] sm:$0xff]  ;;  %v9123_v17 = vld [vmem:[#allocation10 + $0x828] sm:$0xff] }
 0x919   : > { %9011 = vmatpush1.msra.mxu0 %v8872_v23  ;;  %8974 = vmatpush2.msra.mxu1 %v8838_v37  ;;  %v9059_v23 = vld [vmem:[#allocation10 + $0x628] sm:$0xff]  ;;  %v9122_v37 = vld [vmem:[#allocation10 + $0x820] sm:$0xff] }
 0x91a   : > { %9012 = vmatprep.subr.mxu0 %v8871_v53  ;;  %8976 = vmatmul.mubr.f32.vlgmr.msra.gmra.mxu1 %v8905_v60  ;;  %v9058_v53 = vld [vmem:[#allocation10 + $0x620] sm:$0xff] }
 0x91b   : > { %9013 = vmatpush1.msra.mxu0 %v8870_v30  ;;  %9046 = vmatprep.mubr.f32.mxu0 %v12222_v20  ;;  %v9121_v30 = vld [vmem:[#allocation10 + $0x818] sm:$0xff] }
 0x91c   : > { %9221 = vmatprep.subr.mxu1 %v9149_v7  ;;  %9047 = vmatmul.mubr.f32.vlgmr.msra.gmra.mxu0 %v8907_v59  ;;  %v9057_v7 = vld [vmem:[#allocation10 + $0x618] sm:$0xff] }
 0x91d   : > { %9150 = vmatprep.subr.mxu0 %v9085_v19  ;;  %9222 = vmatpush1.msra.mxu1 %v9148_v40  ;;  %v9120_v19 = vld [vmem:[#allocation10 + $0x810] sm:$0xff] }
 0x91e   : > { %9151 = vmatpush1.msra.mxu0 %v9084_v43  ;;  %9214 = vmatprep.mubr.f32.mxu0 %v8906_v18  ;;  %v9076_v18 = vld [vmem:[#allocation10 + $0x6b0] sm:$0xff]  ;;  %v9119_v43 = vld [vmem:[#allocation10 + $0x808] sm:$0xff] }
 0x91f   : > { %9223 = vmatprep.subr.mxu1 %v9147_v45  ;;  %9152 = vmatprep.subr.mxu0 %v9083_v49  ;;  %v9056_v40 = vld [vmem:[#allocation10 + $0x610] sm:$0xff]  ;;  %v9055_v45 = vld [vmem:[#allocation10 + $0x608] sm:$0xff]  ;;  %v9118_v49 = vld [vmem:[#allocation10 + $0x800] sm:$0xff] }
 0x920   : > { %9224 = vmatpush1.msra.mxu1 %v9146_v3  ;;  %9153 = vmatpush1.msra.mxu0 %v9082_v4  ;;  %v9054_v3 = vld [vmem:[#allocation10 + $0x600] sm:$0xff]  ;;  %v9117_v4 = vld [vmem:[#allocation10 + $0x7f8] sm:$0xff] }
 0x921   : > { %9225 = vmatprep.subr.mxu1 %v9145_v31  ;;  %9154 = vmatprep.subr.mxu0 %v9081_v14  ;;  %v9116_v31 = vld [vmem:[#allocation10 + $0x7f0] sm:$0xff]  ;;  %v9115_v14 = vld [vmem:[#allocation10 + $0x7e8] sm:$0xff] }
 0x922   : > { %9226 = vmatpush1.msra.mxu1 %v9144_v11  ;;  %9155 = vmatpush1.msra.mxu0 %v9080_v39  ;;  %v9114_v11 = vld [vmem:[#allocation10 + $0x7e0] sm:$0xff]  ;;  %v9113_v39 = vld [vmem:[#allocation10 + $0x7d8] sm:$0xff] }
 0x923   : > { %9227 = vmatprep.subr.mxu1 %v9143_v8  ;;  %9156 = vmatprep.subr.mxu0 %v9079_v25  ;;  %v9112_v8 = vld [vmem:[#allocation10 + $0x7d0] sm:$0xff]  ;;  %v9111_v25 = vld [vmem:[#allocation10 + $0x7c8] sm:$0xff] }
 0x924   : > { %9228 = vmatpush1.msra.mxu1 %v9142_v1  ;;  %9157 = vmatpush1.msra.mxu0 %v9078_v9  ;;  %v9110_v1 = vld [vmem:[#allocation10 + $0x7c0] sm:$0xff]  ;;  %v9109_v9 = vld [vmem:[#allocation10 + $0x7b8] sm:$0xff] }
 0x925   : > { %9229 = vmatprep.subr.mxu1 %v9141_v32  ;;  %9158 = vmatprep.subr.mxu0 %v9077_v27  ;;  %v9108_v32 = vld [vmem:[#allocation10 + $0x7b0] sm:$0xff]  ;;  %v9105_v27 = vld [vmem:[#allocation10 + $0x798] sm:$0xff] }
 0x926   : > { %9230 = vmatpush1.msra.mxu1 %v9140_v46  ;;  %9159 = vmatpush1.msra.mxu0 %v9076_v18  ;;  %v9104_v46 = vld [vmem:[#allocation10 + $0x790] sm:$0xff]  ;;  %v9103_v18 = vld [vmem:[#allocation10 + $0x788] sm:$0xff] }
 0x927   : > { %9231 = vmatprep.subr.mxu1 %v9139_v52  ;;  %9160 = vmatprep.subr.mxu0 %v9075_v50  ;;  %v9102_v52 = vld [vmem:[#allocation10 + $0x780] sm:$0xff]  ;;  %v9101_v50 = vld [vmem:[#allocation10 + $0x778] sm:$0xff] }
 0x928   : > { %9232 = vmatpush1.msra.mxu1 %v9138_v36  ;;  %9161 = vmatpush1.msra.mxu0 %v9074_v51  ;;  %v9100_v36 = vld [vmem:[#allocation10 + $0x770] sm:$0xff]  ;;  %v9099_v51 = vld [vmem:[#allocation10 + $0x768] sm:$0xff] }
 0x929   : > { %9233 = vmatprep.subr.mxu1 %v9137_v16  ;;  %9162 = vmatprep.subr.mxu0 %v9073_v58  ;;  %v9098_v16 = vld [vmem:[#allocation10 + $0x760] sm:$0xff]  ;;  %v9097_v58 = vld [vmem:[#allocation10 + $0x758] sm:$0xff] }
 0x92a   : > { %9234 = vmatpush1.msra.mxu1 %v9136_v15  ;;  %9163 = vmatpush1.msra.mxu0 %v9072_v10  ;;  %v9096_v15 = vld [vmem:[#allocation10 + $0x750] sm:$0xff]  ;;  %v9095_v10 = vld [vmem:[#allocation10 + $0x748] sm:$0xff] }
 0x92b   : > { %9235 = vmatprep.subr.mxu1 %v9135_v38  ;;  %9164 = vmatprep.subr.mxu0 %v9071_v13  ;;  %v9094_v38 = vld [vmem:[#allocation10 + $0x740] sm:$0xff]  ;;  %v9093_v13 = vld [vmem:[#allocation10 + $0x738] sm:$0xff] }
 0x92c   : > { %9236 = vmatpush1.msra.mxu1 %v9134_v5  ;;  %9165 = vmatpush1.msra.mxu0 %v9070_v54  ;;  %v9092_v5 = vld [vmem:[#allocation10 + $0x730] sm:$0xff]  ;;  %v9091_v54 = vld [vmem:[#allocation10 + $0x728] sm:$0xff] }
 0x92d   : > { %9237 = vmatprep.subr.mxu1 %v9133_v24  ;;  %9166 = vmatprep.subr.mxu0 %v9069_v62  ;;  %v9090_v24 = vld [vmem:[#allocation10 + $0x720] sm:$0xff]  ;;  %v9089_v62 = vld [vmem:[#allocation10 + $0x718] sm:$0xff] }
 0x92e   : > { %9238 = vmatpush1.msra.mxu1 %v9132_v48  ;;  %9167 = vmatpush1.msra.mxu0 %v9068_v63  ;;  %v9088_v48 = vld [vmem:[#allocation10 + $0x710] sm:$0xff]  ;;  %v9087_v63 = vld [vmem:[#allocation10 + $0x708] sm:$0xff] }
 0x92f   : > { %9239 = vmatprep.subr.mxu1 %v9131_v61  ;;  %9168 = vmatprep.subr.mxu0 %v9067_v0  ;;  %v9086_v61 = vld [vmem:[#allocation10 + $0x700] sm:$0xff] }
 0x930   : > { %9240 = vmatpush1.msra.mxu1 %v9130_v26  ;;  %9169 = vmatpush1.msra.mxu0 %v9066_v34  ;;  %v9518_v0 = vld [vmem:[%s20155_s16 + $0xf8] sm:$0xff]  ;;  %v9517_v34 = vld [vmem:[%s20155_s16 + $0xf0] sm:$0xff] }
 0x931   : > { %9241 = vmatprep.subr.mxu1 %v9129_v6  ;;  %9170 = vmatprep.subr.mxu0 %v9065_v33  ;;  %v9502_v26 = vld [vmem:[%s20155_s16 + $0x78] sm:$0xff]  ;;  %v9500_v6 = vld [vmem:[%s20155_s16 + $0x68] sm:$0xff]  ;;  %v8203_v33 = vpop.f32.mrf.mxu1 }
 0x932   : > { %9242 = vmatpush1.msra.mxu1 %v9128_v35  ;;  %9171 = vmatpush1.msra.mxu0 %v9064_v28  ;;  %v8274_v35 = vpop.f32.mrf.mxu0 }
 0x933   : > { %9243 = vmatprep.subr.mxu1 %v9127_v42  ;;  %9172 = vmatprep.subr.mxu0 %v9063_v56  ;;  %v8205_v28 = vpop.f32.mrf.mxu1 }
 0x934   : > { %9244 = vmatpush1.msra.mxu1 %v9126_v12  ;;  %9173 = vmatpush1.msra.mxu0 %v9062_v44  ;;  %v8276_v42 = vpop.f32.mrf.mxu0 }
 0x935   : > { %9245 = vmatprep.subr.mxu1 %v9125_v47  ;;  %9174 = vmatprep.subr.mxu0 %v9061_v2  ;;  %v8513_v56 = vpop.f32.mrf.mxu1 }
 0x936   : > { %9246 = vmatpush1.msra.mxu1 %v9124_v55  ;;  %9175 = vmatpush1.msra.mxu0 %v9060_v29 }
 0x937   : > { %9247 = vmatprep.subr.mxu1 %v9123_v17  ;;  %9176 = vmatprep.subr.mxu0 %v9059_v23  ;;  %v8515_v44 = vpop.f32.mrf.mxu1 }
 0x938   : > { %9248 = vmatpush1.msra.mxu1 %v9122_v37  ;;  %9177 = vmatpush1.msra.mxu0 %v9058_v53 }
 0x939   : > { %9249 = vmatprep.subr.mxu1 %v9121_v30  ;;  %9178 = vmatprep.subr.mxu0 %v9057_v7 }
 0x93a   : > { %9250 = vmatpush1.msra.mxu1 %v9120_v19  ;;  %9179 = vmatpush1.msra.mxu0 %v9056_v40 }
 0x93b   : > { %9251 = vmatprep.subr.mxu1 %v9119_v43  ;;  %9180 = vmatprep.subr.mxu0 %v9055_v45  ;;  %v8277_v45 = vadd.f32 %v8276_v42, %v8205_v28  ;;  %v9513_v28 = vld [vmem:[%s20155_s16 + $0xd0] sm:$0xff] }
 0x93c   : > { %9252 = vmatpush1.msra.mxu1 %v9118_v49  ;;  %9285 = vmatprep.mubr.f32.mxu1 %v12222_v20  ;;  %v11634_v42 = vld [vmem:[%s20155_s16 + $0x150] sm:$0xff] }
 0x93d   : > { %9181 = vmatpush1.msra.mxu0 %v9054_v3  ;;  %9286 = vmatmul.mubr.f32.vlgmr.msra.gmra.mxu1 %v8907_v59  ;;  %v9106_v59 = vld [vmem:[#allocation10 + $0x7a0] sm:$0xff]  ;;  %v8275_v3 = vadd.f32 %v8274_v35, %v8203_v33  ;;  %v11650_v35 = vld [vmem:[%s20155_s16 + $0x1d0] sm:$0xff] }
 0x93e   : > { %9182 = vmatprep.subr.mxu0 %v9117_v4  ;;  %9374 = vmatprep.mubr.f32.mxu1 %v12222_v20  ;;  %v9498_v33 = vld [vmem:[%s20155_s16 + $0x58] sm:$0xff] }
 0x93f   : > { %9183 = vmatpush2.msra.mxu0 %v9116_v31 }
 0x940   : > { %9184 = vmatprep.subr.mxu0 %v9115_v14 }
 0x941   : > { %9185 = vmatpush2.msra.mxu0 %v9114_v11 }
 0x942   : > { %9186 = vmatprep.subr.mxu0 %v9113_v39 }
 0x943   : > { %9187 = vmatpush2.msra.mxu0 %v9112_v8 }
 0x944   : > { %9188 = vmatprep.subr.mxu0 %v9111_v25 }
 0x945   : > { %9189 = vmatpush2.msra.mxu0 %v9110_v1 }
 0x946   : > { %9190 = vmatprep.subr.mxu0 %v9109_v9 }
 0x947   : > { %9191 = vmatpush2.msra.mxu0 %v9108_v32 }
 0x948   : > { %9192 = vmatprep.subr.mxu0 %v9107_v57 }
 0x949   : > { %9193 = vmatpush2.msra.mxu0 %v9106_v59 }
 0x94a   : > { %9194 = vmatprep.subr.mxu0 %v9105_v27 }
 0x94b   : > { %9195 = vmatpush2.msra.mxu0 %v9104_v46 }
 0x94c   : > { %9196 = vmatprep.subr.mxu0 %v9103_v18 }
 0x94d   : > { %9197 = vmatpush2.msra.mxu0 %v9102_v52 }
 0x94e   : > { %9198 = vmatprep.subr.mxu0 %v9101_v50 }
 0x94f   : > { %9199 = vmatpush2.msra.mxu0 %v9100_v36 }
 0x950   : > { %9200 = vmatprep.subr.mxu0 %v9099_v51 }
 0x951   : > { %9201 = vmatpush2.msra.mxu0 %v9098_v16 }
 0x952   : > { %9202 = vmatprep.subr.mxu0 %v9097_v58 }
 0x953   : > { %9203 = vmatpush2.msra.mxu0 %v9096_v15 }
 0x954   : > { %9204 = vmatprep.subr.mxu0 %v9095_v10 }
 0x955   : > { %9205 = vmatpush2.msra.mxu0 %v9094_v38  ;;  %v9298_v38 = vld [vmem:[%s20153_s14] sm:$0x3] }
 0x956   : > { %9206 = vmatprep.subr.mxu0 %v9093_v13  ;;  %v11655_v13 = vld [vmem:[%s20155_s16 + $0x1f8] sm:$0xff] }
 0x957   : > { %9207 = vmatpush2.msra.mxu0 %v9092_v5  ;;  %v8442_v12 = vpop.f32.mrf.mxu0  ;;  %v9381_v5 = vld [vmem:[%s20154_s15] sm:$0x3] }
 0x958   : > { %9208 = vmatprep.subr.mxu0 %v9091_v54  ;;  %v8514_v40 = vadd.f32 %v8513_v56, %v8442_v12  ;;  %v11639_v54 = vld [vmem:[%s20155_s16 + $0x178] sm:$0xff]  ;;  %v9497_v56 = vld [vmem:[%s20155_s16 + $0x50] sm:$0xff]  ;;  %v11649_v12 = vld [vmem:[%s20155_s16 + $0x1c8] sm:$0xff] }
 0x959   : > { %9209 = vmatpush2.msra.mxu0 %v9090_v24  ;;  %v8444_v47 = vpop.f32.mrf.mxu0  ;;  %v11654_v24 = vld [vmem:[%s20155_s16 + $0x1f0] sm:$0xff] }
 0x95a   : > { %9210 = vmatprep.subr.mxu0 %v9089_v62  ;;  %v8516_v49 = vadd.f32 %v8515_v44, %v8444_v47  ;;  %v11638_v62 = vld [vmem:[%s20155_s16 + $0x170] sm:$0xff]  ;;  %v9512_v44 = vld [vmem:[%s20155_s16 + $0xc8] sm:$0xff] }
 0x95b   : > { %9211 = vmatpush2.msra.mxu0 %v9088_v48  ;;  %v11653_v48 = vld [vmem:[%s20155_s16 + $0x1e8] sm:$0xff] }
 0x95c   : > { %9212 = vmatprep.subr.mxu0 %v9087_v63  ;;  %v11637_v63 = vld [vmem:[%s20155_s16 + $0x168] sm:$0xff] }
 0x95d   : > { %9213 = vmatpush2.msra.mxu0 %v9086_v61  ;;  %v11652_v61 = vld [vmem:[%s20155_s16 + $0x1e0] sm:$0xff]  ;;  %v11633_v47 = vld [vmem:[%s20155_s16 + $0x148] sm:$0xff] }
 0x95e   : > { %9215 = vmatmul.mubr.f32.vlgmr.msra.gmra.mxu0 %v8905_v60  ;;  %11931 = vmatprep.subr.mxu0 %v9518_v0  ;;  %v9516_v60 = vld [vmem:[%s20155_s16 + $0xe8] sm:$0xff]  ;;  %v9515_v0 = vld [vmem:[%s20155_s16 + $0xe0] sm:$0xff] }
 0x95f   : > { %11932 = vmatpush3.msra.mxu0 %v9502_v26  ;;  %v11636_v26 = vld [vmem:[%s20155_s16 + $0x160] sm:$0xff] }
 0x960   : > { %11933 = vmatprep.subr.mxu0 %v9517_v34  ;;  %v9499_v34 = vld [vmem:[%s20155_s16 + $0x60] sm:$0xff] }
 0x961   : > { %11934 = vmatpush3.msra.mxu0 %v9501_v21  ;;  %v11651_v21 = vld [vmem:[%s20155_s16 + $0x1d8] sm:$0xff] }
 0x962   : > { %11935 = vmatprep.subr.mxu0 %v9516_v60  ;;  %v9514_v60 = vld [vmem:[%s20155_s16 + $0xd8] sm:$0xff] }
 0x963   : > { %11936 = vmatpush3.msra.mxu0 %v9500_v6  ;;  %v11635_v6 = vld [vmem:[%s20155_s16 + $0x158] sm:$0xff] }
 0x964   : > { %11937 = vmatprep.subr.mxu0 %v9515_v0 }
 0x965   : > { %11938 = vmatpush3.msra.mxu0 %v9499_v34 }
 0x966   : > { %11939 = vmatprep.subr.mxu0 %v9514_v60 }
 0x967   : > { %11940 = vmatpush3.msra.mxu0 %v9498_v33 }
 0x968   : > { %11941 = vmatprep.subr.mxu0 %v9513_v28 }
 0x969   : > { %11942 = vmatpush3.msra.mxu0 %v9497_v56  ;;  %v9722_v56 = vld [vmem:[%s20157_s18 + $0x18] sm:$0xff] }
 0x96a   : > { %11943 = vmatprep.subr.mxu0 %v9512_v44 }
 0x976   : > { %v8584_v2 = vpop.f32.mrf.mxu1 }
 0x977   : > { %v8585_v8 = vadd.f32 %v8584_v2, %v8275_v3  ;;  %v9496_v2 = vld [vmem:[%s20155_s16 + $0x48] sm:$0xff] }
 0x978   : > { %v8655_v55 = vpop.f32.mrf.mxu0  ;;  %v8586_v29 = vpop.f32.mrf.mxu1  ;;  %11944 = vmatpush3.msra.mxu0 %v9496_v2  ;;  %v9508_v3 = vld [vmem:[%s20155_s16 + $0xa8] sm:$0xff] }
 0x979   : > { %v8587_v11 = vadd.f32 %v8586_v29, %v8277_v45  ;;  %v8656_v50 = vadd.f32 %v8655_v55, %v8585_v8  ;;  %v11648_v55 = vld [vmem:[%s20155_s16 + $0x1c0] sm:$0xff]  ;;  %v9493_v45 = vld [vmem:[%s20155_s16 + $0x30] sm:$0xff] }
 0x97a   : > { %v8657_v17 = vpop.f32.mrf.mxu0  ;;  %v9511_v29 = vld [vmem:[%s20155_s16 + $0xc0] sm:$0xff] }
 0x97b   : > { %v8658_v46 = vadd.f32 %v8657_v17, %v8587_v11  ;;  %11945 = vmatprep.subr.mxu0 %v9511_v29  ;;  %v11632_v17 = vld [vmem:[%s20155_s16 + $0x140] sm:$0xff] }
 0x97c   : > { %v9507_v11 = vld [vmem:[%s20155_s16 + $0xa0] sm:$0xff] }
 0x97d   : > { %v9491_v8 = vld [vmem:[%s20155_s16 + $0x20] sm:$0xff] }
 0x999   : > { %v8797_v23 = vpop.f32.mrf.mxu1 }
 0x99b   : > { %v8799_v53 = vpop.f32.mrf.mxu1 }
 0x9bb   : > { %v8726_v37 = vpop.f32.mrf.mxu0 }
 0x9bc   : > { %v8727_v4 = vadd.f32 %v8726_v37, %v8514_v40  ;;  %v11647_v37 = vld [vmem:[%s20155_s16 + $0x1b8] sm:$0xff]  ;;  %v9509_v40 = vld [vmem:[%s20155_s16 + $0xb0] sm:$0xff] }
 0x9bd   : > { %v8728_v30 = vpop.f32.mrf.mxu0 }
 0x9be   : > { %v8729_v39 = vadd.f32 %v8728_v30, %v8516_v49  ;;  %v8798_v32 = vadd.f32 %v8797_v23, %v8727_v4  ;;  %v9495_v23 = vld [vmem:[%s20155_s16 + $0x40] sm:$0xff]  ;;  %v11631_v30 = vld [vmem:[%s20155_s16 + $0x138] sm:$0xff]  ;;  %v11645_v49 = vld [vmem:[%s20155_s16 + $0x1a8] sm:$0xff] }
 0x9bf   : > { %11946 = vmatpush3.msra.mxu0 %v9495_v23  ;;  %v11629_v4 = vld [vmem:[%s20155_s16 + $0x128] sm:$0xff]  ;;  %v9716_v23 = vld [vmem:[%s20156_s17] sm:$0x1] }
 0x9c0   : > { %v8800_v18 = vadd.f32 %v8799_v53, %v8729_v39  ;;  %v9510_v53 = vld [vmem:[%s20155_s16 + $0xb8] sm:$0xff]  ;;  %v11628_v39 = vld [vmem:[%s20155_s16 + $0x120] sm:$0xff] }
 0x9c1   : > { %11947 = vmatprep.subr.mxu0 %v9510_v53 }
 0x9da   : > { %v8977_v7 = vpop.f32.mrf.mxu1 }
 0x9dc   : > { %v9048_v19 = vpop.f32.mrf.mxu0  ;;  %v8979_v43 = vpop.f32.mrf.mxu1 }
 0x9dd   : > { %v9049_v57 = vadd.f32 %v9048_v19, %v8977_v7  ;;  %v9494_v7 = vld [vmem:[%s20155_s16 + $0x38] sm:$0xff]  ;;  %v11646_v19 = vld [vmem:[%s20155_s16 + $0x1b0] sm:$0xff] }
 0x9de   : > { %v9050_v31 = vpop.f32.mrf.mxu0  ;;  %11948 = vmatpush3.msra.mxu0 %v9494_v7  ;;  %v9806_v7 = vld [vmem:[%s20159_s20 + $0x38] sm:$0xff] }
 0x9df   : > { %v9051_v1 = vadd.f32 %v9050_v31, %v8979_v43  ;;  %v9292_v58 = vadd.f32 %v9049_v57, %v8656_v50  ;;  %11949 = vmatprep.subr.mxu0 %v9509_v40  ;;  %v11630_v43 = vld [vmem:[%s20155_s16 + $0x130] sm:$0xff]  ;;  %v9492_v31 = vld [vmem:[%s20155_s16 + $0x28] sm:$0xff] }
 0x9e0   : > { %11950 = vmatpush3.msra.mxu0 %v9493_v45  ;;  %v11642_v57 = vld [vmem:[%s20155_s16 + $0x190] sm:$0xff]  ;;  %v11625_v50 = vld [vmem:[%s20155_s16 + $0x108] sm:$0xff]  ;;  %v9802_v45 = vld [vmem:[%s20159_s20 + $0x18] sm:$0xff] }
 0x9e1   : > { %v9293_v51 = vadd.f32 %v9051_v1, %v8658_v46  ;;  %11951 = vmatprep.subr.mxu0 %v9508_v3  ;;  %v9506_v1 = vld [vmem:[%s20155_s16 + $0x98] sm:$0xff]  ;;  %v9489_v46 = vld [vmem:[%s20155_s16 + $0x10] sm:$0xff]  ;;  %v9804_v40 = vld [vmem:[%s20159_s20 + $0x28] sm:$0xff] }
 0x9e2   : > { %11952 = vmatpush3.msra.mxu0 %v9492_v31  ;;  %v9800_v3 = vld [vmem:[%s20159_s20 + $0x8] sm:$0xff]  ;;  %v9723_v31 = vld [vmem:[%s20158_s19] sm:$0x1] }
 0x9e3   : > { %11953 = vmatprep.subr.mxu0 %v9507_v11 }
 0x9e4   : > { %11954 = vmatpush3.msra.mxu0 %v9491_v8 }
 0x9e5   : > { %11955 = vmatprep.subr.mxu0 %v9506_v1 }
 0x9fd   : > { %v9287_v14 = vpop.f32.mrf.mxu1 }
 0x9ff   : > { %v9289_v59 = vpop.f32.mrf.mxu1 }
 0xa1e   : > { %v9216_v25 = vpop.f32.mrf.mxu0 }
 0xa1f   : > { %v9288_v9 = vadd.f32 %v9287_v14, %v9216_v25  ;;  %v11644_v14 = vld [vmem:[%s20155_s16 + $0x1a0] sm:$0xff]  ;;  %v11643_v25 = vld [vmem:[%s20155_s16 + $0x198] sm:$0xff] }
 0xa20   : > { %v9218_v27 = vpop.f32.mrf.mxu0 }
 0xa21   : > { %v9290_v52 = vadd.f32 %v9289_v59, %v9218_v27  ;;  %v9294_v36 = vadd.f32 %v9288_v9, %v8798_v32  ;;  %v11627_v9 = vld [vmem:[%s20155_s16 + $0x118] sm:$0xff]  ;;  %v9505_v59 = vld [vmem:[%s20155_s16 + $0x90] sm:$0xff] }
 0xa22   : > { %v9490_v32 = vld [vmem:[%s20155_s16 + $0x18] sm:$0xff]  ;;  %v11626_v27 = vld [vmem:[%s20155_s16 + $0x110] sm:$0xff] }
 0xa23   : > { %v9295_v16 = vadd.f32 %v9290_v52, %v8800_v18  ;;  %v9296_v10 = vmax.f32 %v9292_v58, %v9294_v36  ;;  %11956 = vmatpush3.msra.mxu0 %v9490_v32  ;;  %v11641_v18 = vld [vmem:[%s20155_s16 + $0x188] sm:$0xff]  ;;  %v11624_v58 = vld [vmem:[%s20155_s16 + $0x100] sm:$0xff] }
 0xa24   : > { %v9504_v52 = vld [vmem:[%s20155_s16 + $0x88] sm:$0xff]  ;;  %11957 = vmatprep.subr.mxu0 %v9505_v59 }
 0xa25   : > { %v9297_v15 = vmax.f32 %v9293_v51, %v9295_v16  ;;  %v9488_v36 = vld [vmem:[%s20155_s16 + $0x8] sm:$0xff]  ;;  %11958 = vmatpush3.msra.mxu0 %v9489_v46  ;;  %v11640_v51 = vld [vmem:[%s20155_s16 + $0x180] sm:$0xff] }
 0xa26   : > { %v9503_v16 = vld [vmem:[%s20155_s16 + $0x80] sm:$0xff]  ;;  %11959 = vmatprep.subr.mxu0 %v9504_v52 }
 0xa27   : > { %11617 = vmatprep.subr.msk.mxu1 %vm9303_vm10, %v9297_v15  ;;  %11960 = vmatpush3.msra.mxu0 %v9488_v36 }
 0xa28   : > { %11618 = vmatpush1.msk.msra.mxu1 %vm9303_vm10, %v9296_v10  ;;  %11961 = vmatprep.subr.mxu0 %v9503_v16 }
 0xa29   : > { %11619 = vmatmul.mubr.msk.f32.vlgmr.msra.gmra.mxu1 %vm9299_vm11, %v9298_v38  ;;  %11620 = vmatprep.subr.msk.mxu1 %vm9303_vm10, %v9297_v15  ;;  %v9487_v15 = vld [vmem:[%s20155_s16] sm:$0xff] }
 0xa2a   : > { %11621 = vmatpush1.msk.msra.mxu1 %vm9303_vm10, %v9296_v10  ;;  %9449 = vmatprep.mubr.f32.mxu1 %v12222_v20  ;;  %v9458_v38 = vld [vmem:[%s20152_s13] sm:$0x3] }
 0xa2b   : > { %11896 = vmatprep.subr.mxu1 %v11655_v13  ;;  %11962 = vmatpush3.msra.mxu0 %v9487_v15 }
 0xa2d   : > { %11622 = vmatmul.mubr.msk.f32.vlgmr.msra.gmra.mxu1 %vm9299_vm11, %v9381_v5  ;;  %v9463_v5 = vrot.slane %v9458_v38, %v16387_v41 }
 0xa2e   : > { %11897 = vmatpush3.msra.mxu1 %v11639_v54 }
 0xa2f   : > { %11898 = vmatprep.subr.mxu1 %v11654_v24 }
 0xa30   : > { %11899 = vmatpush3.msra.mxu1 %v11638_v62  ;;  %v9467_v62 = vrot.slane %v9458_v38, %v16394_v22 }
 0xa31   : > { %11900 = vmatprep.subr.mxu1 %v11653_v48 }
 0xa32   : > { %11901 = vmatpush3.msra.mxu1 %v11637_v63 }
 0xa33   : > { %11902 = vmatprep.subr.mxu1 %v11652_v61 }
 0xa34   : > { %11903 = vmatpush3.msra.mxu1 %v11636_v26 }
 0xa35   : > { %11904 = vmatprep.subr.mxu1 %v11651_v21 }
 0xa36   : > { %11905 = vmatpush3.msra.mxu1 %v11635_v6 }
 0xa37   : > { %11906 = vmatprep.subr.mxu1 %v11650_v35 }
 0xa38   : > { %11907 = vmatpush3.msra.mxu1 %v11634_v42 }
 0xa39   : > { %11908 = vmatprep.subr.mxu1 %v11649_v12  ;;  %v9719_v12 = vld [vmem:[%s20157_s18] sm:$0xff] }
 0xa3a   : > { %11909 = vmatpush3.msra.mxu1 %v11633_v47 }
 0xa3b   : > { %11910 = vmatprep.subr.mxu1 %v11648_v55 }
 0xa3c   : > { %11911 = vmatpush3.msra.mxu1 %v11632_v17 }
 0xa3d   : > { %11912 = vmatprep.subr.mxu1 %v11647_v37 }
 0xa3e   : > { %11913 = vmatpush3.msra.mxu1 %v11631_v30 }
 0xa3f   : > { %11914 = vmatprep.subr.mxu1 %v11646_v19  ;;  %v9805_v19 = vld [vmem:[%s20159_s20 + $0x30] sm:$0xff] }
 0xa40   : > { %11915 = vmatpush3.msra.mxu1 %v11630_v43  ;;  %v9803_v43 = vld [vmem:[%s20159_s20 + $0x20] sm:$0xff] }
 0xa41   : > { %11916 = vmatprep.subr.mxu1 %v11645_v49  ;;  %v9801_v49 = vld [vmem:[%s20159_s20 + $0x10] sm:$0xff] }
 0xa42   : > { %11917 = vmatpush3.msra.mxu1 %v11629_v4  ;;  %v9799_v4 = vld [vmem:[%s20159_s20] sm:$0xff] }
 0xa43   : > { %11918 = vmatprep.subr.mxu1 %v11644_v14 }
 0xa44   : > { %11919 = vmatpush3.msra.mxu1 %v11628_v39 }
 0xa45   : > { %11920 = vmatprep.subr.mxu1 %v11643_v25 }
 0xa46   : > { %11921 = vmatpush3.msra.mxu1 %v11627_v9 }
 0xa47   : > { %11922 = vmatprep.subr.mxu1 %v11642_v57 }
 0xa48   : > { %11923 = vmatpush3.msra.mxu1 %v11626_v27 }
 0xa49   : > { %11924 = vmatprep.subr.mxu1 %v11641_v18 }
 0xa4a   : > { %11925 = vmatpush3.msra.mxu1 %v11625_v50 }
 0xa4b   : > { %11926 = vmatprep.subr.mxu1 %v11640_v51 }
 0xa4c   : > { %11927 = vmatpush3.msra.mxu1 %v11624_v58 }
 0xa4d   : > { %11994 = vmatprep.subr.mxu1 %v12222_v20 }
 0xae9   : > { %v9376_v10 = vpop.f32.mrf.mxu1 }
 0xaeb   : > { %v9378_v13 = vpop.f32.mrf.mxu1 }
 0xaed   : > { %v9451_v54 = vpop.f32.mrf.mxu1 }
 0xaee   : > { %v9456_v24 = vmax.f32 %v9376_v10, %v9451_v54 }
 0xaef   : > { %v9453_v48 = vpop.f32.mrf.mxu1 }
 0xaf0   : > { %v9470_v63 = vadd.f32 %v9463_v5, %v9456_v24  ;;  %v9457_v61 = vmax.f32 %v9378_v13, %v9453_v48 }
 0xaf2   : > { %v9471_v0 = vadd.f32 %v9467_v62, %v9457_v61  ;;  %v9472_v26 = vmax.f32 %v9470_v63, 0.0 }
 0xaf4   : > { %v9473_v34 = vmax.f32 %v9471_v0, 0.0 }
 0xaf6   : > { %v9476_v21 = vcombine.low %v9472_v26, %v9473_v34 }
 0xaf8   : > { %11623 = vst.sshfl [vmem:[#allocation6] sm:$0x33 pattern:$0x76325410] %v9476_v21 }
 0xaff   : > { %v9520_v60 = vld [vmem:[#allocation6 + $0x1] ss:$2 sm:$0x3]  ;;  %v9486_v6 = vld [vmem:[#allocation6] ss:$2 sm:$0x3] }
 0xb00   : > { %v9558_v33 = vrot.slane %v9520_v60, %v16387_v41  ;;  %v9562_v35 = vrot.slane %v9520_v60, %v16394_v22  ;;  %v9639_v28 = vrot.slane %v9486_v6, %v16387_v41  ;;  %v9643_v42 = vrot.slane %v9486_v6, %v16394_v22  ;;  %v9721_v41 = vld [vmem:[%s20157_s18 + $0x10] sm:$0xff]  ;;  %v9720_v22 = vld [vmem:[%s20157_s18 + $0x8] sm:$0xff] }
 0xb02   : > { %9629 = vmatprep.mubr.f32.mxu1 %v9562_v35  ;;  %9710 = vmatprep.mubr.f32.mxu0 %v9643_v42 }
 0xb03   : > { %9630 = vmatmul.mubr.f32.vlgmr.msra.gmra.mxu1 %v9558_v33  ;;  %9711 = vmatmul.mubr.f32.vlgmr.msra.gmra.mxu0 %v9639_v28 }
 0xb04   : > { %12002 = vmatprep.mubr.msk.f32.mxu1 %vm12223_vm9, %v12222_v20  ;;  %11995 = vmatpush3.msra.mxu1 %v9722_v56 }
 0xb05   : > { %11996 = vmatprep.subr.mxu1 %v12222_v20 }
 0xb06   : > { %11997 = vmatpush3.msra.mxu1 %v9721_v41 }
 0xb07   : > { %11998 = vmatprep.subr.mxu1 %v12222_v20 }
 0xb08   : > { %11999 = vmatpush3.msra.mxu1 %v9720_v22 }
 0xb09   : > { %12000 = vmatprep.subr.mxu1 %v12222_v20 }
 0xb0a   : > { %12001 = vmatpush3.msra.mxu1 %v9719_v12 }
 0xb0b   : > { %12005 = vmatprep.subr.mxu1 %v12222_v20 }
 0xbc3   : > { %v11928_v44 = vpop.f32.mrf.mxu1  ;;  %v11963_v47 = vpop.f32.mrf.mxu0 }
 0xbc5   : > { %v11929_v2 = vpop.f32.mrf.mxu1  ;;  %v11964_v55 = vpop.f32.mrf.mxu0 }
 0xbc6   : > { %v11930_v29 = vadd.f32 %v11929_v2, %v11928_v44  ;;  %v11965_v17 = vadd.f32 %v11964_v55, %v11963_v47 }
 0xbc8   : > { %v9713_v37 = vadd.f32 %v11965_v17, %v11930_v29 }
 0xbca   : > { %v9717_v53 = vadd.f32 %v9716_v23, %v9713_v37 }
 0xbcc   : > { %v9718_v30 = vmax.f32 %v9717_v53, 0.0 }
 0xbce   : > { %12003 = vmatmul.mubr.msk.f32.vlgmr.msra.gmra.mxu1 %vm9724_vm12, %v9718_v30 }
 0xbcf   : > { %12006 = vmatpush3.msra.mxu1 %v9806_v7  ;;  %12021 = vmatprep.mubr.msk.f32.mxu1 %vm12223_vm9, %v12222_v20 }
 0xbd0   : > { %12007 = vmatprep.subr.mxu1 %v12222_v20 }
 0xbd1   : > { %12008 = vmatpush3.msra.mxu1 %v9805_v19 }
 0xbd2   : > { %12009 = vmatprep.subr.mxu1 %v12222_v20 }
 0xbd3   : > { %12010 = vmatpush3.msra.mxu1 %v9804_v40 }
 0xbd4   : > { %12011 = vmatprep.subr.mxu1 %v12222_v20 }
 0xbd5   : > { %12012 = vmatpush3.msra.mxu1 %v9803_v43 }
 0xbd6   : > { %12013 = vmatprep.subr.mxu1 %v12222_v20 }
 0xbd7   : > { %12014 = vmatpush3.msra.mxu1 %v9802_v45 }
 0xbd8   : > { %12015 = vmatprep.subr.mxu1 %v12222_v20 }
 0xbd9   : > { %12016 = vmatpush3.msra.mxu1 %v9801_v49 }
 0xbda   : > { %12017 = vmatprep.subr.mxu1 %v12222_v20 }
 0xbdb   : > { %12018 = vmatpush3.msra.mxu1 %v9800_v3 }
 0xbdc   : > { %12019 = vmatprep.subr.mxu1 %v12222_v20  ;;  %v9807_v20 = vld [vmem:[%s20160_s21] sm:$0x1] }
 0xbdd   : > { %12020 = vmatpush3.msra.mxu1 %v9799_v4 }
 0xc8e   : > { %v9794_v14 = vpop.f32.mrf.mxu1 }
 0xc8f   : > { %v9795_v11 = vadd.f32 %v9794_v14, %v9723_v31 }
 0xc90   : > { %v12004_v39 = vpop.f32.mrf.mxu1 }
 0xc91   : > { %v9798_v8 = vmax.f32 %v9795_v11, 0.0 }
 0xc93   : > { %12022 = vmatmul.mubr.msk.f32.vlgmr.msra.gmra.mxu1 %vm815_vm0, %v9798_v8 }
 0xd53   : > { %v9877_v25 = vpop.f32.mrf.mxu1 }
 0xd54   : > { %v9878_v1 = vadd.f32 %v9877_v25, %v9807_v20 }
 0xd55   : > { %v12023_v9 = vpop.f32.mrf.mxu1 }
 0xd56   : > { %9882 = vst.msk [vmem:[%s705_s1] sm:$0x1] %vm9881_vm13, %v9878_v1 }
 0xd57   : > { %12161 = shalt.err (!%p12158_p3)
}
 0xd58   : > { %s12162_s3 = scalar_lea.hbm %s20104_s25, 16  ;;  %s12166_s24 = scalar_lea.hbm %s20161_s22, 32 }
 0xd59   : > { %p12163_p2 = scmp.ne.s32.totalorder %s20104_s25, %s12162_s3  ;;  %p12167_p7 = scmp.lt.s32.totalorder %s20104_s25, %s20161_s22 }
 0xd5a   : > { %p12168_p6 = scmp.lt.s32.totalorder %s12166_s24, %s12162_s3 }
 0xd5b   : > { %p12164_p4 = pnand %p12163_p2, %p12378_p5 }
 0xd5c   : > { %p12169_p9 = por %p12168_p6, %p12167_p7 }
 0xd5d   : > { %p12165_p13 = pneg %p12164_p4 }
 0xd5f   : > { %p12170_p10 = pnand %p12169_p9, %p12165_p13 }
 0xd61   : > { %12173 = shalt.err (!%p12170_p10)
}
 0xd62   : > { %12032 = dma.vmem_to_hbm [thread:$0]  (%p12378_p5), %s9897_s30, 16, %s20104_s25, %s9884_s29  }
 0xd63 PF: > { %s20213_s7 = sld [smem:[#allocation18_spill]] }
 0xd64   : > { %s20214_s5 = sld [smem:[#allocation16_spill]] }
 0xd65   : > { %s20215_s2 = sld [smem:[#allocation21_spill]] }
 0xd69   : > { %p12049_p12 = scmp.ge.s32.totalorder %s20213_s7, 2 }
 0xd6a   : > { %s9908_s8 = sand.u32 1, %s20214_s5  }
 0xd6b   : > { %p20216_p8 = scmp.ne.s32.totalorder %s20215_s2, 0  ;;  %s9909_s0 = scalar_lea.sflag [#allocation9], %s9908_s8 }
 0xd6d   : > { %p12042_p11 = pnand %p12049_p12, %p20216_p8 }
 0xd6f   : > { %p12043_p0 = pneg %p12042_p11 }
 0xd71   : > { %12199 = dma.done.wait (%p12043_p0), %s9909_s0, 16  }
 0xd72   : > { %12201 = vsyncadd (%p12043_p0), %s9909_s0, 4294967280  ;;  %s20217_s30 = sld [smem:[#allocation19_spill]]  ;;  %s20220_s3 = smov %s12208_s28 }
 0xd73   : > { %s20218_s1 = sld [smem:[#allocation17_spill]] }
 0xd74   : > { %s20219_s29 = sld [smem:[#allocation20_spill]] }
 0xd78   : > { %p34_p1 = scmp.ge.s32.totalorder %s20217_s30, 4  }
 0xd79   : > { %s20221_s28 = smov %s20218_s1 }
 0xd7a   :  { %36 = sbr.rel (!%p34_p1) target bundleno = 17 (0x11), region = 171 }
 0xd7f   :  { %9913 = vsyncpa [#allocation8], 1 }
 0xd80   :  { %9915 = vsyncpa [#allocation8 + $0x1], 1 }
 0xd81   :  { %9916 = vsyncpa [#allocation11], 1 }
 0xd82   :  { %9917 = vsyncpa [#allocation9], 1 }
 0xd83   :  { %9919 = vsyncpa [#allocation9 + $0x1], 1 }

</bundles_post_ra>
